<compile_context>
chip_gen: v6e
topology: v6e:2x2x1
jax: 0.10.0
libtpu: 0.0.40
codegen_flags: <defaults>
</compile_context>

<pallas_src>
import math
import functools

import jax
import jax.numpy as jnp
from jax.experimental import pallas as pl
from jax.experimental.pallas import tpu as pltpu

# ----------------------------- model configuration -----------------------------
HIDDEN = 128
EDGE_FEATURES = 128
NODE_FEATURES = 128
K_NEIGHBORS = 8        # k_neighbors of this configuration (matches the 8-sublane tile)
NUM_LETTERS = 21
VOCAB = 21
N_ENC = 3
N_DEC = 3
AUGMENT_EPS = 0.1
NUM_RBF = 16
NUM_POS_EMB = 16
MAX_REL = 32           # PositionalEncodings max_relative_feature
MSG_SCALE = 30.0       # EncLayer/DecLayer `scale`
LN_EPS = 1e-5          # nn.LayerNorm default
OUT_PAD = 128          # lane-dense padded width of the output head
BF16 = jnp.bfloat16
# Dropout layers are identity in eval mode (inference forward pass).

_CPARAMS = pltpu.CompilerParams(
    dimension_semantics=("parallel",),
    vmem_limit_bytes=48 * 1024 * 1024,   # safe on v5e(128M)/v6e(128M)/v7x(64M physical)
)


# ----------------------------- small helpers -----------------------------------
def _pick_rows_block(R, cap=256):
    """Largest multiple-of-8 divisor of R that is <= cap, preferring >= 2 grid steps
    (so dimension_semantics=('parallel',) can shard across v7x's two TensorCores)."""
    for hi in (min(cap, R // 2), min(cap, R)):
        start = hi - hi % 8
        for t in range(start, 7, -8):
            if R % t == 0:
                return t
    return R  # fallback: single block equal to the full array dim (allowed by BlockSpec)


def _gelu(x):
    # TODO(synk): PyTorch nn.GELU() default is erf-exact; tanh approximation used for
    # Mosaic-friendly (EUP) lowering — small numeric drift vs the reference.
    return jax.nn.gelu(x, approximate=True)


def _ln(v, g, b):
    mu = jnp.mean(v, axis=-1, keepdims=True)
    var = jnp.mean(jnp.square(v - mu), axis=-1, keepdims=True)
    return (v - mu) * jax.lax.rsqrt(var + LN_EPS) * g + b


def _bf(x):
    return x.astype(BF16)


def _dotf32(a, b):
    return jnp.dot(a, b, preferred_element_type=jnp.float32)


# ----------------------------- Pallas kernels ----------------------------------
def _edge_embed_kernel(e_ref, w_ref, vec_ref, we_ref, o_ref):
    # h_E0 = W_e(LayerNorm(edge_embedding(E)))   (edge_embedding has no bias)
    vec = vec_ref[...]
    g, b, be = vec[0:1], vec[1:2], vec[2:3]
    x = _dotf32(e_ref[...], w_ref[...])
    x = _ln(x, g, b)
    o_ref[...] = (_dotf32(_bf(x), we_ref[...]) + be).astype(o_ref.dtype)


def pallas_edge_embed(E_flat, edge_W, norm_g, norm_b, We, be):
    R, cin = E_flat.shape
    H = We.shape[1]
    T = _pick_rows_block(R, 512)
    vec = jnp.stack([norm_g, norm_b, be], axis=0)                # (3, H) f32
    return pl.pallas_call(
        _edge_embed_kernel,
        out_shape=jax.ShapeDtypeStruct((R, H), BF16),
        grid=(R // T,),
        in_specs=[pl.BlockSpec((T, cin), lambda i: (i, 0)),
                  pl.BlockSpec((cin, H), lambda i: (0, 0)),
                  pl.BlockSpec((3, H), lambda i: (0, 0)),
                  pl.BlockSpec((H, H), lambda i: (0, 0))],
        out_specs=pl.BlockSpec((T, H), lambda i: (i, 0)),
        compiler_params=_CPARAMS,
    )(E_flat, _bf(edge_W), vec, _bf(We))


def _node_layer_kernel(*refs, K, scale, mask_on_features, has_hs):
    """Fused message MLP + masked neighbor-sum + residual/LN1/FFN/LN2/node-mask."""
    if has_hs:          # decoder: separate h_E / gathered-h_S / gathered-h_V inputs
        (hv_ref, he_ref, hs_ref, hvn_ref, em_ref, nm_ref,
         w1a_ref, w1e_ref, w1s_ref, w1n_ref, w2_ref, w3_ref,
         vec_ref, win_ref, bin_ref, wout_ref, o_ref) = refs
    else:               # encoder
        (hv_ref, he_ref, hvn_ref, em_ref, nm_ref,
         w1a_ref, w1e_ref, w1n_ref, w2_ref, w3_ref,
         vec_ref, win_ref, bin_ref, wout_ref, o_ref) = refs
        hs_ref = w1s_ref = None

    T, H = hv_ref.shape
    TK = he_ref.shape[0]

    vec = vec_ref[...]                                  # packed (8, H) f32
    b1, b2, b3 = vec[0:1], vec[1:2], vec[2:3]
    n1g, n1b = vec[3:4], vec[4:5]
    bout, n2g, n2b = vec[5:6], vec[6:7], vec[7:8]

    hv = hv_ref[...]                                    # (T, H)  bf16
    em = em_ref[...]                                    # (T, K)  f32

    # message MLP; W1 split by input segment [self | h_E | (h_S) | neighbor h_V]
    pre_self = _dotf32(hv, w1a_ref[...])                # (T, H)  f32
    pre_nb = _dotf32(he_ref[...], w1e_ref[...]) + _dotf32(hvn_ref[...], w1n_ref[...])
    if has_hs:
        pre_nb = pre_nb + _dotf32(hs_ref[...], w1s_ref[...])
    pre_nb = pre_nb.reshape(T, K, H)                    # layout-preserving (K = sublanes)
    if mask_on_features:        # decoder: h_ESV = mask_bw * [h_ES, gather(h_V)]
        pre_nb = pre_nb * em[:, :, None]
    pre = pre_nb + pre_self[:, None, :] + b1            # self-term broadcast, no matmul

    h = _gelu(pre).reshape(TK, H)
    h = _gelu(_dotf32(_bf(h), w2_ref[...]) + b2)
    msg = (_dotf32(_bf(h), w3_ref[...]) + b3).reshape(T, K, H)
    if not mask_on_features:    # encoder: mask_attend applied to messages
        msg = msg * em[:, :, None]
    dh = jnp.sum(msg, axis=1) * (1.0 / scale)           # neighbor-sum on the sublane axis

    # residual + LN1 + PositionWiseFeedForward + LN2 + node mask (dropout = identity, eval)
    h1 = _ln(hv.astype(jnp.float32) + dh, n1g, n1b)
    ff = _dotf32(_bf(_gelu(_dotf32(_bf(h1), win_ref[...]) + bin_ref[...])),
                 wout_ref[...]) + bout
    h2 = _ln(h1 + ff, n2g, n2b)
    o_ref[...] = (nm_ref[...] * h2).astype(o_ref.dtype)


def pallas_node_layer(h_v, h_e, h_s_nb, h_vn, edge_mask, node_mask, p, *, K, mask_on_features):
    """h_v:(R,H) bf16  h_e/h_s_nb/h_vn:(R*K,H) bf16  edge_mask:(R,K) f32  node_mask:(R,1) f32."""
    R, H = h_v.shape
    F = p['Win'].shape[1]
    T = _pick_rows_block(R, 256)
    TK = T * K
    has_hs = h_s_nb is not None
    w1 = p['W1']
    row = lambda i: (i, 0)
    const = lambda i: (0, 0)

    vec = jnp.stack([p['b1'], p['b2'], p['b3'], p['n1g'], p['n1b'],
                     p['bout'], p['n2g'], p['n2b']], axis=0)            # (8, H) f32

    act_arrays = [h_v, h_e] + ([h_s_nb] if has_hs else []) + [h_vn, edge_mask, node_mask]
    act_specs = ([pl.BlockSpec((T, H), row), pl.BlockSpec((TK, H), row)]
                 + ([pl.BlockSpec((TK, H), row)] if has_hs else [])
                 + [pl.BlockSpec((TK, H), row),
                    pl.BlockSpec((T, K), row),
                    pl.BlockSpec((T, 1), row)])

    if has_hs:   # decoder W1 rows: [self | h_E | h_S | neighbor h_V]
        w1_blocks = [w1[:H], w1[H:2 * H], w1[2 * H:3 * H], w1[3 * H:]]
    else:        # encoder W1 rows: [self | h_E | neighbor h_V]
        w1_blocks = [w1[:H], w1[H:2 * H], w1[2 * H:]]
    w_arrays = ([_bf(w) for w in w1_blocks]
                + [_bf(p['W2']), _bf(p['W3']), vec,
                   _bf(p['Win']), p['bin'].reshape(1, F), _bf(p['Wout'])])
    w_specs = ([pl.BlockSpec((H, H), const)] * len(w1_blocks)
               + [pl.BlockSpec((H, H), const), pl.BlockSpec((H, H), const),
                  pl.BlockSpec((8, H), const),
                  pl.BlockSpec((H, F), const), pl.BlockSpec((1, F), const),
                  pl.BlockSpec((F, H), const)])

    kern = functools.partial(_node_layer_kernel, K=K, scale=MSG_SCALE,
                             mask_on_features=mask_on_features, has_hs=has_hs)
    return pl.pallas_call(
        kern,
        out_shape=jax.ShapeDtypeStruct((R, H), BF16),
        grid=(R // T,),
        in_specs=act_specs + w_specs,
        out_specs=pl.BlockSpec((T, H), row),
        compiler_params=_CPARAMS,
    )(*act_arrays, *w_arrays)


def _edge_layer_kernel(hv_ref, he_ref, hvn_ref,
                       w1a_ref, w1e_ref, w1n_ref, w2_ref, w3_ref,
                       vec_ref, o_ref, *, K):
    """Fused edge message MLP + residual + LN3  (encoder edge update)."""
    T, H = hv_ref.shape
    TK = he_ref.shape[0]
    vec = vec_ref[...]
    b1, b2, b3, ng, nb = vec[0:1], vec[1:2], vec[2:3], vec[3:4], vec[4:5]

    he = he_ref[...]                                    # (TK, H) bf16
    pre_self = _dotf32(hv_ref[...], w1a_ref[...])
    pre = _dotf32(he, w1e_ref[...]) + _dotf32(hvn_ref[...], w1n_ref[...])
    pre = (pre.reshape(T, K, H) + pre_self[:, None, :]).reshape(TK, H) + b1
    h = _gelu(pre)
    h = _gelu(_dotf32(_bf(h), w2_ref[...]) + b2)
    msg = _dotf32(_bf(h), w3_ref[...]) + b3
    o_ref[...] = _ln(he.astype(jnp.float32) + msg, ng, nb).astype(o_ref.dtype)


def pallas_edge_layer(h_v, h_e, h_vn, p, *, K):
    R, H = h_v.shape
    T = _pick_rows_block(R, 256)
    TK = T * K
    w1 = p['W11']
    vec = jnp.concatenate(
        [jnp.stack([p['b11'], p['b12'], p['b13'], p['n3g'], p['n3b']], axis=0),
         jnp.zeros((3, H), jnp.float32)], axis=0)                       # (8, H)
    row = lambda i: (i, 0)
    const = lambda i: (0, 0)
    return pl.pallas_call(
        functools.partial(_edge_layer_kernel, K=K),
        out_shape=jax.ShapeDtypeStruct((R * K, H), BF16),
        grid=(R // T,),
        in_specs=[pl.BlockSpec((T, H), row),
                  pl.BlockSpec((TK, H), row),
                  pl.BlockSpec((TK, H), row),
                  pl.BlockSpec((H, H), const),
                  pl.BlockSpec((H, H), const),
                  pl.BlockSpec((H, H), const),
                  pl.BlockSpec((H, H), const),
                  pl.BlockSpec((H, H), const),
                  pl.BlockSpec((8, H), const)],
        out_specs=pl.BlockSpec((TK, H), row),
        compiler_params=_CPARAMS,
    )(h_v, h_e, h_vn,
      _bf(w1[:H]), _bf(w1[H:2 * H]), _bf(w1[2 * H:]),
      _bf(p['W12']), _bf(p['W13']), vec)


def _out_kernel(x_ref, w_ref, b_ref, o_ref):
    logits = _dotf32(x_ref[...], w_ref[...]) + b_ref[...]
    m = jnp.max(logits, axis=-1, keepdims=True)
    z = logits - m
    o_ref[...] = z - jnp.log(jnp.sum(jnp.exp(z), axis=-1, keepdims=True))


def pallas_out_logsoftmax(x, w_pad, b_pad):
    """Lane-dense output head: columns padded to 128 (padding bias = -1e9, exp -> 0)."""
    R, H = x.shape
    L = w_pad.shape[1]
    T = _pick_rows_block(R, 512)
    return pl.pallas_call(
        _out_kernel,
        out_shape=jax.ShapeDtypeStruct((R, L), jnp.float32),
        grid=(R // T,),
        in_specs=[pl.BlockSpec((T, H), lambda i: (i, 0)),
                  pl.BlockSpec((H, L), lambda i: (0, 0)),
                  pl.BlockSpec((1, L), lambda i: (0, 0))],
        out_specs=pl.BlockSpec((T, L), lambda i: (i, 0)),
        compiler_params=_CPARAMS,
    )(x, _bf(w_pad), b_pad.reshape(1, L))


# ----------------------------- graph utilities (XLA glue) ----------------------
def gather_nodes(nodes, neighbor_idx):
    B, N, C = nodes.shape
    K = neighbor_idx.shape[-1]
    flat = neighbor_idx.reshape(B, N * K, 1)
    out = jnp.take_along_axis(nodes, flat, axis=1)
    return out.reshape(B, N, K, C)


def _rbf(D, num_rbf=NUM_RBF):
    d_mu = jnp.linspace(2.0, 22.0, num_rbf)
    d_sigma = (22.0 - 2.0) / num_rbf
    return jnp.exp(-jnp.square((D[..., None] - d_mu) / d_sigma))


def _dist(Xca, mask, top_k, eps=1e-6):
    # TODO(synk): the k-NN search itself stays an O(N^2) dense distance + top_k in XLA;
    # for very large N this should become a blocked Pallas kernel.
    mask_2d = mask[:, None, :] * mask[:, :, None]
    dX = Xca[:, None, :, :] - Xca[:, :, None, :]
    D = mask_2d * jnp.sqrt(jnp.sum(dX ** 2, axis=-1) + eps)
    D_max = jnp.max(D, axis=-1, keepdims=True)
    D_adjust = D + (1.0 - mask_2d) * D_max
    k = min(top_k, Xca.shape[1])
    neg_v, E_idx = jax.lax.top_k(-D_adjust, k)       # smallest-k distances
    return -neg_v, E_idx


def protein_features(p, X, mask, residue_idx, chain_labels, key,
                     top_k=K_NEIGHBORS, augment_eps=AUGMENT_EPS):
    B, N = mask.shape
    if augment_eps > 0:
        X = X + augment_eps * jax.random.normal(key, X.shape, X.dtype)

    b = X[:, :, 1, :] - X[:, :, 0, :]
    c = X[:, :, 2, :] - X[:, :, 1, :]
    a = jnp.cross(b, c)
    Cb = -0.58273431 * a + 0.56802827 * b - 0.54067466 * c + X[:, :, 1, :]
    Ca, Nb, Cc, Ob = X[:, :, 1, :], X[:, :, 0, :], X[:, :, 2, :], X[:, :, 3, :]

    D_neighbors, E_idx = _dist(Ca, mask, top_k)

    # O(B*N*K) pairwise RBFs on gathered neighbor coordinates (instead of 25 dense
    # (B,N,N) distance matrices + take_along_axis).
    atoms = dict(Ca=Ca, N=Nb, C=Cc, O=Ob, Cb=Cb)
    atoms_nb = {name: gather_nodes(v, E_idx) for name, v in atoms.items()}  # (B,N,K,3)

    def get_rbf(a_name, b_name):
        A = atoms[a_name]
        B_nb = atoms_nb[b_name]
        D = jnp.sqrt(jnp.sum(jnp.square(A[:, :, None, :] - B_nb), axis=-1) + 1e-6)
        return _rbf(D)

    rbf_all = [_rbf(D_neighbors)]                     # Ca-Ca
    pairs = [('N', 'N'), ('C', 'C'), ('O', 'O'), ('Cb', 'Cb'), ('Ca', 'N'), ('Ca', 'C'),
             ('Ca', 'O'), ('Ca', 'Cb'), ('N', 'C'), ('N', 'O'), ('N', 'Cb'), ('Cb', 'C'),
             ('Cb', 'O'), ('O', 'C'), ('N', 'Ca'), ('C', 'Ca'), ('O', 'Ca'), ('Cb', 'Ca'),
             ('C', 'N'), ('O', 'N'), ('Cb', 'N'), ('C', 'Cb'), ('O', 'Cb'), ('C', 'O')]
    for a_name, b_name in pairs:
        rbf_all.append(get_rbf(a_name, b_name))
    rbf_all = jnp.concatenate(rbf_all, axis=-1)       # (B, N, K, 25*NUM_RBF)

    offset = residue_idx[:, :, None] - residue_idx[:, None, :]
    offset = jnp.take_along_axis(offset, E_idx, axis=2)
    d_chains = (chain_labels[:, :, None] == chain_labels[:, None, :]).astype(jnp.int32)
    E_chains = jnp.take_along_axis(d_chains, E_idx, axis=2)

    # PositionalEncodings: Linear over one-hot(d)  ==  embedding gather pos_W[d] + pos_b
    d = jnp.clip(offset + MAX_REL, 0, 2 * MAX_REL) * E_chains + (1 - E_chains) * (2 * MAX_REL + 1)
    E_pos = jnp.take(p['pos_W'], d, axis=0) + p['pos_b']        # (B, N, K, NUM_POS_EMB)

    E = jnp.concatenate([E_pos, rbf_all], axis=-1)              # (B, N, K, 416)
    K = E_idx.shape[-1]
    return _bf(E).reshape(B * N * K, -1), E_idx, X


# ----------------------------- full forward ------------------------------------
def protein_mpnn_forward(params, X, S, mask, chain_M, residue_idx, chain_encoding_all, noise_key):
    B, N = S.shape
    H = HIDDEN

    # pad sequence length to a multiple of 8 (masked) so row tiles stay (8,128)-aligned
    pad = (-N) % 8
    if pad:
        X = jnp.pad(X, ((0, 0), (0, pad), (0, 0), (0, 0)))
        S = jnp.pad(S, ((0, 0), (0, pad)))
        mask = jnp.pad(mask, ((0, 0), (0, pad)))
        chain_M = jnp.pad(chain_M, ((0, 0), (0, pad)))
        residue_idx = jnp.pad(residue_idx, ((0, 0), (0, pad)))
        chain_encoding_all = jnp.pad(chain_encoding_all, ((0, 0), (0, pad)))
    Np = N + pad

    X = jnp.nan_to_num(X, nan=0.0)
    E_flat, E_idx, X = protein_features(params['feat'], X, mask, residue_idx,
                                        chain_encoding_all, noise_key)
    K = E_idx.shape[-1]
    RN = B * Np
    RE = RN * K

    fp = params['feat']
    # h_E = W_e(LayerNorm(edge_embedding(E)))  -- one fused kernel, bf16 out
    h_E = pallas_edge_embed(E_flat, fp['edge_W'], fp['norm_g'], fp['norm_b'],
                            params['W_e'], params['b_e'])                       # (RE, H)

    h_V = jnp.zeros((RN, H), BF16)
    node_mask = mask.reshape(RN, 1)
    mask_nb = gather_nodes(mask[..., None], E_idx)[..., 0]                      # (B, Np, K)
    mask_attend = (mask[..., None] * mask_nb).reshape(RN, K)                    # lane-dense

    all_hidden = []
    # TODO(synk): the per-layer neighbor gather stays in XLA (take_along_axis on bf16);
    # fusing it via scalar-prefetch DMA gather is a further optimization.
    for lp in params['enc']:
        h_vn = gather_nodes(h_V.reshape(B, Np, H), E_idx).reshape(RE, H)
        h_V = pallas_node_layer(h_V, h_E, None, h_vn, mask_attend, node_mask, lp,
                                K=K, mask_on_features=False)
        h_vn = gather_nodes(h_V.reshape(B, Np, H), E_idx).reshape(RE, H)
        h_E = pallas_edge_layer(h_V, h_E, h_vn, lp, K=K)

    h_S = params['W_s'][S]                                                      # (B, Np, H) f32
    # gathered h_S is decoder-invariant and kept separate (no h_ES concat in HBM)
    h_S_nb = gather_nodes(_bf(h_S), E_idx).reshape(RE, H)                       # bf16

    chain_M = chain_M * mask  # only feeds the random decoding order (unused for 'id')
    # decoding_order == 'id'  ->  order_mask_backward == ones  =>  mask_bw = mask (over K),
    # mask_fw = 0, so the h_EXV_encoder_fw (encoder-context) term is exactly zero and omitted.
    mask_bw = jnp.broadcast_to(mask[:, :, None], (B, Np, K)).reshape(RN, K)
    # TODO(synk): X_neighbors (gather of X by E_idx) is only consumed by IPMP decoders
    # (use_ipmp=False): skipped.

    for lp in params['dec']:
        h_vn = gather_nodes(h_V.reshape(B, Np, H), E_idx).reshape(RE, H)
        h_V = pallas_node_layer(h_V, h_E, h_S_nb, h_vn, mask_bw, node_mask, lp,
                                K=K, mask_on_features=True)
        all_hidden.append(h_V.reshape(B, Np, H)[:, :N].astype(jnp.float32))

    # lane-dense output head (pad to 128 cols, bias -1e9 on padding), slice back to 21 in JAX
    W_out_pad = jnp.concatenate(
        [params['W_out'], jnp.zeros((H, OUT_PAD - NUM_LETTERS), jnp.float32)], axis=1)
    b_out_pad = jnp.concatenate(
        [params['b_out'], jnp.full((OUT_PAD - NUM_LETTERS,), -1e9, jnp.float32)])
    log_probs = pallas_out_logsoftmax(h_V, W_out_pad, b_out_pad)[:, :NUM_LETTERS]
    log_probs = log_probs.reshape(B, Np, NUM_LETTERS)[:, :N]

    h_E_out = h_E.reshape(B, Np, K, H)[:, :N].astype(jnp.float32)
    return (list(reversed(all_hidden)), h_S[:, :N], log_probs, h_E_out)


# ----------------------------- deterministic parameter init --------------------
def init_params(key):
    H, E = HIDDEN, EDGE_FEATURES
    keys = iter(jax.random.split(key, 100))

    def xavier(shape):
        a = math.sqrt(6.0 / (shape[0] + shape[1]))
        return jax.random.uniform(next(keys), shape, jnp.float32, minval=-a, maxval=a)

    zeros = lambda *s: jnp.zeros(s, jnp.float32)
    ones = lambda *s: jnp.ones(s, jnp.float32)

    edge_in = NUM_POS_EMB + NUM_RBF * 25
    feat = dict(pos_W=xavier((2 * MAX_REL + 2, NUM_POS_EMB)), pos_b=zeros(NUM_POS_EMB),
                edge_W=xavier((edge_in, E)), norm_g=ones(E), norm_b=zeros(E))

    def enc_p():
        return dict(W1=xavier((3 * H, H)), b1=zeros(H), W2=xavier((H, H)), b2=zeros(H),
                    W3=xavier((H, H)), b3=zeros(H),
                    W11=xavier((3 * H, H)), b11=zeros(H), W12=xavier((H, H)), b12=zeros(H),
                    W13=xavier((H, H)), b13=zeros(H),
                    Win=xavier((H, 4 * H)), bin=zeros(4 * H), Wout=xavier((4 * H, H)), bout=zeros(H),
                    n1g=ones(H), n1b=zeros(H), n2g=ones(H), n2b=zeros(H), n3g=ones(H), n3b=zeros(H))

    def dec_p():
        return dict(W1=xavier((4 * H, H)), b1=zeros(H), W2=xavier((H, H)), b2=zeros(H),
                    W3=xavier((H, H)), b3=zeros(H),
                    Win=xavier((H, 4 * H)), bin=zeros(4 * H), Wout=xavier((4 * H, H)), bout=zeros(H),
                    n1g=ones(H), n1b=zeros(H), n2g=ones(H), n2b=zeros(H))

    return dict(feat=feat,
                W_e=xavier((E, H)), b_e=zeros(H),
                W_s=xavier((VOCAB, H)),
                enc=[enc_p() for _ in range(N_ENC)],
                dec=[dec_p() for _ in range(N_DEC)],
                W_out=xavier((H, NUM_LETTERS)), b_out=zeros(NUM_LETTERS))


# ----------------------------- main ---------------------------------------------
if __name__ == "__main__":
    root = jax.random.PRNGKey(0)
    k_param, k_x, k_s, k_noise = jax.random.split(root, 4)

    B, N = 2, 16
    params = init_params(k_param)

    # synthetic backbone coordinates (N, CA, C, O) laid out roughly along a chain
    base = jnp.arange(N, dtype=jnp.float32)[None, :, None, None] * 3.8
    X = base + 0.5 * jax.random.normal(k_x, (B, N, 4, 3), jnp.float32)
    S = jax.random.randint(k_s, (B, N), 0, VOCAB)
    mask = jnp.ones((B, N), jnp.float32)
    chain_M = jnp.ones((B, N), jnp.float32)
    residue_idx = jnp.broadcast_to(jnp.arange(N, dtype=jnp.int32), (B, N))
    chain_encoding_all = jnp.ones((B, N), jnp.int32)

    fwd = jax.jit(protein_mpnn_forward)
    all_hidden, h_S, log_probs, h_E = fwd(params, X, S, mask, chain_M, residue_idx,
                                          chain_encoding_all, k_noise)
    jax.block_until_ready((all_hidden, h_S, log_probs, h_E))

    assert log_probs.shape == (B, N, NUM_LETTERS)
    assert h_S.shape == (B, N, HIDDEN)
    assert h_E.shape == (B, N, K_NEIGHBORS, HIDDEN)
    assert len(all_hidden) == N_DEC and all_hidden[0].shape == (B, N, HIDDEN)
    assert bool(jnp.all(jnp.isfinite(log_probs)))
    print("KERNEL_OK")
</pallas_src>

<mosaic_0001>
module attributes {stable_mosaic.version = 11 : i64} {
  func.func @_edge_embed_kernel(%arg0: i32, %arg1: memref<128x416xbf16, #tpu.memory_space<vmem>>, %arg2: memref<416x128xbf16, #tpu.memory_space<vmem>>, %arg3: memref<3x128xf32, #tpu.memory_space<vmem>>, %arg4: memref<128x128xbf16, #tpu.memory_space<vmem>>, %arg5: memref<128x128xbf16, #tpu.memory_space<vmem>>) attributes {dimension_semantics = [#tpu.dimension_semantics<parallel>], iteration_bounds = array<i64: 2>, scalar_prefetch = 0 : i64, scratch_operands = 0 : i64, tpu.core_type = #tpu.core_type<tc>, window_params = [{transform_indices = @transform_0, window_bounds = array<i64: 128, 416>}, {pipeline_mode = #tpu.pipeline_mode<synchronous>, transform_indices = @transform_1, window_bounds = array<i64: 416, 128>}, {pipeline_mode = #tpu.pipeline_mode<synchronous>, transform_indices = @transform_2, window_bounds = array<i64: 3, 128>}, {pipeline_mode = #tpu.pipeline_mode<synchronous>, transform_indices = @transform_3, window_bounds = array<i64: 128, 128>}, {transform_indices = @transform_4, window_bounds = array<i64: 128, 128>}]} {
    %c0 = arith.constant 0 : index
    %c0_0 = arith.constant 0 : index
    %0 = vector.load %arg3[%c0, %c0_0] : memref<3x128xf32, #tpu.memory_space<vmem>>, vector<3x128xf32>
    %1 = vector.extract_strided_slice %0 {offsets = [0, 0], sizes = [1, 128], strides = [1, 1]} : vector<3x128xf32> to vector<1x128xf32>
    %2 = vector.extract_strided_slice %0 {offsets = [1, 0], sizes = [1, 128], strides = [1, 1]} : vector<3x128xf32> to vector<1x128xf32>
    %3 = vector.extract_strided_slice %0 {offsets = [2, 0], sizes = [1, 128], strides = [1, 1]} : vector<3x128xf32> to vector<1x128xf32>
    %c0_1 = arith.constant 0 : index
    %c0_2 = arith.constant 0 : index
    %4 = vector.load %arg1[%c0_1, %c0_2] : memref<128x416xbf16, #tpu.memory_space<vmem>>, vector<128x416xbf16>
    %c0_3 = arith.constant 0 : index
    %c0_4 = arith.constant 0 : index
    %5 = vector.load %arg2[%c0_3, %c0_4] : memref<416x128xbf16, #tpu.memory_space<vmem>>, vector<416x128xbf16>
    %cst = arith.constant dense<0.000000e+00> : vector<128x128xf32>
    %6 = tpu.matmul %4, %5, %cst {dimension_numbers = #tpu.dot_dimension_numbers<[1], [0], [0], [1], [0, 0, 1, 1], [], []>} : vector<128x416xbf16>, vector<416x128xbf16>, vector<128x128xf32> -> vector<128x128xf32>
    %cst_5 = arith.constant dense<0.000000e+00> : vector<128xf32>
    %7 = vector.multi_reduction <add>, %6, %cst_5 [1] : vector<128x128xf32> to vector<128xf32>
    %8 = vector.shape_cast %7 : vector<128xf32> to vector<128x1xf32>
    %cst_6 = arith.constant 1.280000e+02 : f32
    %9 = vector.broadcast %cst_6 : f32 to vector<128x1xf32>
    %10 = arith.divf %8, %9 : vector<128x1xf32>
    %11 = vector.broadcast %10 : vector<128x1xf32> to vector<128x128xf32>
    %12 = arith.subf %6, %11 : vector<128x128xf32>
    %13 = arith.mulf %12, %12 : vector<128x128xf32>
    %cst_7 = arith.constant dense<0.000000e+00> : vector<128xf32>
    %14 = vector.multi_reduction <add>, %13, %cst_7 [1] : vector<128x128xf32> to vector<128xf32>
    %15 = vector.shape_cast %14 : vector<128xf32> to vector<128x1xf32>
    %cst_8 = arith.constant 1.280000e+02 : f32
    %16 = vector.broadcast %cst_8 : f32 to vector<128x1xf32>
    %17 = arith.divf %15, %16 : vector<128x1xf32>
    %18 = vector.broadcast %10 : vector<128x1xf32> to vector<128x128xf32>
    %19 = arith.subf %6, %18 : vector<128x128xf32>
    %cst_9 = arith.constant 9.99999974E-6 : f32
    %20 = vector.broadcast %cst_9 : f32 to vector<128x1xf32>
    %21 = arith.addf %17, %20 : vector<128x1xf32>
    %22 = math.rsqrt %21 : vector<128x1xf32>
    %23 = vector.broadcast %22 : vector<128x1xf32> to vector<128x128xf32>
    %24 = arith.mulf %19, %23 : vector<128x128xf32>
    %25 = vector.broadcast %1 : vector<1x128xf32> to vector<128x128xf32>
    %26 = arith.mulf %24, %25 : vector<128x128xf32>
    %27 = vector.broadcast %2 : vector<1x128xf32> to vector<128x128xf32>
    %28 = arith.addf %26, %27 : vector<128x128xf32>
    %29 = arith.truncf %28 : vector<128x128xf32> to vector<128x128xbf16>
    %c0_10 = arith.constant 0 : index
    %c0_11 = arith.constant 0 : index
    %30 = vector.load %arg4[%c0_10, %c0_11] : memref<128x128xbf16, #tpu.memory_space<vmem>>, vector<128x128xbf16>
    %cst_12 = arith.constant dense<0.000000e+00> : vector<128x128xf32>
    %31 = tpu.matmul %29, %30, %cst_12 {dimension_numbers = #tpu.dot_dimension_numbers<[1], [0], [0], [1], [0, 0, 1, 1], [], []>} : vector<128x128xbf16>, vector<128x128xbf16>, vector<128x128xf32> -> vector<128x128xf32>
    %32 = vector.broadcast %3 : vector<1x128xf32> to vector<128x128xf32>
    %33 = arith.addf %31, %32 : vector<128x128xf32>
    %34 = arith.truncf %33 : vector<128x128xf32> to vector<128x128xbf16>
    %c0_13 = arith.constant 0 : index
    %c0_14 = arith.constant 0 : index
    %35 = vector.load %arg5[%c0_13, %c0_14] : memref<128x128xbf16, #tpu.memory_space<vmem>>, vector<128x128xbf16>
    tpu.vector_store %arg5[%c0_13, %c0_14], %34 {strides = array<i32>} : memref<128x128xbf16, #tpu.memory_space<vmem>>, vector<128x128xbf16>,
    return
  }
  func.func @transform_0(%arg0: i32) -> (i32, i32) {
    %c0_i32 = arith.constant 0 : i32
    %c0_i32_0 = arith.constant 0 : i32
    return %arg0, %c0_i32 : i32, i32
  }
  func.func @transform_1(%arg0: i32) -> (i32, i32) {
    %c0_i32 = arith.constant 0 : i32
    %c0_i32_0 = arith.constant 0 : i32
    %c0_i32_1 = arith.constant 0 : i32
    return %c0_i32, %c0_i32_0 : i32, i32
  }
  func.func @transform_2(%arg0: i32) -> (i32, i32) {
    %c0_i32 = arith.constant 0 : i32
    %c0_i32_0 = arith.constant 0 : i32
    %c0_i32_1 = arith.constant 0 : i32
    return %c0_i32, %c0_i32_0 : i32, i32
  }
  func.func @transform_3(%arg0: i32) -> (i32, i32) {
    %c0_i32 = arith.constant 0 : i32
    %c0_i32_0 = arith.constant 0 : i32
    %c0_i32_1 = arith.constant 0 : i32
    return %c0_i32, %c0_i32_0 : i32, i32
  }
  func.func @transform_4(%arg0: i32) -> (i32, i32) {
    %c0_i32 = arith.constant 0 : i32
    %c0_i32_0 = arith.constant 0 : i32
    return %arg0, %c0_i32 : i32, i32
  }
}

module attributes {stable_mosaic.version = 11 : i64} {
  func.func @_node_layer_kernel(%arg0: i32, %arg1: memref<16x128xbf16, #tpu.memory_space<vmem>>, %arg2: memref<128x128xbf16, #tpu.memory_space<vmem>>, %arg3: memref<128x128xbf16, #tpu.memory_space<vmem>>, %arg4: memref<16x8xf32, #tpu.memory_space<vmem>>, %arg5: memref<16x1xf32, #tpu.memory_space<vmem>>, %arg6: memref<128x128xbf16, #tpu.memory_space<vmem>>, %arg7: memref<128x128xbf16, #tpu.memory_space<vmem>>, %arg8: memref<128x128xbf16, #tpu.memory_space<vmem>>, %arg9: memref<128x128xbf16, #tpu.memory_space<vmem>>, %arg10: memref<128x128xbf16, #tpu.memory_space<vmem>>, %arg11: memref<8x128xf32, #tpu.memory_space<vmem>>, %arg12: memref<128x512xbf16, #tpu.memory_space<vmem>>, %arg13: memref<1x512xf32, #tpu.memory_space<vmem>>, %arg14: memref<512x128xbf16, #tpu.memory_space<vmem>>, %arg15: memref<16x128xbf16, #tpu.memory_space<vmem>>) attributes {dimension_semantics = [#tpu.dimension_semantics<parallel>], iteration_bounds = array<i64: 2>, scalar_prefetch = 0 : i64, scratch_operands = 0 : i64, tpu.core_type = #tpu.core_type<tc>, window_params = [{transform_indices = @transform_0, window_bounds = array<i64: 16, 128>}, {transform_indices = @transform_1, window_bounds = array<i64: 128, 128>}, {transform_indices = @transform_2, window_bounds = array<i64: 128, 128>}, {transform_indices = @transform_3, window_bounds = array<i64: 16, 8>}, {transform_indices = @transform_4, window_bounds = array<i64: 16, 1>}, {pipeline_mode = #tpu.pipeline_mode<synchronous>, transform_indices = @transform_5, window_bounds = array<i64: 128, 128>}, {pipeline_mode = #tpu.pipeline_mode<synchronous>, transform_indices = @transform_6, window_bounds = array<i64: 128, 128>}, {pipeline_mode = #tpu.pipeline_mode<synchronous>, transform_indices = @transform_7, window_bounds = array<i64: 128, 128>}, {pipeline_mode = #tpu.pipeline_mode<synchronous>, transform_indices = @transform_8, window_bounds = array<i64: 128, 128>}, {pipeline_mode = #tpu.pipeline_mode<synchronous>, transform_indices = @transform_9, window_bounds = array<i64: 128, 128>}, {pipeline_mode = #tpu.pipeline_mode<synchronous>, transform_indices = @transform_10, window_bounds = array<i64: 8, 128>}, {pipeline_mode = #tpu.pipeline_mode<synchronous>, transform_indices = @transform_11, window_bounds = array<i64: 128, 512>}, {pipeline_mode = #tpu.pipeline_mode<synchronous>, transform_indices = @transform_12, window_bounds = array<i64: 1, 512>}, {pipeline_mode = #tpu.pipeline_mode<synchronous>, transform_indices = @transform_13, window_bounds = array<i64: 512, 128>}, {transform_indices = @transform_14, window_bounds = array<i64: 16, 128>}]} {
    %c0 = arith.constant 0 : index
    %c0_0 = arith.constant 0 : index
    %0 = vector.load %arg11[%c0, %c0_0] : memref<8x128xf32, #tpu.memory_space<vmem>>, vector<8x128xf32>
    %1 = vector.extract_strided_slice %0 {offsets = [0, 0], sizes = [1, 128], strides = [1, 1]} : vector<8x128xf32> to vector<1x128xf32>
    %2 = vector.extract_strided_slice %0 {offsets = [1, 0], sizes = [1, 128], strides = [1, 1]} : vector<8x128xf32> to vector<1x128xf32>
    %3 = vector.extract_strided_slice %0 {offsets = [2, 0], sizes = [1, 128], strides = [1, 1]} : vector<8x128xf32> to vector<1x128xf32>
    %4 = vector.extract_strided_slice %0 {offsets = [3, 0], sizes = [1, 128], strides = [1, 1]} : vector<8x128xf32> to vector<1x128xf32>
    %5 = vector.extract_strided_slice %0 {offsets = [4, 0], sizes = [1, 128], strides = [1, 1]} : vector<8x128xf32> to vector<1x128xf32>
    %6 = vector.extract_strided_slice %0 {offsets = [5, 0], sizes = [1, 128], strides = [1, 1]} : vector<8x128xf32> to vector<1x128xf32>
    %7 = vector.extract_strided_slice %0 {offsets = [6, 0], sizes = [1, 128], strides = [1, 1]} : vector<8x128xf32> to vector<1x128xf32>
    %8 = vector.extract_strided_slice %0 {offsets = [7, 0], sizes = [1, 128], strides = [1, 1]} : vector<8x128xf32> to vector<1x128xf32>
    %c0_1 = arith.constant 0 : index
    %c0_2 = arith.constant 0 : index
    %9 = vector.load %arg1[%c0_1, %c0_2] : memref<16x128xbf16, #tpu.memory_space<vmem>>, vector<16x128xbf16>
    %c0_3 = arith.constant 0 : index
    %c0_4 = arith.constant 0 : index
    %10 = vector.load %arg4[%c0_3, %c0_4] : memref<16x8xf32, #tpu.memory_space<vmem>>, vector<16x8xf32>
    %c0_5 = arith.constant 0 : index
    %c0_6 = arith.constant 0 : index
    %11 = vector.load %arg6[%c0_5, %c0_6] : memref<128x128xbf16, #tpu.memory_space<vmem>>, vector<128x128xbf16>
    %cst = arith.constant dense<0.000000e+00> : vector<16x128xf32>
    %12 = tpu.matmul %9, %11, %cst {dimension_numbers = #tpu.dot_dimension_numbers<[1], [0], [0], [1], [0, 0, 1, 1], [], []>} : vector<16x128xbf16>, vector<128x128xbf16>, vector<16x128xf32> -> vector<16x128xf32>
    %c0_7 = arith.constant 0 : index
    %c0_8 = arith.constant 0 : index
    %13 = vector.load %arg2[%c0_7, %c0_8] : memref<128x128xbf16, #tpu.memory_space<vmem>>, vector<128x128xbf16>
    %c0_9 = arith.constant 0 : index
    %c0_10 = arith.constant 0 : index
    %14 = vector.load %arg7[%c0_9, %c0_10] : memref<128x128xbf16, #tpu.memory_space<vmem>>, vector<128x128xbf16>
    %cst_11 = arith.constant dense<0.000000e+00> : vector<128x128xf32>
    %15 = tpu.matmul %13, %14, %cst_11 {dimension_numbers = #tpu.dot_dimension_numbers<[1], [0], [0], [1], [0, 0, 1, 1], [], []>} : vector<128x128xbf16>, vector<128x128xbf16>, vector<128x128xf32> -> vector<128x128xf32>
    %c0_12 = arith.constant 0 : index
    %c0_13 = arith.constant 0 : index
    %16 = vector.load %arg3[%c0_12, %c0_13] : memref<128x128xbf16, #tpu.memory_space<vmem>>, vector<128x128xbf16>
    %c0_14 = arith.constant 0 : index
    %c0_15 = arith.constant 0 : index
    %17 = vector.load %arg8[%c0_14, %c0_15] : memref<128x128xbf16, #tpu.memory_space<vmem>>, vector<128x128xbf16>
    %cst_16 = arith.constant dense<0.000000e+00> : vector<128x128xf32>
    %18 = tpu.matmul %16, %17, %cst_16 {dimension_numbers = #tpu.dot_dimension_numbers<[1], [0], [0], [1], [0, 0, 1, 1], [], []>} : vector<128x128xbf16>, vector<128x128xbf16>, vector<128x128xf32> -> vector<128x128xf32>
    %19 = arith.addf %15, %18 : vector<128x128xf32>
    %20 = vector.shape_cast %19 : vector<128x128xf32> to vector<16x8x128xf32>
    %21 = vector.shape_cast %12 : vector<16x128xf32> to vector<16x1x128xf32>
    %22 = vector.broadcast %21 : vector<16x1x128xf32> to vector<16x8x128xf32>
    %23 = arith.addf %20, %22 : vector<16x8x128xf32>
    %24 = vector.shape_cast %1 : vector<1x128xf32> to vector<1x1x128xf32>
    %25 = vector.broadcast %24 : vector<1x1x128xf32> to vector<16x8x128xf32>
    %26 = arith.addf %23, %25 : vector<16x8x128xf32>
    %27 = arith.mulf %26, %26 : vector<16x8x128xf32>
    %28 = arith.mulf %26, %27 : vector<16x8x128xf32>
    %cst_17 = arith.constant 4.471500e-02 : f32
    %29 = vector.broadcast %cst_17 : f32 to vector<16x8x128xf32>
    %30 = arith.mulf %29, %28 : vector<16x8x128xf32>
    %31 = arith.addf %26, %30 : vector<16x8x128xf32>
    %cst_18 = arith.constant 0.797884583 : f32
    %32 = vector.broadcast %cst_18 : f32 to vector<16x8x128xf32>
    %33 = arith.mulf %32, %31 : vector<16x8x128xf32>
    %34 = math.tanh %33 : vector<16x8x128xf32>
    %cst_19 = arith.constant 1.000000e+00 : f32
    %35 = vector.broadcast %cst_19 : f32 to vector<16x8x128xf32>
    %36 = arith.addf %35, %34 : vector<16x8x128xf32>
    %cst_20 = arith.constant 5.000000e-01 : f32
    %37 = vector.broadcast %cst_20 : f32 to vector<16x8x128xf32>
    %38 = arith.mulf %37, %36 : vector<16x8x128xf32>
    %39 = arith.mulf %26, %38 : vector<16x8x128xf32>
    %40 = vector.shape_cast %39 : vector<16x8x128xf32> to vector<128x128xf32>
    %41 = arith.truncf %40 : vector<128x128xf32> to vector<128x128xbf16>
    %c0_21 = arith.constant 0 : index
    %c0_22 = arith.constant 0 : index
    %42 = vector.load %arg9[%c0_21, %c0_22] : memref<128x128xbf16, #tpu.memory_space<vmem>>, vector<128x128xbf16>
    %cst_23 = arith.constant dense<0.000000e+00> : vector<128x128xf32>
    %43 = tpu.matmul %41, %42, %cst_23 {dimension_numbers = #tpu.dot_dimension_numbers<[1], [0], [0], [1], [0, 0, 1, 1], [], []>} : vector<128x128xbf16>, vector<128x128xbf16>, vector<128x128xf32> -> vector<128x128xf32>
    %44 = vector.broadcast %2 : vector<1x128xf32> to vector<128x128xf32>
    %45 = arith.addf %43, %44 : vector<128x128xf32>
    %46 = arith.mulf %45, %45 : vector<128x128xf32>
    %47 = arith.mulf %45, %46 : vector<128x128xf32>
    %cst_24 = arith.constant 4.471500e-02 : f32
    %48 = vector.broadcast %cst_24 : f32 to vector<128x128xf32>
    %49 = arith.mulf %48, %47 : vector<128x128xf32>
    %50 = arith.addf %45, %49 : vector<128x128xf32>
    %cst_25 = arith.constant 0.797884583 : f32
    %51 = vector.broadcast %cst_25 : f32 to vector<128x128xf32>
    %52 = arith.mulf %51, %50 : vector<128x128xf32>
    %53 = math.tanh %52 : vector<128x128xf32>
    %cst_26 = arith.constant 1.000000e+00 : f32
    %54 = vector.broadcast %cst_26 : f32 to vector<128x128xf32>
    %55 = arith.addf %54, %53 : vector<128x128xf32>
    %cst_27 = arith.constant 5.000000e-01 : f32
    %56 = vector.broadcast %cst_27 : f32 to vector<128x128xf32>
    %57 = arith.mulf %56, %55 : vector<128x128xf32>
    %58 = arith.mulf %45, %57 : vector<128x128xf32>
    %59 = arith.truncf %58 : vector<128x128xf32> to vector<128x128xbf16>
    %c0_28 = arith.constant 0 : index
    %c0_29 = arith.constant 0 : index
    %60 = vector.load %arg10[%c0_28, %c0_29] : memref<128x128xbf16, #tpu.memory_space<vmem>>, vector<128x128xbf16>
    %cst_30 = arith.constant dense<0.000000e+00> : vector<128x128xf32>
    %61 = tpu.matmul %59, %60, %cst_30 {dimension_numbers = #tpu.dot_dimension_numbers<[1], [0], [0], [1], [0, 0, 1, 1], [], []>} : vector<128x128xbf16>, vector<128x128xbf16>, vector<128x128xf32> -> vector<128x128xf32>
    %62 = vector.broadcast %3 : vector<1x128xf32> to vector<128x128xf32>
    %63 = arith.addf %61, %62 : vector<128x128xf32>
    %64 = vector.shape_cast %63 : vector<128x128xf32> to vector<16x8x128xf32>
    %65 = vector.shape_cast %10 : vector<16x8xf32> to vector<16x8x1xf32>
    %66 = vector.broadcast %65 : vector<16x8x1xf32> to vector<16x8x128xf32>
    %67 = arith.mulf %64, %66 : vector<16x8x128xf32>
    %cst_31 = arith.constant dense<0.000000e+00> : vector<16x128xf32>
    %68 = vector.multi_reduction <add>, %67, %cst_31 [1] : vector<16x8x128xf32> to vector<16x128xf32>
    %cst_32 = arith.constant 0.0333333351 : f32
    %69 = vector.broadcast %cst_32 : f32 to vector<16x128xf32>
    %70 = arith.mulf %68, %69 : vector<16x128xf32>
    %71 = arith.extf %9 : vector<16x128xbf16> to vector<16x128xf32>
    %72 = arith.addf %71, %70 : vector<16x128xf32>
    %cst_33 = arith.constant dense<0.000000e+00> : vector<16xf32>
    %73 = vector.multi_reduction <add>, %72, %cst_33 [1] : vector<16x128xf32> to vector<16xf32>
    %74 = vector.shape_cast %73 : vector<16xf32> to vector<16x1xf32>
    %cst_34 = arith.constant 1.280000e+02 : f32
    %75 = vector.broadcast %cst_34 : f32 to vector<16x1xf32>
    %76 = arith.divf %74, %75 : vector<16x1xf32>
    %77 = vector.broadcast %76 : vector<16x1xf32> to vector<16x128xf32>
    %78 = arith.subf %72, %77 : vector<16x128xf32>
    %79 = arith.mulf %78, %78 : vector<16x128xf32>
    %cst_35 = arith.constant dense<0.000000e+00> : vector<16xf32>
    %80 = vector.multi_reduction <add>, %79, %cst_35 [1] : vector<16x128xf32> to vector<16xf32>
    %81 = vector.shape_cast %80 : vector<16xf32> to vector<16x1xf32>
    %cst_36 = arith.constant 1.280000e+02 : f32
    %82 = vector.broadcast %cst_36 : f32 to vector<16x1xf32>
    %83 = arith.divf %81, %82 : vector<16x1xf32>
    %84 = vector.broadcast %76 : vector<16x1xf32> to vector<16x128xf32>
    %85 = arith.subf %72, %84 : vector<16x128xf32>
    %cst_37 = arith.constant 9.99999974E-6 : f32
    %86 = vector.broadcast %cst_37 : f32 to vector<16x1xf32>
    %87 = arith.addf %83, %86 : vector<16x1xf32>
    %88 = math.rsqrt %87 : vector<16x1xf32>
    %89 = vector.broadcast %88 : vector<16x1xf32> to vector<16x128xf32>
    %90 = arith.mulf %85, %89 : vector<16x128xf32>
    %91 = vector.broadcast %4 : vector<1x128xf32> to vector<16x128xf32>
    %92 = arith.mulf %90, %91 : vector<16x128xf32>
    %93 = vector.broadcast %5 : vector<1x128xf32> to vector<16x128xf32>
    %94 = arith.addf %92, %93 : vector<16x128xf32>
    %95 = arith.truncf %94 : vector<16x128xf32> to vector<16x128xbf16>
    %c0_38 = arith.constant 0 : index
    %c0_39 = arith.constant 0 : index
    %96 = vector.load %arg12[%c0_38, %c0_39] : memref<128x512xbf16, #tpu.memory_space<vmem>>, vector<128x512xbf16>
    %cst_40 = arith.constant dense<0.000000e+00> : vector<16x512xf32>
    %97 = tpu.matmul %95, %96, %cst_40 {dimension_numbers = #tpu.dot_dimension_numbers<[1], [0], [0], [1], [0, 0, 1, 1], [], []>} : vector<16x128xbf16>, vector<128x512xbf16>, vector<16x512xf32> -> vector<16x512xf32>
    %c0_41 = arith.constant 0 : index
    %c0_42 = arith.constant 0 : index
    %98 = vector.load %arg13[%c0_41, %c0_42] : memref<1x512xf32, #tpu.memory_space<vmem>>, vector<1x512xf32>
    %99 = vector.broadcast %98 : vector<1x512xf32> to vector<16x512xf32>
    %100 = arith.addf %97, %99 : vector<16x512xf32>
    %101 = arith.mulf %100, %100 : vector<16x512xf32>
    %102 = arith.mulf %100, %101 : vector<16x512xf32>
    %cst_43 = arith.constant 4.471500e-02 : f32
    %103 = vector.broadcast %cst_43 : f32 to vector<16x512xf32>
    %104 = arith.mulf %103, %102 : vector<16x512xf32>
    %105 = arith.addf %100, %104 : vector<16x512xf32>
    %cst_44 = arith.constant 0.797884583 : f32
    %106 = vector.broadcast %cst_44 : f32 to vector<16x512xf32>
    %107 = arith.mulf %106, %105 : vector<16x512xf32>
    %108 = math.tanh %107 : vector<16x512xf32>
    %cst_45 = arith.constant 1.000000e+00 : f32
    %109 = vector.broadcast %cst_45 : f32 to vector<16x512xf32>
    %110 = arith.addf %109, %108 : vector<16x512xf32>
    %cst_46 = arith.constant 5.000000e-01 : f32
    %111 = vector.broadcast %cst_46 : f32 to vector<16x512xf32>
    %112 = arith.mulf %111, %110 : vector<16x512xf32>
    %113 = arith.mulf %100, %112 : vector<16x512xf32>
    %114 = arith.truncf %113 : vector<16x512xf32> to vector<16x512xbf16>
    %c0_47 = arith.constant 0 : index
    %c0_48 = arith.constant 0 : index
    %115 = vector.load %arg14[%c0_47, %c0_48] : memref<512x128xbf16, #tpu.memory_space<vmem>>, vector<512x128xbf16>
    %cst_49 = arith.constant dense<0.000000e+00> : vector<16x128xf32>
    %116 = tpu.matmul %114, %115, %cst_49 {dimension_numbers = #tpu.dot_dimension_numbers<[1], [0], [0], [1], [0, 0, 1, 1], [], []>} : vector<16x512xbf16>, vector<512x128xbf16>, vector<16x128xf32> -> vector<16x128xf32>
    %117 = vector.broadcast %6 : vector<1x128xf32> to vector<16x128xf32>
    %118 = arith.addf %116, %117 : vector<16x128xf32>
    %119 = arith.addf %94, %118 : vector<16x128xf32>
    %cst_50 = arith.constant dense<0.000000e+00> : vector<16xf32>
    %120 = vector.multi_reduction <add>, %119, %cst_50 [1] : vector<16x128xf32> to vector<16xf32>
    %121 = vector.shape_cast %120 : vector<16xf32> to vector<16x1xf32>
    %cst_51 = arith.constant 1.280000e+02 : f32
    %122 = vector.broadcast %cst_51 : f32 to vector<16x1xf32>
    %123 = arith.divf %121, %122 : vector<16x1xf32>
    %124 = vector.broadcast %123 : vector<16x1xf32> to vector<16x128xf32>
    %125 = arith.subf %119, %124 : vector<16x128xf32>
    %126 = arith.mulf %125, %125 : vector<16x128xf32>
    %cst_52 = arith.constant dense<0.000000e+00> : vector<16xf32>
    %127 = vector.multi_reduction <add>, %126, %cst_52 [1] : vector<16x128xf32> to vector<16xf32>
    %128 = vector.shape_cast %127 : vector<16xf32> to vector<16x1xf32>
    %cst_53 = arith.constant 1.280000e+02 : f32
    %129 = vector.broadcast %cst_53 : f32 to vector<16x1xf32>
    %130 = arith.divf %128, %129 : vector<16x1xf32>
    %131 = vector.broadcast %123 : vector<16x1xf32> to vector<16x128xf32>
    %132 = arith.subf %119, %131 : vector<16x128xf32>
    %cst_54 = arith.constant 9.99999974E-6 : f32
    %133 = vector.broadcast %cst_54 : f32 to vector<16x1xf32>
    %134 = arith.addf %130, %133 : vector<16x1xf32>
    %135 = math.rsqrt %134 : vector<16x1xf32>
    %136 = vector.broadcast %135 : vector<16x1xf32> to vector<16x128xf32>
    %137 = arith.mulf %132, %136 : vector<16x128xf32>
    %138 = vector.broadcast %7 : vector<1x128xf32> to vector<16x128xf32>
    %139 = arith.mulf %137, %138 : vector<16x128xf32>
    %140 = vector.broadcast %8 : vector<1x128xf32> to vector<16x128xf32>
    %141 = arith.addf %139, %140 : vector<16x128xf32>
    %c0_55 = arith.constant 0 : index
    %c0_56 = arith.constant 0 : index
    %142 = vector.load %arg5[%c0_55, %c0_56] : memref<16x1xf32, #tpu.memory_space<vmem>>, vector<16x1xf32>
    %143 = vector.broadcast %142 : vector<16x1xf32> to vector<16x128xf32>
    %144 = arith.mulf %143, %141 : vector<16x128xf32>
    %145 = arith.truncf %144 : vector<16x128xf32> to vector<16x128xbf16>
    %c0_57 = arith.constant 0 : index
    %c0_58 = arith.constant 0 : index
    %146 = vector.load %arg15[%c0_57, %c0_58] : memref<16x128xbf16, #tpu.memory_space<vmem>>, vector<16x128xbf16>
    tpu.vector_store %arg15[%c0_57, %c0_58], %145 {strides = array<i32>} : memref<16x128xbf16, #tpu.memory_space<vmem>>, vector<16x128xbf16>,
    return
  }
  func.func @transform_0(%arg0: i32) -> (i32, i32) {
    %c0_i32 = arith.constant 0 : i32
    %c0_i32_0 = arith.constant 0 : i32
    return %arg0, %c0_i32 : i32, i32
  }
  func.func @transform_1(%arg0: i32) -> (i32, i32) {
    %c0_i32 = arith.constant 0 : i32
    %c0_i32_0 = arith.constant 0 : i32
    return %arg0, %c0_i32 : i32, i32
  }
  func.func @transform_2(%arg0: i32) -> (i32, i32) {
    %c0_i32 = arith.constant 0 : i32
    %c0_i32_0 = arith.constant 0 : i32
    return %arg0, %c0_i32 : i32, i32
  }
  func.func @transform_3(%arg0: i32) -> (i32, i32) {
    %c0_i32 = arith.constant 0 : i32
    %c0_i32_0 = arith.constant 0 : i32
    return %arg0, %c0_i32 : i32, i32
  }
  func.func @transform_4(%arg0: i32) -> (i32, i32) {
    %c0_i32 = arith.constant 0 : i32
    %c0_i32_0 = arith.constant 0 : i32
    return %arg0, %c0_i32 : i32, i32
  }
  func.func @transform_5(%arg0: i32) -> (i32, i32) {
    %c0_i32 = arith.constant 0 : i32
    %c0_i32_0 = arith.constant 0 : i32
    %c0_i32_1 = arith.constant 0 : i32
    return %c0_i32, %c0_i32_0 : i32, i32
  }
  func.func @transform_6(%arg0: i32) -> (i32, i32) {
    %c0_i32 = arith.constant 0 : i32
    %c0_i32_0 = arith.constant 0 : i32
    %c0_i32_1 = arith.constant 0 : i32
    return %c0_i32, %c0_i32_0 : i32, i32
  }
  func.func @transform_7(%arg0: i32) -> (i32, i32) {
    %c0_i32 = arith.constant 0 : i32
    %c0_i32_0 = arith.constant 0 : i32
    %c0_i32_1 = arith.constant 0 : i32
    return %c0_i32, %c0_i32_0 : i32, i32
  }
  func.func @transform_8(%arg0: i32) -> (i32, i32) {
    %c0_i32 = arith.constant 0 : i32
    %c0_i32_0 = arith.constant 0 : i32
    %c0_i32_1 = arith.constant 0 : i32
    return %c0_i32, %c0_i32_0 : i32, i32
  }
  func.func @transform_9(%arg0: i32) -> (i32, i32) {
    %c0_i32 = arith.constant 0 : i32
    %c0_i32_0 = arith.constant 0 : i32
    %c0_i32_1 = arith.constant 0 : i32
    return %c0_i32, %c0_i32_0 : i32, i32
  }
  func.func @transform_10(%arg0: i32) -> (i32, i32) {
    %c0_i32 = arith.constant 0 : i32
    %c0_i32_0 = arith.constant 0 : i32
    %c0_i32_1 = arith.constant 0 : i32
    return %c0_i32, %c0_i32_0 : i32, i32
  }
  func.func @transform_11(%arg0: i32) -> (i32, i32) {
    %c0_i32 = arith.constant 0 : i32
    %c0_i32_0 = arith.constant 0 : i32
    %c0_i32_1 = arith.constant 0 : i32
    return %c0_i32, %c0_i32_0 : i32, i32
  }
  func.func @transform_12(%arg0: i32) -> (i32, i32) {
    %c0_i32 = arith.constant 0 : i32
    %c0_i32_0 = arith.constant 0 : i32
    %c0_i32_1 = arith.constant 0 : i32
    return %c0_i32, %c0_i32_0 : i32, i32
  }
  func.func @transform_13(%arg0: i32) -> (i32, i32) {
    %c0_i32 = arith.constant 0 : i32
    %c0_i32_0 = arith.constant 0 : i32
    %c0_i32_1 = arith.constant 0 : i32
    return %c0_i32, %c0_i32_0 : i32, i32
  }
  func.func @transform_14(%arg0: i32) -> (i32, i32) {
    %c0_i32 = arith.constant 0 : i32
    %c0_i32_0 = arith.constant 0 : i32
    return %arg0, %c0_i32 : i32, i32
  }
}

module attributes {stable_mosaic.version = 11 : i64} {
  func.func @_edge_layer_kernel(%arg0: i32, %arg1: memref<16x128xbf16, #tpu.memory_space<vmem>>, %arg2: memref<128x128xbf16, #tpu.memory_space<vmem>>, %arg3: memref<128x128xbf16, #tpu.memory_space<vmem>>, %arg4: memref<128x128xbf16, #tpu.memory_space<vmem>>, %arg5: memref<128x128xbf16, #tpu.memory_space<vmem>>, %arg6: memref<128x128xbf16, #tpu.memory_space<vmem>>, %arg7: memref<128x128xbf16, #tpu.memory_space<vmem>>, %arg8: memref<128x128xbf16, #tpu.memory_space<vmem>>, %arg9: memref<8x128xf32, #tpu.memory_space<vmem>>, %arg10: memref<128x128xbf16, #tpu.memory_space<vmem>>) attributes {dimension_semantics = [#tpu.dimension_semantics<parallel>], iteration_bounds = array<i64: 2>, scalar_prefetch = 0 : i64, scratch_operands = 0 : i64, tpu.core_type = #tpu.core_type<tc>, window_params = [{transform_indices = @transform_0, window_bounds = array<i64: 16, 128>}, {transform_indices = @transform_1, window_bounds = array<i64: 128, 128>}, {transform_indices = @transform_2, window_bounds = array<i64: 128, 128>}, {pipeline_mode = #tpu.pipeline_mode<synchronous>, transform_indices = @transform_3, window_bounds = array<i64: 128, 128>}, {pipeline_mode = #tpu.pipeline_mode<synchronous>, transform_indices = @transform_4, window_bounds = array<i64: 128, 128>}, {pipeline_mode = #tpu.pipeline_mode<synchronous>, transform_indices = @transform_5, window_bounds = array<i64: 128, 128>}, {pipeline_mode = #tpu.pipeline_mode<synchronous>, transform_indices = @transform_6, window_bounds = array<i64: 128, 128>}, {pipeline_mode = #tpu.pipeline_mode<synchronous>, transform_indices = @transform_7, window_bounds = array<i64: 128, 128>}, {pipeline_mode = #tpu.pipeline_mode<synchronous>, transform_indices = @transform_8, window_bounds = array<i64: 8, 128>}, {transform_indices = @transform_9, window_bounds = array<i64: 128, 128>}]} {
    %c0 = arith.constant 0 : index
    %c0_0 = arith.constant 0 : index
    %0 = vector.load %arg9[%c0, %c0_0] : memref<8x128xf32, #tpu.memory_space<vmem>>, vector<8x128xf32>
    %1 = vector.extract_strided_slice %0 {offsets = [0, 0], sizes = [1, 128], strides = [1, 1]} : vector<8x128xf32> to vector<1x128xf32>
    %2 = vector.extract_strided_slice %0 {offsets = [1, 0], sizes = [1, 128], strides = [1, 1]} : vector<8x128xf32> to vector<1x128xf32>
    %3 = vector.extract_strided_slice %0 {offsets = [2, 0], sizes = [1, 128], strides = [1, 1]} : vector<8x128xf32> to vector<1x128xf32>
    %4 = vector.extract_strided_slice %0 {offsets = [3, 0], sizes = [1, 128], strides = [1, 1]} : vector<8x128xf32> to vector<1x128xf32>
    %5 = vector.extract_strided_slice %0 {offsets = [4, 0], sizes = [1, 128], strides = [1, 1]} : vector<8x128xf32> to vector<1x128xf32>
    %c0_1 = arith.constant 0 : index
    %c0_2 = arith.constant 0 : index
    %6 = vector.load %arg2[%c0_1, %c0_2] : memref<128x128xbf16, #tpu.memory_space<vmem>>, vector<128x128xbf16>
    %c0_3 = arith.constant 0 : index
    %c0_4 = arith.constant 0 : index
    %7 = vector.load %arg1[%c0_3, %c0_4] : memref<16x128xbf16, #tpu.memory_space<vmem>>, vector<16x128xbf16>
    %c0_5 = arith.constant 0 : index
    %c0_6 = arith.constant 0 : index
    %8 = vector.load %arg4[%c0_5, %c0_6] : memref<128x128xbf16, #tpu.memory_space<vmem>>, vector<128x128xbf16>
    %cst = arith.constant dense<0.000000e+00> : vector<16x128xf32>
    %9 = tpu.matmul %7, %8, %cst {dimension_numbers = #tpu.dot_dimension_numbers<[1], [0], [0], [1], [0, 0, 1, 1], [], []>} : vector<16x128xbf16>, vector<128x128xbf16>, vector<16x128xf32> -> vector<16x128xf32>
    %c0_7 = arith.constant 0 : index
    %c0_8 = arith.constant 0 : index
    %10 = vector.load %arg5[%c0_7, %c0_8] : memref<128x128xbf16, #tpu.memory_space<vmem>>, vector<128x128xbf16>
    %cst_9 = arith.constant dense<0.000000e+00> : vector<128x128xf32>
    %11 = tpu.matmul %6, %10, %cst_9 {dimension_numbers = #tpu.dot_dimension_numbers<[1], [0], [0], [1], [0, 0, 1, 1], [], []>} : vector<128x128xbf16>, vector<128x128xbf16>, vector<128x128xf32> -> vector<128x128xf32>
    %c0_10 = arith.constant 0 : index
    %c0_11 = arith.constant 0 : index
    %12 = vector.load %arg3[%c0_10, %c0_11] : memref<128x128xbf16, #tpu.memory_space<vmem>>, vector<128x128xbf16>
    %c0_12 = arith.constant 0 : index
    %c0_13 = arith.constant 0 : index
    %13 = vector.load %arg6[%c0_12, %c0_13] : memref<128x128xbf16, #tpu.memory_space<vmem>>, vector<128x128xbf16>
    %cst_14 = arith.constant dense<0.000000e+00> : vector<128x128xf32>
    %14 = tpu.matmul %12, %13, %cst_14 {dimension_numbers = #tpu.dot_dimension_numbers<[1], [0], [0], [1], [0, 0, 1, 1], [], []>} : vector<128x128xbf16>, vector<128x128xbf16>, vector<128x128xf32> -> vector<128x128xf32>
    %15 = arith.addf %11, %14 : vector<128x128xf32>
    %16 = vector.shape_cast %15 : vector<128x128xf32> to vector<16x8x128xf32>
    %17 = vector.shape_cast %9 : vector<16x128xf32> to vector<16x1x128xf32>
    %18 = vector.broadcast %17 : vector<16x1x128xf32> to vector<16x8x128xf32>
    %19 = arith.addf %16, %18 : vector<16x8x128xf32>
    %20 = vector.shape_cast %19 : vector<16x8x128xf32> to vector<128x128xf32>
    %21 = vector.broadcast %1 : vector<1x128xf32> to vector<128x128xf32>
    %22 = arith.addf %20, %21 : vector<128x128xf32>
    %23 = arith.mulf %22, %22 : vector<128x128xf32>
    %24 = arith.mulf %22, %23 : vector<128x128xf32>
    %cst_15 = arith.constant 4.471500e-02 : f32
    %25 = vector.broadcast %cst_15 : f32 to vector<128x128xf32>
    %26 = arith.mulf %25, %24 : vector<128x128xf32>
    %27 = arith.addf %22, %26 : vector<128x128xf32>
    %cst_16 = arith.constant 0.797884583 : f32
    %28 = vector.broadcast %cst_16 : f32 to vector<128x128xf32>
    %29 = arith.mulf %28, %27 : vector<128x128xf32>
    %30 = math.tanh %29 : vector<128x128xf32>
    %cst_17 = arith.constant 1.000000e+00 : f32
    %31 = vector.broadcast %cst_17 : f32 to vector<128x128xf32>
    %32 = arith.addf %31, %30 : vector<128x128xf32>
    %cst_18 = arith.constant 5.000000e-01 : f32
    %33 = vector.broadcast %cst_18 : f32 to vector<128x128xf32>
    %34 = arith.mulf %33, %32 : vector<128x128xf32>
    %35 = arith.mulf %22, %34 : vector<128x128xf32>
    %36 = arith.truncf %35 : vector<128x128xf32> to vector<128x128xbf16>
    %c0_19 = arith.constant 0 : index
    %c0_20 = arith.constant 0 : index
    %37 = vector.load %arg7[%c0_19, %c0_20] : memref<128x128xbf16, #tpu.memory_space<vmem>>, vector<128x128xbf16>
    %cst_21 = arith.constant dense<0.000000e+00> : vector<128x128xf32>
    %38 = tpu.matmul %36, %37, %cst_21 {dimension_numbers = #tpu.dot_dimension_numbers<[1], [0], [0], [1], [0, 0, 1, 1], [], []>} : vector<128x128xbf16>, vector<128x128xbf16>, vector<128x128xf32> -> vector<128x128xf32>
    %39 = vector.broadcast %2 : vector<1x128xf32> to vector<128x128xf32>
    %40 = arith.addf %38, %39 : vector<128x128xf32>
    %41 = arith.mulf %40, %40 : vector<128x128xf32>
    %42 = arith.mulf %40, %41 : vector<128x128xf32>
    %cst_22 = arith.constant 4.471500e-02 : f32
    %43 = vector.broadcast %cst_22 : f32 to vector<128x128xf32>
    %44 = arith.mulf %43, %42 : vector<128x128xf32>
    %45 = arith.addf %40, %44 : vector<128x128xf32>
    %cst_23 = arith.constant 0.797884583 : f32
    %46 = vector.broadcast %cst_23 : f32 to vector<128x128xf32>
    %47 = arith.mulf %46, %45 : vector<128x128xf32>
    %48 = math.tanh %47 : vector<128x128xf32>
    %cst_24 = arith.constant 1.000000e+00 : f32
    %49 = vector.broadcast %cst_24 : f32 to vector<128x128xf32>
    %50 = arith.addf %49, %48 : vector<128x128xf32>
    %cst_25 = arith.constant 5.000000e-01 : f32
    %51 = vector.broadcast %cst_25 : f32 to vector<128x128xf32>
    %52 = arith.mulf %51, %50 : vector<128x128xf32>
    %53 = arith.mulf %40, %52 : vector<128x128xf32>
    %54 = arith.truncf %53 : vector<128x128xf32> to vector<128x128xbf16>
    %c0_26 = arith.constant 0 : index
    %c0_27 = arith.constant 0 : index
    %55 = vector.load %arg8[%c0_26, %c0_27] : memref<128x128xbf16, #tpu.memory_space<vmem>>, vector<128x128xbf16>
    %cst_28 = arith.constant dense<0.000000e+00> : vector<128x128xf32>
    %56 = tpu.matmul %54, %55, %cst_28 {dimension_numbers = #tpu.dot_dimension_numbers<[1], [0], [0], [1], [0, 0, 1, 1], [], []>} : vector<128x128xbf16>, vector<128x128xbf16>, vector<128x128xf32> -> vector<128x128xf32>
    %57 = vector.broadcast %3 : vector<1x128xf32> to vector<128x128xf32>
    %58 = arith.addf %56, %57 : vector<128x128xf32>
    %59 = arith.extf %6 : vector<128x128xbf16> to vector<128x128xf32>
    %60 = arith.addf %59, %58 : vector<128x128xf32>
    %cst_29 = arith.constant dense<0.000000e+00> : vector<128xf32>
    %61 = vector.multi_reduction <add>, %60, %cst_29 [1] : vector<128x128xf32> to vector<128xf32>
    %62 = vector.shape_cast %61 : vector<128xf32> to vector<128x1xf32>
    %cst_30 = arith.constant 1.280000e+02 : f32
    %63 = vector.broadcast %cst_30 : f32 to vector<128x1xf32>
    %64 = arith.divf %62, %63 : vector<128x1xf32>
    %65 = vector.broadcast %64 : vector<128x1xf32> to vector<128x128xf32>
    %66 = arith.subf %60, %65 : vector<128x128xf32>
    %67 = arith.mulf %66, %66 : vector<128x128xf32>
    %cst_31 = arith.constant dense<0.000000e+00> : vector<128xf32>
    %68 = vector.multi_reduction <add>, %67, %cst_31 [1] : vector<128x128xf32> to vector<128xf32>
    %69 = vector.shape_cast %68 : vector<128xf32> to vector<128x1xf32>
    %cst_32 = arith.constant 1.280000e+02 : f32
    %70 = vector.broadcast %cst_32 : f32 to vector<128x1xf32>
    %71 = arith.divf %69, %70 : vector<128x1xf32>
    %72 = vector.broadcast %64 : vector<128x1xf32> to vector<128x128xf32>
    %73 = arith.subf %60, %72 : vector<128x128xf32>
    %cst_33 = arith.constant 9.99999974E-6 : f32
    %74 = vector.broadcast %cst_33 : f32 to vector<128x1xf32>
    %75 = arith.addf %71, %74 : vector<128x1xf32>
    %76 = math.rsqrt %75 : vector<128x1xf32>
    %77 = vector.broadcast %76 : vector<128x1xf32> to vector<128x128xf32>
    %78 = arith.mulf %73, %77 : vector<128x128xf32>
    %79 = vector.broadcast %4 : vector<1x128xf32> to vector<128x128xf32>
    %80 = arith.mulf %78, %79 : vector<128x128xf32>
    %81 = vector.broadcast %5 : vector<1x128xf32> to vector<128x128xf32>
    %82 = arith.addf %80, %81 : vector<128x128xf32>
    %83 = arith.truncf %82 : vector<128x128xf32> to vector<128x128xbf16>
    %c0_34 = arith.constant 0 : index
    %c0_35 = arith.constant 0 : index
    %84 = vector.load %arg10[%c0_34, %c0_35] : memref<128x128xbf16, #tpu.memory_space<vmem>>, vector<128x128xbf16>
    tpu.vector_store %arg10[%c0_34, %c0_35], %83 {strides = array<i32>} : memref<128x128xbf16, #tpu.memory_space<vmem>>, vector<128x128xbf16>,
    return
  }
  func.func @transform_0(%arg0: i32) -> (i32, i32) {
    %c0_i32 = arith.constant 0 : i32
    %c0_i32_0 = arith.constant 0 : i32
    return %arg0, %c0_i32 : i32, i32
  }
  func.func @transform_1(%arg0: i32) -> (i32, i32) {
    %c0_i32 = arith.constant 0 : i32
    %c0_i32_0 = arith.constant 0 : i32
    return %arg0, %c0_i32 : i32, i32
  }
  func.func @transform_2(%arg0: i32) -> (i32, i32) {
    %c0_i32 = arith.constant 0 : i32
    %c0_i32_0 = arith.constant 0 : i32
    return %arg0, %c0_i32 : i32, i32
  }
  func.func @transform_3(%arg0: i32) -> (i32, i32) {
    %c0_i32 = arith.constant 0 : i32
    %c0_i32_0 = arith.constant 0 : i32
    %c0_i32_1 = arith.constant 0 : i32
    return %c0_i32, %c0_i32_0 : i32, i32
  }
  func.func @transform_4(%arg0: i32) -> (i32, i32) {
    %c0_i32 = arith.constant 0 : i32
    %c0_i32_0 = arith.constant 0 : i32
    %c0_i32_1 = arith.constant 0 : i32
    return %c0_i32, %c0_i32_0 : i32, i32
  }
  func.func @transform_5(%arg0: i32) -> (i32, i32) {
    %c0_i32 = arith.constant 0 : i32
    %c0_i32_0 = arith.constant 0 : i32
    %c0_i32_1 = arith.constant 0 : i32
    return %c0_i32, %c0_i32_0 : i32, i32
  }
  func.func @transform_6(%arg0: i32) -> (i32, i32) {
    %c0_i32 = arith.constant 0 : i32
    %c0_i32_0 = arith.constant 0 : i32
    %c0_i32_1 = arith.constant 0 : i32
    return %c0_i32, %c0_i32_0 : i32, i32
  }
  func.func @transform_7(%arg0: i32) -> (i32, i32) {
    %c0_i32 = arith.constant 0 : i32
    %c0_i32_0 = arith.constant 0 : i32
    %c0_i32_1 = arith.constant 0 : i32
    return %c0_i32, %c0_i32_0 : i32, i32
  }
  func.func @transform_8(%arg0: i32) -> (i32, i32) {
    %c0_i32 = arith.constant 0 : i32
    %c0_i32_0 = arith.constant 0 : i32
    %c0_i32_1 = arith.constant 0 : i32
    return %c0_i32, %c0_i32_0 : i32, i32
  }
  func.func @transform_9(%arg0: i32) -> (i32, i32) {
    %c0_i32 = arith.constant 0 : i32
    %c0_i32_0 = arith.constant 0 : i32
    return %arg0, %c0_i32 : i32, i32
  }
}

module attributes {stable_mosaic.version = 11 : i64} {
  func.func @_node_layer_kernel(%arg0: i32, %arg1: memref<16x128xbf16, #tpu.memory_space<vmem>>, %arg2: memref<128x128xbf16, #tpu.memory_space<vmem>>, %arg3: memref<128x128xbf16, #tpu.memory_space<vmem>>, %arg4: memref<128x128xbf16, #tpu.memory_space<vmem>>, %arg5: memref<16x8xf32, #tpu.memory_space<vmem>>, %arg6: memref<16x1xf32, #tpu.memory_space<vmem>>, %arg7: memref<128x128xbf16, #tpu.memory_space<vmem>>, %arg8: memref<128x128xbf16, #tpu.memory_space<vmem>>, %arg9: memref<128x128xbf16, #tpu.memory_space<vmem>>, %arg10: memref<128x128xbf16, #tpu.memory_space<vmem>>, %arg11: memref<128x128xbf16, #tpu.memory_space<vmem>>, %arg12: memref<128x128xbf16, #tpu.memory_space<vmem>>, %arg13: memref<8x128xf32, #tpu.memory_space<vmem>>, %arg14: memref<128x512xbf16, #tpu.memory_space<vmem>>, %arg15: memref<1x512xf32, #tpu.memory_space<vmem>>, %arg16: memref<512x128xbf16, #tpu.memory_space<vmem>>, %arg17: memref<16x128xbf16, #tpu.memory_space<vmem>>) attributes {dimension_semantics = [#tpu.dimension_semantics<parallel>], iteration_bounds = array<i64: 2>, scalar_prefetch = 0 : i64, scratch_operands = 0 : i64, tpu.core_type = #tpu.core_type<tc>, window_params = [{transform_indices = @transform_0, window_bounds = array<i64: 16, 128>}, {transform_indices = @transform_1, window_bounds = array<i64: 128, 128>}, {transform_indices = @transform_2, window_bounds = array<i64: 128, 128>}, {transform_indices = @transform_3, window_bounds = array<i64: 128, 128>}, {transform_indices = @transform_4, window_bounds = array<i64: 16, 8>}, {transform_indices = @transform_5, window_bounds = array<i64: 16, 1>}, {pipeline_mode = #tpu.pipeline_mode<synchronous>, transform_indices = @transform_6, window_bounds = array<i64: 128, 128>}, {pipeline_mode = #tpu.pipeline_mode<synchronous>, transform_indices = @transform_7, window_bounds = array<i64: 128, 128>}, {pipeline_mode = #tpu.pipeline_mode<synchronous>, transform_indices = @transform_8, window_bounds = array<i64: 128, 128>}, {pipeline_mode = #tpu.pipeline_mode<synchronous>, transform_indices = @transform_9, window_bounds = array<i64: 128, 128>}, {pipeline_mode = #tpu.pipeline_mode<synchronous>, transform_indices = @transform_10, window_bounds = array<i64: 128, 128>}, {pipeline_mode = #tpu.pipeline_mode<synchronous>, transform_indices = @transform_11, window_bounds = array<i64: 128, 128>}, {pipeline_mode = #tpu.pipeline_mode<synchronous>, transform_indices = @transform_12, window_bounds = array<i64: 8, 128>}, {pipeline_mode = #tpu.pipeline_mode<synchronous>, transform_indices = @transform_13, window_bounds = array<i64: 128, 512>}, {pipeline_mode = #tpu.pipeline_mode<synchronous>, transform_indices = @transform_14, window_bounds = array<i64: 1, 512>}, {pipeline_mode = #tpu.pipeline_mode<synchronous>, transform_indices = @transform_15, window_bounds = array<i64: 512, 128>}, {transform_indices = @transform_16, window_bounds = array<i64: 16, 128>}]} {
    %c0 = arith.constant 0 : index
    %c0_0 = arith.constant 0 : index
    %0 = vector.load %arg13[%c0, %c0_0] : memref<8x128xf32, #tpu.memory_space<vmem>>, vector<8x128xf32>
    %1 = vector.extract_strided_slice %0 {offsets = [0, 0], sizes = [1, 128], strides = [1, 1]} : vector<8x128xf32> to vector<1x128xf32>
    %2 = vector.extract_strided_slice %0 {offsets = [1, 0], sizes = [1, 128], strides = [1, 1]} : vector<8x128xf32> to vector<1x128xf32>
    %3 = vector.extract_strided_slice %0 {offsets = [2, 0], sizes = [1, 128], strides = [1, 1]} : vector<8x128xf32> to vector<1x128xf32>
    %4 = vector.extract_strided_slice %0 {offsets = [3, 0], sizes = [1, 128], strides = [1, 1]} : vector<8x128xf32> to vector<1x128xf32>
    %5 = vector.extract_strided_slice %0 {offsets = [4, 0], sizes = [1, 128], strides = [1, 1]} : vector<8x128xf32> to vector<1x128xf32>
    %6 = vector.extract_strided_slice %0 {offsets = [5, 0], sizes = [1, 128], strides = [1, 1]} : vector<8x128xf32> to vector<1x128xf32>
    %7 = vector.extract_strided_slice %0 {offsets = [6, 0], sizes = [1, 128], strides = [1, 1]} : vector<8x128xf32> to vector<1x128xf32>
    %8 = vector.extract_strided_slice %0 {offsets = [7, 0], sizes = [1, 128], strides = [1, 1]} : vector<8x128xf32> to vector<1x128xf32>
    %c0_1 = arith.constant 0 : index
    %c0_2 = arith.constant 0 : index
    %9 = vector.load %arg1[%c0_1, %c0_2] : memref<16x128xbf16, #tpu.memory_space<vmem>>, vector<16x128xbf16>
    %c0_3 = arith.constant 0 : index
    %c0_4 = arith.constant 0 : index
    %10 = vector.load %arg5[%c0_3, %c0_4] : memref<16x8xf32, #tpu.memory_space<vmem>>, vector<16x8xf32>
    %c0_5 = arith.constant 0 : index
    %c0_6 = arith.constant 0 : index
    %11 = vector.load %arg7[%c0_5, %c0_6] : memref<128x128xbf16, #tpu.memory_space<vmem>>, vector<128x128xbf16>
    %cst = arith.constant dense<0.000000e+00> : vector<16x128xf32>
    %12 = tpu.matmul %9, %11, %cst {dimension_numbers = #tpu.dot_dimension_numbers<[1], [0], [0], [1], [0, 0, 1, 1], [], []>} : vector<16x128xbf16>, vector<128x128xbf16>, vector<16x128xf32> -> vector<16x128xf32>
    %c0_7 = arith.constant 0 : index
    %c0_8 = arith.constant 0 : index
    %13 = vector.load %arg2[%c0_7, %c0_8] : memref<128x128xbf16, #tpu.memory_space<vmem>>, vector<128x128xbf16>
    %c0_9 = arith.constant 0 : index
    %c0_10 = arith.constant 0 : index
    %14 = vector.load %arg8[%c0_9, %c0_10] : memref<128x128xbf16, #tpu.memory_space<vmem>>, vector<128x128xbf16>
    %cst_11 = arith.constant dense<0.000000e+00> : vector<128x128xf32>
    %15 = tpu.matmul %13, %14, %cst_11 {dimension_numbers = #tpu.dot_dimension_numbers<[1], [0], [0], [1], [0, 0, 1, 1], [], []>} : vector<128x128xbf16>, vector<128x128xbf16>, vector<128x128xf32> -> vector<128x128xf32>
    %c0_12 = arith.constant 0 : index
    %c0_13 = arith.constant 0 : index
    %16 = vector.load %arg4[%c0_12, %c0_13] : memref<128x128xbf16, #tpu.memory_space<vmem>>, vector<128x128xbf16>
    %c0_14 = arith.constant 0 : index
    %c0_15 = arith.constant 0 : index
    %17 = vector.load %arg10[%c0_14, %c0_15] : memref<128x128xbf16, #tpu.memory_space<vmem>>, vector<128x128xbf16>
    %cst_16 = arith.constant dense<0.000000e+00> : vector<128x128xf32>
    %18 = tpu.matmul %16, %17, %cst_16 {dimension_numbers = #tpu.dot_dimension_numbers<[1], [0], [0], [1], [0, 0, 1, 1], [], []>} : vector<128x128xbf16>, vector<128x128xbf16>, vector<128x128xf32> -> vector<128x128xf32>
    %19 = arith.addf %15, %18 : vector<128x128xf32>
    %c0_17 = arith.constant 0 : index
    %c0_18 = arith.constant 0 : index
    %20 = vector.load %arg3[%c0_17, %c0_18] : memref<128x128xbf16, #tpu.memory_space<vmem>>, vector<128x128xbf16>
    %c0_19 = arith.constant 0 : index
    %c0_20 = arith.constant 0 : index
    %21 = vector.load %arg9[%c0_19, %c0_20] : memref<128x128xbf16, #tpu.memory_space<vmem>>, vector<128x128xbf16>
    %cst_21 = arith.constant dense<0.000000e+00> : vector<128x128xf32>
    %22 = tpu.matmul %20, %21, %cst_21 {dimension_numbers = #tpu.dot_dimension_numbers<[1], [0], [0], [1], [0, 0, 1, 1], [], []>} : vector<128x128xbf16>, vector<128x128xbf16>, vector<128x128xf32> -> vector<128x128xf32>
    %23 = arith.addf %19, %22 : vector<128x128xf32>
    %24 = vector.shape_cast %23 : vector<128x128xf32> to vector<16x8x128xf32>
    %25 = vector.shape_cast %10 : vector<16x8xf32> to vector<16x8x1xf32>
    %26 = vector.broadcast %25 : vector<16x8x1xf32> to vector<16x8x128xf32>
    %27 = arith.mulf %24, %26 : vector<16x8x128xf32>
    %28 = vector.shape_cast %12 : vector<16x128xf32> to vector<16x1x128xf32>
    %29 = vector.broadcast %28 : vector<16x1x128xf32> to vector<16x8x128xf32>
    %30 = arith.addf %27, %29 : vector<16x8x128xf32>
    %31 = vector.shape_cast %1 : vector<1x128xf32> to vector<1x1x128xf32>
    %32 = vector.broadcast %31 : vector<1x1x128xf32> to vector<16x8x128xf32>
    %33 = arith.addf %30, %32 : vector<16x8x128xf32>
    %34 = arith.mulf %33, %33 : vector<16x8x128xf32>
    %35 = arith.mulf %33, %34 : vector<16x8x128xf32>
    %cst_22 = arith.constant 4.471500e-02 : f32
    %36 = vector.broadcast %cst_22 : f32 to vector<16x8x128xf32>
    %37 = arith.mulf %36, %35 : vector<16x8x128xf32>
    %38 = arith.addf %33, %37 : vector<16x8x128xf32>
    %cst_23 = arith.constant 0.797884583 : f32
    %39 = vector.broadcast %cst_23 : f32 to vector<16x8x128xf32>
    %40 = arith.mulf %39, %38 : vector<16x8x128xf32>
    %41 = math.tanh %40 : vector<16x8x128xf32>
    %cst_24 = arith.constant 1.000000e+00 : f32
    %42 = vector.broadcast %cst_24 : f32 to vector<16x8x128xf32>
    %43 = arith.addf %42, %41 : vector<16x8x128xf32>
    %cst_25 = arith.constant 5.000000e-01 : f32
    %44 = vector.broadcast %cst_25 : f32 to vector<16x8x128xf32>
    %45 = arith.mulf %44, %43 : vector<16x8x128xf32>
    %46 = arith.mulf %33, %45 : vector<16x8x128xf32>
    %47 = vector.shape_cast %46 : vector<16x8x128xf32> to vector<128x128xf32>
    %48 = arith.truncf %47 : vector<128x128xf32> to vector<128x128xbf16>
    %c0_26 = arith.constant 0 : index
    %c0_27 = arith.constant 0 : index
    %49 = vector.load %arg11[%c0_26, %c0_27] : memref<128x128xbf16, #tpu.memory_space<vmem>>, vector<128x128xbf16>
    %cst_28 = arith.constant dense<0.000000e+00> : vector<128x128xf32>
    %50 = tpu.matmul %48, %49, %cst_28 {dimension_numbers = #tpu.dot_dimension_numbers<[1], [0], [0], [1], [0, 0, 1, 1], [], []>} : vector<128x128xbf16>, vector<128x128xbf16>, vector<128x128xf32> -> vector<128x128xf32>
    %51 = vector.broadcast %2 : vector<1x128xf32> to vector<128x128xf32>
    %52 = arith.addf %50, %51 : vector<128x128xf32>
    %53 = arith.mulf %52, %52 : vector<128x128xf32>
    %54 = arith.mulf %52, %53 : vector<128x128xf32>
    %cst_29 = arith.constant 4.471500e-02 : f32
    %55 = vector.broadcast %cst_29 : f32 to vector<128x128xf32>
    %56 = arith.mulf %55, %54 : vector<128x128xf32>
    %57 = arith.addf %52, %56 : vector<128x128xf32>
    %cst_30 = arith.constant 0.797884583 : f32
    %58 = vector.broadcast %cst_30 : f32 to vector<128x128xf32>
    %59 = arith.mulf %58, %57 : vector<128x128xf32>
    %60 = math.tanh %59 : vector<128x128xf32>
    %cst_31 = arith.constant 1.000000e+00 : f32
    %61 = vector.broadcast %cst_31 : f32 to vector<128x128xf32>
    %62 = arith.addf %61, %60 : vector<128x128xf32>
    %cst_32 = arith.constant 5.000000e-01 : f32
    %63 = vector.broadcast %cst_32 : f32 to vector<128x128xf32>
    %64 = arith.mulf %63, %62 : vector<128x128xf32>
    %65 = arith.mulf %52, %64 : vector<128x128xf32>
    %66 = arith.truncf %65 : vector<128x128xf32> to vector<128x128xbf16>
    %c0_33 = arith.constant 0 : index
    %c0_34 = arith.constant 0 : index
    %67 = vector.load %arg12[%c0_33, %c0_34] : memref<128x128xbf16, #tpu.memory_space<vmem>>, vector<128x128xbf16>
    %cst_35 = arith.constant dense<0.000000e+00> : vector<128x128xf32>
    %68 = tpu.matmul %66, %67, %cst_35 {dimension_numbers = #tpu.dot_dimension_numbers<[1], [0], [0], [1], [0, 0, 1, 1], [], []>} : vector<128x128xbf16>, vector<128x128xbf16>, vector<128x128xf32> -> vector<128x128xf32>
    %69 = vector.broadcast %3 : vector<1x128xf32> to vector<128x128xf32>
    %70 = arith.addf %68, %69 : vector<128x128xf32>
    %71 = vector.shape_cast %70 : vector<128x128xf32> to vector<16x8x128xf32>
    %cst_36 = arith.constant dense<0.000000e+00> : vector<16x128xf32>
    %72 = vector.multi_reduction <add>, %71, %cst_36 [1] : vector<16x8x128xf32> to vector<16x128xf32>
    %cst_37 = arith.constant 0.0333333351 : f32
    %73 = vector.broadcast %cst_37 : f32 to vector<16x128xf32>
    %74 = arith.mulf %72, %73 : vector<16x128xf32>
    %75 = arith.extf %9 : vector<16x128xbf16> to vector<16x128xf32>
    %76 = arith.addf %75, %74 : vector<16x128xf32>
    %cst_38 = arith.constant dense<0.000000e+00> : vector<16xf32>
    %77 = vector.multi_reduction <add>, %76, %cst_38 [1] : vector<16x128xf32> to vector<16xf32>
    %78 = vector.shape_cast %77 : vector<16xf32> to vector<16x1xf32>
    %cst_39 = arith.constant 1.280000e+02 : f32
    %79 = vector.broadcast %cst_39 : f32 to vector<16x1xf32>
    %80 = arith.divf %78, %79 : vector<16x1xf32>
    %81 = vector.broadcast %80 : vector<16x1xf32> to vector<16x128xf32>
    %82 = arith.subf %76, %81 : vector<16x128xf32>
    %83 = arith.mulf %82, %82 : vector<16x128xf32>
    %cst_40 = arith.constant dense<0.000000e+00> : vector<16xf32>
    %84 = vector.multi_reduction <add>, %83, %cst_40 [1] : vector<16x128xf32> to vector<16xf32>
    %85 = vector.shape_cast %84 : vector<16xf32> to vector<16x1xf32>
    %cst_41 = arith.constant 1.280000e+02 : f32
    %86 = vector.broadcast %cst_41 : f32 to vector<16x1xf32>
    %87 = arith.divf %85, %86 : vector<16x1xf32>
    %88 = vector.broadcast %80 : vector<16x1xf32> to vector<16x128xf32>
    %89 = arith.subf %76, %88 : vector<16x128xf32>
    %cst_42 = arith.constant 9.99999974E-6 : f32
    %90 = vector.broadcast %cst_42 : f32 to vector<16x1xf32>
    %91 = arith.addf %87, %90 : vector<16x1xf32>
    %92 = math.rsqrt %91 : vector<16x1xf32>
    %93 = vector.broadcast %92 : vector<16x1xf32> to vector<16x128xf32>
    %94 = arith.mulf %89, %93 : vector<16x128xf32>
    %95 = vector.broadcast %4 : vector<1x128xf32> to vector<16x128xf32>
    %96 = arith.mulf %94, %95 : vector<16x128xf32>
    %97 = vector.broadcast %5 : vector<1x128xf32> to vector<16x128xf32>
    %98 = arith.addf %96, %97 : vector<16x128xf32>
    %99 = arith.truncf %98 : vector<16x128xf32> to vector<16x128xbf16>
    %c0_43 = arith.constant 0 : index
    %c0_44 = arith.constant 0 : index
    %100 = vector.load %arg14[%c0_43, %c0_44] : memref<128x512xbf16, #tpu.memory_space<vmem>>, vector<128x512xbf16>
    %cst_45 = arith.constant dense<0.000000e+00> : vector<16x512xf32>
    %101 = tpu.matmul %99, %100, %cst_45 {dimension_numbers = #tpu.dot_dimension_numbers<[1], [0], [0], [1], [0, 0, 1, 1], [], []>} : vector<16x128xbf16>, vector<128x512xbf16>, vector<16x512xf32> -> vector<16x512xf32>
    %c0_46 = arith.constant 0 : index
    %c0_47 = arith.constant 0 : index
    %102 = vector.load %arg15[%c0_46, %c0_47] : memref<1x512xf32, #tpu.memory_space<vmem>>, vector<1x512xf32>
    %103 = vector.broadcast %102 : vector<1x512xf32> to vector<16x512xf32>
    %104 = arith.addf %101, %103 : vector<16x512xf32>
    %105 = arith.mulf %104, %104 : vector<16x512xf32>
    %106 = arith.mulf %104, %105 : vector<16x512xf32>
    %cst_48 = arith.constant 4.471500e-02 : f32
    %107 = vector.broadcast %cst_48 : f32 to vector<16x512xf32>
    %108 = arith.mulf %107, %106 : vector<16x512xf32>
    %109 = arith.addf %104, %108 : vector<16x512xf32>
    %cst_49 = arith.constant 0.797884583 : f32
    %110 = vector.broadcast %cst_49 : f32 to vector<16x512xf32>
    %111 = arith.mulf %110, %109 : vector<16x512xf32>
    %112 = math.tanh %111 : vector<16x512xf32>
    %cst_50 = arith.constant 1.000000e+00 : f32
    %113 = vector.broadcast %cst_50 : f32 to vector<16x512xf32>
    %114 = arith.addf %113, %112 : vector<16x512xf32>
    %cst_51 = arith.constant 5.000000e-01 : f32
    %115 = vector.broadcast %cst_51 : f32 to vector<16x512xf32>
    %116 = arith.mulf %115, %114 : vector<16x512xf32>
    %117 = arith.mulf %104, %116 : vector<16x512xf32>
    %118 = arith.truncf %117 : vector<16x512xf32> to vector<16x512xbf16>
    %c0_52 = arith.constant 0 : index
    %c0_53 = arith.constant 0 : index
    %119 = vector.load %arg16[%c0_52, %c0_53] : memref<512x128xbf16, #tpu.memory_space<vmem>>, vector<512x128xbf16>
    %cst_54 = arith.constant dense<0.000000e+00> : vector<16x128xf32>
    %120 = tpu.matmul %118, %119, %cst_54 {dimension_numbers = #tpu.dot_dimension_numbers<[1], [0], [0], [1], [0, 0, 1, 1], [], []>} : vector<16x512xbf16>, vector<512x128xbf16>, vector<16x128xf32> -> vector<16x128xf32>
    %121 = vector.broadcast %6 : vector<1x128xf32> to vector<16x128xf32>
    %122 = arith.addf %120, %121 : vector<16x128xf32>
    %123 = arith.addf %98, %122 : vector<16x128xf32>
    %cst_55 = arith.constant dense<0.000000e+00> : vector<16xf32>
    %124 = vector.multi_reduction <add>, %123, %cst_55 [1] : vector<16x128xf32> to vector<16xf32>
    %125 = vector.shape_cast %124 : vector<16xf32> to vector<16x1xf32>
    %cst_56 = arith.constant 1.280000e+02 : f32
    %126 = vector.broadcast %cst_56 : f32 to vector<16x1xf32>
    %127 = arith.divf %125, %126 : vector<16x1xf32>
    %128 = vector.broadcast %127 : vector<16x1xf32> to vector<16x128xf32>
    %129 = arith.subf %123, %128 : vector<16x128xf32>
    %130 = arith.mulf %129, %129 : vector<16x128xf32>
    %cst_57 = arith.constant dense<0.000000e+00> : vector<16xf32>
    %131 = vector.multi_reduction <add>, %130, %cst_57 [1] : vector<16x128xf32> to vector<16xf32>
    %132 = vector.shape_cast %131 : vector<16xf32> to vector<16x1xf32>
    %cst_58 = arith.constant 1.280000e+02 : f32
    %133 = vector.broadcast %cst_58 : f32 to vector<16x1xf32>
    %134 = arith.divf %132, %133 : vector<16x1xf32>
    %135 = vector.broadcast %127 : vector<16x1xf32> to vector<16x128xf32>
    %136 = arith.subf %123, %135 : vector<16x128xf32>
    %cst_59 = arith.constant 9.99999974E-6 : f32
    %137 = vector.broadcast %cst_59 : f32 to vector<16x1xf32>
    %138 = arith.addf %134, %137 : vector<16x1xf32>
    %139 = math.rsqrt %138 : vector<16x1xf32>
    %140 = vector.broadcast %139 : vector<16x1xf32> to vector<16x128xf32>
    %141 = arith.mulf %136, %140 : vector<16x128xf32>
    %142 = vector.broadcast %7 : vector<1x128xf32> to vector<16x128xf32>
    %143 = arith.mulf %141, %142 : vector<16x128xf32>
    %144 = vector.broadcast %8 : vector<1x128xf32> to vector<16x128xf32>
    %145 = arith.addf %143, %144 : vector<16x128xf32>
    %c0_60 = arith.constant 0 : index
    %c0_61 = arith.constant 0 : index
    %146 = vector.load %arg6[%c0_60, %c0_61] : memref<16x1xf32, #tpu.memory_space<vmem>>, vector<16x1xf32>
    %147 = vector.broadcast %146 : vector<16x1xf32> to vector<16x128xf32>
    %148 = arith.mulf %147, %145 : vector<16x128xf32>
    %149 = arith.truncf %148 : vector<16x128xf32> to vector<16x128xbf16>
    %c0_62 = arith.constant 0 : index
    %c0_63 = arith.constant 0 : index
    %150 = vector.load %arg17[%c0_62, %c0_63] : memref<16x128xbf16, #tpu.memory_space<vmem>>, vector<16x128xbf16>
    tpu.vector_store %arg17[%c0_62, %c0_63], %149 {strides = array<i32>} : memref<16x128xbf16, #tpu.memory_space<vmem>>, vector<16x128xbf16>,
    return
  }
  func.func @transform_0(%arg0: i32) -> (i32, i32) {
    %c0_i32 = arith.constant 0 : i32
    %c0_i32_0 = arith.constant 0 : i32
    return %arg0, %c0_i32 : i32, i32
  }
  func.func @transform_1(%arg0: i32) -> (i32, i32) {
    %c0_i32 = arith.constant 0 : i32
    %c0_i32_0 = arith.constant 0 : i32
    return %arg0, %c0_i32 : i32, i32
  }
  func.func @transform_2(%arg0: i32) -> (i32, i32) {
    %c0_i32 = arith.constant 0 : i32
    %c0_i32_0 = arith.constant 0 : i32
    return %arg0, %c0_i32 : i32, i32
  }
  func.func @transform_3(%arg0: i32) -> (i32, i32) {
    %c0_i32 = arith.constant 0 : i32
    %c0_i32_0 = arith.constant 0 : i32
    return %arg0, %c0_i32 : i32, i32
  }
  func.func @transform_4(%arg0: i32) -> (i32, i32) {
    %c0_i32 = arith.constant 0 : i32
    %c0_i32_0 = arith.constant 0 : i32
    return %arg0, %c0_i32 : i32, i32
  }
  func.func @transform_5(%arg0: i32) -> (i32, i32) {
    %c0_i32 = arith.constant 0 : i32
    %c0_i32_0 = arith.constant 0 : i32
    return %arg0, %c0_i32 : i32, i32
  }
  func.func @transform_6(%arg0: i32) -> (i32, i32) {
    %c0_i32 = arith.constant 0 : i32
    %c0_i32_0 = arith.constant 0 : i32
    %c0_i32_1 = arith.constant 0 : i32
    return %c0_i32, %c0_i32_0 : i32, i32
  }
  func.func @transform_7(%arg0: i32) -> (i32, i32) {
    %c0_i32 = arith.constant 0 : i32
    %c0_i32_0 = arith.constant 0 : i32
    %c0_i32_1 = arith.constant 0 : i32
    return %c0_i32, %c0_i32_0 : i32, i32
  }
  func.func @transform_8(%arg0: i32) -> (i32, i32) {
    %c0_i32 = arith.constant 0 : i32
    %c0_i32_0 = arith.constant 0 : i32
    %c0_i32_1 = arith.constant 0 : i32
    return %c0_i32, %c0_i32_0 : i32, i32
  }
  func.func @transform_9(%arg0: i32) -> (i32, i32) {
    %c0_i32 = arith.constant 0 : i32
    %c0_i32_0 = arith.constant 0 : i32
    %c0_i32_1 = arith.constant 0 : i32
    return %c0_i32, %c0_i32_0 : i32, i32
  }
  func.func @transform_10(%arg0: i32) -> (i32, i32) {
    %c0_i32 = arith.constant 0 : i32
    %c0_i32_0 = arith.constant 0 : i32
    %c0_i32_1 = arith.constant 0 : i32
    return %c0_i32, %c0_i32_0 : i32, i32
  }
  func.func @transform_11(%arg0: i32) -> (i32, i32) {
    %c0_i32 = arith.constant 0 : i32
    %c0_i32_0 = arith.constant 0 : i32
    %c0_i32_1 = arith.constant 0 : i32
    return %c0_i32, %c0_i32_0 : i32, i32
  }
  func.func @transform_12(%arg0: i32) -> (i32, i32) {
    %c0_i32 = arith.constant 0 : i32
    %c0_i32_0 = arith.constant 0 : i32
    %c0_i32_1 = arith.constant 0 : i32
    return %c0_i32, %c0_i32_0 : i32, i32
  }
  func.func @transform_13(%arg0: i32) -> (i32, i32) {
    %c0_i32 = arith.constant 0 : i32
    %c0_i32_0 = arith.constant 0 : i32
    %c0_i32_1 = arith.constant 0 : i32
    return %c0_i32, %c0_i32_0 : i32, i32
  }
  func.func @transform_14(%arg0: i32) -> (i32, i32) {
    %c0_i32 = arith.constant 0 : i32
    %c0_i32_0 = arith.constant 0 : i32
    %c0_i32_1 = arith.constant 0 : i32
    return %c0_i32, %c0_i32_0 : i32, i32
  }
  func.func @transform_15(%arg0: i32) -> (i32, i32) {
    %c0_i32 = arith.constant 0 : i32
    %c0_i32_0 = arith.constant 0 : i32
    %c0_i32_1 = arith.constant 0 : i32
    return %c0_i32, %c0_i32_0 : i32, i32
  }
  func.func @transform_16(%arg0: i32) -> (i32, i32) {
    %c0_i32 = arith.constant 0 : i32
    %c0_i32_0 = arith.constant 0 : i32
    return %arg0, %c0_i32 : i32, i32
  }
}

module attributes {stable_mosaic.version = 11 : i64} {
  func.func @_out_kernel(%arg0: i32, %arg1: memref<16x128xbf16, #tpu.memory_space<vmem>>, %arg2: memref<128x128xbf16, #tpu.memory_space<vmem>>, %arg3: memref<1x128xf32, #tpu.memory_space<vmem>>, %arg4: memref<16x128xf32, #tpu.memory_space<vmem>>) attributes {dimension_semantics = [#tpu.dimension_semantics<parallel>], iteration_bounds = array<i64: 2>, scalar_prefetch = 0 : i64, scratch_operands = 0 : i64, tpu.core_type = #tpu.core_type<tc>, window_params = [{transform_indices = @transform_0, window_bounds = array<i64: 16, 128>}, {pipeline_mode = #tpu.pipeline_mode<synchronous>, transform_indices = @transform_1, window_bounds = array<i64: 128, 128>}, {pipeline_mode = #tpu.pipeline_mode<synchronous>, transform_indices = @transform_2, window_bounds = array<i64: 1, 128>}, {transform_indices = @transform_3, window_bounds = array<i64: 16, 128>}]} {
    %c0 = arith.constant 0 : index
    %c0_0 = arith.constant 0 : index
    %0 = vector.load %arg1[%c0, %c0_0] : memref<16x128xbf16, #tpu.memory_space<vmem>>, vector<16x128xbf16>
    %c0_1 = arith.constant 0 : index
    %c0_2 = arith.constant 0 : index
    %1 = vector.load %arg2[%c0_1, %c0_2] : memref<128x128xbf16, #tpu.memory_space<vmem>>, vector<128x128xbf16>
    %cst = arith.constant dense<0.000000e+00> : vector<16x128xf32>
    %2 = tpu.matmul %0, %1, %cst {dimension_numbers = #tpu.dot_dimension_numbers<[1], [0], [0], [1], [0, 0, 1, 1], [], []>} : vector<16x128xbf16>, vector<128x128xbf16>, vector<16x128xf32> -> vector<16x128xf32>
    %c0_3 = arith.constant 0 : index
    %c0_4 = arith.constant 0 : index
    %3 = vector.load %arg3[%c0_3, %c0_4] : memref<1x128xf32, #tpu.memory_space<vmem>>, vector<1x128xf32>
    %4 = vector.broadcast %3 : vector<1x128xf32> to vector<16x128xf32>
    %5 = arith.addf %2, %4 : vector<16x128xf32>
    %cst_5 = arith.constant dense<0xFF800000> : vector<16xf32>
    %6 = vector.multi_reduction <maximumf>, %5, %cst_5 [1] : vector<16x128xf32> to vector<16xf32>
    %7 = vector.shape_cast %6 : vector<16xf32> to vector<16x1xf32>
    %8 = vector.broadcast %7 : vector<16x1xf32> to vector<16x128xf32>
    %9 = arith.subf %5, %8 : vector<16x128xf32>
    %10 = math.exp %9 : vector<16x128xf32>
    %cst_6 = arith.constant dense<0.000000e+00> : vector<16xf32>
    %11 = vector.multi_reduction <add>, %10, %cst_6 [1] : vector<16x128xf32> to vector<16xf32>
    %12 = vector.shape_cast %11 : vector<16xf32> to vector<16x1xf32>
    %13 = math.log %12 : vector<16x1xf32>
    %14 = vector.broadcast %13 : vector<16x1xf32> to vector<16x128xf32>
    %15 = arith.subf %9, %14 : vector<16x128xf32>
    %c0_7 = arith.constant 0 : index
    %c0_8 = arith.constant 0 : index
    %16 = vector.load %arg4[%c0_7, %c0_8] : memref<16x128xf32, #tpu.memory_space<vmem>>, vector<16x128xf32>
    tpu.vector_store %arg4[%c0_7, %c0_8], %15 {strides = array<i32>} : memref<16x128xf32, #tpu.memory_space<vmem>>, vector<16x128xf32>,
    return
  }
  func.func @transform_0(%arg0: i32) -> (i32, i32) {
    %c0_i32 = arith.constant 0 : i32
    %c0_i32_0 = arith.constant 0 : i32
    return %arg0, %c0_i32 : i32, i32
  }
  func.func @transform_1(%arg0: i32) -> (i32, i32) {
    %c0_i32 = arith.constant 0 : i32
    %c0_i32_0 = arith.constant 0 : i32
    %c0_i32_1 = arith.constant 0 : i32
    return %c0_i32, %c0_i32_0 : i32, i32
  }
  func.func @transform_2(%arg0: i32) -> (i32, i32) {
    %c0_i32 = arith.constant 0 : i32
    %c0_i32_0 = arith.constant 0 : i32
    %c0_i32_1 = arith.constant 0 : i32
    return %c0_i32, %c0_i32_0 : i32, i32
  }
  func.func @transform_3(%arg0: i32) -> (i32, i32) {
    %c0_i32 = arith.constant 0 : i32
    %c0_i32_0 = arith.constant 0 : i32
    return %arg0, %c0_i32 : i32, i32
  }
}

</mosaic_0001>

<bundles_post_ra>
// kernel: protein_mpnn_forward.11
= control target key start
LH: loop header
LB: loop body
LE: loop exit
PB: predicated region body
PF: predicated region fallthrough
CT: control target
= control target key end

     0   :  { %s1794_s15 = smov 0   ;;  %s2172_s0 = inlined_call_operand.vmem [shape: bf16[256,416], index: 0, kind: input, shape index: {}]   ;;  %s2173_s1 = inlined_call_operand.vmem [shape: bf16[416,128], index: 1, kind: input, shape index: {}]   ;;  %s2174_s2 = inlined_call_operand.vmem [shape: f32[3,128], index: 2, kind: input, shape index: {}]   ;;  %s2175_s3 = inlined_call_operand.vmem [shape: bf16[128,128], index: 3, kind: input, shape index: {}]   ;;  %s2176_s4 = inlined_call_operand.vmem [shape: bf16[256,128], index: 4, kind: output, shape index: {}]  }
   0x1 LB: > { %s1343_s16 = sadd.s32 4294967295, %s1766_s15   ;;  %p1347_p0 = scmp.ge.s32.totalorder %s1766_s15, 1  ;;  %s1766_s15 = sphi %s1794_s15, %s14_s15  }
   0x2   : > { %p164_p1 = scmp.lt.s32.totalorder %s1766_s15, 3 }
   0x4   : > { %p165_p2 = pnand %p1347_p0, %p164_p1 }
   0x5   : > { %s1348_s9 = sshll.u32 (!%p165_p2), %s1343_s16, 4 }
   0x6   : > { %168 = sbr.rel (%p165_p2) target bundleno = 819 (0x333), region = 36  ;;  %p192_p3 = scmp.lt.s32.totalorder (!%p165_p2), %s1348_s9, 31 }
   0xb   : > { %v1646_v0 = vld [vmem:[%s2173_s1 + $0x78] sm:$0xff]   ;;  %v1768_v1 = vmov 0   ;;  %v1649_v4 = vld [vmem:[%s2173_s1 + $0x70] sm:$0xff]   ;;  %v1652_v7 = vld [vmem:[%s2173_s1 + $0x68] sm:$0xff]   ;;  %s2178_s9 = smov (!%p192_p3, %s1348_s9), 31  ;;  %vm598_vm0 = vcmask 261120  }
   0xc   : > { %720 = vmatprep.subr.bf16.mxu1 %v1768_v1  ;;  %v1647_v2 = vld [vmem:[%s2173_s1 + $0xb8] sm:$0xff]   ;;  %1509 = vmatprep.subr.bf16.mxu0 %v1646_v0  ;;  %v1650_v5 = vld [vmem:[%s2173_s1 + $0xb0] sm:$0xff]   ;;  %v1653_v8 = vld [vmem:[%s2173_s1 + $0xa8] sm:$0xff]   ;;  %s1445_s27 = sshll.u32 %s2178_s9, 4  ;;  %s1352_s19 = sshll.u32 %s2178_s9, 2 }
   0xd   : > { %v1648_v3 = vld [vmem:[%s2173_s1 + $0x38] sm:$0xff]   ;;  %721 = vmatpush1.bf16.msra.mxu1 %v1647_v2  ;;  %v1651_v6 = vld [vmem:[%s2173_s1 + $0x30] sm:$0xff]   ;;  %v1654_v9 = vld [vmem:[%s2173_s1 + $0x28] sm:$0xff]   ;;  %s1874_s11 = scalar_lea.vmem %s2172_s0, %s1445_s27  ;;  %s2159_s22 = scalar_lea.vmem %s2176_s4, %s1352_s19 }
   0xe   : > { %1510 = vmatpush3.bf16.msra.mxu0 %v1648_v3  ;;  %722 = vmatprep.subr.bf16.mxu1 %v1768_v1  ;;  %v1655_v10 = vld [vmem:[%s2173_s1 + $0x60] sm:$0xff]   ;;  %v1658_v13 = vld [vmem:[%s2173_s1 + $0x58] sm:$0xff]   ;;  %v1661_v16 = vld [vmem:[%s2173_s1 + $0x50] sm:$0xff]  }
   0xf   : > { %1511 = vmatprep.subr.bf16.mxu0 %v1649_v4  ;;  %v1656_v11 = vld [vmem:[%s2173_s1 + $0xa0] sm:$0xff]   ;;  %v1659_v14 = vld [vmem:[%s2173_s1 + $0x98] sm:$0xff]   ;;  %v1662_v17 = vld [vmem:[%s2173_s1 + $0x90] sm:$0xff]  }
  0x10   : > { %v1657_v12 = vld [vmem:[%s2173_s1 + $0x20] sm:$0xff]   ;;  %v1660_v15 = vld [vmem:[%s2173_s1 + $0x18] sm:$0xff]   ;;  %v1663_v18 = vld [vmem:[%s2173_s1 + $0x10] sm:$0xff]  }
  0x11   : > { %723 = vmatpush1.bf16.msra.mxu1 %v1650_v5  ;;  %v1664_v19 = vld [vmem:[%s2173_s1 + $0x48] sm:$0xff]   ;;  %v1667_v22 = vld [vmem:[%s2173_s1 + $0x40] sm:$0xff]  }
  0x12   : > { %1512 = vmatpush3.bf16.msra.mxu0 %v1651_v6  ;;  %724 = vmatprep.subr.bf16.mxu1 %v1768_v1  ;;  %v1665_v20 = vld [vmem:[%s2173_s1 + $0x88] sm:$0xff]   ;;  %v1672_v23 = vld [vmem:[%s1874_s11 + $0x4] ss:$16 sps:$4 sm:$0xff]   ;;  %v1670_v27 = vld [vmem:[%s1874_s11] ss:$16 sps:$4 sm:$0xff]  }
  0x13   : > { %1513 = vmatprep.subr.bf16.mxu0 %v1652_v7  ;;  %v1666_v21 = vld [vmem:[%s2173_s1 + $0x8] sm:$0xff]   ;;  %v1668_v24 = vld [vmem:[%s2173_s1 + $0x80] sm:$0xff]   ;;  %655 = vmatprep.mubr.bf16.mxu0 %v1672_v23 }
  0x14   : > { %v1669_v25 = vld [vmem:[%s2173_s1] sm:$0xff]   ;;  %v1677_v26 = vld [vmem:[%s1874_s11 + $0xc] ss:$16 sps:$4 sm:$0xff]   ;;  %v1675_v31 = vld [vmem:[%s1874_s11 + $0x8] ss:$16 sps:$4 sm:$0xff]  }
  0x15   : > { %725 = vmatpush1.bf16.msra.mxu1 %v1653_v8  ;;  %1411 = vmatprep.mubr.msk.bf16.mxu1 %vm598_vm0, %v1677_v26  ;;  %v1673_v28 = vld [vmem:[%s2173_s1 + $0xc8] sm:$0xff]   ;;  %v1678_v29 = vld [vmem:[%s1874_s11 + $0x24] ss:$16 sps:$4 sm:$0xff]   ;;  %v1680_v32 = vld [vmem:[%s1874_s11 + $0x20] ss:$16 sps:$4 sm:$0xff]  }
  0x16   : > { %1514 = vmatpush3.bf16.msra.mxu0 %v1654_v9  ;;  %726 = vmatprep.subr.bf16.mxu1 %v1768_v1  ;;  %v1674_v30 = vld [vmem:[%s2173_s1 + $0xc0] sm:$0xff]   ;;  %v1681_v33 = vld [vmem:[%s1874_s11 + $0x2c] ss:$16 sps:$4 sm:$0xff]   ;;  %v1685_v35 = vld [vmem:[%s1874_s11 + $0x28] ss:$16 sps:$4 sm:$0xff]  }
  0x17   : > { %1515 = vmatprep.subr.bf16.mxu0 %v1655_v10  ;;  %v1683_v34 = vld [vmem:[%s1874_s11 + $0x44] ss:$16 sps:$4 sm:$0xff]   ;;  %v1686_v36 = vld [vmem:[%s1874_s11 + $0x40] ss:$16 sps:$4 sm:$0xff]   ;;  %v1687_v37 = vld [vmem:[%s1874_s11 + $0x4c] ss:$16 sps:$4 sm:$0xff]  }
  0x18   : > { %v1689_v38 = vld [vmem:[%s1874_s11 + $0x64] ss:$16 sps:$4 sm:$0xff]   ;;  %v1691_v39 = vld [vmem:[%s1874_s11 + $0x48] ss:$16 sps:$4 sm:$0xff]   ;;  %v1692_v40 = vld [vmem:[%s1874_s11 + $0x60] ss:$16 sps:$4 sm:$0xff]  }
  0x19   : > { %727 = vmatpush1.bf16.msra.mxu1 %v1656_v11  ;;  %v1693_v41 = vld [vmem:[%s1874_s11 + $0x6c] ss:$16 sps:$4 sm:$0xff]   ;;  %v1695_v42 = vld [vmem:[%s1874_s11 + $0x84] ss:$16 sps:$4 sm:$0xff]   ;;  %v1697_v43 = vld [vmem:[%s1874_s11 + $0x68] ss:$16 sps:$4 sm:$0xff]  }
  0x1a   : > { %1516 = vmatpush3.bf16.msra.mxu0 %v1657_v12  ;;  %728 = vmatprep.subr.bf16.mxu1 %v1768_v1  ;;  %v1698_v44 = vld [vmem:[%s1874_s11 + $0x80] ss:$16 sps:$4 sm:$0xff]   ;;  %v1699_v45 = vld [vmem:[%s1874_s11 + $0x8c] ss:$16 sps:$4 sm:$0xff]   ;;  %v1701_v46 = vld [vmem:[%s1874_s11 + $0xa4] ss:$16 sps:$4 sm:$0xff]  }
  0x1b   : > { %1517 = vmatprep.subr.bf16.mxu0 %v1658_v13  ;;  %v1703_v47 = vld [vmem:[%s1874_s11 + $0x88] ss:$16 sps:$4 sm:$0xff]   ;;  %v1704_v48 = vld [vmem:[%s1874_s11 + $0xa0] ss:$16 sps:$4 sm:$0xff]   ;;  %v1705_v49 = vld [vmem:[%s1874_s11 + $0xac] ss:$16 sps:$4 sm:$0xff]  }
  0x1c   : > { %v1707_v50 = vld [vmem:[%s1874_s11 + $0xc4] ss:$16 sps:$4 sm:$0xff]   ;;  %v1709_v51 = vld [vmem:[%s1874_s11 + $0xa8] ss:$16 sps:$4 sm:$0xff]   ;;  %v1710_v52 = vld [vmem:[%s1874_s11 + $0xc0] ss:$16 sps:$4 sm:$0xff]  }
  0x1d   : > { %729 = vmatpush1.bf16.msra.mxu1 %v1659_v14  ;;  %v1711_v53 = vld [vmem:[%s1874_s11 + $0xcc] ss:$16 sps:$4 sm:$0xff]   ;;  %v1713_v54 = vld [vmem:[%s1874_s11 + $0xe4] ss:$16 sps:$4 sm:$0xff]   ;;  %v1715_v55 = vld [vmem:[%s1874_s11 + $0xc8] ss:$16 sps:$4 sm:$0xff]  }
  0x1e   : > { %1518 = vmatpush3.bf16.msra.mxu0 %v1660_v15  ;;  %730 = vmatprep.subr.bf16.mxu1 %v1768_v1  ;;  %v1716_v56 = vld [vmem:[%s1874_s11 + $0xe0] ss:$16 sps:$4 sm:$0xff]   ;;  %v1717_v57 = vld [vmem:[%s1874_s11 + $0xec] ss:$16 sps:$4 sm:$0xff]   ;;  %v1719_v58 = vld [vmem:[%s1874_s11 + $0xe8] ss:$16 sps:$4 sm:$0xff]  }
  0x1f   : > { %1519 = vmatprep.subr.bf16.mxu0 %v1661_v16 }
  0x21   : > { %731 = vmatpush1.bf16.msra.mxu1 %v1662_v17 }
  0x22   : > { %1520 = vmatpush3.bf16.msra.mxu0 %v1663_v18  ;;  %732 = vmatprep.subr.bf16.mxu1 %v1768_v1 }
  0x23   : > { %1521 = vmatprep.subr.bf16.mxu0 %v1664_v19 }
  0x25   : > { %733 = vmatpush1.bf16.msra.mxu1 %v1665_v20 }
  0x26   : > { %1522 = vmatpush3.bf16.msra.mxu0 %v1666_v21  ;;  %734 = vmatprep.subr.bf16.mxu1 %v1768_v1 }
  0x27   : > { %1523 = vmatprep.subr.bf16.mxu0 %v1667_v22 }
  0x29   : > { %735 = vmatpush1.bf16.msra.mxu1 %v1668_v24 }
  0x2a   : > { %1524 = vmatpush3.bf16.msra.mxu0 %v1669_v25  ;;  %748 = vmatprep.subr.bf16.mxu1 %v1768_v1 }
  0x2d   : > { %656 = vmatmul.mubr.bf16.vlgmr.msra.gmra.mxu0 %v1670_v27  ;;  %749 = vmatpush2.bf16.msra.mxu1 %v1673_v28 }
  0x2e   : > { %750 = vmatprep.subr.bf16.mxu1 %v1768_v1  ;;  %663 = vmatprep.mubr.bf16.mxu0 %v1678_v29 }
  0x31   : > { %751 = vmatpush2.bf16.msra.mxu1 %v1674_v30 }
  0x34   : > { %753 = vmatmul.mubr.bf16.vlgmr.msra.gmra.mxu1 %v1675_v31 }
  0x35   : > { %664 = vmatmul.mubr.bf16.gmra.mxu0 %v1680_v32  ;;  %1412 = vmatprep.mubr.msk.bf16.mxu1 %vm598_vm0, %v1681_v33 }
  0x36   : > { %671 = vmatprep.mubr.bf16.mxu0 %v1683_v34 }
  0x3c   : > { %761 = vmatmul.mubr.bf16.gmra.mxu1 %v1685_v35 }
  0x3d   : > { %672 = vmatmul.mubr.bf16.gmra.mxu0 %v1686_v36  ;;  %1413 = vmatprep.mubr.msk.bf16.mxu1 %vm598_vm0, %v1687_v37 }
  0x3e   : > { %679 = vmatprep.mubr.bf16.mxu0 %v1689_v38 }
  0x44   : > { %769 = vmatmul.mubr.bf16.gmra.mxu1 %v1691_v39 }
  0x45   : > { %680 = vmatmul.mubr.bf16.gmra.mxu0 %v1692_v40  ;;  %1414 = vmatprep.mubr.msk.bf16.mxu1 %vm598_vm0, %v1693_v41 }
  0x46   : > { %687 = vmatprep.mubr.bf16.mxu0 %v1695_v42 }
  0x4c   : > { %777 = vmatmul.mubr.bf16.gmra.mxu1 %v1697_v43 }
  0x4d   : > { %688 = vmatmul.mubr.bf16.gmra.mxu0 %v1698_v44  ;;  %1415 = vmatprep.mubr.msk.bf16.mxu1 %vm598_vm0, %v1699_v45 }
  0x4e   : > { %695 = vmatprep.mubr.bf16.mxu0 %v1701_v46 }
  0x54   : > { %785 = vmatmul.mubr.bf16.gmra.mxu1 %v1703_v47 }
  0x55   : > { %696 = vmatmul.mubr.bf16.gmra.mxu0 %v1704_v48  ;;  %1416 = vmatprep.mubr.msk.bf16.mxu1 %vm598_vm0, %v1705_v49 }
  0x56   : > { %703 = vmatprep.mubr.bf16.mxu0 %v1707_v50 }
  0x5c   : > { %793 = vmatmul.mubr.bf16.gmra.mxu1 %v1709_v51 }
  0x5d   : > { %704 = vmatmul.mubr.bf16.gmra.mxu0 %v1710_v52  ;;  %1417 = vmatprep.mubr.msk.bf16.mxu1 %vm598_vm0, %v1711_v53 }
  0x5e   : > { %711 = vmatprep.mubr.bf16.mxu0 %v1713_v54 }
  0x64   : > { %801 = vmatmul.mubr.bf16.gmra.mxu1 %v1715_v55 }
  0x65   : > { %712 = vmatmul.mubr.bf16.gmra.mxu0 %v1716_v56  ;;  %1418 = vmatprep.mubr.msk.bf16.mxu1 %vm598_vm0, %v1717_v57 }
  0x6c   : > { %809 = vmatmul.mubr.bf16.gmra.mxu1 %v1719_v58 }
  0xed   : > { %v1525_v59 = vpop.f32.mrf.mxu0 }
  0xef   : > { %v1526_v60 = vpop.f32.mrf.mxu0 }
  0xf0   : > { %v1527_v62 = vadd.f32 %v1526_v60, %v1525_v59 }
  0xf1   : > { %v1528_v61 = vpop.f32.mrf.mxu0 }
  0xf3   : > { %v1529_v63 = vpop.f32.mrf.mxu0 }
  0xf4   : > { %v754_v0 = vpop.f32.mrf.mxu1  ;;  %v1530_v4 = vadd.f32 %v1529_v63, %v1528_v61 }
  0xf5   : > { %v1938_v1 = vadd.f32 %v1527_v62, %v754_v0  ;;  %v1531_v2 = vpop.f32.mrf.mxu0 }
  0xf6   : > { %v756_v3 = vpop.f32.mrf.mxu1 }
  0xf7   : > { %v1532_v5 = vpop.f32.mrf.mxu0  ;;  %817 = vadd.xlane.f32.xlu0 %v1938_v1 }
  0xf8   : > { %v757_v6 = vpop.f32.mrf.mxu1  ;;  %v1533_v10 = vadd.f32 %v1532_v5, %v1531_v2 }
  0xf9   : > { %v1941_v7 = vadd.f32 %v1530_v4, %v757_v6  ;;  %v1534_v8 = vpop.f32.mrf.mxu0 }
  0xfa   : > { %v759_v9 = vpop.f32.mrf.mxu1 }
  0xfb   : > { %v1535_v11 = vpop.f32.mrf.mxu0  ;;  %819 = vadd.xlane.f32.xlu0 %v1941_v7 }
  0xfc   : > { %v762_v12 = vpop.f32.mrf.mxu1  ;;  %v1536_v16 = vadd.f32 %v1535_v11, %v1534_v8 }
  0xfd   : > { %v1944_v13 = vadd.f32 %v1533_v10, %v762_v12  ;;  %v1537_v14 = vpop.f32.mrf.mxu0 }
  0xfe   : > { %v764_v15 = vpop.f32.mrf.mxu1 }
  0xff   : > { %v1538_v17 = vpop.f32.mrf.mxu0  ;;  %821 = vadd.xlane.f32.xlu1 %v1944_v13 }
 0x100   : > { %v765_v18 = vpop.f32.mrf.mxu1  ;;  %v1539_v22 = vadd.f32 %v1538_v17, %v1537_v14 }
 0x101   : > { %v1947_v19 = vadd.f32 %v1536_v16, %v765_v18  ;;  %v1540_v20 = vpop.f32.mrf.mxu0 }
 0x102   : > { %v767_v21 = vpop.f32.mrf.mxu1 }
 0x103   : > { %v1541_v23 = vpop.f32.mrf.mxu0  ;;  %823 = vadd.xlane.f32.xlu1 %v1947_v19 }
 0x104   : > { %v770_v24 = vpop.f32.mrf.mxu1  ;;  %v1542_v28 = vadd.f32 %v1541_v23, %v1540_v20 }
 0x105   : > { %v1950_v25 = vadd.f32 %v1539_v22, %v770_v24  ;;  %v1543_v26 = vpop.f32.mrf.mxu0 }
 0x106   : > { %v772_v27 = vpop.f32.mrf.mxu1 }
 0x107   : > { %v1544_v29 = vpop.f32.mrf.mxu0  ;;  %825 = vadd.xlane.f32.xlu0 %v1950_v25 }
 0x108   : > { %v773_v30 = vpop.f32.mrf.mxu1  ;;  %v1545_v34 = vadd.f32 %v1544_v29, %v1543_v26 }
 0x109   : > { %v1953_v31 = vadd.f32 %v1542_v28, %v773_v30  ;;  %v1546_v32 = vpop.f32.mrf.mxu0 }
 0x10a   : > { %v775_v33 = vpop.f32.mrf.mxu1 }
 0x10b   : > { %v1547_v35 = vpop.f32.mrf.mxu0  ;;  %827 = vadd.xlane.f32.xlu1 %v1953_v31 }
 0x10c   : > { %v778_v36 = vpop.f32.mrf.mxu1  ;;  %v1548_v40 = vadd.f32 %v1547_v35, %v1546_v32 }
 0x10d   : > { %v1956_v37 = vadd.f32 %v1545_v34, %v778_v36  ;;  %v1549_v38 = vpop.f32.mrf.mxu0 }
 0x10e   : > { %v780_v39 = vpop.f32.mrf.mxu1 }
 0x10f   : > { %v1550_v41 = vpop.f32.mrf.mxu0  ;;  %829 = vadd.xlane.f32.xlu0 %v1956_v37 }
 0x110   : > { %v781_v42 = vpop.f32.mrf.mxu1  ;;  %v1551_v46 = vadd.f32 %v1550_v41, %v1549_v38 }
 0x111   : > { %v1959_v43 = vadd.f32 %v1548_v40, %v781_v42  ;;  %v1552_v44 = vpop.f32.mrf.mxu0 }
 0x112   : > { %v783_v45 = vpop.f32.mrf.mxu1 }
 0x113   : > { %v1553_v47 = vpop.f32.mrf.mxu0  ;;  %831 = vadd.xlane.f32.xlu1 %v1959_v43 }
 0x114   : > { %v786_v48 = vpop.f32.mrf.mxu1  ;;  %v1554_v52 = vadd.f32 %v1553_v47, %v1552_v44 }
 0x115   : > { %v1962_v49 = vadd.f32 %v1551_v46, %v786_v48  ;;  %v1555_v50 = vpop.f32.mrf.mxu0 }
 0x116   : > { %v788_v51 = vpop.f32.mrf.mxu1 }
 0x117   : > { %v1556_v53 = vpop.f32.mrf.mxu0  ;;  %833 = vadd.xlane.f32.xlu0 %v1962_v49 }
 0x118   : > { %v789_v54 = vpop.f32.mrf.mxu1  ;;  %v1557_v58 = vadd.f32 %v1556_v53, %v1555_v50 }
 0x119   : > { %v1965_v55 = vadd.f32 %v1554_v52, %v789_v54  ;;  %v1558_v56 = vpop.f32.mrf.mxu0 }
 0x11a   : > { %v791_v57 = vpop.f32.mrf.mxu1 }
 0x11b   : > { %v1559_v59 = vpop.f32.mrf.mxu0  ;;  %835 = vadd.xlane.f32.xlu1 %v1965_v55 }
 0x11c   : > { %v794_v60 = vpop.f32.mrf.mxu1  ;;  %v1560_v0 = vadd.f32 %v1559_v59, %v1558_v56  ;;  %v1721_v59 = vld [vmem:[%s2175_s3 + $0x30] sm:$0xff]  }
 0x11d   : > { %v1968_v61 = vadd.f32 %v1557_v58, %v794_v60  ;;  %v1561_v62 = vpop.f32.mrf.mxu0 }
 0x11e   : > { %v796_v63 = vpop.f32.mrf.mxu1 }
 0x11f   : > { %v1562_v2 = vpop.f32.mrf.mxu0  ;;  %837 = vadd.xlane.f32.xlu0 %v1968_v61 }
 0x120   : > { %v797_v3 = vpop.f32.mrf.mxu1  ;;  %v1563_v8 = vadd.f32 %v1562_v2, %v1561_v62 }
 0x121   : > { %v1971_v4 = vadd.f32 %v1560_v0, %v797_v3  ;;  %v1564_v5 = vpop.f32.mrf.mxu0  ;;  %v1722_v0 = vld [vmem:[%s2175_s3 + $0x28] sm:$0xff]  }
 0x122   : > { %v799_v6 = vpop.f32.mrf.mxu1 }
 0x123   : > { %v1565_v9 = vpop.f32.mrf.mxu0  ;;  %839 = vadd.xlane.f32.xlu1 %v1971_v4  ;;  %v1723_v6 = vld [vmem:[%s2175_s3 + $0x20] sm:$0xff]  }
 0x124   : > { %v802_v10 = vpop.f32.mrf.mxu1  ;;  %v1566_v15 = vadd.f32 %v1565_v9, %v1564_v5 }
 0x125   : > { %v1974_v11 = vadd.f32 %v1563_v8, %v802_v10  ;;  %v1567_v12 = vpop.f32.mrf.mxu0 }
 0x126   : > { %v804_v14 = vpop.f32.mrf.mxu1 }
 0x127   : > { %v1568_v16 = vpop.f32.mrf.mxu0  ;;  %841 = vadd.xlane.f32.xlu0 %v1974_v11 }
 0x128   : > { %v805_v17 = vpop.f32.mrf.mxu1  ;;  %v1569_v22 = vadd.f32 %v1568_v16, %v1567_v12  ;;  %v1724_v12 = vld [vmem:[%s2175_s3 + $0x18] sm:$0xff]  }
 0x129   : > { %v1977_v18 = vadd.f32 %v1566_v15, %v805_v17  ;;  %v1570_v20 = vpop.f32.mrf.mxu0  ;;  %v1725_v17 = vld [vmem:[%s2175_s3 + $0x10] sm:$0xff]  }
 0x12a   : > { %v807_v21 = vpop.f32.mrf.mxu1 }
 0x12b   : > { %843 = vadd.xlane.f32.xlu1 %v1977_v18  ;;  %v1571_v23 = vpop.f32.mrf.mxu0 }
 0x12c   : > { %v810_v24 = vpop.f32.mrf.mxu1  ;;  %v1572_v28 = vadd.f32 %v1571_v23, %v1570_v20  ;;  %v1726_v23 = vld [vmem:[%s2175_s3 + $0x8] sm:$0xff]  }
 0x12d   : > { %v1980_v26 = vadd.f32 %v1569_v22, %v810_v24 }
 0x12e   : > { %v812_v27 = vpop.f32.mrf.mxu1 }
 0x12f   : > { %845 = vadd.xlane.f32.xlu0 %v1980_v26 }
 0x130   : > { %v813_v29 = vpop.f32.mrf.mxu1 }
 0x131   : > { %v1983_v30 = vadd.f32 %v1572_v28, %v813_v29  ;;  %v1727_v29 = vld [vmem:[%s2175_s3] sm:$0xff]  }
 0x132   : > { %v815_v32 = vpop.f32.mrf.mxu1 }
 0x133   : > { %847 = vadd.xlane.f32.xlu1 %v1983_v30 }
 0x180   : > { %v818_v33 = vpop.xlane.xlu0 %817 }
 0x181   : > { %v850_v34 = vmul.f32 0.0078125, %v818_v33 }
 0x183   : > { %v1987_v35 = vsub.f32 %v1938_v1, %v850_v34 }
 0x184   : > { %v820_v36 = vpop.xlane.xlu0 %819 }
 0x185   : > { %v851_v38 = vmul.f32 0.0078125, %v820_v36  ;;  %v882_v39 = vmul.f32 %v1987_v35, %v1987_v35 }
 0x187   : > { %v1992_v40 = vsub.f32 %v1941_v7, %v851_v38  ;;  %898 = vadd.xlane.f32.xlu0 %v882_v39 }
 0x188   : > { %v822_v41 = vpop.xlane.xlu1 %821 }
 0x189   : > { %v852_v42 = vmul.f32 0.0078125, %v822_v41  ;;  %v883_v44 = vmul.f32 %v1992_v40, %v1992_v40 }
 0x18b   : > { %v1997_v45 = vsub.f32 %v1944_v13, %v852_v42  ;;  %900 = vadd.xlane.f32.xlu1 %v883_v44 }
 0x18c   : > { %v824_v1 = vpop.xlane.xlu1 %823 }
 0x18d   : > { %v853_v46 = vmul.f32 0.0078125, %v824_v1  ;;  %v884_v47 = vmul.f32 %v1997_v45, %v1997_v45 }
 0x18f   : > { %v2002_v48 = vsub.f32 %v1947_v19, %v853_v46  ;;  %902 = vadd.xlane.f32.xlu0 %v884_v47  ;;  %v1720_v19 = vld [vmem:[%s2175_s3 + $0x38] sm:$0xff]  }
 0x190   : > { %v826_v7 = vpop.xlane.xlu0 %825  ;;  %1589 = vmatprep.subr.bf16.mxu0 %v1720_v19  ;;  %1621 = vmatprep.subr.bf16.mxu1 %v1720_v19 }
 0x191   : > { %v854_v50 = vmul.f32 0.0078125, %v826_v7  ;;  %v885_v51 = vmul.f32 %v2002_v48, %v2002_v48  ;;  %1590 = vmatpush3.bf16.msra.mxu0 %v1720_v19  ;;  %1629 = vmatpush3.bf16.msra.mxu1 %v1720_v19 }
 0x192   : > { %1591 = vmatprep.subr.bf16.mxu0 %v1721_v59  ;;  %1622 = vmatprep.subr.bf16.mxu1 %v1721_v59 }
 0x193   : > { %v2007_v52 = vsub.f32 %v1950_v25, %v854_v50  ;;  %904 = vadd.xlane.f32.xlu1 %v885_v51 }
 0x194   : > { %v828_v13 = vpop.xlane.xlu1 %827 }
 0x195   : > { %v855_v53 = vmul.f32 0.0078125, %v828_v13  ;;  %v886_v54 = vmul.f32 %v2007_v52, %v2007_v52  ;;  %1592 = vmatpush3.bf16.msra.mxu0 %v1721_v59  ;;  %1630 = vmatpush3.bf16.msra.mxu1 %v1721_v59 }
 0x196   : > { %1593 = vmatprep.subr.bf16.mxu0 %v1722_v0  ;;  %1623 = vmatprep.subr.bf16.mxu1 %v1722_v0 }
 0x197   : > { %v2015_v56 = vsub.f32 %v1953_v31, %v855_v53  ;;  %906 = vadd.xlane.f32.xlu0 %v886_v54  ;;  %v994_v53 = vlaneseq }
 0x198   : > { %v830_v57 = vpop.xlane.xlu0 %829 }
 0x199   : > { %v856_v25 = vmul.f32 0.0078125, %v830_v57  ;;  %v887_v58 = vmul.f32 %v2015_v56, %v2015_v56  ;;  %1594 = vmatpush3.bf16.msra.mxu0 %v1722_v0  ;;  %1631 = vmatpush3.bf16.msra.mxu1 %v1722_v0 }
 0x19a   : > { %1595 = vmatprep.subr.bf16.mxu0 %v1723_v6  ;;  %1624 = vmatprep.subr.bf16.mxu1 %v1723_v6 }
 0x19b   : > { %v2023_v60 = vsub.f32 %v1956_v37, %v856_v25  ;;  %908 = vadd.xlane.f32.xlu1 %v887_v58  ;;  %v2090_v25 = vshrl.u32 %v994_v53, 7 }
 0x19c   : > { %v832_v31 = vpop.xlane.xlu1 %831 }
 0x19d   : > { %v857_v62 = vmul.f32 0.0078125, %v832_v31  ;;  %v888_v63 = vmul.f32 %v2023_v60, %v2023_v60  ;;  %1596 = vmatpush3.bf16.msra.mxu0 %v1723_v6  ;;  %1632 = vmatpush3.bf16.msra.mxu1 %v1723_v6  ;;  %v996_v31 = vsub.s32 0, %v2090_v25 }
 0x19e   : > { %1597 = vmatprep.subr.bf16.mxu0 %v1724_v12  ;;  %1625 = vmatprep.subr.bf16.mxu1 %v1724_v12 }
 0x19f   : > { %v2031_v2 = vsub.f32 %v1959_v43, %v857_v62  ;;  %910 = vadd.xlane.f32.xlu0 %v888_v63  ;;  %v2096_v63 = vld [vmem:[%s2174_s2] sm:$0x7] }
 0x1a0   : > { %v834_v37 = vpop.xlane.xlu0 %833  ;;  %v2100_v6 = vrot.slane %v2096_v63, %v996_v31 }
 0x1a1   : > { %v858_v3 = vmul.f32 0.0078125, %v834_v37  ;;  %v889_v5 = vmul.f32 %v2031_v2, %v2031_v2  ;;  %1598 = vmatpush3.bf16.msra.mxu0 %v1724_v12  ;;  %1633 = vmatpush3.bf16.msra.mxu1 %v1724_v12 }
 0x1a2   : > { %1599 = vmatprep.subr.bf16.mxu0 %v1725_v17  ;;  %1626 = vmatprep.subr.bf16.mxu1 %v1725_v17 }
 0x1a3   : > { %v2039_v8 = vsub.f32 %v1962_v49, %v858_v3  ;;  %912 = vadd.xlane.f32.xlu1 %v889_v5 }
 0x1a4   : > { %v836_v43 = vpop.xlane.xlu1 %835 }
 0x1a5   : > { %v859_v9 = vmul.f32 0.0078125, %v836_v43  ;;  %v890_v10 = vmul.f32 %v2039_v8, %v2039_v8  ;;  %1600 = vmatpush3.bf16.msra.mxu0 %v1725_v17  ;;  %1634 = vmatpush3.bf16.msra.mxu1 %v1725_v17  ;;  %v1016_v43 = vsub.s32 1, %v2090_v25 }
 0x1a6   : > { %1601 = vmatprep.subr.bf16.mxu0 %v1726_v23  ;;  %1627 = vmatprep.subr.bf16.mxu1 %v1726_v23 }
 0x1a7   : > { %v2047_v14 = vsub.f32 %v1965_v55, %v859_v9  ;;  %914 = vadd.xlane.f32.xlu0 %v890_v10  ;;  %v2106_v17 = vrot.slane %v2096_v63, %v1016_v43 }
 0x1a8   : > { %v838_v49 = vpop.xlane.xlu0 %837 }
 0x1a9   : > { %v860_v15 = vmul.f32 0.0078125, %v838_v49  ;;  %v891_v16 = vmul.f32 %v2047_v14, %v2047_v14  ;;  %1602 = vmatpush3.bf16.msra.mxu0 %v1726_v23  ;;  %1635 = vmatpush3.bf16.msra.mxu1 %v1726_v23 }
 0x1aa   : > { %1603 = vmatprep.subr.bf16.mxu0 %v1727_v29  ;;  %1628 = vmatprep.subr.bf16.mxu1 %v1727_v29 }
 0x1ab   : > { %v2055_v20 = vsub.f32 %v1968_v61, %v860_v15  ;;  %916 = vadd.xlane.f32.xlu1 %v891_v16 }
 0x1ac   : > { %v840_v55 = vpop.xlane.xlu1 %839 }
 0x1ad   : > { %v861_v21 = vmul.f32 0.0078125, %v840_v55  ;;  %v892_v22 = vmul.f32 %v2055_v20, %v2055_v20  ;;  %1604 = vmatpush3.bf16.msra.mxu0 %v1727_v29  ;;  %1636 = vmatpush3.bf16.msra.mxu1 %v1727_v29 }
 0x1af   : > { %v2063_v24 = vsub.f32 %v1971_v4, %v861_v21  ;;  %918 = vadd.xlane.f32.xlu0 %v892_v22 }
 0x1b0   : > { %v842_v61 = vpop.xlane.xlu0 %841 }
 0x1b1   : > { %v862_v27 = vmul.f32 0.0078125, %v842_v61  ;;  %v893_v28 = vmul.f32 %v2063_v24, %v2063_v24 }
 0x1b3   : > { %v2071_v32 = vsub.f32 %v1974_v11, %v862_v27  ;;  %920 = vadd.xlane.f32.xlu1 %v893_v28 }
 0x1b4   : > { %v844_v4 = vpop.xlane.xlu1 %843 }
 0x1b5   : > { %v863_v33 = vmul.f32 0.0078125, %v844_v4  ;;  %v894_v34 = vmul.f32 %v2071_v32, %v2071_v32 }
 0x1b7   : > { %v2076_v36 = vsub.f32 %v1977_v18, %v863_v33  ;;  %922 = vadd.xlane.f32.xlu0 %v894_v34 }
 0x1b8   : > { %v846_v38 = vpop.xlane.xlu0 %845 }
 0x1b9   : > { %v864_v39 = vmul.f32 0.0078125, %v846_v38  ;;  %v895_v11 = vmul.f32 %v2076_v36, %v2076_v36 }
 0x1bb   : > { %v2081_v41 = vsub.f32 %v1980_v26, %v864_v39  ;;  %924 = vadd.xlane.f32.xlu1 %v895_v11 }
 0x1bc   : > { %v848_v42 = vpop.xlane.xlu1 %847 }
 0x1bd   : > { %v865_v44 = vmul.f32 0.0078125, %v848_v42  ;;  %v896_v1 = vmul.f32 %v2081_v41, %v2081_v41 }
 0x1bf   : > { %v2086_v46 = vsub.f32 %v1983_v30, %v865_v44  ;;  %926 = vadd.xlane.f32.xlu0 %v896_v1 }
 0x1c1   : > { %v897_v18 = vmul.f32 %v2086_v46, %v2086_v46 }
 0x1c3   : > { %928 = vadd.xlane.f32.xlu1 %v897_v18 }
 0x210   : > { %v899_v47 = vpop.xlane.xlu0 %898 }
 0x211   : > { %v930_v7 = vmul.f32 0.0078125, %v899_v47 }
 0x213   : > { %v946_v50 = vadd.f32 1e-05, %v930_v7 }
 0x214   : > { %v901_v51 = vpop.xlane.xlu1 %900 }
 0x215   : > { %1728 = vrsqrt.f32 %v946_v50  ;;  %v931_v26 = vmul.f32 0.0078125, %v901_v51 }
 0x217   : > { %v947_v13 = vadd.f32 1e-05, %v931_v26 }
 0x218   : > { %v903_v54 = vpop.xlane.xlu0 %902 }
 0x219   : > { %1730 = vrsqrt.f32 %v947_v13  ;;  %v932_v19 = vmul.f32 0.0078125, %v903_v54 }
 0x21b   : > { %v948_v57 = vadd.f32 1e-05, %v932_v19 }
 0x21c   : > { %v905_v30 = vpop.xlane.xlu1 %904 }
 0x21d   : > { %1732 = vrsqrt.f32 %v948_v57  ;;  %v933_v58 = vmul.f32 0.0078125, %v905_v30 }
 0x21f   : > { %v949_v59 = vadd.f32 1e-05, %v933_v58 }
 0x220   : > { %v907_v62 = vpop.xlane.xlu0 %906 }
 0x221   : > { %1734 = vrsqrt.f32 %v949_v59  ;;  %v934_v0 = vmul.f32 0.0078125, %v907_v62 }
 0x222   : > { %v1729_v37 = vpop.eup %1728 }
 0x223   : > { %v950_v3 = vadd.f32 1e-05, %v934_v0  ;;  %v978_v5 = vmul.f32 %v1729_v37, %v1987_v35 }
 0x224   : > { %v909_v9 = vpop.xlane.xlu1 %908 }
 0x225   : > { %1736 = vrsqrt.f32 %v950_v3  ;;  %v935_v10 = vmul.f32 0.0078125, %v909_v9  ;;  %v998_v16 = vmul.f32 %v2100_v6, %v978_v5 }
 0x226   : > { %v1731_v12 = vpop.eup %1730 }
 0x227   : > { %v951_v49 = vadd.f32 1e-05, %v935_v10  ;;  %v979_v15 = vmul.f32 %v1731_v12, %v1992_v40  ;;  %v1018_v27 = vadd.f32 %v2106_v17, %v998_v16 }
 0x228   : > { %v911_v55 = vpop.xlane.xlu0 %910 }
 0x229   : > { %1738 = vrsqrt.f32 %v951_v49  ;;  %v936_v35 = vmul.f32 0.0078125, %v911_v55  ;;  %v999_v21 = vmul.f32 %v2100_v6, %v979_v15 }
 0x22a   : > { %v1733_v22 = vpop.eup %1732 }
 0x22b   : > { %v980_v23 = vmul.f32 %v1733_v22, %v1997_v45  ;;  %v952_v61 = vadd.f32 1e-05, %v936_v35  ;;  %v1019_v28 = vadd.f32 %v2106_v17, %v999_v21 }
 0x22c   : > { %v913_v29 = vpop.xlane.xlu1 %912 }
 0x22d   : > { %1740 = vrsqrt.f32 %v952_v61  ;;  %v937_v40 = vmul.f32 0.0078125, %v913_v29  ;;  %v1034_v4 = vpack.c.bf16 %v1019_v28, %v1018_v27  ;;  %v1000_v39 = vmul.f32 %v2100_v6, %v980_v23 }
 0x22e   : > { %v1735_v33 = vpop.eup %1734 }
 0x22f   : > { %v981_v34 = vmul.f32 %v1735_v33, %v2002_v48  ;;  %v953_v38 = vadd.f32 1e-05, %v937_v40  ;;  %1605 = vmatprep.mubr.bf16.mxu0 %v1034_v4  ;;  %v1020_v18 = vadd.f32 %v2106_v17, %v1000_v39 }
 0x230   : > { %v915_v11 = vpop.xlane.xlu0 %914 }
 0x231   : > { %1742 = vrsqrt.f32 %v953_v38  ;;  %v938_v42 = vmul.f32 0.0078125, %v915_v11  ;;  %v1001_v45 = vmul.f32 %v2100_v6, %v981_v34 }
 0x232   : > { %v1737_v44 = vpop.eup %1736 }
 0x233   : > { %v954_v1 = vadd.f32 1e-05, %v938_v42  ;;  %v1021_v47 = vadd.f32 %v2106_v17, %v1001_v45  ;;  %v982_v7 = vmul.f32 %v1737_v44, %v2007_v52 }
 0x234   : > { %v917_v50 = vpop.xlane.xlu1 %916 }
 0x235   : > { %1744 = vrsqrt.f32 %v954_v1  ;;  %v939_v48 = vmul.f32 0.0078125, %v917_v50  ;;  %v1035_v51 = vpack.c.bf16 %v1021_v47, %v1020_v18  ;;  %v1002_v54 = vmul.f32 %v2100_v6, %v982_v7 }
 0x236   : > { %v1739_v26 = vpop.eup %1738 }
 0x237   : > { %v955_v13 = vadd.f32 1e-05, %v939_v48  ;;  %1606 = vmatmul.mubr.bf16.vlgmr.msra.gmra.mxu0 %v1035_v51  ;;  %v983_v53 = vmul.f32 %v1739_v26, %v2015_v56  ;;  %v1022_v52 = vadd.f32 %v2106_v17, %v1002_v54 }
 0x238   : > { %v919_v19 = vpop.xlane.xlu0 %918 }
 0x239   : > { %1746 = vrsqrt.f32 %v955_v13  ;;  %v940_v57 = vmul.f32 0.0078125, %v919_v19  ;;  %v1003_v30 = vmul.f32 %v2100_v6, %v983_v53 }
 0x23a   : > { %v1741_v58 = vpop.eup %1740 }
 0x23b   : > { %v956_v59 = vadd.f32 1e-05, %v940_v57  ;;  %v1023_v31 = vadd.f32 %v2106_v17, %v1003_v30  ;;  %v984_v62 = vmul.f32 %v1741_v58, %v2023_v60 }
 0x23c   : > { %v921_v0 = vpop.xlane.xlu1 %920 }
 0x23d   : > { %1748 = vrsqrt.f32 %v956_v59  ;;  %v941_v37 = vmul.f32 0.0078125, %v921_v0  ;;  %v1036_v3 = vpack.c.bf16 %v1023_v31, %v1022_v52  ;;  %v1004_v9 = vmul.f32 %v2100_v6, %v984_v62 }
 0x23e   : > { %v1743_v56 = vpop.eup %1742 }
 0x23f   : > { %v957_v5 = vadd.f32 1e-05, %v941_v37  ;;  %1609 = vmatprep.mubr.bf16.mxu0 %v1036_v3  ;;  %v985_v43 = vmul.f32 %v1743_v56, %v2031_v2  ;;  %v1024_v60 = vadd.f32 %v2106_v17, %v1004_v9 }
 0x240   : > { %v923_v10 = vpop.xlane.xlu0 %922 }
 0x241   : > { %1750 = vrsqrt.f32 %v957_v5  ;;  %v942_v12 = vmul.f32 0.0078125, %v923_v10  ;;  %v1005_v49 = vmul.f32 %v2100_v6, %v985_v43 }
 0x242   : > { %v1745_v15 = vpop.eup %1744 }
 0x243   : > { %v958_v16 = vadd.f32 1e-05, %v942_v12  ;;  %v1025_v55 = vadd.f32 %v2106_v17, %v1005_v49  ;;  %v986_v35 = vmul.f32 %v1745_v15, %v2039_v8 }
 0x244   : > { %v925_v21 = vpop.xlane.xlu1 %924 }
 0x245   : > { %1752 = vrsqrt.f32 %v958_v16  ;;  %v943_v22 = vmul.f32 0.0078125, %v925_v21  ;;  %v1037_v23 = vpack.c.bf16 %v1025_v55, %v1024_v60  ;;  %v1006_v28 = vmul.f32 %v2100_v6, %v986_v35 }
 0x246   : > { %v1747_v2 = vpop.eup %1746 }
 0x247   : > { %v959_v61 = vadd.f32 1e-05, %v943_v22  ;;  %1610 = vmatmul.mubr.bf16.gmra.mxu0 %v1037_v23  ;;  %v987_v27 = vmul.f32 %v1747_v2, %v2047_v14  ;;  %v1026_v8 = vadd.f32 %v2106_v17, %v1006_v28 }
 0x248   : > { %v927_v29 = vpop.xlane.xlu0 %926 }
 0x249   : > { %1754 = vrsqrt.f32 %v959_v61  ;;  %v944_v40 = vmul.f32 0.0078125, %v927_v29  ;;  %v1007_v4 = vmul.f32 %v2100_v6, %v987_v27 }
 0x24a   : > { %v1749_v33 = vpop.eup %1748 }
 0x24b   : > { %v960_v34 = vadd.f32 1e-05, %v944_v40  ;;  %v1027_v38 = vadd.f32 %v2106_v17, %v1007_v4  ;;  %v988_v39 = vmul.f32 %v1749_v33, %v2055_v20 }
 0x24c   : > { %v929_v11 = vpop.xlane.xlu1 %928 }
 0x24d   : > { %1756 = vrsqrt.f32 %v960_v34  ;;  %v945_v42 = vmul.f32 0.0078125, %v929_v11  ;;  %v1038_v45 = vpack.c.bf16 %v1027_v38, %v1026_v8  ;;  %v1008_v18 = vmul.f32 %v2100_v6, %v988_v39 }
 0x24e   : > { %v1751_v14 = vpop.eup %1750 }
 0x24f   : > { %v961_v44 = vadd.f32 1e-05, %v945_v42  ;;  %1613 = vmatprep.mubr.bf16.mxu0 %v1038_v45  ;;  %v989_v1 = vmul.f32 %v1751_v14, %v2063_v24  ;;  %v1028_v50 = vadd.f32 %v2106_v17, %v1008_v18 }
 0x251   : > { %1758 = vrsqrt.f32 %v961_v44  ;;  %v1009_v47 = vmul.f32 %v2100_v6, %v989_v1 }
 0x252   : > { %v1753_v7 = vpop.eup %1752 }
 0x253   : > { %v1029_v48 = vadd.f32 %v2106_v17, %v1009_v47  ;;  %v990_v20 = vmul.f32 %v1753_v7, %v2071_v32 }
 0x255   : > { %v1039_v51 = vpack.c.bf16 %v1029_v48, %v1028_v50  ;;  %v1010_v53 = vmul.f32 %v2100_v6, %v990_v20 }
 0x256   : > { %v1755_v26 = vpop.eup %1754 }
 0x257   : > { %1614 = vmatmul.mubr.bf16.gmra.mxu0 %v1039_v51  ;;  %v991_v13 = vmul.f32 %v1755_v26, %v2076_v36  ;;  %v1030_v57 = vadd.f32 %v2106_v17, %v1010_v53 }
 0x259   : > { %v1011_v24 = vmul.f32 %v2100_v6, %v991_v13 }
 0x25a   : > { %v1757_v54 = vpop.eup %1756 }
 0x25b   : > { %v992_v19 = vmul.f32 %v1757_v54, %v2081_v41  ;;  %v1031_v30 = vadd.f32 %v2106_v17, %v1011_v24  ;;  %v1060_v41 = vsub.s32 2, %v2090_v25 }
 0x25d   : > { %v1040_v58 = vpack.c.bf16 %v1031_v30, %v1030_v57  ;;  %v1012_v52 = vmul.f32 %v2100_v6, %v992_v19  ;;  %v1061_v3 = vrot.slane %v2096_v63, %v1060_v41 }
 0x25e   : > { %v1759_v59 = vpop.eup %1758 }
 0x25f   : > { %v993_v32 = vmul.f32 %v1759_v59, %v2086_v46  ;;  %1617 = vmatprep.mubr.bf16.mxu1 %v1040_v58  ;;  %v1032_v31 = vadd.f32 %v2106_v17, %v1012_v52 }
 0x261   : > { %v1013_v36 = vmul.f32 %v2100_v6, %v993_v32 }
 0x263   : > { %v1033_v62 = vadd.f32 %v2106_v17, %v1013_v36 }
 0x265   : > { %v1041_v0 = vpack.c.bf16 %v1033_v62, %v1032_v31 }
 0x267   : > { %1618 = vmatmul.mubr.bf16.vlgmr.msra.gmra.mxu1 %v1041_v0 }
 0x2f7   : > { %v1607_v37 = vpop.f32.mrf.mxu0 }
 0x2f8   : > { %v1153_v46 = vadd.f32 %v1607_v37, %v1061_v3 }
 0x2f9   : > { %v1144_v56 = vpop.f32.mrf.mxu0 }
 0x2fa   : > { %v1145_v17 = vadd.f32 %v1144_v56, %v1061_v3 }
 0x2fb   : > { %v1608_v5 = vpop.f32.mrf.mxu0 }
 0x2fc   : > { %v1156_v43 = vadd.f32 %v1608_v5, %v1061_v3 }
 0x2fd   : > { %v1147_v6 = vpop.f32.mrf.mxu0 }
 0x2fe   : > { %v1470_v9 = vpack.c.bf16 %v1156_v43, %v1153_v46  ;;  %v1148_v25 = vadd.f32 %v1147_v6, %v1061_v3 }
 0x300   : > { %1502 = vst [vmem:[%s2159_s22 + $0x8] sm:$0xff] %v1470_v9   ;;  %v1465_v63 = vpack.c.bf16 %v1148_v25, %v1145_v17 }
 0x302   : > { %1466 = vst [vmem:[%s2159_s22] sm:$0xff] %v1465_v63  }
 0x307   : > { %v1611_v10 = vpop.f32.mrf.mxu0 }
 0x308   : > { %v1169_v15 = vadd.f32 %v1611_v10, %v1061_v3 }
 0x309   : > { %v1160_v12 = vpop.f32.mrf.mxu0 }
 0x30a   : > { %v1161_v55 = vadd.f32 %v1160_v12, %v1061_v3 }
 0x30b   : > { %v1612_v49 = vpop.f32.mrf.mxu0 }
 0x30c   : > { %v1172_v16 = vadd.f32 %v1612_v49, %v1061_v3 }
 0x30d   : > { %v1163_v60 = vpop.f32.mrf.mxu0 }
 0x30e   : > { %v1480_v35 = vpack.c.bf16 %v1172_v16, %v1169_v15  ;;  %v1164_v21 = vadd.f32 %v1163_v60, %v1061_v3 }
 0x310   : > { %1504 = vst [vmem:[%s2159_s22 + $0x18] sm:$0xff] %v1480_v35   ;;  %v1475_v22 = vpack.c.bf16 %v1164_v21, %v1161_v55 }
 0x312   : > { %1503 = vst [vmem:[%s2159_s22 + $0x10] sm:$0xff] %v1475_v22  }
 0x317   : > { %v1615_v23 = vpop.f32.mrf.mxu0 }
 0x318   : > { %v1185_v27 = vadd.f32 %v1615_v23, %v1061_v3 }
 0x319   : > { %v1176_v2 = vpop.f32.mrf.mxu0 }
 0x31a   : > { %v1177_v40 = vadd.f32 %v1176_v2, %v1061_v3 }
 0x31b   : > { %v1616_v61 = vpop.f32.mrf.mxu0 }
 0x31c   : > { %v1188_v28 = vadd.f32 %v1616_v61, %v1061_v3 }
 0x31d   : > { %v1179_v29 = vpop.f32.mrf.mxu0 }
 0x31e   : > { %v1490_v4 = vpack.c.bf16 %v1188_v28, %v1185_v27  ;;  %v1180_v33 = vadd.f32 %v1179_v29, %v1061_v3 }
 0x320   : > { %1506 = vst [vmem:[%s2159_s22 + $0x28] sm:$0xff] %v1490_v4   ;;  %v1485_v34 = vpack.c.bf16 %v1180_v33, %v1177_v40 }
 0x322   : > { %1505 = vst [vmem:[%s2159_s22 + $0x20] sm:$0xff] %v1485_v34  }
 0x327   : > { %v1619_v8 = vpop.f32.mrf.mxu1 }
 0x328   : > { %v1201_v11 = vadd.f32 %v1619_v8, %v1061_v3 }
 0x329   : > { %v1192_v38 = vpop.f32.mrf.mxu1 }
 0x32a   : > { %v1193_v14 = vadd.f32 %v1192_v38, %v1061_v3 }
 0x32b   : > { %v1620_v39 = vpop.f32.mrf.mxu1 }
 0x32c   : > { %v1204_v42 = vadd.f32 %v1620_v39, %v1061_v3 }
 0x32d   : > { %v1195_v45 = vpop.f32.mrf.mxu1 }
 0x32e   : > { %v1500_v44 = vpack.c.bf16 %v1204_v42, %v1201_v11  ;;  %v1196_v1 = vadd.f32 %v1195_v45, %v1061_v3 }
 0x330   : > { %1508 = vst [vmem:[%s2159_s22 + $0x38] sm:$0xff] %v1500_v44   ;;  %v1495_v18 = vpack.c.bf16 %v1196_v1, %v1193_v14 }
 0x332   : > { %1507 = vst [vmem:[%s2159_s22 + $0x30] sm:$0xff] %v1495_v18  }
 0x333 PF: > { %s14_s15 = sadd.s32 1, %s1766_s15  }
 0x334   : > { %p11_p4 = scmp.ge.s32.totalorder %s14_s15, 4  }
 0x336   :  { %13 = sbr.rel (!%p11_p4) target bundleno = 1 (0x1), region = 66 }

// kernel: protein_mpnn_forward.12
= control target key start
LH: loop header
LB: loop body
LE: loop exit
PB: predicated region body
PF: predicated region fallthrough
CT: control target
= control target key end

     0   :  { %s3921_s29 = smov 0   ;;  %s4835_s0 = inlined_call_operand.vmem [shape: bf16[32,128], index: 0, kind: input, shape index: {}]   ;;  %s4836_s1 = inlined_call_operand.vmem [shape: bf16[256,128], index: 1, kind: input, shape index: {}]   ;;  %s4837_s2 = inlined_call_operand.vmem [shape: bf16[256,128], index: 2, kind: input, shape index: {}]   ;;  %s4838_s3 = inlined_call_operand.vmem [shape: f32[32,8], index: 3, kind: input, shape index: {}]   ;;  %s4839_s4 = inlined_call_operand.vmem [shape: f32[32,1], index: 4, kind: input, shape index: {}]   ;;  %s4840_s5 = inlined_call_operand.vmem [shape: bf16[128,128], index: 5, kind: input, shape index: {}]   ;;  %s4841_s6 = inlined_call_operand.vmem [shape: bf16[128,128], index: 6, kind: input, shape index: {}]   ;;  %s4842_s7 = inlined_call_operand.vmem [shape: bf16[128,128], index: 7, kind: input, shape index: {}]   ;;  %s4843_s8 = inlined_call_operand.vmem [shape: bf16[128,128], index: 8, kind: input, shape index: {}]   ;;  %s4844_s9 = inlined_call_operand.vmem [shape: bf16[128,128], index: 9, kind: input, shape index: {}]   ;;  %s4845_s10 = inlined_call_operand.vmem [shape: f32[8,128], index: 10, kind: input, shape index: {}]   ;;  %s4846_s11 = inlined_call_operand.vmem [shape: bf16[128,512], index: 11, kind: input, shape index: {}]   ;;  %s4847_s12 = inlined_call_operand.vmem [shape: f32[1,512], index: 12, kind: input, shape index: {}]   ;;  %s4848_s13 = inlined_call_operand.vmem [shape: bf16[512,128], index: 13, kind: input, shape index: {}]   ;;  %s4849_s14 = inlined_call_operand.vmem [shape: bf16[32,128], index: 14, kind: output, shape index: {}]  }
   0x1 LB: > { %s3177_s30 = sadd.s32 4294967295, %s3840_s29   ;;  %p3181_p0 = scmp.ge.s32.totalorder %s3840_s29, 1  ;;  %s3840_s29 = sphi %s3921_s29, %s24_s29  }
   0x2   : > { %p457_p1 = scmp.lt.s32.totalorder %s3840_s29, 3 }
   0x4   : > { %p458_p2 = pnand %p3181_p0, %p457_p1 }
   0x5   : > { %s3184_s23 = sshll.u32 (!%p458_p2), %s3177_s30, 4  ;;  %s3182_s24 = sshll.u32 (!%p458_p2), %s3177_s30, 1 }
   0x6   : > { %461 = sbr.rel (%p458_p2) target bundleno = 1866 (0x74a), region = 76  ;;  %p530_p3 = scmp.lt.s32.totalorder (!%p458_p2), %s3184_s23, 31 }
   0x7   : > { %p524_p4 = scmp.lt.s32.totalorder (!%p458_p2), %s3182_s24, 3 }
   0xb   : > { %v3605_v0 = vld [vmem:[%s4840_s5 + $0x38] sm:$0xff]   ;;  %v3842_v1 = vmov 0.0   ;;  %v3606_v2 = vld [vmem:[%s4840_s5 + $0x30] sm:$0xff]   ;;  %vm3843_vm0 = vmmov 0   ;;  %v3607_v3 = vld [vmem:[%s4840_s5 + $0x28] sm:$0xff]   ;;  %s4851_s23 = smov (!%p530_p3, %s3184_s23), 31  ;;  %v1132_v56 = vlaneseq }
   0xc   : > { %3443 = vmatprep.subr.bf16.mxu0 %v3842_v1  ;;  %3459 = vmatprep.mubr.msk.bf16.mxu0 %vm3843_vm0, %v3842_v1  ;;  %v3612_v4 = vld [vmem:[%s4842_s7 + $0x38] sm:$0xff]   ;;  %v3614_v5 = vld [vmem:[%s4842_s7 + $0x30] sm:$0xff]   ;;  %v3608_v6 = vld [vmem:[%s4840_s5 + $0x20] sm:$0xff]   ;;  %s4853_s24 = smov (!%p524_p4, %s3182_s24), 3  ;;  %s3185_s22 = sshll.u32 %s4851_s23, 2  ;;  %vm2234_vm1 = vcmask 1041409  }
   0xd   : > { %3444 = vmatpush3.bf16.msra.mxu0 %v3605_v0  ;;  %3463 = vmatprep.subr.bf16.mxu1 %v3612_v4  ;;  %v3617_v7 = vld [vmem:[%s4842_s7 + $0x28] sm:$0xff]   ;;  %v3609_v8 = vld [vmem:[%s4840_s5 + $0x18] sm:$0xff]   ;;  %v3619_v9 = vld [vmem:[%s4842_s7 + $0x20] sm:$0xff]   ;;  %s3183_s25 = sshll.u32 %s4853_s24, 2  ;;  %s3968_s16 = scalar_lea.vmem %s4837_s2, %s3185_s22  ;;  %v3844_v54 = vmov 1966171168  }
   0xe   : > { %3445 = vmatprep.subr.bf16.mxu0 %v3842_v1  ;;  %3464 = vmatpush3.bf16.msra.mxu1 %v3612_v4  ;;  %v3610_v10 = vld [vmem:[%s4840_s5 + $0x10] sm:$0xff]   ;;  %v3621_v11 = vld [vmem:[%s4842_s7 + $0x18] sm:$0xff]   ;;  %v3611_v12 = vld [vmem:[%s4840_s5 + $0x8] sm:$0xff]   ;;  %s3978_s19 = scalar_lea.vmem %s4835_s0, %s3183_s25  ;;  %s3994_s23 = scalar_lea.vmem %s4836_s1, %s3185_s22  ;;  %v1130_v55 = vunpack.c.l.s4 %v3844_v54  ;;  %v4062_v60 = vshrl.u32 %v1132_v56, 7  ;;  %vm2236_vm2 = vcmask 1042434   ;;  %vm2238_vm3 = vcmask 1043459  }
   0xf   : > { %3465 = vmatprep.subr.bf16.mxu1 %v3614_v5  ;;  %v3623_v13 = vld [vmem:[%s4842_s7 + $0x10] sm:$0xff]   ;;  %v3613_v14 = vld [vmem:[%s4840_s5] sm:$0xff]   ;;  %v3616_v17 = vld [vmem:[%s4841_s6 + $0x38] sm:$0xff]   ;;  %s3189_s28 = sshll.u32 %s4853_s24, 3  ;;  %vm2240_vm4 = vcmask 1044484   ;;  %vm2242_vm5 = vcmask 1045509   ;;  %s557_s26 = scalar_lea.vmem %s4849_s14, %s3183_s25 }
  0x10   : > { %v3629_v15 = vld [vmem:[%s3968_s16] sm:$0xff]   ;;  %v3625_v18 = vld [vmem:[%s4842_s7 + $0x8] sm:$0xff]   ;;  %v3618_v19 = vld [vmem:[%s4841_s6 + $0x30] sm:$0xff]   ;;  %v1131_v59 = vunpack.c.0.s8 %v1130_v55  ;;  %s545_s17 = scalar_lea.vmem %s4838_s3, %s3189_s28  ;;  %vm2244_vm6 = vcmask 1046534   ;;  %vm2246_vm7 = vcmask 1047559  }
  0x11   : > { %3446 = vmatpush3.bf16.msra.mxu0 %v3606_v2  ;;  %v561_v16 = vld [vmem:[%s3978_s19] sm:$0xff]   ;;  %3479 = vmatprep.mubr.bf16.mxu1 %v3629_v15  ;;  %v3620_v22 = vld [vmem:[%s4841_s6 + $0x28] sm:$0xff]   ;;  %v3634_v24 = vld [vmem:[%s3968_s16 + $0x10] sm:$0xff]  }
  0x12   : > { %3447 = vmatprep.subr.bf16.mxu0 %v3842_v1  ;;  %3466 = vmatpush3.bf16.msra.mxu1 %v3614_v5  ;;  %v3627_v20 = vld [vmem:[%s4842_s7] sm:$0xff]   ;;  %v3630_v23 = vld [vmem:[%s3968_s16 + $0x8] sm:$0xff]   ;;  %v3624_v26 = vld [vmem:[%s4841_s6 + $0x18] sm:$0xff]   ;;  %v1134_v63 = vsub.s32 %v1131_v59, %v4062_v60 }
  0x13   : > { %3467 = vmatprep.subr.bf16.mxu1 %v3617_v7  ;;  %v3632_v21 = vld [vmem:[%s3994_s23] sm:$0xff]   ;;  %v3635_v27 = vld [vmem:[%s3968_s16 + $0x18] sm:$0xff]   ;;  %v3626_v29 = vld [vmem:[%s4841_s6 + $0x10] sm:$0xff]  }
  0x14   : > { %v3622_v25 = vld [vmem:[%s4841_s6 + $0x20] sm:$0xff]   ;;  %v3628_v30 = vld [vmem:[%s4841_s6 + $0x8] sm:$0xff]   ;;  %v3642_v32 = vld [vmem:[%s3968_s16 + $0x30] sm:$0xff]  }
  0x15   : > { %3448 = vmatpush3.bf16.msra.mxu0 %v3607_v3  ;;  %v3638_v28 = vld [vmem:[%s3968_s16 + $0x20] sm:$0xff]   ;;  %v3639_v31 = vld [vmem:[%s3968_s16 + $0x28] sm:$0xff]   ;;  %v3643_v35 = vld [vmem:[%s3968_s16 + $0x38] sm:$0xff]  }
  0x16   : > { %3449 = vmatprep.subr.bf16.mxu0 %v3842_v1  ;;  %3468 = vmatpush3.bf16.msra.mxu1 %v3617_v7  ;;  %v3631_v33 = vld [vmem:[%s4841_s6] sm:$0xff]   ;;  %v3633_v34 = vld [vmem:[%s3994_s23 + $0x8] sm:$0xff]   ;;  %v3636_v36 = vld [vmem:[%s3994_s23 + $0x10] sm:$0xff]  }
  0x17   : > { %3469 = vmatprep.subr.bf16.mxu1 %v3619_v9  ;;  %v3637_v37 = vld [vmem:[%s3994_s23 + $0x18] sm:$0xff]   ;;  %v3640_v38 = vld [vmem:[%s3994_s23 + $0x20] sm:$0xff]   ;;  %v3641_v39 = vld [vmem:[%s3994_s23 + $0x28] sm:$0xff]  }
  0x18   : > { %v3644_v40 = vld [vmem:[%s3994_s23 + $0x30] sm:$0xff]   ;;  %v3645_v41 = vld [vmem:[%s3994_s23 + $0x38] sm:$0xff]   ;;  %v3648_v44 = vld [vmem:[%s4843_s8 + $0x28] sm:$0xff]  }
  0x19   : > { %3450 = vmatpush3.bf16.msra.mxu0 %v3608_v6  ;;  %v3646_v42 = vld [vmem:[%s4843_s8 + $0x38] sm:$0xff]   ;;  %v3647_v43 = vld [vmem:[%s4843_s8 + $0x30] sm:$0xff]   ;;  %v3649_v45 = vld [vmem:[%s4843_s8 + $0x20] sm:$0xff]  }
  0x1a   : > { %3451 = vmatprep.subr.bf16.mxu0 %v3842_v1  ;;  %3470 = vmatpush3.bf16.msra.mxu1 %v3619_v9  ;;  %v3650_v46 = vld [vmem:[%s4843_s8 + $0x18] sm:$0xff]   ;;  %v3651_v47 = vld [vmem:[%s4843_s8 + $0x10] sm:$0xff]   ;;  %v3652_v48 = vld [vmem:[%s4843_s8 + $0x8] sm:$0xff]  }
  0x1b   : > { %3471 = vmatprep.subr.bf16.mxu1 %v3621_v11  ;;  %v3653_v49 = vld [vmem:[%s4843_s8] sm:$0xff]  }
  0x1d   : > { %3452 = vmatpush3.bf16.msra.mxu0 %v3609_v8 }
  0x1e   : > { %3453 = vmatprep.subr.bf16.mxu0 %v3842_v1  ;;  %3472 = vmatpush3.bf16.msra.mxu1 %v3621_v11 }
  0x1f   : > { %3473 = vmatprep.subr.bf16.mxu1 %v3623_v13 }
  0x21   : > { %3454 = vmatpush3.bf16.msra.mxu0 %v3610_v10 }
  0x22   : > { %3455 = vmatprep.subr.bf16.mxu0 %v3842_v1  ;;  %3474 = vmatpush3.bf16.msra.mxu1 %v3623_v13  ;;  %v4072_v13 = vld [vmem:[%s4845_s10] sm:$0xff] }
  0x23   : > { %3475 = vmatprep.subr.bf16.mxu1 %v3625_v18 }
  0x25   : > { %3456 = vmatpush3.bf16.msra.mxu0 %v3611_v12 }
  0x26   : > { %3457 = vmatprep.subr.bf16.mxu0 %v3842_v1  ;;  %3476 = vmatpush3.bf16.msra.mxu1 %v3625_v18 }
  0x27   : > { %3477 = vmatprep.subr.bf16.mxu1 %v3627_v20 }
  0x29   : > { %3458 = vmatpush3.bf16.msra.mxu0 %v3613_v14  ;;  %v4075_v14 = vsub.s32 0, %v4062_v60 }
  0x2a   : > { %3495 = vmatprep.subr.bf16.mxu0 %v3616_v17  ;;  %3478 = vmatpush3.bf16.msra.mxu1 %v3627_v20 }
  0x2b   : > { %3527 = vmatprep.subr.bf16.mxu1 %v3646_v42 }
  0x2c   : > { %3460 = vmatmul.mubr.bf16.vlgmr.msra.gmra.mxu0 %v561_v16 }
  0x2d   : > { %3496 = vmatpush3.bf16.msra.mxu0 %v3616_v17  ;;  %3511 = vmatprep.mubr.bf16.mxu0 %v3632_v21 }
  0x2e   : > { %3497 = vmatprep.subr.bf16.mxu0 %v3618_v19  ;;  %3480 = vmatmul.mubr.bf16.vlgmr.msra.gmra.mxu1 %v3630_v23 }
  0x2f   : > { %3483 = vmatprep.mubr.bf16.mxu1 %v3634_v24  ;;  %3528 = vmatpush3.bf16.msra.mxu1 %v3646_v42 }
  0x30   : > { %3529 = vmatprep.subr.bf16.mxu1 %v3647_v43 }
  0x31   : > { %3498 = vmatpush3.bf16.msra.mxu0 %v3618_v19 }
  0x32   : > { %3499 = vmatprep.subr.bf16.mxu0 %v3620_v22 }
  0x33   : > { %3530 = vmatpush3.bf16.msra.mxu1 %v3647_v43 }
  0x34   : > { %3531 = vmatprep.subr.bf16.mxu1 %v3648_v44 }
  0x35   : > { %3500 = vmatpush3.bf16.msra.mxu0 %v3620_v22  ;;  %v4086_v22 = vrot.slane %v4072_v13, %v4075_v14 }
  0x36   : > { %3501 = vmatprep.subr.bf16.mxu0 %v3622_v25  ;;  %3484 = vmatmul.mubr.bf16.gmra.mxu1 %v3635_v27 }
  0x37   : > { %3487 = vmatprep.mubr.bf16.mxu1 %v3638_v28  ;;  %3532 = vmatpush3.bf16.msra.mxu1 %v3648_v44 }
  0x38   : > { %3533 = vmatprep.subr.bf16.mxu1 %v3649_v45 }
  0x39   : > { %3502 = vmatpush3.bf16.msra.mxu0 %v3622_v25 }
  0x3a   : > { %3503 = vmatprep.subr.bf16.mxu0 %v3624_v26 }
  0x3b   : > { %3534 = vmatpush3.bf16.msra.mxu1 %v3649_v45 }
  0x3c   : > { %3535 = vmatprep.subr.bf16.mxu1 %v3650_v46 }
  0x3d   : > { %3504 = vmatpush3.bf16.msra.mxu0 %v3624_v26 }
  0x3e   : > { %3505 = vmatprep.subr.bf16.mxu0 %v3626_v29  ;;  %3488 = vmatmul.mubr.bf16.gmra.mxu1 %v3639_v31 }
  0x3f   : > { %3491 = vmatprep.mubr.bf16.mxu1 %v3642_v32  ;;  %3536 = vmatpush3.bf16.msra.mxu1 %v3650_v46 }
  0x40   : > { %3537 = vmatprep.subr.bf16.mxu1 %v3651_v47 }
  0x41   : > { %3506 = vmatpush3.bf16.msra.mxu0 %v3626_v29 }
  0x42   : > { %3507 = vmatprep.subr.bf16.mxu0 %v3628_v30 }
  0x43   : > { %3538 = vmatpush3.bf16.msra.mxu1 %v3651_v47 }
  0x44   : > { %3539 = vmatprep.subr.bf16.mxu1 %v3652_v48 }
  0x45   : > { %3508 = vmatpush3.bf16.msra.mxu0 %v3628_v30 }
  0x46   : > { %3509 = vmatprep.subr.bf16.mxu0 %v3631_v33  ;;  %3492 = vmatmul.mubr.bf16.gmra.mxu1 %v3643_v35 }
  0x47   : > { %3540 = vmatpush3.bf16.msra.mxu1 %v3652_v48 }
  0x48   : > { %3541 = vmatprep.subr.bf16.mxu1 %v3653_v49 }
  0x49   : > { %3510 = vmatpush3.bf16.msra.mxu0 %v3631_v33 }
  0x4b   : > { %3542 = vmatpush3.bf16.msra.mxu1 %v3653_v49 }
  0x4c   : > { %3512 = vmatmul.mubr.bf16.vlgmr.msra.gmra.mxu0 %v3633_v34 }
  0x4d   : > { %3515 = vmatprep.mubr.bf16.mxu0 %v3636_v36 }
  0x54   : > { %3516 = vmatmul.mubr.bf16.gmra.mxu0 %v3637_v37 }
  0x55   : > { %3519 = vmatprep.mubr.bf16.mxu0 %v3640_v38 }
  0x5c   : > { %3520 = vmatmul.mubr.bf16.gmra.mxu0 %v3641_v39 }
  0x5d   : > { %3523 = vmatprep.mubr.bf16.mxu0 %v3644_v40 }
  0x64   : > { %3524 = vmatmul.mubr.bf16.gmra.mxu0 %v3645_v41 }
  0xec   : > { %v669_v50 = vpop.f32.mrf.mxu0 }
  0xed   : > { %v1128_v1 = vcombine.high %v669_v50, %v669_v50  ;;  %v1135_v2 = vrot.slane %v669_v50, %v1134_v63 }
  0xee   : > { %v3461_v51 = vpop.f32.mrf.mxu0  ;;  %v3481_v57 = vpop.f32.mrf.mxu1 }
  0xef   : > { %v1142_v4 = vrot.slane %v1128_v1, %v1134_v63  ;;  %v1143_v5 = vcombine.high %v1135_v2, %v1135_v2  ;;  %v1151_v6 = vrot.slane %v1135_v2, %v1134_v63 }
  0xf0   : > { %v672_v52 = vpop.f32.mrf.mxu0  ;;  %v870_v58 = vpop.f32.mrf.mxu1 }
  0xf1   : > { %v1144_v8 = vcombine.high %v1142_v4, %v1142_v4  ;;  %v1165_v9 = vrot.slane %v1143_v5, %v1134_v63  ;;  %v1173_v10 = vcombine.high %v1151_v6, %v1151_v6  ;;  %v1177_v11 = vcombine.high %v672_v52, %v672_v52 }
  0xf2   : > { %v3462_v53 = vpop.f32.mrf.mxu0  ;;  %v3482_v61 = vpop.f32.mrf.mxu1  ;;  %v1184_v12 = vrot.slane %v672_v52, %v1134_v63  ;;  %v4079_v16 = vrot.slane %v1142_v4, %v1134_v63  ;;  %v1229_v29 = vrot.slane %v1151_v6, %v4075_v14 }
  0xf3   : > { %v4081_v17 = vrot.slane %v1144_v8, %v1134_v63  ;;  %v1175_v19 = vcombine.high %v1165_v9, %v1165_v9  ;;  %v1237_v21 = vrot.slane %v1173_v10, %v4075_v14  ;;  %v1191_v23 = vrot.slane %v1177_v11, %v1134_v63 }
  0xf4   : > { %v873_v62 = vpop.f32.mrf.mxu1  ;;  %v1192_v24 = vcombine.high %v1184_v12, %v1184_v12  ;;  %v4088_v25 = vrot.slane %v1184_v12, %v1134_v63  ;;  %v1233_v33 = vrot.slane %v1165_v9, %v4075_v14  ;;  %v1174_v34 = vcombine.high %v4079_v16, %v4079_v16 }
  0xf5   : > { %v1241_v32 = vrot.slane %v1175_v19, %v4075_v14  ;;  %v1176_v35 = vcombine.high %v4081_v17, %v4081_v17  ;;  %v1245_v39 = vrot.slane %v4079_v16, %v4075_v14  ;;  %v1193_v40 = vcombine.high %v1191_v23, %v1191_v23 }
  0xf6   : > { %v3485_v0 = vpop.f32.mrf.mxu1  ;;  %v4104_v41 = vrot.slane %v1192_v24, %v1134_v63  ;;  %v1222_v42 = vcombine.high %v4088_v25, %v4088_v25  ;;  %v1249_v44 = vrot.slane %v4081_v17, %v4075_v14  ;;  %v4115_v50 = vrot.slane %v1191_v23, %v1134_v63 }
  0xf7   : > { %v1253_v52 = vrot.slane %v1174_v34, %v4075_v14  ;;  %v1257_v53 = vrot.slane %v1176_v35, %v4075_v14  ;;  %v1261_v54 = vrot.slane %v4088_v25, %v4075_v14  ;;  %v4127_v59 = vrot.slane %v1193_v40, %v1134_v63 }
  0xf8   : > { %v4065_v3 = vpop.f32.mrf.mxu1  ;;  %v1269_v1 = vrot.slane %v1222_v42, %v4075_v14  ;;  %v1224_v2 = vcombine.high %v4104_v41, %v4104_v41  ;;  %v1265_v11 = vrot.slane %v4104_v41, %v4075_v14  ;;  %v1223_v12 = vcombine.high %v4115_v50, %v4115_v50 }
  0xf9   : > { %v1277_v19 = vrot.slane %v4115_v50, %v4075_v14 }
  0xfa   : > { %v4067_v7 = vpop.f32.mrf.mxu1  ;;  %v1273_v24 = vrot.slane %v1224_v2, %v4075_v14 }
  0xfc   : > { %v4077_v15 = vpop.f32.mrf.mxu1 }
  0xfe   : > { %v4091_v30 = vpop.f32.mrf.mxu1 }
 0x100   : > { %v902_v49 = vpop.f32.mrf.mxu1 }
 0x102   : > { %v3490_v9 = vpop.f32.mrf.mxu1 }
 0x10c   : > { %v3513_v18 = vpop.f32.mrf.mxu0 }
 0x10d   : > { %v1072_v20 = vadd.f32 %v3513_v18, %v3481_v57 }
 0x10e   : > { %v1063_v26 = vpop.f32.mrf.mxu0 }
 0x10f   : > { %v1308_v27 = vadd.f32 %v1237_v21, %v1072_v20  ;;  %v1064_v28 = vadd.f32 %v1063_v26, %v870_v58 }
 0x110   : > { %v3514_v31 = vpop.f32.mrf.mxu0 }
 0x111   : > { %v4100_v36 = vadd.f32 %v4086_v22, %v1308_v27  ;;  %v1306_v37 = vadd.f32 %v1229_v29, %v1064_v28  ;;  %v1075_v38 = vadd.f32 %v3514_v31, %v3482_v61  ;;  %v905_v29 = vpop.f32.mrf.mxu1 }
 0x112   : > { %v1066_v43 = vpop.f32.mrf.mxu0 }
 0x113   : > { %v1344_v45 = vmul.f32 %v4100_v36, %v4100_v36  ;;  %v4113_v46 = vadd.f32 %v4086_v22, %v1306_v37  ;;  %v1309_v47 = vadd.f32 %v1241_v32, %v1075_v38  ;;  %v1067_v48 = vadd.f32 %v1066_v43, %v873_v62 }
 0x114   : > { %v3517_v51 = vpop.f32.mrf.mxu0  ;;  %v1225_v38 = vcombine.high %v4127_v59, %v4127_v59 }
 0x115   : > { %v1360_v55 = vmul.f32 %v1344_v45, %v4100_v36  ;;  %v1342_v56 = vmul.f32 %v4113_v46, %v4113_v46  ;;  %v4125_v57 = vadd.f32 %v4086_v22, %v1309_v47  ;;  %v1307_v58 = vadd.f32 %v1233_v33, %v1067_v48 }
 0x116   : > { %v1088_v61 = vadd.f32 %v3517_v51, %v3485_v0  ;;  %v1079_v62 = vpop.f32.mrf.mxu0 }
 0x117   : > { %v1376_v4 = vmul.f32 0.044715, %v1360_v55  ;;  %v1358_v5 = vmul.f32 %v1342_v56, %v4113_v46  ;;  %v1345_v6 = vmul.f32 %v4125_v57, %v4125_v57  ;;  %v4136_v8 = vadd.f32 %v4086_v22, %v1307_v58 }
 0x118   : > { %v1312_v10 = vadd.f32 %v1253_v52, %v1088_v61  ;;  %v1080_v63 = vadd.f32 %v1079_v62, %v4065_v3  ;;  %v3518_v0 = vpop.f32.mrf.mxu0 }
 0x119   : > { %v1392_v16 = vadd.f32 %v1376_v4, %v4100_v36  ;;  %v1361_v17 = vmul.f32 %v1345_v6, %v4125_v57  ;;  %v1343_v18 = vmul.f32 %v4136_v8, %v4136_v8  ;;  %v1091_v21 = vadd.f32 %v3518_v0, %v4067_v7 }
 0x11a   : > { %v4150_v20 = vadd.f32 %v4086_v22, %v1312_v10  ;;  %v1310_v3 = vadd.f32 %v1245_v39, %v1080_v63  ;;  %v1082_v23 = vpop.f32.mrf.mxu0  ;;  %v1374_v26 = vmul.f32 0.044715, %v1358_v5  ;;  %v1281_v39 = vrot.slane %v4127_v59, %v4075_v14 }
 0x11b   : > { %v1408_v25 = vmul.f32 0.7978846, %v1392_v16  ;;  %v1377_v27 = vmul.f32 0.044715, %v1361_v17  ;;  %v1359_v28 = vmul.f32 %v1343_v18, %v4136_v8  ;;  %v1313_v33 = vadd.f32 %v1257_v53, %v1091_v21 }
 0x11c   : > { %v1348_v31 = vmul.f32 %v4150_v20, %v4150_v20  ;;  %v4158_v32 = vadd.f32 %v4086_v22, %v1310_v3  ;;  %v1083_v34 = vadd.f32 %v1082_v23, %v4077_v15  ;;  %v3521_v35 = vpop.f32.mrf.mxu0  ;;  %v1390_v45 = vadd.f32 %v1374_v26, %v4113_v46 }
 0x11d   : > { %v1393_v7 = vadd.f32 %v1377_v27, %v4125_v57  ;;  %v1104_v37 = vadd.f32 %v3521_v35, %v4091_v30  ;;  %v1375_v40 = vmul.f32 0.044715, %v1359_v28  ;;  %v4170_v42 = vadd.f32 %v4086_v22, %v1313_v33  ;;  %v3493_v30 = vpop.f32.mrf.mxu1 }
 0x11e   : > { %v1346_v41 = vmul.f32 %v4158_v32, %v4158_v32  ;;  %v1311_v43 = vadd.f32 %v1249_v44, %v1083_v34  ;;  %v1095_v15 = vpop.f32.mrf.mxu0  ;;  %3743 = vtanh.f32 %v1408_v25  ;;  %v1364_v52 = vmul.f32 %v1348_v31, %v4150_v20 }
 0x11f   : > { %v1409_v47 = vmul.f32 0.7978846, %v1393_v7  ;;  %v1316_v48 = vadd.f32 %v1269_v1, %v1104_v37  ;;  %v1096_v51 = vadd.f32 %v1095_v15, %v902_v49  ;;  %v1349_v58 = vmul.f32 %v4170_v42, %v4170_v42  ;;  %v918_v10 = vpop.f32.mrf.mxu1 }
 0x120   : > { %v1362_v53 = vmul.f32 %v1346_v41, %v4158_v32  ;;  %v4176_v55 = vadd.f32 %v4086_v22, %v1311_v43  ;;  %v3522_v56 = vpop.f32.mrf.mxu0  ;;  %v1391_v49 = vadd.f32 %v1375_v40, %v4136_v8  ;;  %v1285_v4 = vrot.slane %v1223_v12, %v4075_v14 }
 0x121   : > { %v4181_v44 = vadd.f32 %v4086_v22, %v1316_v48  ;;  %v1314_v61 = vadd.f32 %v1261_v54, %v1096_v51  ;;  %v1107_v62 = vadd.f32 %v3522_v56, %v3490_v9  ;;  %3745 = vtanh.f32 %v1409_v47  ;;  %v3494_v34 = vpop.f32.mrf.mxu1 }
 0x122   : > { %v1347_v1 = vmul.f32 %v4176_v55, %v4176_v55  ;;  %v1098_v2 = vpop.f32.mrf.mxu0  ;;  %v1380_v54 = vmul.f32 0.044715, %v1364_v52  ;;  %v1378_v9 = vmul.f32 0.044715, %v1362_v53  ;;  %v1406_v18 = vmul.f32 0.7978846, %v1390_v45 }
 0x123   : > { %v1352_v5 = vmul.f32 %v4181_v44, %v4181_v44  ;;  %v4190_v6 = vadd.f32 %v4086_v22, %v1314_v61  ;;  %v1317_v63 = vadd.f32 %v1273_v24, %v1107_v62  ;;  %v1099_v0 = vadd.f32 %v1098_v2, %v905_v29 }
 0x124   : > { %v1363_v16 = vmul.f32 %v1347_v1, %v4176_v55  ;;  %v3525_v17 = vpop.f32.mrf.mxu0  ;;  %v1365_v3 = vmul.f32 %v1349_v58, %v4170_v42  ;;  %v1289_v27 = vrot.slane %v1225_v38, %v4075_v14  ;;  %v1407_v28 = vmul.f32 0.7978846, %v1391_v49  ;;  %v921_v58 = vpop.f32.mrf.mxu1 }
 0x125   : > { %v1350_v12 = vmul.f32 %v4190_v6, %v4190_v6  ;;  %v4197_v21 = vadd.f32 %v4086_v22, %v1317_v63  ;;  %v1315_v23 = vadd.f32 %v1265_v11, %v1099_v0  ;;  %v1368_v25 = vmul.f32 %v1352_v5, %v4181_v44 }
 0x126   : > { %v1120_v26 = vadd.f32 %v3525_v17, %v3493_v30  ;;  %v1111_v24 = vpop.f32.mrf.mxu0  ;;  %v1379_v29 = vmul.f32 0.044715, %v1363_v16  ;;  %v1396_v7 = vadd.f32 %v1380_v54, %v4150_v20  ;;  %3747 = vtanh.f32 %v1406_v18 }
 0x127   : > { %v1366_v31 = vmul.f32 %v1350_v12, %v4190_v6  ;;  %v1353_v33 = vmul.f32 %v4197_v21, %v4197_v21  ;;  %v4205_v35 = vadd.f32 %v4086_v22, %v1315_v23  ;;  %v1112_v37 = vadd.f32 %v1111_v24, %v918_v10 }
 0x128   : > { %v1320_v11 = vadd.f32 %v1285_v4, %v1120_v26  ;;  %v3526_v40 = vpop.f32.mrf.mxu0  ;;  %v1394_v41 = vadd.f32 %v1378_v9, %v4158_v32  ;;  %v1381_v38 = vmul.f32 0.044715, %v1365_v3  ;;  %3749 = vtanh.f32 %v1407_v28 }
 0x129   : > { %v1369_v43 = vmul.f32 %v1353_v33, %v4197_v21  ;;  %v1351_v15 = vmul.f32 %v4205_v35, %v4205_v35  ;;  %v1318_v47 = vadd.f32 %v1277_v19, %v1112_v37  ;;  %v1123_v48 = vadd.f32 %v3526_v40, %v3494_v34 }
 0x12a   : > { %v4213_v45 = vadd.f32 %v4086_v22, %v1320_v11  ;;  %v1114_v30 = vpop.f32.mrf.mxu0  ;;  %v1395_v51 = vadd.f32 %v1379_v29, %v4176_v55  ;;  %v1384_v52 = vmul.f32 0.044715, %v1368_v25  ;;  %v1382_v53 = vmul.f32 0.044715, %v1366_v31 }
 0x12b   : > { %v1367_v56 = vmul.f32 %v1351_v15, %v4205_v35  ;;  %v4223_v62 = vadd.f32 %v4086_v22, %v1318_v47  ;;  %v1321_v49 = vadd.f32 %v1289_v27, %v1123_v48  ;;  %v1115_v1 = vadd.f32 %v1114_v30, %v921_v58  ;;  %v3744_v50 = vpop.eup %3743 }
 0x12c   : > { %v1356_v61 = vmul.f32 %v4213_v45, %v4213_v45  ;;  %v1397_v19 = vadd.f32 %v1381_v38, %v4170_v42  ;;  %v1385_v2 = vmul.f32 0.044715, %v1369_v43  ;;  %v1410_v5 = vmul.f32 0.7978846, %v1394_v41 }
 0x12d   : > { %v1383_v4 = vmul.f32 0.044715, %v1367_v56  ;;  %v1354_v10 = vmul.f32 %v4223_v62, %v4223_v62  ;;  %v4229_v63 = vadd.f32 %v4086_v22, %v1321_v49  ;;  %v1319_v0 = vadd.f32 %v1281_v39, %v1115_v1 }
 0x12e   : > { %v3746_v54 = vpop.eup %3745  ;;  %v1398_v9 = vadd.f32 %v1382_v53, %v4190_v6  ;;  %v1372_v17 = vmul.f32 %v1356_v61, %v4213_v45  ;;  %v1411_v18 = vmul.f32 0.7978846, %v1395_v51  ;;  %v1400_v3 = vadd.f32 %v1384_v52, %v4181_v44 }
 0x12f   : > { %v1399_v16 = vadd.f32 %v1383_v4, %v4205_v35  ;;  %v1370_v12 = vmul.f32 %v1354_v10, %v4223_v62  ;;  %v1357_v23 = vmul.f32 %v4229_v63, %v4229_v63  ;;  %v4242_v25 = vadd.f32 %v4086_v22, %v1319_v0 }
 0x130   : > { %v1401_v59 = vadd.f32 %v1385_v2, %v4197_v21  ;;  %3751 = vtanh.f32 %v1410_v5  ;;  %v1412_v39 = vmul.f32 0.7978846, %v1396_v7  ;;  %v1413_v26 = vmul.f32 0.7978846, %v1397_v19 }
 0x131   : > { %v1441_v24 = vadd.f32 1.0, %v3746_v54  ;;  %v1386_v27 = vmul.f32 0.044715, %v1370_v12  ;;  %v1373_v28 = vmul.f32 %v1357_v23, %v4229_v63  ;;  %v1355_v29 = vmul.f32 %v4242_v25, %v4242_v25 }
 0x132   : > { %v1388_v31 = vmul.f32 0.044715, %v1372_v17  ;;  %3753 = vtanh.f32 %v1411_v18  ;;  %v1414_v33 = vmul.f32 0.7978846, %v1398_v9  ;;  %v1415_v34 = vmul.f32 0.7978846, %v1399_v16 }
 0x133   : > { %v1402_v11 = vadd.f32 %v1386_v27, %v4223_v62  ;;  %v1389_v22 = vmul.f32 0.044715, %v1373_v28  ;;  %v1371_v37 = vmul.f32 %v1355_v29, %v4242_v25  ;;  %3755 = vtanh.f32 %v1412_v39  ;;  %v3748_v40 = vpop.eup %3747 }
 0x134   : > { %v1440_v7 = vadd.f32 1.0, %v3744_v50  ;;  %3757 = vtanh.f32 %v1413_v26  ;;  %v1416_v41 = vmul.f32 0.7978846, %v1400_v3  ;;  %v1417_v38 = vmul.f32 0.7978846, %v1401_v59 }
 0x135   : > { %v1405_v43 = vadd.f32 %v1389_v22, %v4229_v63  ;;  %v1387_v15 = vmul.f32 0.044715, %v1371_v37  ;;  %v1438_v47 = vadd.f32 1.0, %v3748_v40  ;;  %3759 = vtanh.f32 %v1414_v33  ;;  %v3750_v48 = vpop.eup %3749 }
 0x136   : > { %v1457_v30 = vmul.f32 0.5, %v1441_v24  ;;  %v1404_v51 = vadd.f32 %v1388_v31, %v4213_v45  ;;  %3761 = vtanh.f32 %v1415_v34  ;;  %v1418_v52 = vmul.f32 0.7978846, %v1402_v11 }
 0x137   : > { %v1403_v53 = vadd.f32 %v1387_v15, %v4242_v25  ;;  %v1439_v56 = vadd.f32 1.0, %v3750_v48  ;;  %v1454_v58 = vmul.f32 0.5, %v1438_v47  ;;  %3763 = vtanh.f32 %v1416_v41 }
 0x138   : > { %v1456_v61 = vmul.f32 0.5, %v1440_v7  ;;  %3765 = vtanh.f32 %v1417_v38  ;;  %v1421_v49 = vmul.f32 0.7978846, %v1405_v43  ;;  %v1473_v19 = vmul.f32 %v1457_v30, %v4125_v57 }
 0x139   : > { %v1455_v1 = vmul.f32 0.5, %v1439_v56  ;;  %v1419_v50 = vmul.f32 0.7978846, %v1403_v53  ;;  %3767 = vtanh.f32 %v1418_v52  ;;  %v1420_v2 = vmul.f32 0.7978846, %v1404_v51 }
 0x13a   : > { %v1470_v4 = vmul.f32 %v1454_v58, %v4113_v46  ;;  %v1472_v10 = vmul.f32 %v1456_v61, %v4100_v36 }
 0x13b   : > { %v1471_v5 = vmul.f32 %v1455_v1, %v4136_v8  ;;  %3769 = vtanh.f32 %v1419_v50 }
 0x13c   : > { %3771 = vtanh.f32 %v1421_v49  ;;  %v1487_v9 = vpack.c.bf16 %v1473_v19, %v1472_v10 }
 0x13d   : > { %v3752_v0 = vpop.eup %3751  ;;  %v1486_v54 = vpack.c.bf16 %v1471_v5, %v1470_v4  ;;  %3773 = vtanh.f32 %v1420_v2 }
 0x13e   : > { %v1442_v16 = vadd.f32 1.0, %v3752_v0 }
 0x13f   : > { %v3754_v17 = vpop.eup %3753  ;;  %3543 = vmatprep.mubr.bf16.mxu1 %v1486_v54  ;;  %v3660_v54 = vld [vmem:[%s4844_s9 + $0x8] sm:$0xff]  }
 0x140   : > { %v3756_v18 = vpop.eup %3755  ;;  %3544 = vmatmul.mubr.bf16.vlgmr.msra.gmra.mxu1 %v1487_v9  ;;  %v1443_v3 = vadd.f32 1.0, %v3754_v17  ;;  %v1458_v57 = vmul.f32 0.5, %v1442_v16  ;;  %v3661_v9 = vld [vmem:[%s4844_s9] sm:$0xff]   ;;  %v564_v17 = vld [vmem:[%s545_s17 + $0x8] sm:$0xff] }
 0x141   : > { %v3758_v12 = vpop.eup %3757  ;;  %v1444_v23 = vadd.f32 1.0, %v3756_v18  ;;  %v563_v16 = vld [vmem:[%s545_s17] sm:$0xff]  ;;  %v4300_v18 = vsub.s32 1, %v4062_v60 }
 0x142   : > { %v3760_v46 = vpop.eup %3759  ;;  %v1459_v59 = vmul.f32 0.5, %v1443_v3  ;;  %v1445_v8 = vadd.f32 1.0, %v3758_v12  ;;  %v1474_v27 = vmul.f32 %v1458_v57, %v4158_v32  ;;  %v1979_v3 = vrot.slane %v563_v16, %v4075_v14 }
 0x143   : > { %v3762_v39 = vpop.eup %3761  ;;  %v1460_v26 = vmul.f32 0.5, %v1444_v23  ;;  %v1446_v36 = vadd.f32 1.0, %v3760_v46  ;;  %v2035_v57 = vrot.slane %v564_v17, %v4075_v14  ;;  %v1986_v12 = vrot.slane %v563_v16, %v4300_v18 }
 0x144   : > { %v3764_v24 = vpop.eup %3763  ;;  %v1475_v28 = vmul.f32 %v1459_v59, %v4176_v55  ;;  %v1461_v29 = vmul.f32 0.5, %v1445_v8  ;;  %v1447_v31 = vadd.f32 1.0, %v3762_v39  ;;  %1981 = vbcast.lane.b32.xlu0 %v1979_v3, 256  ;;  %v4306_v23 = vsub.s32 2, %v4062_v60 }
 0x145   : > { %v3766_v33 = vpop.eup %3765  ;;  %v1476_v34 = vmul.f32 %v1460_v26, %v4150_v20  ;;  %v1462_v11 = vmul.f32 0.5, %v1446_v36  ;;  %v1448_v22 = vadd.f32 1.0, %v3764_v24  ;;  %2037 = vbcast.lane.b32.xlu1 %v2035_v57, 256  ;;  %v2042_v46 = vrot.slane %v564_v17, %v4300_v18 }
 0x146   : > { %v3768_v37 = vpop.eup %3767  ;;  %v1488_v40 = vpack.c.bf16 %v1475_v28, %v1474_v27  ;;  %v1477_v7 = vmul.f32 %v1461_v29, %v4170_v42  ;;  %v1463_v41 = vmul.f32 0.5, %v1447_v31  ;;  %v1449_v38 = vadd.f32 1.0, %v3766_v33 }
 0x147   : > { %v1450_v43 = vadd.f32 1.0, %v3768_v37  ;;  %v1478_v32 = vmul.f32 %v1462_v11, %v4190_v6  ;;  %v1464_v53 = vmul.f32 0.5, %v1448_v22  ;;  %v1993_v59 = vrot.slane %v563_v16, %v4306_v23 }
 0x148   : > { %v3770_v15 = vpop.eup %3769  ;;  %3547 = vmatprep.mubr.bf16.mxu1 %v1488_v40  ;;  %v1489_v47 = vpack.c.bf16 %v1477_v7, %v1476_v34  ;;  %v1479_v55 = vmul.f32 %v1463_v41, %v4205_v35  ;;  %v1465_v48 = vmul.f32 0.5, %v1449_v38  ;;  %1988 = vbcast.lane.b32.xlu0 %v1986_v12, 256  ;;  %v4311_v8 = vsub.s32 3, %v4062_v60 }
 0x149   : > { %v3772_v30 = vpop.eup %3771  ;;  %v1451_v51 = vadd.f32 1.0, %v3770_v15  ;;  %v1466_v20 = vmul.f32 0.5, %v1450_v43  ;;  %v1480_v6 = vmul.f32 %v1464_v53, %v4181_v44  ;;  %v3655_v44 = vld [vmem:[%s4844_s9 + $0x30] sm:$0xff]   ;;  %2044 = vbcast.lane.b32.xlu1 %v2042_v46, 256  ;;  %v2049_v39 = vrot.slane %v564_v17, %v4306_v23 }
 0x14a   : > { %3548 = vmatmul.mubr.bf16.gmra.mxu1 %v1489_v47  ;;  %v1490_v52 = vpack.c.bf16 %v1479_v55, %v1478_v32  ;;  %v3774_v56 = vpop.eup %3773  ;;  %v1481_v42 = vmul.f32 %v1465_v48, %v4197_v21  ;;  %v1453_v61 = vadd.f32 1.0, %v3772_v30  ;;  %v3654_v21 = vld [vmem:[%s4844_s9 + $0x38] sm:$0xff]   ;;  %v2000_v26 = vrot.slane %v563_v16, %v4311_v8 }
 0x14b   : > { %v1467_v58 = vmul.f32 0.5, %v1451_v51  ;;  %v1482_v49 = vmul.f32 %v1466_v20, %v4223_v62  ;;  %v1452_v35 = vadd.f32 1.0, %v3774_v56  ;;  %3559 = vmatprep.subr.bf16.mxu0 %v3654_v21  ;;  %v3656_v62 = vld [vmem:[%s4844_s9 + $0x28] sm:$0xff]   ;;  %v4316_v36 = vsub.s32 4, %v4062_v60 }
 0x14c   : > { %3551 = vmatprep.mubr.bf16.mxu1 %v1490_v52  ;;  %v1491_v19 = vpack.c.bf16 %v1481_v42, %v1480_v6  ;;  %v1469_v2 = vmul.f32 0.5, %v1453_v61  ;;  %3560 = vmatpush3.bf16.msra.mxu0 %v3654_v21  ;;  %v2056_v24 = vrot.slane %v564_v17, %v4311_v8  ;;  %v4321_v28 = vsub.s32 5, %v4062_v60 }
 0x14d   : > { %v1483_v1 = vmul.f32 %v1467_v58, %v4242_v25  ;;  %v1468_v4 = vmul.f32 0.5, %v1452_v35  ;;  %3561 = vmatprep.subr.bf16.mxu0 %v3655_v44  ;;  %v3659_v25 = vld [vmem:[%s4844_s9 + $0x10] sm:$0xff]   ;;  %1995 = vbcast.lane.b32.xlu0 %v1993_v59, 256  ;;  %v2007_v27 = vrot.slane %v563_v16, %v4316_v36  ;;  %v2063_v29 = vrot.slane %v564_v17, %v4316_v36 }
 0x14e   : > { %v1485_v5 = vmul.f32 %v1469_v2, %v4229_v63  ;;  %v3658_v63 = vld [vmem:[%s4844_s9 + $0x18] sm:$0xff]   ;;  %2051 = vbcast.lane.b32.xlu1 %v2049_v39, 256  ;;  %v2014_v31 = vrot.slane %v563_v16, %v4321_v28  ;;  %v4326_v33 = vsub.s32 6, %v4062_v60  ;;  %v2070_v34 = vrot.slane %v564_v17, %v4321_v28 }
 0x14f   : > { %v1492_v50 = vpack.c.bf16 %v1483_v1, %v1482_v49  ;;  %v1484_v10 = vmul.f32 %v1468_v4, %v4213_v45  ;;  %v3657_v45 = vld [vmem:[%s4844_s9 + $0x20] sm:$0xff]   ;;  %v4331_v22 = vsub.s32 7, %v4062_v60  ;;  %v4338_v41 = vrot.slane %v4072_v13, %v4300_v18 }
 0x150   : > { %3562 = vmatpush3.bf16.msra.mxu0 %v3655_v44  ;;  %v2021_v11 = vrot.slane %v563_v16, %v4326_v33  ;;  %v2077_v37 = vrot.slane %v564_v17, %v4326_v33 }
 0x151   : > { %v1493_v0 = vpack.c.bf16 %v1485_v5, %v1484_v10  ;;  %3563 = vmatprep.subr.bf16.mxu0 %v3656_v62  ;;  %2002 = vbcast.lane.b32.xlu0 %v2000_v26, 256  ;;  %v2028_v40 = vrot.slane %v563_v16, %v4331_v22  ;;  %v2084_v7 = vrot.slane %v564_v17, %v4331_v22 }
 0x152   : > { %3552 = vmatmul.mubr.bf16.gmra.mxu1 %v1491_v19  ;;  %2058 = vbcast.lane.b32.xlu1 %v2056_v24, 256 }
 0x153   : > { %3555 = vmatprep.mubr.bf16.mxu1 %v1492_v50 }
 0x154   : > { %3564 = vmatpush3.bf16.msra.mxu0 %v3656_v62 }
 0x155   : > { %3565 = vmatprep.subr.bf16.mxu0 %v3657_v45  ;;  %2009 = vbcast.lane.b32.xlu0 %v2007_v27, 256 }
 0x156   : > { %2065 = vbcast.lane.b32.xlu1 %v2063_v29, 256 }
 0x158   : > { %3566 = vmatpush3.bf16.msra.mxu0 %v3657_v45 }
 0x159   : > { %3567 = vmatprep.subr.bf16.mxu0 %v3658_v63  ;;  %2016 = vbcast.lane.b32.xlu0 %v2014_v31, 256 }
 0x15a   : > { %3556 = vmatmul.mubr.bf16.gmra.mxu1 %v1493_v0  ;;  %2072 = vbcast.lane.b32.xlu1 %v2070_v34, 256 }
 0x15c   : > { %3568 = vmatpush3.bf16.msra.mxu0 %v3658_v63 }
 0x15d   : > { %3569 = vmatprep.subr.bf16.mxu0 %v3659_v25  ;;  %2023 = vbcast.lane.b32.xlu0 %v2021_v11, 256 }
 0x15e   : > { %2079 = vbcast.lane.b32.xlu1 %v2077_v37, 256 }
 0x160   : > { %3570 = vmatpush3.bf16.msra.mxu0 %v3659_v25 }
 0x161   : > { %3571 = vmatprep.subr.bf16.mxu0 %v3660_v54  ;;  %2030 = vbcast.lane.b32.xlu0 %v2028_v40, 256 }
 0x162   : > { %2086 = vbcast.lane.b32.xlu1 %v2084_v7, 256 }
 0x164   : > { %3572 = vmatpush3.bf16.msra.mxu0 %v3660_v54 }
 0x165   : > { %3573 = vmatprep.subr.bf16.mxu0 %v3661_v9 }
 0x168   : > { %3574 = vmatpush3.bf16.msra.mxu0 %v3661_v9 }
 0x200   : > { %v3545_v38 = vpop.f32.mrf.mxu1 }
 0x201   : > { %v4341_v43 = vadd.f32 %v3545_v38, %v4338_v41 }
 0x202   : > { %v1596_v60 = vpop.f32.mrf.mxu1 }
 0x203   : > { %v1661_v15 = vmul.f32 %v4341_v43, %v4341_v43  ;;  %v4346_v47 = vadd.f32 %v1596_v60, %v4338_v41 }
 0x204   : > { %v3546_v32 = vpop.f32.mrf.mxu1 }
 0x205   : > { %v1677_v55 = vmul.f32 %v1661_v15, %v4341_v43  ;;  %v1659_v48 = vmul.f32 %v4346_v47, %v4346_v47  ;;  %v4352_v13 = vadd.f32 %v3546_v32, %v4338_v41 }
 0x206   : > { %v1599_v30 = vpop.f32.mrf.mxu1 }
 0x207   : > { %v1693_v51 = vmul.f32 0.044715, %v1677_v55  ;;  %v1675_v20 = vmul.f32 %v1659_v48, %v4346_v47  ;;  %v1662_v52 = vmul.f32 %v4352_v13, %v4352_v13  ;;  %v4358_v53 = vadd.f32 %v1599_v30, %v4338_v41 }
 0x209   : > { %v1709_v56 = vadd.f32 %v1693_v51, %v4341_v43  ;;  %v1691_v58 = vmul.f32 0.044715, %v1675_v20  ;;  %v1678_v42 = vmul.f32 %v1662_v52, %v4352_v13  ;;  %v1660_v61 = vmul.f32 %v4358_v53, %v4358_v53 }
 0x20a   : > { %v3549_v49 = vpop.f32.mrf.mxu1 }
 0x20b   : > { %v1725_v1 = vmul.f32 0.7978846, %v1709_v56  ;;  %v1694_v6 = vmul.f32 0.044715, %v1678_v42  ;;  %v1676_v35 = vmul.f32 %v1660_v61, %v4358_v53  ;;  %v1707_v50 = vadd.f32 %v1691_v58, %v4346_v47 }
 0x20c   : > { %v4367_v19 = vadd.f32 %v3549_v49, %v4338_v41  ;;  %v1612_v2 = vpop.f32.mrf.mxu1 }
 0x20d   : > { %3775 = vtanh.f32 %v1725_v1  ;;  %v1710_v4 = vadd.f32 %v1694_v6, %v4352_v13  ;;  %v1692_v5 = vmul.f32 0.044715, %v1676_v35  ;;  %v4373_v0 = vadd.f32 %v1612_v2, %v4338_v41 }
 0x20e   : > { %v1665_v10 = vmul.f32 %v4367_v19, %v4367_v19  ;;  %v3550_v21 = vpop.f32.mrf.mxu1  ;;  %v1723_v63 = vmul.f32 0.7978846, %v1707_v50 }
 0x20f   : > { %v1726_v44 = vmul.f32 0.7978846, %v1710_v4  ;;  %v1708_v62 = vadd.f32 %v1692_v5, %v4358_v53  ;;  %v4377_v45 = vadd.f32 %v3550_v21, %v4338_v41  ;;  %v1663_v54 = vmul.f32 %v4373_v0, %v4373_v0 }
 0x210   : > { %v1681_v25 = vmul.f32 %v1665_v10, %v4367_v19  ;;  %v1615_v9 = vpop.f32.mrf.mxu1 }
 0x211   : > { %3777 = vtanh.f32 %v1726_v44  ;;  %v1666_v16 = vmul.f32 %v4377_v45, %v4377_v45  ;;  %v4385_v17 = vadd.f32 %v1615_v9, %v4338_v41  ;;  %v1724_v3 = vmul.f32 0.7978846, %v1708_v62 }
 0x212   : > { %v1697_v57 = vmul.f32 0.044715, %v1681_v25  ;;  %v1679_v12 = vmul.f32 %v1663_v54, %v4373_v0  ;;  %v3553_v46 = vpop.f32.mrf.mxu1  ;;  %3779 = vtanh.f32 %v1723_v63 }
 0x213   : > { %v1682_v59 = vmul.f32 %v1666_v16, %v4377_v45  ;;  %v1664_v39 = vmul.f32 %v4385_v17, %v4385_v17  ;;  %v4392_v26 = vadd.f32 %v3553_v46, %v4338_v41  ;;  %3781 = vtanh.f32 %v1724_v3 }
 0x214   : > { %v1713_v24 = vadd.f32 %v1697_v57, %v4367_v19  ;;  %v1695_v27 = vmul.f32 0.044715, %v1679_v12  ;;  %v1628_v29 = vpop.f32.mrf.mxu1 }
 0x215   : > { %v1698_v31 = vmul.f32 0.044715, %v1682_v59  ;;  %v1680_v34 = vmul.f32 %v1664_v39, %v4385_v17  ;;  %v1669_v11 = vmul.f32 %v4392_v26, %v4392_v26  ;;  %v4399_v37 = vadd.f32 %v1628_v29, %v4338_v41 }
 0x216   : > { %v1729_v40 = vmul.f32 0.7978846, %v1713_v24  ;;  %v1711_v7 = vadd.f32 %v1695_v27, %v4373_v0  ;;  %v3554_v38 = vpop.f32.mrf.mxu1 }
 0x217   : > { %v1714_v60 = vadd.f32 %v1698_v31, %v4377_v45  ;;  %v1696_v15 = vmul.f32 0.044715, %v1680_v34  ;;  %v1685_v32 = vmul.f32 %v1669_v11, %v4392_v26  ;;  %v1667_v55 = vmul.f32 %v4399_v37, %v4399_v37 }
 0x218   : > { %3783 = vtanh.f32 %v1729_v40  ;;  %v1727_v48 = vmul.f32 0.7978846, %v1711_v7  ;;  %v4407_v30 = vadd.f32 %v3554_v38, %v4338_v41  ;;  %v1631_v51 = vpop.f32.mrf.mxu1 }
 0x219   : > { %v1730_v20 = vmul.f32 0.7978846, %v1714_v60  ;;  %v1712_v52 = vadd.f32 %v1696_v15, %v4385_v17  ;;  %v1701_v56 = vmul.f32 0.044715, %v1685_v32  ;;  %v1683_v58 = vmul.f32 %v1667_v55, %v4399_v37 }
 0x21a   : > { %v3776_v42 = vpop.eup %3775  ;;  %3785 = vtanh.f32 %v1727_v48  ;;  %v1670_v61 = vmul.f32 %v4407_v30, %v4407_v30  ;;  %v4414_v49 = vadd.f32 %v1631_v51, %v4338_v41  ;;  %v3557_v1 = vpop.f32.mrf.mxu1 }
 0x21b   : > { %v1757_v6 = vadd.f32 1.0, %v3776_v42  ;;  %3787 = vtanh.f32 %v1730_v20  ;;  %v1728_v35 = vmul.f32 0.7978846, %v1712_v52  ;;  %v1717_v50 = vadd.f32 %v1701_v56, %v4392_v26 }
 0x21c   : > { %v1699_v2 = vmul.f32 0.044715, %v1683_v58  ;;  %v1686_v4 = vmul.f32 %v1670_v61, %v4407_v30  ;;  %v1668_v5 = vmul.f32 %v4414_v49, %v4414_v49  ;;  %v4421_v10 = vadd.f32 %v3557_v1, %v4338_v41  ;;  %v1644_v21 = vpop.f32.mrf.mxu1 }
 0x21d   : > { %3789 = vtanh.f32 %v1728_v35  ;;  %v4424_v44 = vadd.f32 %v1644_v21, %v4338_v41  ;;  %v1773_v3 = vmul.f32 0.5, %v1757_v6  ;;  %v1733_v57 = vmul.f32 0.7978846, %v1717_v50 }
 0x21e   : > { %v3778_v62 = vpop.eup %3777  ;;  %v1715_v63 = vadd.f32 %v1699_v2, %v4399_v37  ;;  %v1702_v25 = vmul.f32 0.044715, %v1686_v4  ;;  %v1684_v54 = vmul.f32 %v1668_v5, %v4414_v49  ;;  %v1673_v9 = vmul.f32 %v4421_v10, %v4421_v10  ;;  %v3558_v16 = vpop.f32.mrf.mxu1 }
 0x21f   : > { %v1671_v12 = vmul.f32 %v4424_v44, %v4424_v44  ;;  %v3780_v29 = vpop.eup %3779  ;;  %v1758_v31 = vadd.f32 1.0, %v3778_v62  ;;  %v4436_v11 = vadd.f32 %v3558_v16, %v4338_v41  ;;  %v1789_v62 = vmul.f32 %v1773_v3, %v4341_v43 }
 0x220   : > { %v1731_v46 = vmul.f32 0.7978846, %v1715_v63  ;;  %v1718_v59 = vadd.f32 %v1702_v25, %v4407_v30  ;;  %v1700_v39 = vmul.f32 0.044715, %v1684_v54  ;;  %v1689_v24 = vmul.f32 %v1673_v9, %v4421_v10  ;;  %v1647_v27 = vpop.f32.mrf.mxu1  ;;  %v3782_v15 = vpop.eup %3781 }
 0x221   : > { %v1687_v34 = vmul.f32 %v1671_v12, %v4424_v44  ;;  %v4439_v40 = vadd.f32 %v1647_v27, %v4338_v41  ;;  %v1674_v55 = vmul.f32 %v4436_v11, %v4436_v11  ;;  %v1755_v41 = vadd.f32 1.0, %v3780_v29 }
 0x222   : > { %3791 = vtanh.f32 %v1731_v46  ;;  %v1734_v7 = vmul.f32 0.7978846, %v1718_v59  ;;  %v1716_v38 = vadd.f32 %v1700_v39, %v4414_v49  ;;  %v1705_v60 = vmul.f32 0.044715, %v1689_v24 }
 0x223   : > { %3793 = vtanh.f32 %v1733_v57  ;;  %v1703_v32 = vmul.f32 0.044715, %v1687_v34  ;;  %v1672_v48 = vmul.f32 %v4439_v40, %v4439_v40  ;;  %v1774_v56 = vmul.f32 0.5, %v1758_v31 }
 0x224   : > { %3795 = vtanh.f32 %v1734_v7  ;;  %v1732_v51 = vmul.f32 0.7978846, %v1716_v38  ;;  %v1721_v20 = vadd.f32 %v1705_v60, %v4421_v10  ;;  %v1690_v42 = vmul.f32 %v1674_v55, %v4436_v11 }
 0x225   : > { %v3784_v52 = vpop.eup %3783  ;;  %v1719_v58 = vadd.f32 %v1703_v32, %v4424_v44  ;;  %v1688_v61 = vmul.f32 %v1672_v48, %v4439_v40  ;;  %v1756_v6 = vadd.f32 1.0, %v3782_v15  ;;  %v1771_v35 = vmul.f32 0.5, %v1755_v41 }
 0x226   : > { %3797 = vtanh.f32 %v1732_v51  ;;  %v1737_v1 = vmul.f32 0.7978846, %v1721_v20  ;;  %v1706_v4 = vmul.f32 0.044715, %v1690_v42  ;;  %v1790_v54 = vmul.f32 %v1774_v56, %v4352_v13 }
 0x227   : > { %v3786_v50 = vpop.eup %3785  ;;  %v1735_v2 = vmul.f32 0.7978846, %v1719_v58  ;;  %v1704_v5 = vmul.f32 0.044715, %v1688_v61  ;;  %v1772_v63 = vmul.f32 0.5, %v1756_v6  ;;  %v1787_v12 = vmul.f32 %v1771_v35, %v4346_v47 }
 0x228   : > { %v3788_v21 = vpop.eup %3787  ;;  %3799 = vtanh.f32 %v1737_v1  ;;  %v1759_v25 = vadd.f32 1.0, %v3786_v50  ;;  %v1722_v9 = vadd.f32 %v1706_v4, %v4436_v11  ;;  %v1761_v59 = vadd.f32 1.0, %v3784_v52 }
 0x229   : > { %3801 = vtanh.f32 %v1735_v2  ;;  %v1720_v16 = vadd.f32 %v1704_v5, %v4439_v40  ;;  %v1788_v46 = vmul.f32 %v1772_v63, %v4358_v53  ;;  %v1762_v39 = vadd.f32 1.0, %v3788_v21 }
 0x22a   : > { %v3790_v57 = vpop.eup %3789  ;;  %v1738_v24 = vmul.f32 0.7978846, %v1722_v9  ;;  %v1775_v3 = vmul.f32 0.5, %v1759_v25  ;;  %v1804_v31 = vpack.c.bf16 %v1790_v54, %v1789_v62  ;;  %v1777_v53 = vmul.f32 0.5, %v1761_v59 }
 0x22b   : > { %v1736_v27 = vmul.f32 0.7978846, %v1720_v16  ;;  %v1760_v43 = vadd.f32 1.0, %v3790_v57  ;;  %v1803_v29 = vpack.c.bf16 %v1788_v46, %v1787_v12  ;;  %v1778_v34 = vmul.f32 0.5, %v1762_v39  ;;  %v1982_v39 = vpop.permute.xlu0 %1981 }
 0x22c   : > { %3803 = vtanh.f32 %v1738_v24  ;;  %v1791_v38 = vmul.f32 %v1775_v3, %v4373_v0  ;;  %v1793_v41 = vmul.f32 %v1777_v53, %v4367_v19 }
 0x22d   : > { %v1776_v13 = vmul.f32 0.5, %v1760_v43  ;;  %3805 = vtanh.f32 %v1736_v27  ;;  %3575 = vmatprep.mubr.bf16.mxu0 %v1803_v29  ;;  %v1794_v48 = vmul.f32 %v1778_v34, %v4377_v45  ;;  %v4468_v43 = vpop.permute.xlu1 %2037 }
 0x22e   : > { %3576 = vmatmul.mubr.bf16.vlgmr.msra.gmra.mxu0 %v1804_v31 }
 0x22f   : > { %v3792_v7 = vpop.eup %3791  ;;  %v1792_v47 = vmul.f32 %v1776_v13, %v4385_v17  ;;  %v1806_v61 = vpack.c.bf16 %v1794_v48, %v1793_v41  ;;  %v1989_v24 = vpop.permute.xlu0 %1988 }
 0x230   : > { %v3794_v60 = vpop.eup %3793  ;;  %v1763_v15 = vadd.f32 1.0, %v3792_v7 }
 0x231   : > { %v3796_v32 = vpop.eup %3795  ;;  %v1805_v55 = vpack.c.bf16 %v1792_v47, %v1791_v38  ;;  %v1765_v52 = vadd.f32 1.0, %v3794_v60  ;;  %v4470_v29 = vpop.permute.xlu1 %2044 }
 0x232   : > { %v1766_v51 = vadd.f32 1.0, %v3796_v32  ;;  %v1779_v58 = vmul.f32 0.5, %v1763_v15 }
 0x233   : > { %v3798_v20 = vpop.eup %3797  ;;  %3579 = vmatprep.mubr.bf16.mxu0 %v1805_v55  ;;  %v1781_v6 = vmul.f32 0.5, %v1765_v52  ;;  %v1996_v27 = vpop.permute.xlu0 %1995 }
 0x234   : > { %v1764_v56 = vadd.f32 1.0, %v3798_v20  ;;  %v1782_v0 = vmul.f32 0.5, %v1766_v51  ;;  %v1795_v35 = vmul.f32 %v1779_v58, %v4399_v37 }
 0x235   : > { %v3800_v42 = vpop.eup %3799  ;;  %v1797_v21 = vmul.f32 %v1781_v6, %v4392_v26 }
 0x236   : > { %v3802_v1 = vpop.eup %3801  ;;  %v1780_v17 = vmul.f32 0.5, %v1764_v56  ;;  %3580 = vmatmul.mubr.bf16.gmra.mxu0 %v1806_v61  ;;  %v1798_v2 = vmul.f32 %v1782_v0, %v4407_v30  ;;  %v1769_v62 = vadd.f32 1.0, %v3800_v42 }
 0x237   : > { %v1767_v45 = vadd.f32 1.0, %v3802_v1  ;;  %v2003_v3 = vpop.permute.xlu0 %2002 }
 0x238   : > { %v1796_v50 = vmul.f32 %v1780_v17, %v4414_v49  ;;  %v1808_v9 = vpack.c.bf16 %v1798_v2, %v1797_v21  ;;  %v1785_v37 = vmul.f32 0.5, %v1769_v62 }
 0x239   : > { %v3804_v4 = vpop.eup %3803  ;;  %v1783_v54 = vmul.f32 0.5, %v1767_v45 }
 0x23a   : > { %v1807_v5 = vpack.c.bf16 %v1796_v50, %v1795_v35  ;;  %v3806_v19 = vpop.eup %3805  ;;  %v1770_v63 = vadd.f32 1.0, %v3804_v4  ;;  %v1801_v59 = vmul.f32 %v1785_v37, %v4421_v10 }
 0x23b   : > { %v1768_v25 = vadd.f32 1.0, %v3806_v19  ;;  %v1799_v49 = vmul.f32 %v1783_v54, %v4424_v44  ;;  %v2010_v31 = vpop.permute.xlu0 %2009  ;;  %v4475_v44 = vld [vmem:[%s4845_s10] sm:$0xff] }
 0x23c   : > { %3583 = vmatprep.mubr.bf16.mxu0 %v1807_v5  ;;  %v1786_v16 = vmul.f32 0.5, %v1770_v63  ;;  %v4479_v10 = vrot.slane %v4475_v44, %v4306_v23 }
 0x23d   : > { %v1784_v57 = vmul.f32 0.5, %v1768_v25 }
 0x23e   : > { %3584 = vmatmul.mubr.bf16.gmra.mxu0 %v1808_v9  ;;  %v1802_v30 = vmul.f32 %v1786_v16, %v4436_v11  ;;  %v4481_v11 = vpop.permute.xlu1 %2051 }
 0x23f   : > { %v1800_v12 = vmul.f32 %v1784_v57, %v4439_v40  ;;  %v2017_v34 = vpop.permute.xlu0 %2016 }
 0x240   : > { %v1810_v26 = vpack.c.bf16 %v1802_v30, %v1801_v59 }
 0x241   : > { %v1809_v46 = vpack.c.bf16 %v1800_v12, %v1799_v49 }
 0x242   : > { %v4486_v55 = vpop.permute.xlu1 %2058 }
 0x243   : > { %3587 = vmatprep.mubr.bf16.mxu0 %v1809_v46  ;;  %v2024_v56 = vpop.permute.xlu0 %2023 }
 0x246   : > { %3588 = vmatmul.mubr.bf16.gmra.mxu0 %v1810_v26  ;;  %v4490_v2 = vpop.permute.xlu1 %2065 }
 0x247   : > { %v2031_v54 = vpop.permute.xlu0 %2030 }
 0x2ee   : > { %v3577_v40 = vpop.f32.mrf.mxu0 }
 0x2ef   : > { %v1922_v13 = vadd.f32 %v3577_v40, %v4479_v10  ;;  %v4495_v40 = vpop.permute.xlu1 %2072 }
 0x2f0   : > { %v1913_v7 = vpop.f32.mrf.mxu0 }
 0x2f1   : > { %v2090_v38 = vmul.f32 %v1996_v27, %v1922_v13  ;;  %v1914_v47 = vadd.f32 %v1913_v7, %v4479_v10 }
 0x2f2   : > { %v3578_v53 = vpop.f32.mrf.mxu0 }
 0x2f3   : > { %v2116_v60 = vrot.slane %v2090_v38, 4  ;;  %v2088_v15 = vmul.f32 %v1982_v39, %v1914_v47  ;;  %v1925_v32 = vadd.f32 %v3578_v53, %v4479_v10 }
 0x2f4   : > { %v1916_v48 = vpop.f32.mrf.mxu0 }
 0x2f5   : > { %v2117_v51 = vadd.f32 %v2116_v60, %v2090_v38  ;;  %v2104_v20 = vrot.slane %v2088_v15, 4  ;;  %v2091_v41 = vmul.f32 %v2003_v3, %v1925_v32  ;;  %v1917_v52 = vadd.f32 %v1916_v48, %v4479_v10 }
 0x2f6   : > { %v3581_v58 = vpop.f32.mrf.mxu0 }
 0x2f7   : > { %v2118_v42 = vrot.slane %v2117_v51, 2  ;;  %v2105_v61 = vadd.f32 %v2104_v20, %v2088_v15  ;;  %v2122_v0 = vrot.slane %v2091_v41, 4  ;;  %v2089_v1 = vmul.f32 %v1989_v24, %v1917_v52 }
 0x2f8   : > { %v1938_v17 = vadd.f32 %v3581_v58, %v4479_v10  ;;  %v1929_v6 = vpop.f32.mrf.mxu0 }
 0x2f9   : > { %v2106_v35 = vrot.slane %v2105_v61, 2  ;;  %v2123_v50 = vadd.f32 %v2122_v0, %v2091_v41  ;;  %v2110_v45 = vrot.slane %v2089_v1, 4  ;;  %v1930_v5 = vadd.f32 %v1929_v6, %v4479_v10 }
 0x2fa   : > { %v2094_v4 = vmul.f32 %v2024_v56, %v1938_v17  ;;  %v3582_v19 = vpop.f32.mrf.mxu0  ;;  %v2119_v21 = vadd.f32 %v2118_v42, %v2117_v51 }
 0x2fb   : > { %v2107_v62 = vadd.f32 %v2106_v35, %v2105_v61  ;;  %v2124_v63 = vrot.slane %v2123_v50, 2  ;;  %v2111_v25 = vadd.f32 %v2110_v45, %v2089_v1  ;;  %v2092_v16 = vmul.f32 %v2010_v31, %v1930_v5  ;;  %v2080_v35 = vpop.permute.xlu1 %2079 }
 0x2fc   : > { %v2140_v9 = vrot.slane %v2094_v4, 4  ;;  %v1941_v57 = vadd.f32 %v3582_v19, %v4479_v10  ;;  %v1932_v37 = vpop.f32.mrf.mxu0  ;;  %v2120_v24 = vrot.slane %v2119_v21, 1 }
 0x2fd   : > { %v2125_v49 = vadd.f32 %v2124_v63, %v2123_v50  ;;  %v2112_v12 = vrot.slane %v2111_v25, 2  ;;  %v2128_v46 = vrot.slane %v2092_v16, 4  ;;  %v1933_v26 = vadd.f32 %v1932_v37, %v4479_v10 }
 0x2fe   : > { %v2141_v30 = vadd.f32 %v2140_v9, %v2094_v4  ;;  %v2095_v59 = vmul.f32 %v2031_v54, %v1941_v57  ;;  %v3585_v39 = vpop.f32.mrf.mxu0  ;;  %v2108_v27 = vrot.slane %v2107_v62, 1  ;;  %v2121_v20 = vadd.f32 %v2120_v24, %v2119_v21  ;;  %v4508_v9 = vld [vmem:[%s3978_s19] sm:$0xff]   ;;  %s551_s19 = scalar_lea.vmem %s4839_s4, %s3189_s28 }
 0x2ff   : > { %v2113_v3 = vadd.f32 %v2112_v12, %v2111_v25  ;;  %v2126_v13 = vrot.slane %v2125_v49, 1  ;;  %v2129_v38 = vadd.f32 %v2128_v46, %v2092_v16  ;;  %v2093_v31 = vmul.f32 %v2017_v34, %v1933_v26 }
 0x300   : > { %v2142_v7 = vrot.slane %v2141_v30, 2  ;;  %v1945_v47 = vpop.f32.mrf.mxu0  ;;  %v2146_v53 = vrot.slane %v2095_v59, 4  ;;  %v1954_v60 = vadd.f32 %v3585_v39, %v4479_v10  ;;  %v2109_v56 = vadd.f32 %v2108_v27, %v2107_v62 }
 0x301   : > { %v2114_v15 = vrot.slane %v2113_v3, 1  ;;  %v2130_v32 = vrot.slane %v2129_v38, 2  ;;  %v2134_v48 = vrot.slane %v2093_v31, 4  ;;  %v1946_v52 = vadd.f32 %v1945_v47, %v4479_v10 }
 0x302   : > { %v3586_v51 = vpop.f32.mrf.mxu0  ;;  %v2098_v41 = vmul.f32 %v4481_v11, %v1954_v60  ;;  %v2127_v58 = vadd.f32 %v2126_v13, %v2125_v49  ;;  %v2143_v42 = vadd.f32 %v2142_v7, %v2141_v30  ;;  %v2147_v1 = vadd.f32 %v2146_v53, %v2095_v59  ;;  %v2087_v13 = vpop.permute.xlu1 %2086 }
 0x303   : > { %v2135_v61 = vadd.f32 %v2134_v48, %v2093_v31  ;;  %v2096_v17 = vmul.f32 %v4468_v43, %v1946_v52  ;;  %v1957_v6 = vadd.f32 %v3586_v51, %v4479_v10  ;;  %v2115_v50 = vadd.f32 %v2114_v15, %v2113_v3 }
 0x304   : > { %v1948_v0 = vpop.f32.mrf.mxu0  ;;  %v2164_v34 = vrot.slane %v2098_v41, 4  ;;  %v2131_v45 = vadd.f32 %v2130_v32, %v2129_v38  ;;  %v4502_v5 = vmul.f32 0.033333335, %v2121_v20  ;;  %v2200_v63 = vmul.f32 0.033333335, %v2109_v56 }
 0x305   : > { %v2136_v4 = vrot.slane %v2135_v61, 2  ;;  %v2152_v21 = vrot.slane %v2096_v17, 4  ;;  %v2099_v62 = vmul.f32 %v4486_v55, %v1957_v6  ;;  %v4505_v25 = vmul.f32 0.033333335, %v2127_v58 }
 0x306   : > { %v3589_v11 = vpop.f32.mrf.mxu0  ;;  %v2165_v19 = vadd.f32 %v2164_v34, %v2098_v41  ;;  %v2144_v54 = vrot.slane %v2143_v42, 1  ;;  %v2216_v16 = vunpack.c.l.bf16 %v4508_v9  ;;  %v2148_v57 = vrot.slane %v2147_v1, 2 }
 0x307   : > { %v2153_v37 = vadd.f32 %v2152_v21, %v2096_v17  ;;  %v2170_v49 = vrot.slane %v2099_v62, 4  ;;  %v1949_v12 = vadd.f32 %v1948_v0, %v4479_v10  ;;  %v2201_v30 = vmul.f32 0.033333335, %v2115_v50 }
 0x308   : > { %v1961_v43 = vpop.f32.mrf.mxu0  ;;  %v2132_v46 = vrot.slane %v2131_v45, 1  ;;  %v2137_v59 = vadd.f32 %v2136_v4, %v2135_v61  ;;  %v1970_v26 = vadd.f32 %v3589_v11, %v4479_v10  ;;  %v2166_v39 = vrot.slane %v2165_v19, 2 }
 0x309   : > { %v2154_v24 = vrot.slane %v2153_v37, 2  ;;  %v2171_v27 = vadd.f32 %v2170_v49, %v2099_v62  ;;  %v2097_v3 = vmul.f32 %v4470_v29, %v1949_v12  ;;  %v2145_v7 = vadd.f32 %v2144_v54, %v2143_v42 }
 0x30a   : > { %v3590_v55 = vpop.f32.mrf.mxu0  ;;  %v2102_v38 = vmul.f32 %v2080_v35, %v1970_v26  ;;  %v1962_v31 = vadd.f32 %v1961_v43, %v4479_v10  ;;  %v2149_v53 = vadd.f32 %v2148_v57, %v2147_v1  ;;  %v2133_v51 = vadd.f32 %v2132_v46, %v2131_v45 }
 0x30b   : > { %v1973_v47 = vadd.f32 %v3590_v55, %v4479_v10  ;;  %v2155_v60 = vadd.f32 %v2154_v24, %v2153_v37  ;;  %v2172_v15 = vrot.slane %v2171_v27, 2  ;;  %v2158_v32 = vrot.slane %v2097_v3, 4 }
 0x30c   : > { %v1964_v48 = vpop.f32.mrf.mxu0  ;;  %v2188_v20 = vrot.slane %v2102_v38, 4  ;;  %v2100_v41 = vmul.f32 %v4490_v2, %v1962_v31  ;;  %v2138_v56 = vrot.slane %v2137_v59, 1  ;;  %v2167_v29 = vadd.f32 %v2166_v39, %v2165_v19 }
 0x30d   : > { %v2103_v52 = vmul.f32 %v2087_v13, %v1973_v47  ;;  %v2173_v58 = vadd.f32 %v2172_v15, %v2171_v27  ;;  %v2159_v42 = vadd.f32 %v2158_v32, %v2097_v3  ;;  %v1965_v17 = vadd.f32 %v1964_v48, %v4479_v10 }
 0x30e   : > { %v2189_v61 = vadd.f32 %v2188_v20, %v2102_v38  ;;  %v2176_v0 = vrot.slane %v2100_v41, 4  ;;  %v2235_v1 = vsel %vm2234_vm1, %v2201_v30, %v2200_v63  ;;  %v2150_v6 = vrot.slane %v2149_v53, 1 }
 0x30f   : > { %v2194_v34 = vrot.slane %v2103_v52, 4  ;;  %v2156_v35 = vrot.slane %v2155_v60, 1  ;;  %v2160_v50 = vrot.slane %v2159_v42, 2  ;;  %v2101_v11 = vmul.f32 %v4495_v40, %v1965_v17 }
 0x310   : > { %v2190_v45 = vrot.slane %v2189_v61, 2  ;;  %v2177_v2 = vadd.f32 %v2176_v0, %v2100_v41  ;;  %v2204_v19 = vmul.f32 0.033333335, %v2133_v51  ;;  %v2139_v21 = vadd.f32 %v2138_v56, %v2137_v59 }
 0x311   : > { %v2195_v4 = vadd.f32 %v2194_v34, %v2103_v52  ;;  %v2168_v62 = vrot.slane %v2167_v29, 1  ;;  %v2161_v54 = vadd.f32 %v2160_v50, %v2159_v42  ;;  %v2174_v43 = vrot.slane %v2173_v58, 1 }
 0x312   : > { %v2178_v57 = vrot.slane %v2177_v2, 2  ;;  %v2182_v10 = vrot.slane %v2101_v11, 4  ;;  %v2157_v49 = vadd.f32 %v2156_v35, %v2155_v60  ;;  %v2191_v63 = vadd.f32 %v2190_v45, %v2189_v61 }
 0x313   : > { %v2196_v37 = vrot.slane %v2195_v4, 2  ;;  %v2162_v12 = vrot.slane %v2161_v54, 1  ;;  %v2237_v30 = vsel %vm2236_vm2, %v4502_v5, %v2235_v1  ;;  %v2151_v46 = vadd.f32 %v2150_v6, %v2149_v53 }
 0x314   : > { %v2179_v26 = vadd.f32 %v2178_v57, %v2177_v2  ;;  %v2183_v39 = vadd.f32 %v2182_v10, %v2101_v11  ;;  %v2205_v24 = vmul.f32 0.033333335, %v2139_v21  ;;  %v2169_v40 = vadd.f32 %v2168_v62, %v2167_v29 }
 0x315   : > { %v2197_v55 = vadd.f32 %v2196_v37, %v2195_v4  ;;  %v2163_v27 = vadd.f32 %v2162_v12, %v2161_v54  ;;  %v2239_v59 = vsel %vm2238_vm3, %v4505_v25, %v2237_v30  ;;  %v2206_v3 = vmul.f32 0.033333335, %v2145_v7  ;;  %v3667_v12 = vld [vmem:[%s4846_s11 + $0xec] ss:$16 sps:$4 sm:$0xff]   ;;  %v3665_v30 = vld [vmem:[%s4846_s11 + $0xe8] ss:$16 sps:$4 sm:$0xff]  }
 0x316   : > { %v2175_v13 = vadd.f32 %v2174_v43, %v2173_v58  ;;  %v2180_v38 = vrot.slane %v2179_v26, 1  ;;  %v2184_v31 = vrot.slane %v2183_v39, 2  ;;  %v2208_v47 = vmul.f32 0.033333335, %v2157_v49  ;;  %v3664_v49 = vld [vmem:[%s4846_s11 + $0xe4] ss:$16 sps:$4 sm:$0xff]   ;;  %2552 = vmatprep.subr.bf16.mxu0 %v3667_v12 }
 0x317   : > { %v2209_v60 = vmul.f32 0.033333335, %v2163_v27  ;;  %v2192_v15 = vrot.slane %v2191_v63, 1  ;;  %v2198_v5 = vrot.slane %v2197_v55, 1  ;;  %v2241_v48 = vsel %vm2240_vm4, %v2204_v19, %v2239_v59  ;;  %2509 = vmatprep.subr.bf16.mxu1 %v3664_v49  ;;  %2553 = vmatpush1.bf16.msra.mxu0 %v3665_v30  ;;  %v3674_v27 = vld [vmem:[%s4846_s11 + $0xa0] ss:$16 sps:$4 sm:$0xff]  }
 0x318   : > { %v2181_v32 = vadd.f32 %v2180_v38, %v2179_v26  ;;  %v2185_v53 = vadd.f32 %v2184_v31, %v2183_v39  ;;  %v2210_v51 = vmul.f32 0.033333335, %v2169_v40  ;;  %v2207_v41 = vmul.f32 0.033333335, %v2151_v46  ;;  %v3670_v46 = vld [vmem:[%s4846_s11 + $0xc4] ss:$16 sps:$4 sm:$0xff]  }
 0x319   : > { %v2248_v20 = vsel %vm2234_vm1, %v2209_v60, %v2208_v47  ;;  %v2243_v52 = vsel %vm2242_vm5, %v2205_v24, %v2241_v48  ;;  %v2211_v25 = vmul.f32 0.033333335, %v2175_v13  ;;  %v2193_v29 = vadd.f32 %v2192_v15, %v2191_v63  ;;  %v3662_v63 = vld [vmem:[%s4846_s11 + $0xe0] ss:$16 sps:$4 sm:$0xff]   ;;  %v3673_v26 = vld [vmem:[%s4846_s11 + $0xcc] ss:$16 sps:$4 sm:$0xff]  }
 0x31a   : > { %v2186_v7 = vrot.slane %v2185_v53, 1  ;;  %v2245_v56 = vsel %vm2244_vm6, %v2206_v3, %v2243_v52  ;;  %v2212_v58 = vmul.f32 0.033333335, %v2181_v32  ;;  %v2249_v61 = vsel %vm2236_vm2, %v2210_v51, %v2248_v20  ;;  %2510 = vmatpush1.bf16.msra.mxu1 %v3662_v63  ;;  %v3671_v39 = vld [vmem:[%s4846_s11 + $0xc8] ss:$16 sps:$4 sm:$0xff]   ;;  %2554 = vmatprep.subr.bf16.mxu0 %v3673_v26  ;;  %v3716_v49 = vld [vmem:[%s4848_s13 + $0x30] sm:$0xff]  }
 0x31b   : > { %v2247_v42 = vsel %vm2246_vm7, %v2207_v41, %v2245_v56  ;;  %v2199_v0 = vadd.f32 %v2198_v5, %v2197_v55  ;;  %v2250_v1 = vsel %vm2238_vm3, %v2211_v25, %v2249_v61  ;;  %v2214_v35 = vmul.f32 0.033333335, %v2193_v29  ;;  %v3668_v55 = vld [vmem:[%s4846_s11 + $0xc0] ss:$16 sps:$4 sm:$0xff]   ;;  %2511 = vmatprep.subr.bf16.mxu1 %v3670_v46  ;;  %2555 = vmatpush1.bf16.msra.mxu0 %v3671_v39  ;;  %v3676_v24 = vld [vmem:[%s4846_s11 + $0xa4] ss:$16 sps:$4 sm:$0xff]  }
 0x31c   : > { %v2187_v34 = vadd.f32 %v2186_v7, %v2185_v53  ;;  %v2257_v17 = vadd.f32 %v2247_v42, %v2216_v16  ;;  %v2217_v50 = vunpack.c.h.bf16 %v4508_v9  ;;  %v2251_v45 = vsel %vm2240_vm4, %v2212_v58, %v2250_v1  ;;  %v3679_v40 = vld [vmem:[%s4846_s11 + $0xac] ss:$16 sps:$4 sm:$0xff]   ;;  %v3677_v59 = vld [vmem:[%s4846_s11 + $0xa8] ss:$16 sps:$4 sm:$0xff]   ;;  %v3682_v3 = vld [vmem:[%s4846_s11 + $0x84] ss:$16 sps:$4 sm:$0xff]  }
 0x31d   : > { %v2215_v2 = vmul.f32 0.033333335, %v2199_v0  ;;  %2556 = vmatprep.subr.bf16.mxu0 %v3679_v40  ;;  %v3685_v13 = vld [vmem:[%s4846_s11 + $0x8c] ss:$16 sps:$4 sm:$0xff]   ;;  %v3680_v38 = vld [vmem:[%s4846_s11 + $0x80] ss:$16 sps:$4 sm:$0xff]  }
 0x31e   : > { %v2213_v6 = vmul.f32 0.033333335, %v2187_v34  ;;  %2259 = vadd.xlane.f32.xlu0 %v2257_v17  ;;  %2512 = vmatpush1.bf16.msra.mxu1 %v3668_v55  ;;  %v3683_v31 = vld [vmem:[%s4846_s11 + $0x88] ss:$16 sps:$4 sm:$0xff]   ;;  %v3686_v47 = vld [vmem:[%s4846_s11 + $0x60] ss:$16 sps:$4 sm:$0xff]  }
 0x31f   : > { %2513 = vmatprep.subr.bf16.mxu1 %v3676_v24  ;;  %2557 = vmatpush1.bf16.msra.mxu0 %v3677_v59  ;;  %v3688_v60 = vld [vmem:[%s4846_s11 + $0x64] ss:$16 sps:$4 sm:$0xff]   ;;  %v3689_v15 = vld [vmem:[%s4846_s11 + $0x68] ss:$16 sps:$4 sm:$0xff]   ;;  %v3691_v32 = vld [vmem:[%s4846_s11 + $0x6c] ss:$16 sps:$4 sm:$0xff]  }
 0x320   : > { %v2252_v4 = vsel %vm2242_vm5, %v2213_v6, %v2251_v45  ;;  %2558 = vmatprep.subr.bf16.mxu0 %v3685_v13  ;;  %v3694_v5 = vld [vmem:[%s4846_s11 + $0x44] ss:$16 sps:$4 sm:$0xff]   ;;  %v3697_v53 = vld [vmem:[%s4846_s11 + $0x4c] ss:$16 sps:$4 sm:$0xff]   ;;  %v3692_v48 = vld [vmem:[%s4846_s11 + $0x40] ss:$16 sps:$4 sm:$0xff]  }
 0x321   : > { %v2253_v11 = vsel %vm2244_vm6, %v2214_v35, %v2252_v4  ;;  %v3695_v51 = vld [vmem:[%s4846_s11 + $0x48] ss:$16 sps:$4 sm:$0xff]   ;;  %v3700_v20 = vld [vmem:[%s4846_s11 + $0x24] ss:$16 sps:$4 sm:$0xff]   ;;  %v3703_v41 = vld [vmem:[%s4846_s11 + $0x2c] ss:$16 sps:$4 sm:$0xff]   ;;  %v2291_v4 = vrot.slane %v4475_v44, %v4316_v36 }
 0x322   : > { %v2254_v19 = vsel %vm2246_vm7, %v2215_v2, %v2253_v11  ;;  %2514 = vmatpush1.bf16.msra.mxu1 %v3674_v27  ;;  %v3845_v52 = vmov 0   ;;  %v3698_v25 = vld [vmem:[%s4846_s11 + $0x20] ss:$16 sps:$4 sm:$0xff]   ;;  %v3701_v7 = vld [vmem:[%s4846_s11 + $0x28] ss:$16 sps:$4 sm:$0xff]  }
 0x323   : > { %v2258_v21 = vadd.f32 %v2254_v19, %v2217_v50  ;;  %2515 = vmatprep.subr.bf16.mxu1 %v3682_v3  ;;  %2559 = vmatpush1.bf16.msra.mxu0 %v3683_v31  ;;  %v3706_v56 = vld [vmem:[%s4846_s11 + $0x4] ss:$16 sps:$4 sm:$0xff]   ;;  %v3709_v29 = vld [vmem:[%s4846_s11 + $0xc] ss:$16 sps:$4 sm:$0xff]   ;;  %v3704_v58 = vld [vmem:[%s4846_s11] ss:$16 sps:$4 sm:$0xff]   ;;  %v2285_v50 = vrot.slane %v4475_v44, %v4311_v8 }
 0x324   : > { %2560 = vmatprep.subr.bf16.mxu0 %v3691_v32  ;;  %2541 = vmatprep.mubr.bf16.mxu1 %v3845_v52  ;;  %v3707_v42 = vld [vmem:[%s4846_s11 + $0x8] ss:$16 sps:$4 sm:$0xff]   ;;  %v3717_v12 = vld [vmem:[%s4848_s13 + $0xb0] sm:$0xff]   ;;  %v3722_v55 = vld [vmem:[%s4848_s13 + $0x60] sm:$0xff]  }
 0x325   : > { %2261 = vadd.xlane.f32.xlu1 %v2258_v21  ;;  %2584 = vmatprep.mubr.bf16.mxu0 %v3845_v52  ;;  %v3711_v36 = vld [vmem:[%s4848_s13 + $0xf8] sm:$0xff]   ;;  %v3718_v63 = vld [vmem:[%s4848_s13 + $0x68] sm:$0xff]   ;;  %v3723_v39 = vld [vmem:[%s4848_s13 + $0xe0] sm:$0xff]  }
 0x326   : > { %2516 = vmatpush1.bf16.msra.mxu1 %v3680_v38  ;;  %3603 = vset.pattern.permute.xlu1 %v3845_v52  ;;  %v3719_v30 = vld [vmem:[%s4848_s13 + $0xe8] sm:$0xff]   ;;  %v3724_v24 = vld [vmem:[%s4848_s13 + $0x20] sm:$0xff]   ;;  %v3726_v27 = vld [vmem:[%s4848_s13 + $0x58] sm:$0xff]  }
 0x327   : > { %2517 = vmatprep.subr.bf16.mxu1 %v3688_v60  ;;  %2561 = vmatpush1.bf16.msra.mxu0 %v3689_v15  ;;  %v3720_v46 = vld [vmem:[%s4848_s13 + $0x28] sm:$0xff]   ;;  %v3725_v40 = vld [vmem:[%s4848_s13 + $0xa0] sm:$0xff]   ;;  %v3727_v59 = vld [vmem:[%s4848_s13 + $0xd8] sm:$0xff]  }
 0x328   : > { %2562 = vmatprep.subr.bf16.mxu0 %v3697_v53  ;;  %3604 = vset.pattern.permute.xlu0 %v3845_v52  ;;  %v3721_v26 = vld [vmem:[%s4848_s13 + $0xa8] sm:$0xff]   ;;  %v3728_v3 = vld [vmem:[%s4848_s13 + $0x18] sm:$0xff]   ;;  %v3730_v38 = vld [vmem:[%s4848_s13 + $0x50] sm:$0xff]  }
 0x329   : > { %v3729_v13 = vld [vmem:[%s4848_s13 + $0x98] sm:$0xff]   ;;  %v3731_v31 = vld [vmem:[%s4848_s13 + $0xd0] sm:$0xff]   ;;  %v3734_v15 = vld [vmem:[%s4848_s13 + $0x48] sm:$0xff]  }
 0x32a   : > { %2518 = vmatpush1.bf16.msra.mxu1 %v3686_v47  ;;  %v3732_v47 = vld [vmem:[%s4848_s13 + $0x10] sm:$0xff]   ;;  %v3735_v32 = vld [vmem:[%s4848_s13 + $0xc8] sm:$0xff]   ;;  %v2327_v52 = vld [vmem:[%s4847_s12] sm:$0xf] }
 0x32b   : > { %2519 = vmatprep.subr.bf16.mxu1 %v3694_v5  ;;  %2563 = vmatpush1.bf16.msra.mxu0 %v3695_v51  ;;  %v3733_v60 = vld [vmem:[%s4848_s13 + $0x90] sm:$0xff]   ;;  %v3736_v5 = vld [vmem:[%s4848_s13 + $0x8] sm:$0xff]   ;;  %v3739_v51 = vld [vmem:[%s4848_s13 + $0xc0] sm:$0xff]  }
 0x32c   : > { %2564 = vmatprep.subr.bf16.mxu0 %v3703_v41  ;;  %v3737_v53 = vld [vmem:[%s4848_s13 + $0x88] sm:$0xff]   ;;  %v3741_v41 = vld [vmem:[%s4848_s13 + $0x80] sm:$0xff]  }
 0x32e   : > { %2520 = vmatpush1.bf16.msra.mxu1 %v3692_v48  ;;  %v3738_v48 = vld [vmem:[%s4848_s13 + $0x40] sm:$0xff]  }
 0x32f   : > { %2521 = vmatprep.subr.bf16.mxu1 %v3700_v20  ;;  %2565 = vmatpush1.bf16.msra.mxu0 %v3701_v7  ;;  %v3740_v20 = vld [vmem:[%s4848_s13] sm:$0xff]   ;;  %v2340_v7 = vrot.slane %v2327_v52, %v4306_v23 }
 0x330   : > { %2566 = vmatprep.subr.bf16.mxu0 %v3709_v29  ;;  %v2344_v29 = vrot.slane %v2327_v52, %v4311_v8 }
 0x332   : > { %2522 = vmatpush1.bf16.msra.mxu1 %v3698_v25  ;;  %v2332_v25 = vrot.slane %v2327_v52, %v4075_v14 }
 0x333   : > { %2523 = vmatprep.subr.bf16.mxu1 %v3706_v56  ;;  %2567 = vmatpush1.bf16.msra.mxu0 %v3707_v42  ;;  %v2336_v56 = vrot.slane %v2327_v52, %v4300_v18 }
 0x334   : > { %3421 = vmatprep.subr.bf16.mxu0 %v3711_v36 }
 0x336   : > { %2524 = vmatpush1.bf16.msra.mxu1 %v3704_v58 }
 0x3a7   : > { %v2260_v62 = vpop.xlane.xlu0 %2259 }
 0x3a8   : > { %v2264_v16 = vmul.f32 0.0078125, %v2260_v62 }
 0x3aa   : > { %v4538_v54 = vsub.f32 %v2257_v17, %v2264_v16 }
 0x3ac   : > { %v2268_v43 = vmul.f32 %v4538_v54, %v4538_v54 }
 0x3ae   : > { %2270 = vadd.xlane.f32.xlu0 %v2268_v43  ;;  %v2262_v9 = vpop.xlane.xlu1 %2261 }
 0x3af   : > { %v2265_v57 = vmul.f32 0.0078125, %v2262_v9  ;;  %v3712_v9 = vld [vmem:[%s4848_s13 + $0x38] sm:$0xff]  }
 0x3b1   : > { %v4542_v37 = vsub.f32 %v2258_v21, %v2265_v57  ;;  %v3713_v57 = vld [vmem:[%s4848_s13 + $0xb8] sm:$0xff]  }
 0x3b3   : > { %v2269_v10 = vmul.f32 %v4542_v37, %v4542_v37 }
 0x3b5   : > { %2272 = vadd.xlane.f32.xlu0 %v2269_v10  ;;  %v3715_v10 = vld [vmem:[%s4848_s13 + $0xf0] sm:$0xff]  }
 0x437   : > { %v2271_v61 = vpop.xlane.xlu0 %2270 }
 0x438   : > { %v2274_v0 = vmul.f32 0.0078125, %v2271_v61 }
 0x43a   : > { %v2276_v34 = vadd.f32 1e-05, %v2274_v0 }
 0x43c   : > { %3807 = vrsqrt.f32 %v2276_v34 }
 0x43e   : > { %v2273_v17 = vpop.xlane.xlu0 %2272 }
 0x43f   : > { %v2275_v1 = vmul.f32 0.0078125, %v2273_v17 }
 0x441   : > { %v2277_v6 = vadd.f32 1e-05, %v2275_v1 }
 0x443   : > { %3809 = vrsqrt.f32 %v2277_v6 }
 0x449   : > { %v3808_v35 = vpop.eup %3807 }
 0x44a   : > { %v2280_v45 = vmul.f32 %v3808_v35, %v4538_v54  ;;  %v3710_v54 = vld [vmem:[%s4848_s13 + $0x78] sm:$0xff]  }
 0x44b   : > { %3399 = vmatprep.subr.bf16.mxu1 %v3710_v54 }
 0x44c   : > { %v2286_v19 = vmul.f32 %v2285_v50, %v2280_v45 }
 0x44e   : > { %v4648_v62 = vadd.f32 %v2291_v4, %v2286_v19 }
 0x450   : > { %v3810_v2 = vpop.eup %3809 }
 0x451   : > { %v2281_v11 = vmul.f32 %v3810_v2, %v4542_v37  ;;  %v3714_v37 = vld [vmem:[%s4848_s13 + $0x70] sm:$0xff]  }
 0x453   : > { %v2287_v21 = vmul.f32 %v2285_v50, %v2281_v11 }
 0x455   : > { %v4650_v16 = vadd.f32 %v2291_v4, %v2287_v21 }
 0x457   : > { %v2294_v43 = vpack.c.bf16 %v4650_v16, %v4648_v62 }
 0x459   : > { %2542 = vmatmul.mubr.bf16.vlgmr.msra.gmra.mxu1 %v2294_v43  ;;  %2585 = vmatmul.mubr.bf16.vlgmr.msra.gmra.mxu0 %v2294_v43 }
 0x45a   : > { %3400 = vmatpush3.bf16.msra.mxu1 %v3712_v9  ;;  %3422 = vmatpush3.bf16.msra.mxu0 %v3713_v57 }
 0x45b   : > { %3401 = vmatprep.subr.bf16.mxu1 %v3714_v37  ;;  %3423 = vmatprep.subr.bf16.mxu0 %v3715_v10 }
 0x45e   : > { %3402 = vmatpush3.bf16.msra.mxu1 %v3716_v49  ;;  %3424 = vmatpush3.bf16.msra.mxu0 %v3717_v12 }
 0x45f   : > { %3403 = vmatprep.subr.bf16.mxu1 %v3718_v63  ;;  %3425 = vmatprep.subr.bf16.mxu0 %v3719_v30 }
 0x462   : > { %3404 = vmatpush3.bf16.msra.mxu1 %v3720_v46  ;;  %3426 = vmatpush3.bf16.msra.mxu0 %v3721_v26 }
 0x463   : > { %3405 = vmatprep.subr.bf16.mxu1 %v3722_v55  ;;  %3427 = vmatprep.subr.bf16.mxu0 %v3723_v39 }
 0x466   : > { %3406 = vmatpush3.bf16.msra.mxu1 %v3724_v24  ;;  %3428 = vmatpush3.bf16.msra.mxu0 %v3725_v40 }
 0x467   : > { %3407 = vmatprep.subr.bf16.mxu1 %v3726_v27  ;;  %3429 = vmatprep.subr.bf16.mxu0 %v3727_v59 }
 0x46a   : > { %3408 = vmatpush3.bf16.msra.mxu1 %v3728_v3  ;;  %3430 = vmatpush3.bf16.msra.mxu0 %v3729_v13 }
 0x46b   : > { %3409 = vmatprep.subr.bf16.mxu1 %v3730_v38  ;;  %3431 = vmatprep.subr.bf16.mxu0 %v3731_v31 }
 0x46e   : > { %3410 = vmatpush3.bf16.msra.mxu1 %v3732_v47  ;;  %3432 = vmatpush3.bf16.msra.mxu0 %v3733_v60 }
 0x46f   : > { %3411 = vmatprep.subr.bf16.mxu1 %v3734_v15  ;;  %3433 = vmatprep.subr.bf16.mxu0 %v3735_v32 }
 0x472   : > { %3412 = vmatpush3.bf16.msra.mxu1 %v3736_v5  ;;  %3434 = vmatpush3.bf16.msra.mxu0 %v3737_v53 }
 0x473   : > { %3413 = vmatprep.subr.bf16.mxu1 %v3738_v48  ;;  %3435 = vmatprep.subr.bf16.mxu0 %v3739_v51 }
 0x476   : > { %3414 = vmatpush3.bf16.msra.mxu1 %v3740_v20  ;;  %3436 = vmatpush3.bf16.msra.mxu0 %v3741_v41 }
 0x519   : > { %v2543_v58 = vpop.f32.mrf.mxu1  ;;  %v2586_v42 = vpop.f32.mrf.mxu0 }
 0x51a   : > { %v4757_v61 = vadd.f32 %v2543_v58, %v2332_v25  ;;  %v4759_v0 = vadd.f32 %v2586_v42, %v2340_v7 }
 0x51b   : > { %v2545_v34 = vpop.f32.mrf.mxu1  ;;  %v2588_v17 = vpop.f32.mrf.mxu0 }
 0x51c   : > { %v2595_v1 = vmul.f32 %v4757_v61, %v4757_v61  ;;  %v2597_v14 = vmul.f32 %v4759_v0, %v4759_v0  ;;  %v4765_v6 = vadd.f32 %v2545_v34, %v2336_v56  ;;  %v4767_v23 = vadd.f32 %v2588_v17, %v2344_v29 }
 0x51d   : > { %v2547_v18 = vpop.f32.mrf.mxu1  ;;  %v2590_v8 = vpop.f32.mrf.mxu0 }
 0x51e   : > { %v2603_v35 = vmul.f32 %v2595_v1, %v4757_v61  ;;  %v2605_v50 = vmul.f32 %v2597_v14, %v4759_v0  ;;  %v2596_v45 = vmul.f32 %v4765_v6, %v4765_v6  ;;  %v2598_v2 = vmul.f32 %v4767_v23, %v4767_v23 }
 0x51f   : > { %v4775_v4 = vadd.f32 %v2547_v18, %v2332_v25  ;;  %v4777_v11 = vadd.f32 %v2590_v8, %v2340_v7  ;;  %v2549_v19 = vpop.f32.mrf.mxu1  ;;  %v2592_v21 = vpop.f32.mrf.mxu0 }
 0x520   : > { %v2611_v43 = vmul.f32 0.044715, %v2603_v35  ;;  %v2613_v54 = vmul.f32 0.044715, %v2605_v50  ;;  %v2604_v36 = vmul.f32 %v2596_v45, %v4765_v6  ;;  %v2606_v9 = vmul.f32 %v2598_v2, %v4767_v23 }
 0x521   : > { %v2599_v57 = vmul.f32 %v4775_v4, %v4775_v4  ;;  %v2601_v37 = vmul.f32 %v4777_v11, %v4777_v11  ;;  %v4785_v10 = vadd.f32 %v2549_v19, %v2336_v56  ;;  %v4787_v49 = vadd.f32 %v2592_v21, %v2344_v29 }
 0x522   : > { %v2619_v12 = vadd.f32 %v2611_v43, %v4757_v61  ;;  %v2621_v63 = vadd.f32 %v2613_v54, %v4759_v0  ;;  %v2612_v30 = vmul.f32 0.044715, %v2604_v36  ;;  %v2614_v46 = vmul.f32 0.044715, %v2606_v9 }
 0x523   : > { %v2607_v26 = vmul.f32 %v2599_v57, %v4775_v4  ;;  %v2609_v55 = vmul.f32 %v2601_v37, %v4777_v11  ;;  %v2600_v39 = vmul.f32 %v4785_v10, %v4785_v10  ;;  %v2602_v24 = vmul.f32 %v4787_v49, %v4787_v49 }
 0x524   : > { %v2627_v40 = vmul.f32 0.7978846, %v2619_v12  ;;  %v2629_v27 = vmul.f32 0.7978846, %v2621_v63  ;;  %v2620_v59 = vadd.f32 %v2612_v30, %v4765_v6  ;;  %v2622_v3 = vadd.f32 %v2614_v46, %v4767_v23 }
 0x525   : > { %v2615_v13 = vmul.f32 0.044715, %v2607_v26  ;;  %v2617_v38 = vmul.f32 0.044715, %v2609_v55  ;;  %v2608_v31 = vmul.f32 %v2600_v39, %v4785_v10  ;;  %v2610_v47 = vmul.f32 %v2602_v24, %v4787_v49 }
 0x526   : > { %3811 = vtanh.f32 %v2627_v40  ;;  %v2628_v60 = vmul.f32 0.7978846, %v2620_v59  ;;  %v2630_v15 = vmul.f32 0.7978846, %v2622_v3 }
 0x527   : > { %3813 = vtanh.f32 %v2629_v27  ;;  %v2623_v32 = vadd.f32 %v2615_v13, %v4775_v4  ;;  %v2625_v5 = vadd.f32 %v2617_v38, %v4777_v11  ;;  %v2616_v53 = vmul.f32 0.044715, %v2608_v31 }
 0x528   : > { %3815 = vtanh.f32 %v2628_v60  ;;  %v2618_v48 = vmul.f32 0.044715, %v2610_v47 }
 0x529   : > { %3817 = vtanh.f32 %v2630_v15  ;;  %v2631_v51 = vmul.f32 0.7978846, %v2623_v32  ;;  %v2633_v20 = vmul.f32 0.7978846, %v2625_v5  ;;  %v2624_v41 = vadd.f32 %v2616_v53, %v4785_v10 }
 0x52a   : > { %v2626_v52 = vadd.f32 %v2618_v48, %v4787_v49 }
 0x52b   : > { %3819 = vtanh.f32 %v2631_v51  ;;  %v2632_v25 = vmul.f32 0.7978846, %v2624_v41 }
 0x52c   : > { %3821 = vtanh.f32 %v2633_v20  ;;  %v2634_v7 = vmul.f32 0.7978846, %v2626_v52 }
 0x52d   : > { %3823 = vtanh.f32 %v2632_v25 }
 0x52e   : > { %3825 = vtanh.f32 %v2634_v7 }
 0x533   : > { %v3812_v56 = vpop.eup %3811 }
 0x534   : > { %v3814_v29 = vpop.eup %3813  ;;  %v2643_v1 = vadd.f32 1.0, %v3812_v56 }
 0x535   : > { %v3816_v58 = vpop.eup %3815  ;;  %v2645_v8 = vadd.f32 1.0, %v3814_v29 }
 0x536   : > { %v3818_v42 = vpop.eup %3817  ;;  %v2644_v34 = vadd.f32 1.0, %v3816_v58  ;;  %v2651_v54 = vmul.f32 0.5, %v2643_v1 }
 0x537   : > { %v2646_v14 = vadd.f32 1.0, %v3818_v42  ;;  %v2653_v37 = vmul.f32 0.5, %v2645_v8  ;;  %v3050_v42 = vld [vmem:[%s551_s19 + $0x8] sm:$0xff]  ;;  %v3833_v8 = vld [vmem:[%s4845_s10] sm:$0xff] }
 0x538   : > { %v3820_v17 = vpop.eup %3819  ;;  %v2652_v43 = vmul.f32 0.5, %v2644_v34  ;;  %v2659_v39 = vmul.f32 %v2651_v54, %v4757_v61 }
 0x539   : > { %v3822_v18 = vpop.eup %3821  ;;  %v2647_v35 = vadd.f32 1.0, %v3820_v17  ;;  %v2654_v57 = vmul.f32 0.5, %v2646_v14  ;;  %v2661_v27 = vmul.f32 %v2653_v37, %v4759_v0 }
 0x53a   : > { %v3824_v50 = vpop.eup %3823  ;;  %v2649_v45 = vadd.f32 1.0, %v3822_v18  ;;  %v2660_v26 = vmul.f32 %v2652_v43, %v4765_v6 }
 0x53b   : > { %v3826_v2 = vpop.eup %3825  ;;  %v2655_v19 = vmul.f32 0.5, %v2647_v35  ;;  %v2648_v21 = vadd.f32 1.0, %v3824_v50  ;;  %v2662_v24 = vmul.f32 %v2654_v57, %v4767_v23  ;;  %v3040_v35 = vrot.slane %v3833_v8, %v4326_v33 }
 0x53c   : > { %v2657_v36 = vmul.f32 0.5, %v2649_v45  ;;  %v2650_v9 = vadd.f32 1.0, %v3826_v2 }
 0x53d   : > { %v2656_v12 = vmul.f32 0.5, %v2648_v21  ;;  %v2663_v63 = vmul.f32 %v2655_v19, %v4775_v4  ;;  %v3046_v19 = vrot.slane %v3833_v8, %v4331_v22 }
 0x53e   : > { %v2658_v30 = vmul.f32 0.5, %v2650_v9  ;;  %v2665_v46 = vmul.f32 %v2657_v36, %v4777_v11 }
 0x53f   : > { %v2664_v55 = vmul.f32 %v2656_v12, %v4785_v10  ;;  %v2667_v13 = vpack.c.bf16 %v2663_v63, %v2659_v39  ;;  %v2738_v10 = vrot.slane %v4475_v44, %v4321_v28 }
 0x540   : > { %v2666_v40 = vmul.f32 %v2658_v30, %v4787_v49  ;;  %v2669_v4 = vpack.c.bf16 %v2665_v46, %v2661_v27 }
 0x541   : > { %v2668_v59 = vpack.c.bf16 %v2664_v55, %v2660_v26 }
 0x542   : > { %v2670_v3 = vpack.c.bf16 %v2666_v40, %v2662_v24 }
 0x543   : > { %2963 = vmatprep.mubr.bf16.mxu1 %v2668_v59 }
 0x544   : > { %3004 = vmatprep.mubr.bf16.mxu0 %v2670_v3  ;;  %2964 = vmatmul.mubr.bf16.vlgmr.msra.gmra.mxu1 %v2667_v13 }
 0x545   : > { %3005 = vmatmul.mubr.bf16.vlgmr.msra.gmra.mxu0 %v2669_v4 }
 0x604   : > { %v3415_v11 = vpop.f32.mrf.mxu1 }
 0x605   : > { %v3437_v6 = vpop.f32.mrf.mxu0 }
 0x606   : > { %v3416_v61 = vpop.f32.mrf.mxu1 }
 0x607   : > { %v3417_v38 = vadd.f32 %v3416_v61, %v3415_v11  ;;  %v3438_v23 = vpop.f32.mrf.mxu0 }
 0x608   : > { %v3418_v31 = vpop.f32.mrf.mxu1  ;;  %v3439_v47 = vadd.f32 %v3438_v23, %v3437_v6 }
 0x609   : > { %v2966_v49 = vadd.f32 %v3417_v38, %v2738_v10  ;;  %v3440_v0 = vpop.f32.mrf.mxu0 }
 0x60a   : > { %v3419_v60 = vpop.f32.mrf.mxu1 }
 0x60b   : > { %v3007_v15 = vadd.f32 %v3439_v47, %v2966_v49  ;;  %v3420_v32 = vadd.f32 %v3419_v60, %v3418_v31  ;;  %v3441_v5 = vpop.f32.mrf.mxu0 }
 0x60c   : > { %v3442_v48 = vadd.f32 %v3441_v5, %v3440_v0 }
 0x60d   : > { %v2969_v53 = vadd.f32 %v3420_v32, %v2738_v10  ;;  %v3013_v51 = vadd.f32 %v3007_v15, %v4648_v62  ;;  %v3049_v62 = vld [vmem:[%s551_s19] sm:$0xff] }
 0x60f   : > { %v3010_v20 = vadd.f32 %v3442_v48, %v2969_v53  ;;  %3015 = vadd.xlane.f32.xlu1 %v3013_v51 }
 0x611   : > { %v3014_v28 = vadd.f32 %v3010_v20, %v4650_v16 }
 0x613   : > { %3017 = vadd.xlane.f32.xlu0 %v3014_v28 }
 0x698   : > { %v3016_v44 = vpop.xlane.xlu1 %3015 }
 0x699   : > { %v3019_v41 = vmul.f32 0.0078125, %v3016_v44 }
 0x69b   : > { %v3021_v52 = vsub.f32 %v3013_v51, %v3019_v41 }
 0x69c   : > { %v3018_v25 = vpop.xlane.xlu0 %3017 }
 0x69d   : > { %v3020_v7 = vmul.f32 0.0078125, %v3018_v25  ;;  %v3023_v56 = vmul.f32 %v3021_v52, %v3021_v52 }
 0x69f   : > { %v3022_v29 = vsub.f32 %v3014_v28, %v3020_v7  ;;  %3025 = vadd.xlane.f32.xlu1 %v3023_v56 }
 0x6a1   : > { %v3024_v58 = vmul.f32 %v3022_v29, %v3022_v29 }
 0x6a3   : > { %3027 = vadd.xlane.f32.xlu0 %v3024_v58 }
 0x6b0   : > { %3053 = vperm.xlu1 %3603, %v3049_v62  }
 0x6b9   : > { %3058 = vperm.xlu0 %3604, %v3050_v42  }
 0x728   : > { %v3026_v16 = vpop.xlane.xlu1 %3025 }
 0x729   : > { %v3029_v34 = vmul.f32 0.0078125, %v3026_v16 }
 0x72b   : > { %v3031_v17 = vadd.f32 1e-05, %v3029_v34 }
 0x72c   : > { %v3028_v1 = vpop.xlane.xlu0 %3027  ;;  %v3054_v9 = vpop.permute.xlu1 %3053 }
 0x72d   : > { %3827 = vrsqrt.f32 %v3031_v17  ;;  %v3030_v14 = vmul.f32 0.0078125, %v3028_v1 }
 0x72f   : > { %v3032_v18 = vadd.f32 1e-05, %v3030_v14 }
 0x731   : > { %3829 = vrsqrt.f32 %v3032_v18 }
 0x734   : > { %v3059_v57 = vpop.permute.xlu0 %3058 }
 0x73a   : > { %v3828_v50 = vpop.eup %3827 }
 0x73b   : > { %v3035_v45 = vmul.f32 %v3828_v50, %v3021_v52 }
 0x73d   : > { %v3041_v2 = vmul.f32 %v3040_v35, %v3035_v45 }
 0x73e   : > { %v3830_v21 = vpop.eup %3829 }
 0x73f   : > { %v3036_v43 = vmul.f32 %v3830_v21, %v3022_v29  ;;  %v3047_v54 = vadd.f32 %v3046_v19, %v3041_v2 }
 0x741   : > { %v3042_v36 = vmul.f32 %v3040_v35, %v3036_v43  ;;  %v3061_v12 = vmul.f32 %v3054_v9, %v3047_v54 }
 0x743   : > { %v3048_v37 = vadd.f32 %v3046_v19, %v3042_v36 }
 0x745   : > { %v3062_v63 = vmul.f32 %v3059_v57, %v3048_v37 }
 0x747   : > { %v3324_v33 = vpack.c.bf16 %v3062_v63, %v3061_v12 }
 0x749   : > { %3325 = vst [vmem:[%s557_s26] sm:$0xff] %v3324_v33  }
 0x74a PF: > { %s24_s29 = sadd.s32 1, %s3840_s29  }
 0x74b   : > { %p21_p5 = scmp.ge.s32.totalorder %s24_s29, 4  }
 0x74d   :  { %23 = sbr.rel (!%p21_p5) target bundleno = 1 (0x1), region = 118 }

// kernel: protein_mpnn_forward.13
= control target key start
LH: loop header
LB: loop body
LE: loop exit
PB: predicated region body
PF: predicated region fallthrough
CT: control target
= control target key end

     0   :  { %s2834_s30 = smov 0   ;;  %s3571_s0 = inlined_call_operand.vmem [shape: bf16[32,128], index: 0, kind: input, shape index: {}]   ;;  %s3572_s1 = inlined_call_operand.vmem [shape: bf16[256,128], index: 1, kind: input, shape index: {}]   ;;  %s3573_s2 = inlined_call_operand.vmem [shape: bf16[256,128], index: 2, kind: input, shape index: {}]   ;;  %s3574_s3 = inlined_call_operand.vmem [shape: bf16[128,128], index: 3, kind: input, shape index: {}]   ;;  %s3575_s4 = inlined_call_operand.vmem [shape: bf16[128,128], index: 4, kind: input, shape index: {}]   ;;  %s3576_s5 = inlined_call_operand.vmem [shape: bf16[128,128], index: 5, kind: input, shape index: {}]   ;;  %s3577_s6 = inlined_call_operand.vmem [shape: bf16[128,128], index: 6, kind: input, shape index: {}]   ;;  %s3578_s7 = inlined_call_operand.vmem [shape: bf16[128,128], index: 7, kind: input, shape index: {}]   ;;  %s3579_s8 = inlined_call_operand.vmem [shape: f32[8,128], index: 8, kind: input, shape index: {}]   ;;  %s3580_s9 = inlined_call_operand.vmem [shape: bf16[256,128], index: 9, kind: output, shape index: {}]  }
   0x1 LB: > { %s2204_s10 = sadd.s32 4294967295, %s2779_s30   ;;  %p2208_p0 = scmp.ge.s32.totalorder %s2779_s30, 1  ;;  %s2779_s30 = sphi %s2834_s30, %s19_s30  }
   0x2   : > { %p310_p1 = scmp.lt.s32.totalorder %s2779_s30, 3 }
   0x4   : > { %p311_p2 = pnand %p2208_p0, %p310_p1 }
   0x5   : > { %s2209_s15 = sshll.u32 (!%p311_p2), %s2204_s10, 1  ;;  %s2211_s18 = sshll.u32 (!%p311_p2), %s2204_s10, 4 }
   0x6   : > { %314 = sbr.rel (%p311_p2) target bundleno = 1097 (0x449), region = 56  ;;  %p357_p3 = scmp.lt.s32.totalorder (!%p311_p2), %s2209_s15, 3 }
   0x7   : > { %p363_p4 = scmp.lt.s32.totalorder (!%p311_p2), %s2211_s18, 31 }
   0xb   : > { %v2603_v0 = vld [vmem:[%s3574_s3 + $0x38] sm:$0xff]   ;;  %v2781_v1 = vmov 0.0   ;;  %v2604_v2 = vld [vmem:[%s3574_s3 + $0x30] sm:$0xff]   ;;  %vm2782_vm0 = vmmov 0   ;;  %s3582_s15 = smov (!%p357_p3, %s2209_s15), 3  ;;  %v2605_v3 = vld [vmem:[%s3574_s3 + $0x28] sm:$0xff]   ;;  %v951_v56 = vlaneseq }
   0xc   : > { %2428 = vmatprep.subr.bf16.mxu0 %v2781_v1  ;;  %2444 = vmatprep.mubr.msk.bf16.mxu0 %vm2782_vm0, %v2781_v1  ;;  %v2610_v4 = vld [vmem:[%s3576_s5 + $0x38] sm:$0xff]   ;;  %s2210_s21 = sshll.u32 %s3582_s15, 2  ;;  %v2612_v5 = vld [vmem:[%s3576_s5 + $0x30] sm:$0xff]   ;;  %v2606_v6 = vld [vmem:[%s3574_s3 + $0x20] sm:$0xff]   ;;  %s3584_s18 = smov (!%p363_p4, %s2211_s18), 31 }
   0xd   : > { %2429 = vmatpush3.bf16.msra.mxu0 %v2603_v0  ;;  %2448 = vmatprep.subr.bf16.mxu1 %v2610_v4  ;;  %s2860_s26 = scalar_lea.vmem %s3571_s0, %s2210_s21  ;;  %v2615_v7 = vld [vmem:[%s3576_s5 + $0x28] sm:$0xff]   ;;  %v2607_v8 = vld [vmem:[%s3574_s3 + $0x18] sm:$0xff]   ;;  %v2617_v9 = vld [vmem:[%s3576_s5 + $0x20] sm:$0xff]   ;;  %s2877_s17 = sshll.u32 %s3584_s18, 2  ;;  %v2783_v54 = vmov 1966171168  }
   0xe   : > { %2430 = vmatprep.subr.bf16.mxu0 %v2781_v1  ;;  %2449 = vmatpush3.bf16.msra.mxu1 %v2610_v4  ;;  %v2608_v10 = vld [vmem:[%s3574_s3 + $0x10] sm:$0xff]   ;;  %v2619_v11 = vld [vmem:[%s3576_s5 + $0x18] sm:$0xff]   ;;  %s2886_s23 = scalar_lea.vmem %s3573_s2, %s2877_s17  ;;  %v2609_v12 = vld [vmem:[%s3574_s3 + $0x8] sm:$0xff]   ;;  %s2902_s12 = scalar_lea.vmem %s3572_s1, %s2877_s17  ;;  %v949_v55 = vunpack.c.l.s4 %v2783_v54  ;;  %v2974_v60 = vshrl.u32 %v951_v56, 7 }
   0xf   : > { %2450 = vmatprep.subr.bf16.mxu1 %v2612_v5  ;;  %v2621_v13 = vld [vmem:[%s3576_s5 + $0x10] sm:$0xff]   ;;  %v2627_v14 = vld [vmem:[%s2886_s23] sm:$0xff]   ;;  %v2614_v16 = vld [vmem:[%s3575_s4 + $0x38] sm:$0xff]   ;;  %s3519_s19 = scalar_lea.vmem %s3580_s9, %s2877_s17 }
  0x10   : > { %v2611_v15 = vld [vmem:[%s3574_s3] sm:$0xff]   ;;  %v2623_v17 = vld [vmem:[%s3576_s5 + $0x8] sm:$0xff]   ;;  %2464 = vmatprep.mubr.bf16.mxu1 %v2627_v14  ;;  %v2616_v20 = vld [vmem:[%s3575_s4 + $0x30] sm:$0xff]   ;;  %v950_v59 = vunpack.c.0.s8 %v949_v55  ;;  %v2987_v14 = vsub.s32 0, %v2974_v60 }
  0x11   : > { %2431 = vmatpush3.bf16.msra.mxu0 %v2604_v2  ;;  %v2613_v18 = vld [vmem:[%s2860_s26] sm:$0xff]   ;;  %v2618_v22 = vld [vmem:[%s3575_s4 + $0x28] sm:$0xff]   ;;  %v2632_v24 = vld [vmem:[%s2886_s23 + $0x10] sm:$0xff]  }
  0x12   : > { %2432 = vmatprep.subr.bf16.mxu0 %v2781_v1  ;;  %2451 = vmatpush3.bf16.msra.mxu1 %v2612_v5  ;;  %v382_v19 = vld [vmem:[%s2902_s12] sm:$0xff]   ;;  %v2628_v23 = vld [vmem:[%s2886_s23 + $0x8] sm:$0xff]   ;;  %v2622_v26 = vld [vmem:[%s3575_s4 + $0x18] sm:$0xff]   ;;  %v953_v63 = vsub.s32 %v950_v59, %v2974_v60 }
  0x13   : > { %2452 = vmatprep.subr.bf16.mxu1 %v2615_v7  ;;  %v2625_v21 = vld [vmem:[%s3576_s5] sm:$0xff]   ;;  %v2633_v27 = vld [vmem:[%s2886_s23 + $0x18] sm:$0xff]   ;;  %v2624_v29 = vld [vmem:[%s3575_s4 + $0x10] sm:$0xff]  }
  0x14   : > { %v2620_v25 = vld [vmem:[%s3575_s4 + $0x20] sm:$0xff]   ;;  %v2626_v30 = vld [vmem:[%s3575_s4 + $0x8] sm:$0xff]   ;;  %v2640_v32 = vld [vmem:[%s2886_s23 + $0x30] sm:$0xff]  }
  0x15   : > { %2433 = vmatpush3.bf16.msra.mxu0 %v2605_v3  ;;  %v2636_v28 = vld [vmem:[%s2886_s23 + $0x20] sm:$0xff]   ;;  %v2637_v31 = vld [vmem:[%s2886_s23 + $0x28] sm:$0xff]   ;;  %v386_v35 = vld [vmem:[%s2902_s12 + $0x10] sm:$0xff]  }
  0x16   : > { %2434 = vmatprep.subr.bf16.mxu0 %v2781_v1  ;;  %2453 = vmatpush3.bf16.msra.mxu1 %v2615_v7  ;;  %v2629_v33 = vld [vmem:[%s3575_s4] sm:$0xff]   ;;  %v384_v34 = vld [vmem:[%s2902_s12 + $0x8] sm:$0xff]   ;;  %v2641_v36 = vld [vmem:[%s2886_s23 + $0x38] sm:$0xff]  }
  0x17   : > { %2454 = vmatprep.subr.bf16.mxu1 %v2617_v9  ;;  %v388_v37 = vld [vmem:[%s2902_s12 + $0x18] sm:$0xff]   ;;  %v390_v38 = vld [vmem:[%s2902_s12 + $0x20] sm:$0xff]   ;;  %v392_v39 = vld [vmem:[%s2902_s12 + $0x28] sm:$0xff]  }
  0x18   : > { %v394_v40 = vld [vmem:[%s2902_s12 + $0x30] sm:$0xff]   ;;  %v396_v41 = vld [vmem:[%s2902_s12 + $0x38] sm:$0xff]   ;;  %v2646_v44 = vld [vmem:[%s3577_s6 + $0x28] sm:$0xff]  }
  0x19   : > { %2435 = vmatpush3.bf16.msra.mxu0 %v2606_v6  ;;  %v2644_v42 = vld [vmem:[%s3577_s6 + $0x38] sm:$0xff]   ;;  %v2645_v43 = vld [vmem:[%s3577_s6 + $0x30] sm:$0xff]   ;;  %v2647_v45 = vld [vmem:[%s3577_s6 + $0x20] sm:$0xff]  }
  0x1a   : > { %2436 = vmatprep.subr.bf16.mxu0 %v2781_v1  ;;  %2455 = vmatpush3.bf16.msra.mxu1 %v2617_v9  ;;  %v2648_v46 = vld [vmem:[%s3577_s6 + $0x18] sm:$0xff]   ;;  %v2649_v47 = vld [vmem:[%s3577_s6 + $0x10] sm:$0xff]   ;;  %v2650_v48 = vld [vmem:[%s3577_s6 + $0x8] sm:$0xff]  }
  0x1b   : > { %2456 = vmatprep.subr.bf16.mxu1 %v2619_v11  ;;  %v2651_v49 = vld [vmem:[%s3577_s6] sm:$0xff]  }
  0x1d   : > { %2437 = vmatpush3.bf16.msra.mxu0 %v2607_v8 }
  0x1e   : > { %2438 = vmatprep.subr.bf16.mxu0 %v2781_v1  ;;  %2457 = vmatpush3.bf16.msra.mxu1 %v2619_v11 }
  0x1f   : > { %2458 = vmatprep.subr.bf16.mxu1 %v2621_v13 }
  0x21   : > { %2439 = vmatpush3.bf16.msra.mxu0 %v2608_v10 }
  0x22   : > { %2440 = vmatprep.subr.bf16.mxu0 %v2781_v1  ;;  %2459 = vmatpush3.bf16.msra.mxu1 %v2621_v13  ;;  %v2984_v13 = vld [vmem:[%s3579_s8] sm:$0xff] }
  0x23   : > { %2460 = vmatprep.subr.bf16.mxu1 %v2623_v17 }
  0x25   : > { %2441 = vmatpush3.bf16.msra.mxu0 %v2609_v12 }
  0x26   : > { %2442 = vmatprep.subr.bf16.mxu0 %v2781_v1  ;;  %2461 = vmatpush3.bf16.msra.mxu1 %v2623_v17 }
  0x27   : > { %2462 = vmatprep.subr.bf16.mxu1 %v2625_v21 }
  0x29   : > { %2443 = vmatpush3.bf16.msra.mxu0 %v2611_v15 }
  0x2a   : > { %2480 = vmatprep.subr.bf16.mxu0 %v2614_v16  ;;  %2463 = vmatpush3.bf16.msra.mxu1 %v2625_v21 }
  0x2b   : > { %2512 = vmatprep.subr.bf16.mxu1 %v2644_v42 }
  0x2c   : > { %2445 = vmatmul.mubr.bf16.vlgmr.msra.gmra.mxu0 %v2613_v18 }
  0x2d   : > { %2481 = vmatpush3.bf16.msra.mxu0 %v2614_v16  ;;  %2496 = vmatprep.mubr.bf16.mxu0 %v382_v19 }
  0x2e   : > { %2482 = vmatprep.subr.bf16.mxu0 %v2616_v20  ;;  %2465 = vmatmul.mubr.bf16.vlgmr.msra.gmra.mxu1 %v2628_v23 }
  0x2f   : > { %2468 = vmatprep.mubr.bf16.mxu1 %v2632_v24  ;;  %2513 = vmatpush3.bf16.msra.mxu1 %v2644_v42 }
  0x30   : > { %2514 = vmatprep.subr.bf16.mxu1 %v2645_v43 }
  0x31   : > { %2483 = vmatpush3.bf16.msra.mxu0 %v2616_v20 }
  0x32   : > { %2484 = vmatprep.subr.bf16.mxu0 %v2618_v22 }
  0x33   : > { %2515 = vmatpush3.bf16.msra.mxu1 %v2645_v43 }
  0x34   : > { %2516 = vmatprep.subr.bf16.mxu1 %v2646_v44 }
  0x35   : > { %2485 = vmatpush3.bf16.msra.mxu0 %v2618_v22  ;;  %v2998_v22 = vrot.slane %v2984_v13, %v2987_v14 }
  0x36   : > { %2486 = vmatprep.subr.bf16.mxu0 %v2620_v25  ;;  %2469 = vmatmul.mubr.bf16.gmra.mxu1 %v2633_v27 }
  0x37   : > { %2472 = vmatprep.mubr.bf16.mxu1 %v2636_v28  ;;  %2517 = vmatpush3.bf16.msra.mxu1 %v2646_v44 }
  0x38   : > { %2518 = vmatprep.subr.bf16.mxu1 %v2647_v45 }
  0x39   : > { %2487 = vmatpush3.bf16.msra.mxu0 %v2620_v25 }
  0x3a   : > { %2488 = vmatprep.subr.bf16.mxu0 %v2622_v26 }
  0x3b   : > { %2519 = vmatpush3.bf16.msra.mxu1 %v2647_v45 }
  0x3c   : > { %2520 = vmatprep.subr.bf16.mxu1 %v2648_v46 }
  0x3d   : > { %2489 = vmatpush3.bf16.msra.mxu0 %v2622_v26 }
  0x3e   : > { %2490 = vmatprep.subr.bf16.mxu0 %v2624_v29  ;;  %2473 = vmatmul.mubr.bf16.gmra.mxu1 %v2637_v31 }
  0x3f   : > { %2476 = vmatprep.mubr.bf16.mxu1 %v2640_v32  ;;  %2521 = vmatpush3.bf16.msra.mxu1 %v2648_v46 }
  0x40   : > { %2522 = vmatprep.subr.bf16.mxu1 %v2649_v47 }
  0x41   : > { %2491 = vmatpush3.bf16.msra.mxu0 %v2624_v29 }
  0x42   : > { %2492 = vmatprep.subr.bf16.mxu0 %v2626_v30 }
  0x43   : > { %2523 = vmatpush3.bf16.msra.mxu1 %v2649_v47 }
  0x44   : > { %2524 = vmatprep.subr.bf16.mxu1 %v2650_v48 }
  0x45   : > { %2493 = vmatpush3.bf16.msra.mxu0 %v2626_v30 }
  0x46   : > { %2494 = vmatprep.subr.bf16.mxu0 %v2629_v33  ;;  %2477 = vmatmul.mubr.bf16.gmra.mxu1 %v2641_v36 }
  0x47   : > { %2525 = vmatpush3.bf16.msra.mxu1 %v2650_v48 }
  0x48   : > { %2526 = vmatprep.subr.bf16.mxu1 %v2651_v49 }
  0x49   : > { %2495 = vmatpush3.bf16.msra.mxu0 %v2629_v33 }
  0x4b   : > { %2527 = vmatpush3.bf16.msra.mxu1 %v2651_v49 }
  0x4c   : > { %2497 = vmatmul.mubr.bf16.vlgmr.msra.gmra.mxu0 %v384_v34 }
  0x4d   : > { %2500 = vmatprep.mubr.bf16.mxu0 %v386_v35 }
  0x54   : > { %2501 = vmatmul.mubr.bf16.gmra.mxu0 %v388_v37 }
  0x55   : > { %2504 = vmatprep.mubr.bf16.mxu0 %v390_v38 }
  0x5c   : > { %2505 = vmatmul.mubr.bf16.gmra.mxu0 %v392_v39 }
  0x5d   : > { %2508 = vmatprep.mubr.bf16.mxu0 %v394_v40 }
  0x64   : > { %2509 = vmatmul.mubr.bf16.gmra.mxu0 %v396_v41 }
  0xec   : > { %v504_v50 = vpop.f32.mrf.mxu0 }
  0xed   : > { %v947_v1 = vcombine.high %v504_v50, %v504_v50  ;;  %v954_v2 = vrot.slane %v504_v50, %v953_v63 }
  0xee   : > { %v2446_v51 = vpop.f32.mrf.mxu0  ;;  %v2466_v57 = vpop.f32.mrf.mxu1 }
  0xef   : > { %v961_v4 = vrot.slane %v947_v1, %v953_v63  ;;  %v962_v5 = vcombine.high %v954_v2, %v954_v2  ;;  %v970_v6 = vrot.slane %v954_v2, %v953_v63 }
  0xf0   : > { %v507_v52 = vpop.f32.mrf.mxu0  ;;  %v689_v58 = vpop.f32.mrf.mxu1 }
  0xf1   : > { %v963_v8 = vcombine.high %v961_v4, %v961_v4  ;;  %v984_v9 = vrot.slane %v962_v5, %v953_v63  ;;  %v992_v10 = vcombine.high %v970_v6, %v970_v6  ;;  %v996_v11 = vcombine.high %v507_v52, %v507_v52 }
  0xf2   : > { %v2447_v53 = vpop.f32.mrf.mxu0  ;;  %v2467_v61 = vpop.f32.mrf.mxu1  ;;  %v1003_v12 = vrot.slane %v507_v52, %v953_v63  ;;  %v2991_v16 = vrot.slane %v961_v4, %v953_v63  ;;  %v1048_v29 = vrot.slane %v970_v6, %v2987_v14 }
  0xf3   : > { %v2993_v17 = vrot.slane %v963_v8, %v953_v63  ;;  %v994_v19 = vcombine.high %v984_v9, %v984_v9  ;;  %v1056_v21 = vrot.slane %v992_v10, %v2987_v14  ;;  %v1010_v23 = vrot.slane %v996_v11, %v953_v63 }
  0xf4   : > { %v692_v62 = vpop.f32.mrf.mxu1  ;;  %v1011_v24 = vcombine.high %v1003_v12, %v1003_v12  ;;  %v3000_v25 = vrot.slane %v1003_v12, %v953_v63  ;;  %v1052_v33 = vrot.slane %v984_v9, %v2987_v14  ;;  %v993_v34 = vcombine.high %v2991_v16, %v2991_v16 }
  0xf5   : > { %v1060_v32 = vrot.slane %v994_v19, %v2987_v14  ;;  %v995_v35 = vcombine.high %v2993_v17, %v2993_v17  ;;  %v1064_v39 = vrot.slane %v2991_v16, %v2987_v14  ;;  %v1012_v40 = vcombine.high %v1010_v23, %v1010_v23 }
  0xf6   : > { %v2470_v0 = vpop.f32.mrf.mxu1  ;;  %v3016_v41 = vrot.slane %v1011_v24, %v953_v63  ;;  %v1041_v42 = vcombine.high %v3000_v25, %v3000_v25  ;;  %v1068_v44 = vrot.slane %v2993_v17, %v2987_v14  ;;  %v3027_v50 = vrot.slane %v1010_v23, %v953_v63 }
  0xf7   : > { %v1072_v52 = vrot.slane %v993_v34, %v2987_v14  ;;  %v1076_v53 = vrot.slane %v995_v35, %v2987_v14  ;;  %v1080_v54 = vrot.slane %v3000_v25, %v2987_v14  ;;  %v3039_v59 = vrot.slane %v1012_v40, %v953_v63 }
  0xf8   : > { %v2977_v3 = vpop.f32.mrf.mxu1  ;;  %v1088_v1 = vrot.slane %v1041_v42, %v2987_v14  ;;  %v1043_v2 = vcombine.high %v3016_v41, %v3016_v41  ;;  %v1084_v11 = vrot.slane %v3016_v41, %v2987_v14  ;;  %v1042_v12 = vcombine.high %v3027_v50, %v3027_v50 }
  0xf9   : > { %v1096_v19 = vrot.slane %v3027_v50, %v2987_v14 }
  0xfa   : > { %v2979_v7 = vpop.f32.mrf.mxu1  ;;  %v1092_v24 = vrot.slane %v1043_v2, %v2987_v14 }
  0xfc   : > { %v2989_v15 = vpop.f32.mrf.mxu1 }
  0xfe   : > { %v3003_v30 = vpop.f32.mrf.mxu1 }
 0x100   : > { %v721_v49 = vpop.f32.mrf.mxu1 }
 0x102   : > { %v2475_v9 = vpop.f32.mrf.mxu1 }
 0x10c   : > { %v2498_v18 = vpop.f32.mrf.mxu0 }
 0x10d   : > { %v891_v20 = vadd.f32 %v2498_v18, %v2466_v57 }
 0x10e   : > { %v882_v26 = vpop.f32.mrf.mxu0 }
 0x10f   : > { %v1127_v27 = vadd.f32 %v1056_v21, %v891_v20  ;;  %v883_v28 = vadd.f32 %v882_v26, %v689_v58 }
 0x110   : > { %v2499_v31 = vpop.f32.mrf.mxu0 }
 0x111   : > { %v3012_v36 = vadd.f32 %v2998_v22, %v1127_v27  ;;  %v1125_v37 = vadd.f32 %v1048_v29, %v883_v28  ;;  %v894_v38 = vadd.f32 %v2499_v31, %v2467_v61  ;;  %v724_v29 = vpop.f32.mrf.mxu1 }
 0x112   : > { %v885_v43 = vpop.f32.mrf.mxu0 }
 0x113   : > { %v1163_v45 = vmul.f32 %v3012_v36, %v3012_v36  ;;  %v3025_v46 = vadd.f32 %v2998_v22, %v1125_v37  ;;  %v1128_v47 = vadd.f32 %v1060_v32, %v894_v38  ;;  %v886_v48 = vadd.f32 %v885_v43, %v692_v62 }
 0x114   : > { %v2502_v51 = vpop.f32.mrf.mxu0  ;;  %v1044_v38 = vcombine.high %v3039_v59, %v3039_v59 }
 0x115   : > { %v1179_v55 = vmul.f32 %v1163_v45, %v3012_v36  ;;  %v1161_v56 = vmul.f32 %v3025_v46, %v3025_v46  ;;  %v3037_v57 = vadd.f32 %v2998_v22, %v1128_v47  ;;  %v1126_v58 = vadd.f32 %v1052_v33, %v886_v48 }
 0x116   : > { %v907_v61 = vadd.f32 %v2502_v51, %v2470_v0  ;;  %v898_v62 = vpop.f32.mrf.mxu0 }
 0x117   : > { %v1195_v4 = vmul.f32 0.044715, %v1179_v55  ;;  %v1177_v5 = vmul.f32 %v1161_v56, %v3025_v46  ;;  %v1164_v6 = vmul.f32 %v3037_v57, %v3037_v57  ;;  %v3048_v8 = vadd.f32 %v2998_v22, %v1126_v58 }
 0x118   : > { %v1131_v10 = vadd.f32 %v1072_v52, %v907_v61  ;;  %v899_v63 = vadd.f32 %v898_v62, %v2977_v3  ;;  %v2503_v0 = vpop.f32.mrf.mxu0 }
 0x119   : > { %v1211_v16 = vadd.f32 %v1195_v4, %v3012_v36  ;;  %v1180_v17 = vmul.f32 %v1164_v6, %v3037_v57  ;;  %v1162_v18 = vmul.f32 %v3048_v8, %v3048_v8  ;;  %v910_v21 = vadd.f32 %v2503_v0, %v2979_v7 }
 0x11a   : > { %v3062_v20 = vadd.f32 %v2998_v22, %v1131_v10  ;;  %v1129_v3 = vadd.f32 %v1064_v39, %v899_v63  ;;  %v901_v23 = vpop.f32.mrf.mxu0  ;;  %v1193_v26 = vmul.f32 0.044715, %v1177_v5  ;;  %v1100_v39 = vrot.slane %v3039_v59, %v2987_v14 }
 0x11b   : > { %v1227_v25 = vmul.f32 0.7978846, %v1211_v16  ;;  %v1196_v27 = vmul.f32 0.044715, %v1180_v17  ;;  %v1178_v28 = vmul.f32 %v1162_v18, %v3048_v8  ;;  %v1132_v33 = vadd.f32 %v1076_v53, %v910_v21 }
 0x11c   : > { %v1167_v31 = vmul.f32 %v3062_v20, %v3062_v20  ;;  %v3070_v32 = vadd.f32 %v2998_v22, %v1129_v3  ;;  %v902_v34 = vadd.f32 %v901_v23, %v2989_v15  ;;  %v2506_v35 = vpop.f32.mrf.mxu0  ;;  %v1209_v45 = vadd.f32 %v1193_v26, %v3025_v46 }
 0x11d   : > { %v1212_v7 = vadd.f32 %v1196_v27, %v3037_v57  ;;  %v923_v37 = vadd.f32 %v2506_v35, %v3003_v30  ;;  %v1194_v40 = vmul.f32 0.044715, %v1178_v28  ;;  %v3082_v42 = vadd.f32 %v2998_v22, %v1132_v33  ;;  %v2478_v30 = vpop.f32.mrf.mxu1 }
 0x11e   : > { %v1165_v41 = vmul.f32 %v3070_v32, %v3070_v32  ;;  %v1130_v43 = vadd.f32 %v1068_v44, %v902_v34  ;;  %v914_v15 = vpop.f32.mrf.mxu0  ;;  %2668 = vtanh.f32 %v1227_v25  ;;  %v1183_v52 = vmul.f32 %v1167_v31, %v3062_v20 }
 0x11f   : > { %v1228_v47 = vmul.f32 0.7978846, %v1212_v7  ;;  %v1135_v48 = vadd.f32 %v1088_v1, %v923_v37  ;;  %v915_v51 = vadd.f32 %v914_v15, %v721_v49  ;;  %v1168_v58 = vmul.f32 %v3082_v42, %v3082_v42  ;;  %v737_v10 = vpop.f32.mrf.mxu1 }
 0x120   : > { %v1181_v53 = vmul.f32 %v1165_v41, %v3070_v32  ;;  %v3088_v55 = vadd.f32 %v2998_v22, %v1130_v43  ;;  %v2507_v56 = vpop.f32.mrf.mxu0  ;;  %v1210_v49 = vadd.f32 %v1194_v40, %v3048_v8  ;;  %v1104_v4 = vrot.slane %v1042_v12, %v2987_v14 }
 0x121   : > { %v3093_v44 = vadd.f32 %v2998_v22, %v1135_v48  ;;  %v1133_v61 = vadd.f32 %v1080_v54, %v915_v51  ;;  %v926_v62 = vadd.f32 %v2507_v56, %v2475_v9  ;;  %2670 = vtanh.f32 %v1228_v47  ;;  %v2479_v34 = vpop.f32.mrf.mxu1 }
 0x122   : > { %v1166_v1 = vmul.f32 %v3088_v55, %v3088_v55  ;;  %v917_v2 = vpop.f32.mrf.mxu0  ;;  %v1199_v54 = vmul.f32 0.044715, %v1183_v52  ;;  %v1197_v9 = vmul.f32 0.044715, %v1181_v53  ;;  %v1225_v18 = vmul.f32 0.7978846, %v1209_v45 }
 0x123   : > { %v1171_v5 = vmul.f32 %v3093_v44, %v3093_v44  ;;  %v3102_v6 = vadd.f32 %v2998_v22, %v1133_v61  ;;  %v1136_v63 = vadd.f32 %v1092_v24, %v926_v62  ;;  %v918_v0 = vadd.f32 %v917_v2, %v724_v29 }
 0x124   : > { %v1182_v16 = vmul.f32 %v1166_v1, %v3088_v55  ;;  %v2510_v17 = vpop.f32.mrf.mxu0  ;;  %v1184_v3 = vmul.f32 %v1168_v58, %v3082_v42  ;;  %v1108_v27 = vrot.slane %v1044_v38, %v2987_v14  ;;  %v1226_v28 = vmul.f32 0.7978846, %v1210_v49  ;;  %v740_v58 = vpop.f32.mrf.mxu1 }
 0x125   : > { %v1169_v12 = vmul.f32 %v3102_v6, %v3102_v6  ;;  %v3109_v21 = vadd.f32 %v2998_v22, %v1136_v63  ;;  %v1134_v23 = vadd.f32 %v1084_v11, %v918_v0  ;;  %v1187_v25 = vmul.f32 %v1171_v5, %v3093_v44 }
 0x126   : > { %v939_v26 = vadd.f32 %v2510_v17, %v2478_v30  ;;  %v930_v24 = vpop.f32.mrf.mxu0  ;;  %v1198_v29 = vmul.f32 0.044715, %v1182_v16  ;;  %v1215_v7 = vadd.f32 %v1199_v54, %v3062_v20  ;;  %2672 = vtanh.f32 %v1225_v18 }
 0x127   : > { %v1185_v31 = vmul.f32 %v1169_v12, %v3102_v6  ;;  %v1172_v33 = vmul.f32 %v3109_v21, %v3109_v21  ;;  %v3117_v35 = vadd.f32 %v2998_v22, %v1134_v23  ;;  %v931_v37 = vadd.f32 %v930_v24, %v737_v10 }
 0x128   : > { %v1139_v11 = vadd.f32 %v1104_v4, %v939_v26  ;;  %v2511_v40 = vpop.f32.mrf.mxu0  ;;  %v1213_v41 = vadd.f32 %v1197_v9, %v3070_v32  ;;  %v1200_v38 = vmul.f32 0.044715, %v1184_v3  ;;  %2674 = vtanh.f32 %v1226_v28 }
 0x129   : > { %v1188_v43 = vmul.f32 %v1172_v33, %v3109_v21  ;;  %v1170_v15 = vmul.f32 %v3117_v35, %v3117_v35  ;;  %v1137_v47 = vadd.f32 %v1096_v19, %v931_v37  ;;  %v942_v48 = vadd.f32 %v2511_v40, %v2479_v34 }
 0x12a   : > { %v3125_v45 = vadd.f32 %v2998_v22, %v1139_v11  ;;  %v933_v30 = vpop.f32.mrf.mxu0  ;;  %v1214_v51 = vadd.f32 %v1198_v29, %v3088_v55  ;;  %v1203_v52 = vmul.f32 0.044715, %v1187_v25  ;;  %v1201_v53 = vmul.f32 0.044715, %v1185_v31 }
 0x12b   : > { %v1186_v56 = vmul.f32 %v1170_v15, %v3117_v35  ;;  %v3135_v62 = vadd.f32 %v2998_v22, %v1137_v47  ;;  %v1140_v49 = vadd.f32 %v1108_v27, %v942_v48  ;;  %v934_v1 = vadd.f32 %v933_v30, %v740_v58  ;;  %v2669_v50 = vpop.eup %2668 }
 0x12c   : > { %v1175_v61 = vmul.f32 %v3125_v45, %v3125_v45  ;;  %v1216_v19 = vadd.f32 %v1200_v38, %v3082_v42  ;;  %v1204_v2 = vmul.f32 0.044715, %v1188_v43  ;;  %v1229_v5 = vmul.f32 0.7978846, %v1213_v41 }
 0x12d   : > { %v1202_v4 = vmul.f32 0.044715, %v1186_v56  ;;  %v1173_v10 = vmul.f32 %v3135_v62, %v3135_v62  ;;  %v3141_v63 = vadd.f32 %v2998_v22, %v1140_v49  ;;  %v1138_v0 = vadd.f32 %v1100_v39, %v934_v1 }
 0x12e   : > { %v2671_v54 = vpop.eup %2670  ;;  %v1217_v9 = vadd.f32 %v1201_v53, %v3102_v6  ;;  %v1191_v17 = vmul.f32 %v1175_v61, %v3125_v45  ;;  %v1230_v18 = vmul.f32 0.7978846, %v1214_v51  ;;  %v1219_v3 = vadd.f32 %v1203_v52, %v3093_v44 }
 0x12f   : > { %v1218_v16 = vadd.f32 %v1202_v4, %v3117_v35  ;;  %v1189_v12 = vmul.f32 %v1173_v10, %v3135_v62  ;;  %v1176_v23 = vmul.f32 %v3141_v63, %v3141_v63  ;;  %v3154_v25 = vadd.f32 %v2998_v22, %v1138_v0 }
 0x130   : > { %v1220_v14 = vadd.f32 %v1204_v2, %v3109_v21  ;;  %2676 = vtanh.f32 %v1229_v5  ;;  %v1231_v59 = vmul.f32 0.7978846, %v1215_v7  ;;  %v1232_v39 = vmul.f32 0.7978846, %v1216_v19 }
 0x131   : > { %v1260_v26 = vadd.f32 1.0, %v2671_v54  ;;  %v1205_v24 = vmul.f32 0.044715, %v1189_v12  ;;  %v1192_v27 = vmul.f32 %v1176_v23, %v3141_v63  ;;  %v1174_v28 = vmul.f32 %v3154_v25, %v3154_v25 }
 0x132   : > { %v1207_v29 = vmul.f32 0.044715, %v1191_v17  ;;  %2678 = vtanh.f32 %v1230_v18  ;;  %v1233_v31 = vmul.f32 0.7978846, %v1217_v9  ;;  %v1234_v33 = vmul.f32 0.7978846, %v1218_v16 }
 0x133   : > { %v1221_v34 = vadd.f32 %v1205_v24, %v3135_v62  ;;  %v1208_v22 = vmul.f32 0.044715, %v1192_v27  ;;  %v1190_v11 = vmul.f32 %v1174_v28, %v3154_v25  ;;  %2680 = vtanh.f32 %v1231_v59  ;;  %v2673_v37 = vpop.eup %2672 }
 0x134   : > { %v1259_v7 = vadd.f32 1.0, %v2669_v50  ;;  %2682 = vtanh.f32 %v1232_v39  ;;  %v1235_v40 = vmul.f32 0.7978846, %v1219_v3  ;;  %v1236_v41 = vmul.f32 0.7978846, %v1220_v14 }
 0x135   : > { %v1224_v38 = vadd.f32 %v1208_v22, %v3141_v63  ;;  %v1206_v43 = vmul.f32 0.044715, %v1190_v11  ;;  %v1257_v15 = vadd.f32 1.0, %v2673_v37  ;;  %2684 = vtanh.f32 %v1233_v31  ;;  %v2675_v47 = vpop.eup %2674 }
 0x136   : > { %v1276_v48 = vmul.f32 0.5, %v1260_v26  ;;  %v1223_v30 = vadd.f32 %v1207_v29, %v3125_v45  ;;  %2686 = vtanh.f32 %v1234_v33  ;;  %v1237_v51 = vmul.f32 0.7978846, %v1221_v34 }
 0x137   : > { %v1222_v52 = vadd.f32 %v1206_v43, %v3154_v25  ;;  %v1258_v53 = vadd.f32 1.0, %v2675_v47  ;;  %v1273_v56 = vmul.f32 0.5, %v1257_v15  ;;  %2688 = vtanh.f32 %v1235_v40 }
 0x138   : > { %v1275_v58 = vmul.f32 0.5, %v1259_v7  ;;  %2690 = vtanh.f32 %v1236_v41  ;;  %v1240_v61 = vmul.f32 0.7978846, %v1224_v38  ;;  %v1292_v50 = vmul.f32 %v1276_v48, %v3037_v57 }
 0x139   : > { %v1274_v49 = vmul.f32 0.5, %v1258_v53  ;;  %v1238_v1 = vmul.f32 0.7978846, %v1222_v52  ;;  %2692 = vtanh.f32 %v1237_v51  ;;  %v1239_v19 = vmul.f32 0.7978846, %v1223_v30 }
 0x13a   : > { %v1289_v2 = vmul.f32 %v1273_v56, %v3025_v46  ;;  %v1291_v5 = vmul.f32 %v1275_v58, %v3012_v36 }
 0x13b   : > { %v1290_v4 = vmul.f32 %v1274_v49, %v3048_v8  ;;  %2694 = vtanh.f32 %v1238_v1 }
 0x13c   : > { %2696 = vtanh.f32 %v1240_v61  ;;  %v1306_v54 = vpack.c.bf16 %v1292_v50, %v1291_v5 }
 0x13d   : > { %v2677_v10 = vpop.eup %2676  ;;  %v1305_v0 = vpack.c.bf16 %v1290_v4, %v1289_v2  ;;  %2698 = vtanh.f32 %v1239_v19 }
 0x13e   : > { %v1261_v9 = vadd.f32 1.0, %v2677_v10  ;;  %v2658_v10 = vld [vmem:[%s3578_s7 + $0x8] sm:$0xff]  }
 0x13f   : > { %v2679_v16 = vpop.eup %2678  ;;  %2528 = vmatprep.mubr.bf16.mxu1 %v1305_v0  ;;  %v2659_v0 = vld [vmem:[%s3578_s7] sm:$0xff]  }
 0x140   : > { %v2681_v17 = vpop.eup %2680  ;;  %2529 = vmatmul.mubr.bf16.vlgmr.msra.gmra.mxu1 %v1306_v54  ;;  %v1262_v18 = vadd.f32 1.0, %v2679_v16  ;;  %v1277_v57 = vmul.f32 0.5, %v1261_v9  ;;  %v1331_v54 = vsub.s32 1, %v2974_v60 }
 0x141   : > { %v2683_v3 = vpop.eup %2682  ;;  %v1263_v12 = vadd.f32 1.0, %v2681_v17 }
 0x142   : > { %v2685_v46 = vpop.eup %2684  ;;  %v1278_v23 = vmul.f32 0.5, %v1262_v18  ;;  %v1264_v8 = vadd.f32 1.0, %v2683_v3  ;;  %v1293_v26 = vmul.f32 %v1277_v57, %v3070_v32  ;;  %v3207_v9 = vrot.slane %v2984_v13, %v1331_v54 }
 0x143   : > { %v2687_v14 = vpop.eup %2686  ;;  %v1279_v59 = vmul.f32 0.5, %v1263_v12  ;;  %v1265_v36 = vadd.f32 1.0, %v2685_v46 }
 0x144   : > { %v2689_v39 = vpop.eup %2688  ;;  %v1294_v24 = vmul.f32 %v1278_v23, %v3088_v55  ;;  %v1280_v27 = vmul.f32 0.5, %v1264_v8  ;;  %v1266_v28 = vadd.f32 1.0, %v2687_v14 }
 0x145   : > { %v2691_v29 = vpop.eup %2690  ;;  %v1295_v31 = vmul.f32 %v1279_v59, %v3062_v20  ;;  %v1281_v33 = vmul.f32 0.5, %v1265_v36  ;;  %v1267_v34 = vadd.f32 1.0, %v2689_v39 }
 0x146   : > { %v2693_v22 = vpop.eup %2692  ;;  %v1307_v11 = vpack.c.bf16 %v1294_v24, %v1293_v26  ;;  %v1296_v37 = vmul.f32 %v1280_v27, %v3082_v42  ;;  %v1282_v7 = vmul.f32 0.5, %v1266_v28  ;;  %v1268_v40 = vadd.f32 1.0, %v2691_v29 }
 0x147   : > { %v1269_v41 = vadd.f32 1.0, %v2693_v22  ;;  %v1297_v32 = vmul.f32 %v1281_v33, %v3102_v6  ;;  %v1283_v51 = vmul.f32 0.5, %v1267_v34 }
 0x148   : > { %v2695_v38 = vpop.eup %2694  ;;  %2532 = vmatprep.mubr.bf16.mxu1 %v1307_v11  ;;  %v1308_v43 = vpack.c.bf16 %v1296_v37, %v1295_v31  ;;  %v1298_v55 = vmul.f32 %v1282_v7, %v3117_v35  ;;  %v1284_v15 = vmul.f32 0.5, %v1268_v40 }
 0x149   : > { %v2697_v47 = vpop.eup %2696  ;;  %v1270_v48 = vadd.f32 1.0, %v2695_v38  ;;  %v1285_v20 = vmul.f32 0.5, %v1269_v41  ;;  %v1299_v6 = vmul.f32 %v1283_v51, %v3093_v44  ;;  %v2653_v44 = vld [vmem:[%s3578_s7 + $0x30] sm:$0xff]  }
 0x14a   : > { %2533 = vmatmul.mubr.bf16.gmra.mxu1 %v1308_v43  ;;  %v1309_v30 = vpack.c.bf16 %v1298_v55, %v1297_v32  ;;  %v2699_v52 = vpop.eup %2698  ;;  %v1300_v42 = vmul.f32 %v1284_v15, %v3109_v21  ;;  %v1272_v56 = vadd.f32 1.0, %v2697_v47  ;;  %v2652_v21 = vld [vmem:[%s3578_s7 + $0x38] sm:$0xff]  }
 0x14b   : > { %v1286_v53 = vmul.f32 0.5, %v1270_v48  ;;  %v1301_v58 = vmul.f32 %v1285_v20, %v3135_v62  ;;  %v1271_v35 = vadd.f32 1.0, %v2699_v52  ;;  %2544 = vmatprep.subr.bf16.mxu0 %v2652_v21  ;;  %2576 = vmatprep.subr.bf16.mxu1 %v2652_v21  ;;  %v2655_v62 = vld [vmem:[%s3578_s7 + $0x20] sm:$0xff]  }
 0x14c   : > { %2536 = vmatprep.mubr.bf16.mxu1 %v1309_v30  ;;  %v1310_v1 = vpack.c.bf16 %v1300_v42, %v1299_v6  ;;  %v1288_v50 = vmul.f32 0.5, %v1272_v56  ;;  %2545 = vmatpush3.bf16.msra.mxu0 %v2652_v21 }
 0x14d   : > { %v1302_v61 = vmul.f32 %v1286_v53, %v3154_v25  ;;  %v1287_v19 = vmul.f32 0.5, %v1271_v35  ;;  %2584 = vmatpush3.bf16.msra.mxu1 %v2652_v21  ;;  %2546 = vmatprep.subr.bf16.mxu0 %v2653_v44  ;;  %v2657_v25 = vld [vmem:[%s3578_s7 + $0x10] sm:$0xff]  }
 0x14e   : > { %v1304_v2 = vmul.f32 %v1288_v50, %v3141_v63  ;;  %2577 = vmatprep.subr.bf16.mxu1 %v2653_v44  ;;  %v2656_v63 = vld [vmem:[%s3578_s7 + $0x18] sm:$0xff]  }
 0x14f   : > { %v1311_v49 = vpack.c.bf16 %v1302_v61, %v1301_v58  ;;  %v1303_v4 = vmul.f32 %v1287_v19, %v3125_v45  ;;  %v2654_v45 = vld [vmem:[%s3578_s7 + $0x28] sm:$0xff]  }
 0x150   : > { %2547 = vmatpush3.bf16.msra.mxu0 %v2653_v44 }
 0x151   : > { %v1312_v5 = vpack.c.bf16 %v1304_v2, %v1303_v4  ;;  %2585 = vmatpush3.bf16.msra.mxu1 %v2653_v44  ;;  %2548 = vmatprep.subr.bf16.mxu0 %v2654_v45 }
 0x152   : > { %2537 = vmatmul.mubr.bf16.gmra.mxu1 %v1310_v1  ;;  %2578 = vmatprep.subr.bf16.mxu1 %v2654_v45 }
 0x153   : > { %2540 = vmatprep.mubr.bf16.mxu1 %v1311_v49 }
 0x154   : > { %2549 = vmatpush3.bf16.msra.mxu0 %v2654_v45 }
 0x155   : > { %2586 = vmatpush3.bf16.msra.mxu1 %v2654_v45  ;;  %2550 = vmatprep.subr.bf16.mxu0 %v2655_v62 }
 0x156   : > { %2579 = vmatprep.subr.bf16.mxu1 %v2655_v62 }
 0x158   : > { %2551 = vmatpush3.bf16.msra.mxu0 %v2655_v62 }
 0x159   : > { %2587 = vmatpush3.bf16.msra.mxu1 %v2655_v62  ;;  %2552 = vmatprep.subr.bf16.mxu0 %v2656_v63 }
 0x15a   : > { %2541 = vmatmul.mubr.bf16.gmra.mxu1 %v1312_v5  ;;  %2580 = vmatprep.subr.bf16.mxu1 %v2656_v63 }
 0x15c   : > { %2553 = vmatpush3.bf16.msra.mxu0 %v2656_v63 }
 0x15d   : > { %2588 = vmatpush3.bf16.msra.mxu1 %v2656_v63  ;;  %2554 = vmatprep.subr.bf16.mxu0 %v2657_v25 }
 0x15e   : > { %2581 = vmatprep.subr.bf16.mxu1 %v2657_v25 }
 0x160   : > { %2555 = vmatpush3.bf16.msra.mxu0 %v2657_v25 }
 0x161   : > { %2589 = vmatpush3.bf16.msra.mxu1 %v2657_v25  ;;  %2556 = vmatprep.subr.bf16.mxu0 %v2658_v10 }
 0x162   : > { %2582 = vmatprep.subr.bf16.mxu1 %v2658_v10 }
 0x164   : > { %2557 = vmatpush3.bf16.msra.mxu0 %v2658_v10 }
 0x165   : > { %2590 = vmatpush3.bf16.msra.mxu1 %v2658_v10  ;;  %2558 = vmatprep.subr.bf16.mxu0 %v2659_v0 }
 0x166   : > { %2583 = vmatprep.subr.bf16.mxu1 %v2659_v0 }
 0x168   : > { %2559 = vmatpush3.bf16.msra.mxu0 %v2659_v0 }
 0x169   : > { %2591 = vmatpush3.bf16.msra.mxu1 %v2659_v0 }
 0x200   : > { %v2530_v16 = vpop.f32.mrf.mxu1 }
 0x201   : > { %v3210_v17 = vadd.f32 %v2530_v16, %v3207_v9 }
 0x202   : > { %v1415_v18 = vpop.f32.mrf.mxu1 }
 0x203   : > { %v1480_v57 = vmul.f32 %v3210_v17, %v3210_v17  ;;  %v3215_v3 = vadd.f32 %v1415_v18, %v3207_v9 }
 0x204   : > { %v2531_v12 = vpop.f32.mrf.mxu1 }
 0x205   : > { %v1496_v46 = vmul.f32 %v1480_v57, %v3210_v17  ;;  %v1478_v23 = vmul.f32 %v3215_v3, %v3215_v3  ;;  %v3221_v13 = vadd.f32 %v2531_v12, %v3207_v9 }
 0x206   : > { %v1418_v8 = vpop.f32.mrf.mxu1 }
 0x207   : > { %v1512_v14 = vmul.f32 0.044715, %v1496_v46  ;;  %v1494_v59 = vmul.f32 %v1478_v23, %v3215_v3  ;;  %v1481_v36 = vmul.f32 %v3221_v13, %v3221_v13  ;;  %v3227_v39 = vadd.f32 %v1418_v8, %v3207_v9 }
 0x209   : > { %v1528_v26 = vadd.f32 %v1512_v14, %v3210_v17  ;;  %v1510_v24 = vmul.f32 0.044715, %v1494_v59  ;;  %v1497_v27 = vmul.f32 %v1481_v36, %v3221_v13  ;;  %v1479_v28 = vmul.f32 %v3227_v39, %v3227_v39 }
 0x20a   : > { %v2534_v29 = vpop.f32.mrf.mxu1 }
 0x20b   : > { %v1544_v31 = vmul.f32 0.7978846, %v1528_v26  ;;  %v1513_v33 = vmul.f32 0.044715, %v1497_v27  ;;  %v1495_v34 = vmul.f32 %v1479_v28, %v3227_v39  ;;  %v1526_v22 = vadd.f32 %v1510_v24, %v3215_v3 }
 0x20c   : > { %v3236_v11 = vadd.f32 %v2534_v29, %v3207_v9  ;;  %v1431_v37 = vpop.f32.mrf.mxu1 }
 0x20d   : > { %v1529_v7 = vadd.f32 %v1513_v33, %v3221_v13  ;;  %v1511_v40 = vmul.f32 0.044715, %v1495_v34  ;;  %v3242_v38 = vadd.f32 %v1431_v37, %v3207_v9  ;;  %2700 = vtanh.f32 %v1544_v31 }
 0x20e   : > { %v1484_v41 = vmul.f32 %v3236_v11, %v3236_v11  ;;  %v2535_v43 = vpop.f32.mrf.mxu1  ;;  %v1542_v47 = vmul.f32 0.7978846, %v1526_v22 }
 0x20f   : > { %v1545_v32 = vmul.f32 0.7978846, %v1529_v7  ;;  %v1527_v55 = vadd.f32 %v1511_v40, %v3227_v39  ;;  %v3246_v15 = vadd.f32 %v2535_v43, %v3207_v9  ;;  %v1482_v20 = vmul.f32 %v3242_v38, %v3242_v38 }
 0x210   : > { %v1500_v48 = vmul.f32 %v1484_v41, %v3236_v11  ;;  %v1434_v30 = vpop.f32.mrf.mxu1 }
 0x211   : > { %2702 = vtanh.f32 %v1545_v32  ;;  %v1485_v51 = vmul.f32 %v3246_v15, %v3246_v15  ;;  %v3254_v52 = vadd.f32 %v1434_v30, %v3207_v9  ;;  %v1543_v53 = vmul.f32 0.7978846, %v1527_v55 }
 0x212   : > { %v1516_v42 = vmul.f32 0.044715, %v1500_v48  ;;  %v1498_v56 = vmul.f32 %v1482_v20, %v3242_v38  ;;  %v2538_v58 = vpop.f32.mrf.mxu1  ;;  %2704 = vtanh.f32 %v1542_v47 }
 0x213   : > { %v1501_v61 = vmul.f32 %v1485_v51, %v3246_v15  ;;  %v1483_v6 = vmul.f32 %v3254_v52, %v3254_v52  ;;  %v3261_v35 = vadd.f32 %v2538_v58, %v3207_v9  ;;  %2706 = vtanh.f32 %v1543_v53 }
 0x214   : > { %v1532_v49 = vadd.f32 %v1516_v42, %v3236_v11  ;;  %v1514_v1 = vmul.f32 0.044715, %v1498_v56  ;;  %v1447_v50 = vpop.f32.mrf.mxu1 }
 0x215   : > { %v1517_v19 = vmul.f32 0.044715, %v1501_v61  ;;  %v1499_v2 = vmul.f32 %v1483_v6, %v3254_v52  ;;  %v1488_v4 = vmul.f32 %v3261_v35, %v3261_v35  ;;  %v3268_v5 = vadd.f32 %v1447_v50, %v3207_v9 }
 0x216   : > { %v1548_v21 = vmul.f32 0.7978846, %v1532_v49  ;;  %v1530_v44 = vadd.f32 %v1514_v1, %v3242_v38  ;;  %v2539_v45 = vpop.f32.mrf.mxu1 }
 0x217   : > { %v1533_v62 = vadd.f32 %v1517_v19, %v3246_v15  ;;  %v1515_v63 = vmul.f32 0.044715, %v1499_v2  ;;  %v1504_v25 = vmul.f32 %v1488_v4, %v3261_v35  ;;  %v1486_v10 = vmul.f32 %v3268_v5, %v3268_v5 }
 0x218   : > { %2708 = vtanh.f32 %v1548_v21  ;;  %v1546_v0 = vmul.f32 0.7978846, %v1530_v44  ;;  %v3276_v54 = vadd.f32 %v2539_v45, %v3207_v9  ;;  %v1450_v16 = vpop.f32.mrf.mxu1 }
 0x219   : > { %v1549_v18 = vmul.f32 0.7978846, %v1533_v62  ;;  %v1531_v57 = vadd.f32 %v1515_v63, %v3254_v52  ;;  %v1520_v12 = vmul.f32 0.044715, %v1504_v25  ;;  %v1502_v46 = vmul.f32 %v1486_v10, %v3268_v5 }
 0x21a   : > { %2710 = vtanh.f32 %v1546_v0  ;;  %v1489_v23 = vmul.f32 %v3276_v54, %v3276_v54  ;;  %v3283_v8 = vadd.f32 %v1450_v16, %v3207_v9  ;;  %v2542_v14 = vpop.f32.mrf.mxu1  ;;  %v2701_v26 = vpop.eup %2700 }
 0x21b   : > { %2712 = vtanh.f32 %v1549_v18  ;;  %v1547_v59 = vmul.f32 0.7978846, %v1531_v57  ;;  %v1536_v36 = vadd.f32 %v1520_v12, %v3261_v35  ;;  %v1518_v24 = vmul.f32 0.044715, %v1502_v46 }
 0x21c   : > { %v1505_v27 = vmul.f32 %v1489_v23, %v3276_v54  ;;  %v1487_v28 = vmul.f32 %v3283_v8, %v3283_v8  ;;  %v3290_v29 = vadd.f32 %v2542_v14, %v3207_v9  ;;  %v1463_v31 = vpop.f32.mrf.mxu1  ;;  %v1576_v32 = vadd.f32 1.0, %v2701_v26 }
 0x21d   : > { %2714 = vtanh.f32 %v1547_v59  ;;  %v1552_v33 = vmul.f32 0.7978846, %v1536_v36  ;;  %v3293_v34 = vadd.f32 %v1463_v31, %v3207_v9  ;;  %v1534_v37 = vadd.f32 %v1518_v24, %v3268_v5 }
 0x21e   : > { %v2703_v22 = vpop.eup %2702  ;;  %v1521_v7 = vmul.f32 0.044715, %v1505_v27  ;;  %v1503_v40 = vmul.f32 %v1487_v28, %v3283_v8  ;;  %v1492_v41 = vmul.f32 %v3290_v29, %v3290_v29  ;;  %v2543_v43 = vpop.f32.mrf.mxu1  ;;  %v1592_v19 = vmul.f32 0.5, %v1576_v32 }
 0x21f   : > { %v1577_v55 = vadd.f32 1.0, %v2703_v22  ;;  %v1490_v47 = vmul.f32 %v3293_v34, %v3293_v34  ;;  %v1550_v48 = vmul.f32 0.7978846, %v1534_v37  ;;  %v2705_v42 = vpop.eup %2704  ;;  %2716 = vtanh.f32 %v1552_v33 }
 0x220   : > { %v1537_v20 = vadd.f32 %v1521_v7, %v3276_v54  ;;  %v1519_v30 = vmul.f32 0.044715, %v1503_v40  ;;  %v1508_v51 = vmul.f32 %v1492_v41, %v3290_v29  ;;  %v1466_v53 = vpop.f32.mrf.mxu1  ;;  %v3305_v58 = vadd.f32 %v2543_v43, %v3207_v9  ;;  %v2707_v50 = vpop.eup %2706 }
 0x221   : > { %v1506_v56 = vmul.f32 %v1490_v47, %v3293_v34  ;;  %v3308_v61 = vadd.f32 %v1466_v53, %v3207_v9  ;;  %2718 = vtanh.f32 %v1550_v48  ;;  %v1574_v9 = vadd.f32 1.0, %v2705_v42 }
 0x222   : > { %v1553_v6 = vmul.f32 0.7978846, %v1537_v20  ;;  %v1535_v49 = vadd.f32 %v1519_v30, %v3283_v8  ;;  %v1524_v1 = vmul.f32 0.044715, %v1508_v51  ;;  %v1493_v4 = vmul.f32 %v3305_v58, %v3305_v58 }
 0x223   : > { %v1522_v2 = vmul.f32 0.044715, %v1506_v56  ;;  %v1491_v21 = vmul.f32 %v3308_v61, %v3308_v61  ;;  %v1593_v63 = vmul.f32 0.5, %v1577_v55  ;;  %v1575_v18 = vadd.f32 1.0, %v2707_v50 }
 0x224   : > { %2720 = vtanh.f32 %v1553_v6  ;;  %v1551_v44 = vmul.f32 0.7978846, %v1535_v49  ;;  %v1540_v45 = vadd.f32 %v1524_v1, %v3290_v29  ;;  %v1509_v10 = vmul.f32 %v1493_v4, %v3305_v58 }
 0x225   : > { %v2709_v62 = vpop.eup %2708  ;;  %v1538_v25 = vadd.f32 %v1522_v2, %v3293_v34  ;;  %v1507_v0 = vmul.f32 %v1491_v21, %v3308_v61  ;;  %v1590_v57 = vmul.f32 0.5, %v1574_v9  ;;  %v1608_v36 = vmul.f32 %v1592_v19, %v3210_v17 }
 0x226   : > { %2722 = vtanh.f32 %v1551_v44  ;;  %v1556_v16 = vmul.f32 0.7978846, %v1540_v45  ;;  %v1525_v23 = vmul.f32 0.044715, %v1509_v10  ;;  %v1591_v26 = vmul.f32 0.5, %v1575_v18 }
 0x227   : > { %v2711_v12 = vpop.eup %2710  ;;  %v1554_v46 = vmul.f32 0.7978846, %v1538_v25  ;;  %v1523_v14 = vmul.f32 0.044715, %v1507_v0  ;;  %v1609_v27 = vmul.f32 %v1593_v63, %v3221_v13  ;;  %v1606_v22 = vmul.f32 %v1590_v57, %v3215_v3 }
 0x228   : > { %v2713_v59 = vpop.eup %2712  ;;  %2724 = vtanh.f32 %v1556_v16  ;;  %v1578_v24 = vadd.f32 1.0, %v2711_v12  ;;  %v1541_v28 = vadd.f32 %v1525_v23, %v3305_v58  ;;  %v1607_v37 = vmul.f32 %v1591_v26, %v3227_v39 }
 0x229   : > { %2726 = vtanh.f32 %v1554_v46  ;;  %v1539_v31 = vadd.f32 %v1523_v14, %v3308_v61  ;;  %v1580_v7 = vadd.f32 1.0, %v2709_v62  ;;  %v1581_v40 = vadd.f32 1.0, %v2713_v59 }
 0x22a   : > { %v2715_v33 = vpop.eup %2714  ;;  %v1557_v41 = vmul.f32 0.7978846, %v1541_v28  ;;  %v1594_v32 = vmul.f32 0.5, %v1578_v24  ;;  %v1622_v55 = vpack.c.bf16 %v1607_v37, %v1606_v22  ;;  %v1623_v47 = vpack.c.bf16 %v1609_v27, %v1608_v36  ;;  %v3341_v28 = vld [vmem:[%s3579_s8] sm:$0xff] }
 0x22b   : > { %v1555_v43 = vmul.f32 0.7978846, %v1539_v31  ;;  %v1579_v17 = vadd.f32 1.0, %v2715_v33  ;;  %v1597_v48 = vmul.f32 0.5, %v1581_v40  ;;  %v1596_v51 = vmul.f32 0.5, %v1580_v7 }
 0x22c   : > { %2728 = vtanh.f32 %v1557_v41  ;;  %v2717_v20 = vpop.eup %2716  ;;  %2560 = vmatprep.mubr.bf16.mxu0 %v1622_v55  ;;  %v1610_v3 = vmul.f32 %v1594_v32, %v3242_v38  ;;  %v1648_v27 = vsub.s32 2, %v2974_v60 }
 0x22d   : > { %v1595_v13 = vmul.f32 0.5, %v1579_v17  ;;  %2730 = vtanh.f32 %v1555_v43  ;;  %2561 = vmatmul.mubr.bf16.vlgmr.msra.gmra.mxu0 %v1623_v47  ;;  %v1584_v56 = vadd.f32 1.0, %v2717_v20  ;;  %v1613_v49 = vmul.f32 %v1597_v48, %v3246_v15 }
 0x22e   : > { %v2719_v30 = vpop.eup %2718  ;;  %v1612_v19 = vmul.f32 %v1596_v51, %v3236_v11  ;;  %v3344_v31 = vrot.slane %v3341_v28, %v1648_v27 }
 0x22f   : > { %v1611_v39 = vmul.f32 %v1595_v13, %v3254_v52  ;;  %v1582_v53 = vadd.f32 1.0, %v2719_v30  ;;  %v1600_v45 = vmul.f32 0.5, %v1584_v56 }
 0x230   : > { %v1625_v38 = vpack.c.bf16 %v1613_v49, %v1612_v19 }
 0x231   : > { %v2721_v42 = vpop.eup %2720  ;;  %v1624_v6 = vpack.c.bf16 %v1611_v39, %v1610_v3  ;;  %v1598_v21 = vmul.f32 0.5, %v1582_v53  ;;  %v1616_v10 = vmul.f32 %v1600_v45, %v3261_v35  ;;  %v2767_v39 = vld [vmem:[%s2902_s12 + $0x18] sm:$0xff]  }
 0x232   : > { %v1585_v1 = vadd.f32 1.0, %v2721_v42  ;;  %v1801_v51 = vunpack.c.l.bf16 %v2767_v39  ;;  %v1802_v42 = vunpack.c.h.bf16 %v2767_v39 }
 0x233   : > { %v2723_v50 = vpop.eup %2722  ;;  %2564 = vmatprep.mubr.bf16.mxu0 %v1624_v6  ;;  %v1614_v63 = vmul.f32 %v1598_v21, %v3268_v5 }
 0x234   : > { %v1601_v2 = vmul.f32 0.5, %v1585_v1  ;;  %v1583_v4 = vadd.f32 1.0, %v2723_v50  ;;  %v2768_v50 = vld [vmem:[%s2902_s12 + $0x10] sm:$0xff]  }
 0x235   : > { %v2725_v44 = vpop.eup %2724  ;;  %2565 = vmatmul.mubr.bf16.gmra.mxu0 %v1625_v38  ;;  %v1799_v19 = vunpack.c.l.bf16 %v2768_v50  ;;  %v1800_v45 = vunpack.c.h.bf16 %v2768_v50 }
 0x236   : > { %v2727_v9 = vpop.eup %2726  ;;  %v1599_v52 = vmul.f32 0.5, %v1583_v4  ;;  %v1617_v62 = vmul.f32 %v1601_v2, %v3276_v54  ;;  %v1588_v0 = vadd.f32 1.0, %v2725_v44 }
 0x237   : > { %v1586_v25 = vadd.f32 1.0, %v2727_v9 }
 0x238   : > { %v1615_v15 = vmul.f32 %v1599_v52, %v3283_v8  ;;  %v1627_v57 = vpack.c.bf16 %v1617_v62, %v1616_v10  ;;  %v1604_v54 = vmul.f32 0.5, %v1588_v0  ;;  %v2769_v62 = vld [vmem:[%s2902_s12 + $0x28] sm:$0xff]  }
 0x239   : > { %v2729_v11 = vpop.eup %2728  ;;  %v1602_v23 = vmul.f32 0.5, %v1586_v25 }
 0x23a   : > { %v1626_v16 = vpack.c.bf16 %v1615_v15, %v1614_v63  ;;  %v2731_v18 = vpop.eup %2730  ;;  %v1589_v12 = vadd.f32 1.0, %v2729_v11  ;;  %v1620_v36 = vmul.f32 %v1604_v54, %v3290_v29  ;;  %v2766_v29 = vld [vmem:[%s2902_s12] sm:$0xff]   ;;  %v1805_v63 = vunpack.c.l.bf16 %v2769_v62 }
 0x23b   : > { %v1587_v46 = vadd.f32 1.0, %v2731_v18  ;;  %v1618_v8 = vmul.f32 %v1602_v23, %v3293_v34  ;;  %v1795_v22 = vunpack.c.l.bf16 %v2766_v29  ;;  %v1796_v55 = vunpack.c.h.bf16 %v2766_v29  ;;  %v2772_v29 = vld [vmem:[%s2902_s12 + $0x38] sm:$0xff]  }
 0x23c   : > { %2568 = vmatprep.mubr.bf16.mxu1 %v1626_v16  ;;  %v1605_v14 = vmul.f32 0.5, %v1589_v12  ;;  %v1806_v15 = vunpack.c.h.bf16 %v2769_v62  ;;  %v2770_v12 = vld [vmem:[%s2902_s12 + $0x20] sm:$0xff]  }
 0x23d   : > { %2569 = vmatmul.mubr.bf16.vlgmr.msra.gmra.mxu1 %v1627_v57  ;;  %v1603_v59 = vmul.f32 0.5, %v1587_v46  ;;  %v1803_v46 = vunpack.c.l.bf16 %v2770_v12 }
 0x23e   : > { %v1621_v5 = vmul.f32 %v1605_v14, %v3305_v58  ;;  %v2765_v58 = vld [vmem:[%s2902_s12 + $0x8] sm:$0xff]   ;;  %v1804_v14 = vunpack.c.h.bf16 %v2770_v12 }
 0x23f   : > { %v1619_v35 = vmul.f32 %v1603_v59, %v3308_v61  ;;  %v1797_v34 = vunpack.c.l.bf16 %v2765_v58  ;;  %v1798_v41 = vunpack.c.h.bf16 %v2765_v58  ;;  %v2771_v59 = vld [vmem:[%s2902_s12 + $0x30] sm:$0xff]  }
 0x240   : > { %v1629_v24 = vpack.c.bf16 %v1621_v5, %v1620_v36  ;;  %v1807_v5 = vunpack.c.l.bf16 %v2771_v59  ;;  %v1808_v58 = vunpack.c.h.bf16 %v2771_v59 }
 0x241   : > { %v1628_v26 = vpack.c.bf16 %v1619_v35, %v1618_v8 }
 0x243   : > { %2572 = vmatprep.mubr.bf16.mxu1 %v1628_v26 }
 0x245   : > { %2573 = vmatmul.mubr.bf16.gmra.mxu1 %v1629_v24 }
 0x2ed   : > { %v2562_v33 = vpop.f32.mrf.mxu0 }
 0x2ee   : > { %v1741_v61 = vadd.f32 %v2562_v33, %v3344_v31 }
 0x2ef   : > { %v1732_v37 = vpop.f32.mrf.mxu0 }
 0x2f0   : > { %v1733_v7 = vadd.f32 %v1732_v37, %v3344_v31  ;;  %v3350_v40 = vadd.f32 %v1797_v34, %v1741_v61 }
 0x2f1   : > { %v2563_v43 = vpop.f32.mrf.mxu0 }
 0x2f2   : > { %v1744_v17 = vadd.f32 %v2563_v43, %v3344_v31  ;;  %1831 = vadd.xlane.f32.xlu1 %v3350_v40  ;;  %v3354_v32 = vadd.f32 %v1795_v22, %v1733_v7  ;;  %v1809_v22 = vunpack.c.l.bf16 %v2772_v29 }
 0x2f3   : > { %v1735_v47 = vpop.f32.mrf.mxu0 }
 0x2f4   : > { %v1736_v13 = vadd.f32 %v1735_v47, %v3344_v31  ;;  %1827 = vadd.xlane.f32.xlu0 %v3354_v32  ;;  %v3358_v48 = vadd.f32 %v1798_v41, %v1744_v17  ;;  %v1810_v41 = vunpack.c.h.bf16 %v2772_v29 }
 0x2f5   : > { %v2566_v20 = vpop.f32.mrf.mxu0 }
 0x2f6   : > { %v1757_v30 = vadd.f32 %v2566_v20, %v3344_v31  ;;  %1833 = vadd.xlane.f32.xlu1 %v3358_v48  ;;  %v3362_v3 = vadd.f32 %v1796_v55, %v1736_v13 }
 0x2f7   : > { %v1748_v53 = vpop.f32.mrf.mxu0 }
 0x2f8   : > { %1829 = vadd.xlane.f32.xlu0 %v3362_v3  ;;  %v1749_v6 = vadd.f32 %v1748_v53, %v3344_v31  ;;  %v3368_v1 = vadd.f32 %v1801_v51, %v1757_v30 }
 0x2f9   : > { %v2567_v56 = vpop.f32.mrf.mxu0 }
 0x2fa   : > { %v1760_v49 = vadd.f32 %v2567_v56, %v3344_v31  ;;  %v3377_v52 = vadd.f32 %v1799_v19, %v1749_v6 }
 0x2fb   : > { %v1751_v2 = vpop.f32.mrf.mxu0 }
 0x2fc   : > { %v1752_v21 = vadd.f32 %v1751_v2, %v3344_v31  ;;  %1839 = vadd.xlane.f32.xlu0 %v3368_v1  ;;  %v3373_v44 = vadd.f32 %v1802_v42, %v1760_v49 }
 0x2fd   : > { %v2570_v4 = vpop.f32.mrf.mxu1 }
 0x2fe   : > { %v1773_v9 = vadd.f32 %v2570_v4, %v3344_v31  ;;  %1841 = vadd.xlane.f32.xlu1 %v3373_v44  ;;  %v3382_v0 = vadd.f32 %v1800_v45, %v1752_v21 }
 0x2ff   : > { %v1764_v38 = vpop.f32.mrf.mxu1 }
 0x300   : > { %1835 = vadd.xlane.f32.xlu0 %v3377_v52  ;;  %v1765_v16 = vadd.f32 %v1764_v38, %v3344_v31  ;;  %v3386_v18 = vadd.f32 %v1805_v63, %v1773_v9 }
 0x301   : > { %v2571_v25 = vpop.f32.mrf.mxu1 }
 0x302   : > { %v1776_v10 = vadd.f32 %v2571_v25, %v3344_v31  ;;  %1837 = vadd.xlane.f32.xlu1 %v3382_v0  ;;  %v3396_v36 = vadd.f32 %v1803_v46, %v1765_v16 }
 0x303   : > { %v1767_v11 = vpop.f32.mrf.mxu1 }
 0x304   : > { %v3388_v57 = vadd.f32 %v1806_v15, %v1776_v10  ;;  %v1768_v54 = vadd.f32 %v1767_v11, %v3344_v31  ;;  %1847 = vadd.xlane.f32.xlu0 %v3386_v18 }
 0x305   : > { %v2574_v23 = vpop.f32.mrf.mxu1 }
 0x306   : > { %1849 = vadd.xlane.f32.xlu1 %v3388_v57  ;;  %v3399_v24 = vadd.f32 %v1804_v14, %v1768_v54  ;;  %v1789_v33 = vadd.f32 %v2574_v23, %v3344_v31 }
 0x307   : > { %v1780_v8 = vpop.f32.mrf.mxu1 }
 0x308   : > { %v1781_v35 = vadd.f32 %v1780_v8, %v3344_v31  ;;  %1843 = vadd.xlane.f32.xlu0 %v3396_v36  ;;  %v3412_v43 = vadd.f32 %v1809_v22, %v1789_v33 }
 0x309   : > { %v2575_v26 = vpop.f32.mrf.mxu1 }
 0x30a   : > { %v3401_v27 = vadd.f32 %v1807_v5, %v1781_v35  ;;  %1845 = vadd.xlane.f32.xlu1 %v3399_v24  ;;  %v1792_v37 = vadd.f32 %v2575_v26, %v3344_v31 }
 0x30b   : > { %v1783_v34 = vpop.f32.mrf.mxu1 }
 0x30c   : > { %v1784_v61 = vadd.f32 %v1783_v34, %v3344_v31  ;;  %1851 = vadd.xlane.f32.xlu0 %v3401_v27  ;;  %v3415_v17 = vadd.f32 %v1810_v41, %v1792_v37 }
 0x30e   : > { %v3409_v7 = vadd.f32 %v1808_v58, %v1784_v61 }
 0x310   : > { %1853 = vadd.xlane.f32.xlu1 %v3409_v7  ;;  %1855 = vadd.xlane.f32.xlu0 %v3412_v43 }
 0x314   : > { %1857 = vadd.xlane.f32.xlu1 %v3415_v17 }
 0x37b   : > { %v1832_v55 = vpop.xlane.xlu1 %1831 }
 0x37c   : > { %v1862_v47 = vmul.f32 0.0078125, %v1832_v55 }
 0x37d   : > { %v1828_v13 = vpop.xlane.xlu0 %1827 }
 0x37e   : > { %v3419_v31 = vsub.f32 %v3350_v40, %v1862_v47  ;;  %v1860_v20 = vmul.f32 0.0078125, %v1828_v13 }
 0x37f   : > { %v1834_v30 = vpop.xlane.xlu1 %1833 }
 0x380   : > { %v3422_v39 = vsub.f32 %v3354_v32, %v1860_v20  ;;  %v1863_v51 = vmul.f32 0.0078125, %v1834_v30  ;;  %v1894_v53 = vmul.f32 %v3419_v31, %v3419_v31 }
 0x381   : > { %v1830_v42 = vpop.xlane.xlu0 %1829 }
 0x382   : > { %v3427_v56 = vsub.f32 %v3358_v48, %v1863_v51  ;;  %v1861_v6 = vmul.f32 0.0078125, %v1830_v42  ;;  %1912 = vadd.xlane.f32.xlu0 %v1894_v53  ;;  %v1892_v32 = vmul.f32 %v3422_v39, %v3422_v39 }
 0x384   : > { %v3430_v49 = vsub.f32 %v3362_v3, %v1861_v6  ;;  %v1895_v40 = vmul.f32 %v3427_v56, %v3427_v56 }
 0x385   : > { %v1840_v50 = vpop.xlane.xlu0 %1839 }
 0x386   : > { %v1866_v19 = vmul.f32 0.0078125, %v1840_v50  ;;  %1914 = vadd.xlane.f32.xlu1 %v1895_v40  ;;  %1908 = vadd.xlane.f32.xlu0 %v1892_v32  ;;  %v1893_v21 = vmul.f32 %v3430_v49, %v3430_v49 }
 0x387   : > { %v1842_v2 = vpop.xlane.xlu1 %1841 }
 0x388   : > { %v3437_v4 = vsub.f32 %v3368_v1, %v1866_v19  ;;  %v1867_v48 = vmul.f32 0.0078125, %v1842_v2 }
 0x389   : > { %v1836_v3 = vpop.xlane.xlu0 %1835 }
 0x38a   : > { %v3442_v45 = vsub.f32 %v3373_v44, %v1867_v48  ;;  %v1864_v38 = vmul.f32 0.0078125, %v1836_v3  ;;  %1910 = vadd.xlane.f32.xlu1 %v1893_v21  ;;  %v1898_v9 = vmul.f32 %v3437_v4, %v3437_v4 }
 0x38b   : > { %v1838_v62 = vpop.xlane.xlu1 %1837 }
 0x38c   : > { %v3447_v63 = vsub.f32 %v3377_v52, %v1864_v38  ;;  %v1865_v15 = vmul.f32 0.0078125, %v1838_v62  ;;  %1920 = vadd.xlane.f32.xlu0 %v1898_v9  ;;  %v1899_v1 = vmul.f32 %v3442_v45, %v3442_v45  ;;  %v2006_v62 = vsub.s32 3, %v2974_v60 }
 0x38d   : > { %v1848_v25 = vpop.xlane.xlu0 %1847 }
 0x38e   : > { %v3452_v10 = vsub.f32 %v3382_v0, %v1865_v15  ;;  %v1870_v44 = vmul.f32 0.0078125, %v1848_v25  ;;  %1922 = vadd.xlane.f32.xlu1 %v1899_v1  ;;  %v1896_v11 = vmul.f32 %v3447_v63, %v3447_v63 }
 0x38f   : > { %v1850_v16 = vpop.xlane.xlu1 %1849 }
 0x390   : > { %v3457_v12 = vsub.f32 %v3386_v18, %v1870_v44  ;;  %v1871_v52 = vmul.f32 0.0078125, %v1850_v16  ;;  %1916 = vadd.xlane.f32.xlu0 %v1896_v11  ;;  %v1897_v46 = vmul.f32 %v3452_v10, %v3452_v10 }
 0x391   : > { %v1844_v23 = vpop.xlane.xlu0 %1843 }
 0x392   : > { %v3462_v54 = vsub.f32 %v3388_v57, %v1871_v52  ;;  %v1868_v0 = vmul.f32 0.0078125, %v1844_v23  ;;  %1918 = vadd.xlane.f32.xlu1 %v1897_v46  ;;  %v1902_v14 = vmul.f32 %v3457_v12, %v3457_v12  ;;  %v3500_v46 = vrot.slane %v3341_v28, %v2006_v62 }
 0x393   : > { %v1846_v59 = vpop.xlane.xlu1 %1845  ;;  %v2026_v23 = vsub.s32 4, %v2974_v60 }
 0x394   : > { %v3467_v5 = vsub.f32 %v3396_v36, %v1868_v0  ;;  %v1869_v18 = vmul.f32 0.0078125, %v1846_v59  ;;  %1928 = vadd.xlane.f32.xlu0 %v1902_v14  ;;  %v1903_v8 = vmul.f32 %v3462_v54, %v3462_v54 }
 0x395   : > { %v1852_v35 = vpop.xlane.xlu0 %1851 }
 0x396   : > { %v3472_v26 = vsub.f32 %v3399_v24, %v1869_v18  ;;  %v1872_v57 = vmul.f32 0.0078125, %v1852_v35  ;;  %1930 = vadd.xlane.f32.xlu1 %v1903_v8  ;;  %v1900_v58 = vmul.f32 %v3467_v5, %v3467_v5 }
 0x398   : > { %v3477_v33 = vsub.f32 %v3401_v27, %v1872_v57  ;;  %1924 = vadd.xlane.f32.xlu0 %v1900_v58  ;;  %v1901_v61 = vmul.f32 %v3472_v26, %v3472_v26 }
 0x399   : > { %v1854_v34 = vpop.xlane.xlu1 %1853  ;;  %v1856_v29 = vpop.xlane.xlu0 %1855 }
 0x39a   : > { %v1873_v36 = vmul.f32 0.0078125, %v1854_v34  ;;  %v1874_v24 = vmul.f32 0.0078125, %v1856_v29  ;;  %1926 = vadd.xlane.f32.xlu1 %v1901_v61  ;;  %v1904_v37 = vmul.f32 %v3477_v33, %v3477_v33  ;;  %v3505_v34 = vrot.slane %v3341_v28, %v2026_v23 }
 0x39c   : > { %v3482_v22 = vsub.f32 %v3409_v7, %v1873_v36  ;;  %v3487_v55 = vsub.f32 %v3412_v43, %v1874_v24  ;;  %1932 = vadd.xlane.f32.xlu0 %v1904_v37 }
 0x39d   : > { %v1858_v41 = vpop.xlane.xlu1 %1857 }
 0x39e   : > { %v1875_v27 = vmul.f32 0.0078125, %v1858_v41  ;;  %v1905_v47 = vmul.f32 %v3482_v22, %v3482_v22  ;;  %v1906_v7 = vmul.f32 %v3487_v55, %v3487_v55 }
 0x3a0   : > { %v3492_v13 = vsub.f32 %v3415_v17, %v1875_v27  ;;  %1934 = vadd.xlane.f32.xlu1 %v1905_v47  ;;  %1936 = vadd.xlane.f32.xlu0 %v1906_v7 }
 0x3a2   : > { %v1907_v20 = vmul.f32 %v3492_v13, %v3492_v13 }
 0x3a4   : > { %1938 = vadd.xlane.f32.xlu1 %v1907_v20 }
 0x40b   : > { %v1913_v30 = vpop.xlane.xlu0 %1912 }
 0x40c   : > { %v1942_v43 = vmul.f32 0.0078125, %v1913_v30 }
 0x40e   : > { %v1958_v51 = vadd.f32 1e-05, %v1942_v43 }
 0x40f   : > { %v1915_v53 = vpop.xlane.xlu1 %1914  ;;  %v1909_v42 = vpop.xlane.xlu0 %1908 }
 0x410   : > { %2732 = vrsqrt.f32 %v1958_v51  ;;  %v1943_v6 = vmul.f32 0.0078125, %v1915_v53  ;;  %v1940_v40 = vmul.f32 0.0078125, %v1909_v42 }
 0x412   : > { %v1959_v32 = vadd.f32 1e-05, %v1943_v6  ;;  %v1956_v17 = vadd.f32 1e-05, %v1940_v40 }
 0x413   : > { %v1911_v50 = vpop.xlane.xlu1 %1910 }
 0x414   : > { %2734 = vrsqrt.f32 %v1959_v32  ;;  %v1941_v19 = vmul.f32 0.0078125, %v1911_v50 }
 0x415   : > { %2736 = vrsqrt.f32 %v1956_v17  ;;  %v1921_v2 = vpop.xlane.xlu0 %1920 }
 0x416   : > { %v1957_v48 = vadd.f32 1e-05, %v1941_v19  ;;  %v1946_v21 = vmul.f32 0.0078125, %v1921_v2 }
 0x417   : > { %v1923_v3 = vpop.xlane.xlu1 %1922 }
 0x418   : > { %2738 = vrsqrt.f32 %v1957_v48  ;;  %v1962_v38 = vadd.f32 1e-05, %v1946_v21  ;;  %v1947_v9 = vmul.f32 0.0078125, %v1923_v3 }
 0x419   : > { %v1917_v15 = vpop.xlane.xlu0 %1916 }
 0x41a   : > { %2740 = vrsqrt.f32 %v1962_v38  ;;  %v1963_v1 = vadd.f32 1e-05, %v1947_v9  ;;  %v1944_v25 = vmul.f32 0.0078125, %v1917_v15 }
 0x41b   : > { %v1919_v44 = vpop.xlane.xlu1 %1918 }
 0x41c   : > { %2742 = vrsqrt.f32 %v1963_v1  ;;  %v1960_v11 = vadd.f32 1e-05, %v1944_v25  ;;  %v1945_v16 = vmul.f32 0.0078125, %v1919_v44 }
 0x41d   : > { %v2733_v52 = vpop.eup %2732  ;;  %v1929_v0 = vpop.xlane.xlu0 %1928 }
 0x41e   : > { %v1990_v14 = vmul.f32 %v2733_v52, %v3419_v31  ;;  %2744 = vrsqrt.f32 %v1960_v11  ;;  %v1961_v59 = vadd.f32 1e-05, %v1945_v16  ;;  %v1950_v18 = vmul.f32 0.0078125, %v1929_v0 }
 0x41f   : > { %v1931_v8 = vpop.xlane.xlu1 %1930 }
 0x420   : > { %2746 = vrsqrt.f32 %v1961_v59  ;;  %v1966_v35 = vadd.f32 1e-05, %v1950_v18  ;;  %v1951_v57 = vmul.f32 0.0078125, %v1931_v8  ;;  %v2010_v36 = vmul.f32 %v3500_v46, %v1990_v14 }
 0x421   : > { %v2735_v58 = vpop.eup %2734  ;;  %v1925_v61 = vpop.xlane.xlu0 %1924 }
 0x422   : > { %v2737_v29 = vpop.eup %2736  ;;  %v1991_v60 = vmul.f32 %v2735_v58, %v3427_v56  ;;  %2748 = vrsqrt.f32 %v1966_v35  ;;  %v1967_v24 = vadd.f32 1e-05, %v1951_v57  ;;  %v1948_v37 = vmul.f32 0.0078125, %v1925_v61 }
 0x423   : > { %v1988_v31 = vmul.f32 %v2737_v29, %v3422_v39  ;;  %v1927_v41 = vpop.xlane.xlu1 %1926  ;;  %v2030_v28 = vadd.f32 %v3505_v34, %v2010_v36 }
 0x424   : > { %v2011_v27 = vmul.f32 %v3500_v46, %v1991_v60  ;;  %2750 = vrsqrt.f32 %v1967_v24  ;;  %v1949_v47 = vmul.f32 0.0078125, %v1927_v41  ;;  %v1964_v30 = vadd.f32 1e-05, %v1948_v37 }
 0x425   : > { %v2739_v7 = vpop.eup %2738  ;;  %v2008_v20 = vmul.f32 %v3500_v46, %v1988_v31  ;;  %v1933_v43 = vpop.xlane.xlu0 %1932 }
 0x426   : > { %v2031_v56 = vadd.f32 %v3505_v34, %v2011_v27  ;;  %v1989_v51 = vmul.f32 %v2739_v7, %v3430_v49  ;;  %v1965_v53 = vadd.f32 1e-05, %v1949_v47  ;;  %v1952_v39 = vmul.f32 0.0078125, %v1933_v43 }
 0x427   : > { %v2741_v42 = vpop.eup %2740  ;;  %2752 = vrsqrt.f32 %v1964_v30  ;;  %v2028_v49 = vadd.f32 %v3505_v34, %v2008_v20 }
 0x428   : > { %v2316_v40 = vpack.c.bf16 %v2031_v56, %v2030_v28  ;;  %v2009_v32 = vmul.f32 %v3500_v46, %v1989_v51  ;;  %v1994_v17 = vmul.f32 %v2741_v42, %v3437_v4  ;;  %2754 = vrsqrt.f32 %v1965_v53 }
 0x429   : > { %v1935_v6 = vpop.xlane.xlu1 %1934  ;;  %v2743_v50 = vpop.eup %2742  ;;  %v1968_v19 = vadd.f32 1e-05, %v1952_v39 }
 0x42a   : > { %v1953_v2 = vmul.f32 0.0078125, %v1935_v6  ;;  %v1937_v48 = vpop.xlane.xlu0 %1936  ;;  %2348 = vst [vmem:[%s3519_s19 + $0x8] sm:$0xff] %v2316_v40   ;;  %v2029_v21 = vadd.f32 %v3505_v34, %v2009_v32  ;;  %v2014_v3 = vmul.f32 %v3500_v46, %v1994_v17  ;;  %v1995_v38 = vmul.f32 %v2743_v50, %v3442_v45 }
 0x42b   : > { %v1954_v9 = vmul.f32 0.0078125, %v1937_v48  ;;  %v2745_v62 = vpop.eup %2744  ;;  %2756 = vrsqrt.f32 %v1968_v19 }
 0x42c   : > { %v1969_v15 = vadd.f32 1e-05, %v1953_v2  ;;  %v2311_v1 = vpack.c.bf16 %v2029_v21, %v2028_v49  ;;  %v2015_v25 = vmul.f32 %v3500_v46, %v1995_v38  ;;  %v1992_v44 = vmul.f32 %v2745_v62, %v3447_v63 }
 0x42d   : > { %v1939_v4 = vpop.xlane.xlu1 %1938  ;;  %v2747_v11 = vpop.eup %2746  ;;  %v1970_v16 = vadd.f32 1e-05, %v1954_v9  ;;  %v2034_v23 = vadd.f32 %v3505_v34, %v2014_v3 }
 0x42e   : > { %2758 = vrsqrt.f32 %v1969_v15  ;;  %v1955_v52 = vmul.f32 0.0078125, %v1939_v4  ;;  %2312 = vst [vmem:[%s3519_s19] sm:$0xff] %v2311_v1   ;;  %v2035_v45 = vadd.f32 %v3505_v34, %v2015_v25  ;;  %v2012_v0 = vmul.f32 %v3500_v46, %v1992_v44 }
 0x42f   : > { %v1993_v14 = vmul.f32 %v2747_v11, %v3452_v10  ;;  %v2749_v59 = vpop.eup %2748  ;;  %2760 = vrsqrt.f32 %v1970_v16 }
 0x430   : > { %v1971_v18 = vadd.f32 1e-05, %v1955_v52  ;;  %v2326_v8 = vpack.c.bf16 %v2035_v45, %v2034_v23  ;;  %v1998_v35 = vmul.f32 %v2749_v59, %v3457_v12  ;;  %v2032_v58 = vadd.f32 %v3505_v34, %v2012_v0 }
 0x431   : > { %v2013_v63 = vmul.f32 %v3500_v46, %v1993_v14  ;;  %v2751_v57 = vpop.eup %2750 }
 0x432   : > { %2762 = vrsqrt.f32 %v1971_v18  ;;  %2350 = vst [vmem:[%s3519_s19 + $0x18] sm:$0xff] %v2326_v8   ;;  %v2018_v61 = vmul.f32 %v3500_v46, %v1998_v35  ;;  %v1999_v10 = vmul.f32 %v2751_v57, %v3462_v54 }
 0x433   : > { %v2033_v36 = vadd.f32 %v3505_v34, %v2013_v63 }
 0x434   : > { %v2753_v29 = vpop.eup %2752  ;;  %v2019_v24 = vmul.f32 %v3500_v46, %v1999_v10  ;;  %v2038_v12 = vadd.f32 %v3505_v34, %v2018_v61 }
 0x435   : > { %v2321_v60 = vpack.c.bf16 %v2033_v36, %v2032_v58  ;;  %v2755_v31 = vpop.eup %2754  ;;  %v1996_v37 = vmul.f32 %v2753_v29, %v3467_v5 }
 0x436   : > { %v2039_v41 = vadd.f32 %v3505_v34, %v2019_v24  ;;  %v1997_v27 = vmul.f32 %v2755_v31, %v3472_v26 }
 0x437   : > { %2349 = vst [vmem:[%s3519_s19 + $0x10] sm:$0xff] %v2321_v60   ;;  %v2016_v47 = vmul.f32 %v3500_v46, %v1996_v37 }
 0x438   : > { %v2757_v7 = vpop.eup %2756  ;;  %v2336_v54 = vpack.c.bf16 %v2039_v41, %v2038_v12  ;;  %v2017_v28 = vmul.f32 %v3500_v46, %v1997_v27 }
 0x439   : > { %v2000_v20 = vmul.f32 %v2757_v7, %v3477_v33  ;;  %v2036_v5 = vadd.f32 %v3505_v34, %v2016_v47 }
 0x43a   : > { %2352 = vst [vmem:[%s3519_s19 + $0x28] sm:$0xff] %v2336_v54   ;;  %v2037_v43 = vadd.f32 %v3505_v34, %v2017_v28 }
 0x43b   : > { %v2759_v30 = vpop.eup %2758  ;;  %v2020_v56 = vmul.f32 %v3500_v46, %v2000_v20 }
 0x43c   : > { %v2001_v26 = vmul.f32 %v2759_v30, %v3482_v22  ;;  %v2761_v51 = vpop.eup %2760  ;;  %v2331_v53 = vpack.c.bf16 %v2037_v43, %v2036_v5 }
 0x43d   : > { %v2002_v42 = vmul.f32 %v2761_v51, %v3487_v55  ;;  %v2040_v33 = vadd.f32 %v3505_v34, %v2020_v56 }
 0x43e   : > { %v2021_v39 = vmul.f32 %v3500_v46, %v2001_v26  ;;  %2351 = vst [vmem:[%s3519_s19 + $0x20] sm:$0xff] %v2331_v53  }
 0x43f   : > { %v2763_v6 = vpop.eup %2762  ;;  %v2022_v32 = vmul.f32 %v3500_v46, %v2002_v42 }
 0x440   : > { %v2041_v40 = vadd.f32 %v3505_v34, %v2021_v39  ;;  %v2003_v17 = vmul.f32 %v2763_v6, %v3492_v13 }
 0x441   : > { %v2042_v49 = vadd.f32 %v3505_v34, %v2022_v32 }
 0x442   : > { %v2341_v50 = vpack.c.bf16 %v2041_v40, %v2040_v33  ;;  %v2023_v22 = vmul.f32 %v3500_v46, %v2003_v17 }
 0x444   : > { %2353 = vst [vmem:[%s3519_s19 + $0x30] sm:$0xff] %v2341_v50   ;;  %v2043_v19 = vadd.f32 %v3505_v34, %v2023_v22 }
 0x446   : > { %v2346_v2 = vpack.c.bf16 %v2043_v19, %v2042_v49 }
 0x448   : > { %2354 = vst [vmem:[%s3519_s19 + $0x38] sm:$0xff] %v2346_v2  }
 0x449 PF: > { %s19_s30 = sadd.s32 1, %s2779_s30  }
 0x44a   : > { %p16_p5 = scmp.ge.s32.totalorder %s19_s30, 4  }
 0x44c   :  { %18 = sbr.rel (!%p16_p5) target bundleno = 1 (0x1), region = 92 }

// kernel: protein_mpnn_forward.21
= control target key start
LH: loop header
LB: loop body
LE: loop exit
PB: predicated region body
PF: predicated region fallthrough
CT: control target
= control target key end

     0   :  { %8 = vsyncpa [#allocation3], 0  ;;  %s718_s0 = inlined_call_operand.vmem [shape: bf16[32,128], index: 0, kind: input, shape index: {}]   ;;  %s719_s1 = inlined_call_operand.vmem [shape: bf16[128,128], index: 1, kind: input, shape index: {}]   ;;  %s720_s2 = inlined_call_operand.vmem [shape: f32[1,128], index: 2, kind: input, shape index: {}]   ;;  %s721_s3 = inlined_call_operand.hbm [shape: f32[32,128], index: 3, kind: output, shape index: {}]  }
   0x1   :  { %10 = vsyncpa [#allocation3 + $0x1], 0  ;;  %s590_s12 = smov 0   ;;  %s592_s13 = smov 0  }
   0x2   :  { %s594_s14 = smov 0   ;;  %s596_s15 = smov 0  }
   0x3 LB: > { %s611_s16 = sadd.s32 4294967295, %s563_s15   ;;  %s391_s17 = sadd.s32 4294967294, %s563_s15   ;;  %s563_s15 = sphi %s596_s15, %s727_s15   ;;  %s559_s14 = sphi %s594_s14, %s726_s14   ;;  %s555_s13 = sphi %s592_s13, %s725_s13   ;;  %s551_s12 = sphi %s590_s12, %s724_s12  }
   0x4   : > { %s615_s18 = sadd.s32 1, %s563_s15   ;;  %s91_s19 = sadd.s32 1, %s559_s14 }
   0x5   : > { %s88_s20 = ssub.s32 %s563_s15, %s615_s18  ;;  %p101_p0 = scmp.ne.s32.totalorder %s559_s14, %s555_s13 }
   0x6   : > { %p89_p1 = scmp.eq.s32.totalorder %s88_s20, 0  ;;  %p102_p2 = scmp.eq.s32.totalorder %s611_s16, 1 }
   0x7   : > { %p107_p3 = scmp.ne.s32.totalorder %s555_s13, %s551_s12  ;;  %p108_p4 = scmp.eq.s32.totalorder %s391_s17, 1 }
   0x8   : > { %s626_s21 = scalar_select %p89_p1, %s559_s14, %s91_s19  }
   0x9   : > { %p628_p5 = por %p102_p2, %p101_p0  ;;  %p632_p6 = por %p108_p4, %p107_p3 }
   0xa   : > { %p394_p7 = scmp.ge.s32.totalorder %s563_s15, 1  ;;  %p141_p8 = scmp.lt.s32.totalorder %s563_s15, 3 }
   0xc   : > { %p142_p9 = pnand %p394_p7, %p141_p8 }
   0xd   : > { %s396_s28 = sshll.u32 (!%p142_p9), %s611_s16, 1  ;;  %s162_s29 = sand.u32 (!%p142_p9), 1, %s555_s13  }
   0xe   : > { %145 = sbr.rel (%p142_p9) target bundleno = 577 (0x241), region = 32  ;;  %p166_p10 = scmp.lt.s32.totalorder (!%p142_p9), %s396_s28, 3 }
   0xf   : > { %s395_s30 = sshll.u32 (!%p142_p9), %s162_s29, 4  ;;  %s678_s10 = scalar_lea.sflag (!%p142_p9), [#allocation3], %s162_s29 }
  0x10   : > { %s164_s5 = scalar_lea.vmem (!%p142_p9), [#allocation2], %s395_s30  ;;  %s567_s11 = smov (!%p142_p9), [#allocation2]  }
  0x11   : > { %s329_s6 = sshll.u32 (!%p142_p9), %s164_s5, 4  ;;  %s507_s17 = sshll.u32 (!%p142_p9), %s567_s11, 4  ;;  %s676_s6 = int_to_ptr.vmem [resolvable:$true] %s329_s6  ;;  %s508_s17 = int_to_ptr.vmem [resolvable:$false] %s507_s17 }
  0x12   : > { %s509_s19 = scalar_lea.vmem (!%p142_p9), %s508_s17, 512  ;;  %p510_p0 = scmp.lt.s32.totalorder (!%p142_p9), %s676_s6, %s508_s17 }
  0x13   : > { %v486_v0 = vld [vmem:[%s719_s1 + $0x38] sm:$0xff]   ;;  %v565_v1 = vmov 0.0   ;;  %v487_v2 = vld [vmem:[%s719_s1 + $0x30] sm:$0xff]   ;;  %vm566_vm0 = vmmov 0   ;;  %s729_s28 = smov (!%p166_p10, %s396_s28), 3  ;;  %v488_v3 = vld [vmem:[%s719_s1 + $0x28] sm:$0xff]  }
  0x14   : > { %423 = vmatprep.subr.bf16.mxu0 %v565_v1  ;;  %439 = vmatprep.mubr.msk.bf16.mxu0 %vm566_vm0, %v565_v1  ;;  %s397_s4 = sshll.u32 %s729_s28, 2  ;;  %v489_v4 = vld [vmem:[%s719_s1 + $0x20] sm:$0xff]   ;;  %v490_v5 = vld [vmem:[%s719_s1 + $0x18] sm:$0xff]   ;;  %v491_v6 = vld [vmem:[%s719_s1 + $0x10] sm:$0xff]  }
  0x15   : > { %424 = vmatpush3.bf16.msra.mxu0 %v486_v0  ;;  %s169_s7 = scalar_lea.vmem %s718_s0, %s397_s4  ;;  %v492_v7 = vld [vmem:[%s719_s1 + $0x8] sm:$0xff]   ;;  %v493_v8 = vld [vmem:[%s719_s1] sm:$0xff]   ;;  %s413_s4 = sshll.u32 %s611_s16, 8 }
  0x16   : > { %425 = vmatprep.subr.bf16.mxu0 %v565_v1  ;;  %v494_v9 = vld [vmem:[%s169_s7] sm:$0xff]   ;;  %s674_s9 = scalar_lea.hbm %s721_s3, %s413_s4  ;;  %s503_s16 = scalar_lea.vmem %s676_s6, 256 }
  0x17   : > { %v398_v10 = vld [vmem:[%s720_s2] ss:$0 sm:$0xff]  ;;  %p504_p11 = scmp.ne.s32.totalorder %s676_s6, %s503_s16  ;;  %p511_p1 = scmp.lt.s32.totalorder %s509_s19, %s503_s16 }
  0x19   : > { %426 = vmatpush3.bf16.msra.mxu0 %v487_v2  ;;  %p505_p12 = pnand %p504_p11, %p628_p5  ;;  %p512_p2 = por %p511_p1, %p510_p0 }
  0x1a   : > { %427 = vmatprep.subr.bf16.mxu0 %v565_v1 }
  0x1b   : > { %p506_p13 = pneg %p505_p12 }
  0x1d   : > { %428 = vmatpush3.bf16.msra.mxu0 %v488_v3  ;;  %p513_p3 = pnand %p512_p2, %p506_p13 }
  0x1e   : > { %429 = vmatprep.subr.bf16.mxu0 %v565_v1 }
  0x21   : > { %430 = vmatpush3.bf16.msra.mxu0 %v489_v4 }
  0x22   : > { %431 = vmatprep.subr.bf16.mxu0 %v565_v1 }
  0x25   : > { %432 = vmatpush3.bf16.msra.mxu0 %v490_v5 }
  0x26   : > { %433 = vmatprep.subr.bf16.mxu0 %v565_v1 }
  0x29   : > { %434 = vmatpush3.bf16.msra.mxu0 %v491_v6 }
  0x2a   : > { %435 = vmatprep.subr.bf16.mxu0 %v565_v1 }
  0x2d   : > { %436 = vmatpush3.bf16.msra.mxu0 %v492_v7 }
  0x2e   : > { %437 = vmatprep.subr.bf16.mxu0 %v565_v1 }
  0x31   : > { %438 = vmatpush3.bf16.msra.mxu0 %v493_v8 }
  0x34   : > { %440 = vmatmul.mubr.bf16.vlgmr.msra.gmra.mxu0 %v494_v9 }
  0xf4   : > { %v286_v11 = vpop.f32.mrf.mxu0 }
  0xf5   : > { %v287_v12 = vadd.f32 %v398_v10, %v286_v11 }
  0xf6   : > { %v441_v13 = vpop.f32.mrf.mxu0 }
  0xf7   : > { %293 = vmax.xlane.f32.xlu0 %v287_v12 }
  0xf8   : > { %v289_v14 = vpop.f32.mrf.mxu0 }
  0xf9   : > { %v290_v15 = vadd.f32 %v398_v10, %v289_v14 }
  0xfa   : > { %v442_v16 = vpop.f32.mrf.mxu0 }
  0xfb   : > { %295 = vmax.xlane.f32.xlu0 %v290_v15 }
 0x180   : > { %v294_v17 = vpop.xlane.xlu0 %293 }
 0x181   : > { %v297_v18 = vsub.f32 %v287_v12, %v294_v17 }
 0x183   : > { %v299_v19 = vmul.f32 1.442695, %v297_v18 }
 0x184   : > { %v296_v20 = vpop.xlane.xlu0 %295 }
 0x185   : > { %v298_v21 = vsub.f32 %v290_v15, %v296_v20  ;;  %495 = vpow2.f32 %v299_v19 }
 0x187   : > { %v301_v22 = vmul.f32 1.442695, %v298_v21 }
 0x189   : > { %497 = vpow2.f32 %v301_v22 }
 0x192   : > { %v496_v23 = vpop.eup %495 }
 0x193   : > { %303 = vadd.xlane.f32.xlu1 %v496_v23 }
 0x196   : > { %v498_v24 = vpop.eup %497 }
 0x197   : > { %305 = vadd.xlane.f32.xlu1 %v498_v24 }
 0x21c   : > { %v304_v25 = vpop.xlane.xlu1 %303 }
 0x21d   : > { %499 = vlog2.f32 %v304_v25 }
 0x220   : > { %v306_v26 = vpop.xlane.xlu1 %305 }
 0x221   : > { %501 = vlog2.f32 %v306_v26 }
 0x22a   : > { %v500_v27 = vpop.eup %499 }
 0x22b   : > { %v308_v28 = vmul.f32 0.6931472, %v500_v27 }
 0x22d   : > { %v311_v29 = vsub.f32 %v297_v18, %v308_v28 }
 0x22e   : > { %v502_v30 = vpop.eup %501 }
 0x22f   : > { %313 = vst [vmem:[%s164_s5] sm:$0xff] %v311_v29  ;;  %v310_v31 = vmul.f32 0.6931472, %v502_v30 }
 0x231   : > { %v312_v32 = vsub.f32 %v298_v21, %v310_v31 }
 0x233   : > { %314 = vst [vmem:[%s164_s5 + $0x8] sm:$0xff] %v312_v32 }
 0x234   : > { %516 = shalt.err (!%p513_p3)
}
 0x235   : > { %s517_s20 = scalar_lea.hbm %s674_s9, 256  ;;  %s521_s26 = scalar_lea.hbm %s721_s3, 512 }
 0x236   : > { %p518_p4 = scmp.ne.s32.totalorder %s674_s9, %s517_s20  ;;  %p522_p9 = scmp.lt.s32.totalorder %s674_s9, %s721_s3 }
 0x237   : > { %p523_p10 = scmp.lt.s32.totalorder %s521_s26, %s517_s20 }
 0x238   : > { %p519_p7 = pnand %p518_p4, %p628_p5 }
 0x239   : > { %p524_p11 = por %p523_p10, %p522_p9 }
 0x23a   : > { %p520_p8 = pneg %p519_p7 }
 0x23c   : > { %p525_p12 = pnand %p524_p11, %p520_p8 }
 0x23e   : > { %528 = shalt.err (!%p525_p12)
}
 0x23f   : > { %s568_s29 = smov 128   ;;  %s569_s30 = smov 8  }
 0x240   : > { %443 = dma.vmem_to_hbm [thread:$0]  (%p628_p5), %s676_s6, 256, %s674_s9, %s678_s10, %s568_s29, %s568_s29, %s569_s30  }
 0x241 PF: > { %p449_p13 = scmp.ge.s32.totalorder %s563_s15, 2  ;;  %s344_s4 = sand.u32 1, %s551_s12  }
 0x242   : > { %s345_s5 = scalar_lea.sflag [#allocation3], %s344_s4 }
 0x243   : > { %p446_p0 = pnand %p449_p13, %p632_p6 }
 0x245   : > { %p447_p1 = pneg %p446_p0 }
 0x247   : > { %546 = dma.done.wait (%p447_p1), %s345_s5, 256  }
 0x248   : > { %548 = vsyncadd (%p447_p1), %s345_s5, 4294967040  ;;  %p13_p2 = scmp.ge.s32.totalorder %s615_s18, 4   ;;  %s724_s12 = smov %s555_s13 }
 0x249   : > { %s725_s13 = smov %s559_s14  ;;  %s726_s14 = smov %s626_s21 }
 0x24a   : > { %s727_s15 = smov %s615_s18  ;;  %15 = sbr.rel (!%p13_p2) target bundleno = 3 (0x3), region = 67 }
 0x24f   :  { %350 = vsyncpa [#allocation3], 1 }
 0x250   :  { %352 = vsyncpa [#allocation3 + $0x1], 1 }

// kernel: protein_mpnn_forward.18
= control target key start
LH: loop header
LB: loop body
LE: loop exit
PB: predicated region body
PF: predicated region fallthrough
CT: control target
= control target key end

     0   :  { %s4341_s21 = smov 0   ;;  %s5371_s0 = inlined_call_operand.vmem [shape: bf16[32,128], index: 0, kind: input, shape index: {}]   ;;  %s5372_s1 = inlined_call_operand.vmem [shape: bf16[256,128], index: 1, kind: input, shape index: {}]   ;;  %s5373_s2 = inlined_call_operand.vmem [shape: bf16[256,128], index: 2, kind: input, shape index: {}]   ;;  %s5374_s3 = inlined_call_operand.vmem [shape: bf16[256,128], index: 3, kind: input, shape index: {}]   ;;  %s5375_s4 = inlined_call_operand.vmem [shape: f32[32,8], index: 4, kind: input, shape index: {}]   ;;  %s5376_s5 = inlined_call_operand.vmem [shape: f32[32,1], index: 5, kind: input, shape index: {}]   ;;  %s5377_s6 = inlined_call_operand.vmem [shape: bf16[128,128], index: 6, kind: input, shape index: {}]   ;;  %s5378_s7 = inlined_call_operand.vmem [shape: bf16[128,128], index: 7, kind: input, shape index: {}]   ;;  %s5379_s8 = inlined_call_operand.vmem [shape: bf16[128,128], index: 8, kind: input, shape index: {}]   ;;  %s5380_s9 = inlined_call_operand.vmem [shape: bf16[128,128], index: 9, kind: input, shape index: {}]   ;;  %s5381_s10 = inlined_call_operand.vmem [shape: bf16[128,128], index: 10, kind: input, shape index: {}]   ;;  %s5382_s11 = inlined_call_operand.vmem [shape: bf16[128,128], index: 11, kind: input, shape index: {}]   ;;  %s5383_s12 = inlined_call_operand.vmem [shape: f32[8,128], index: 12, kind: input, shape index: {}]   ;;  %s5384_s13 = inlined_call_operand.vmem [shape: bf16[128,512], index: 13, kind: input, shape index: {}]   ;;  %s5385_s14 = inlined_call_operand.vmem [shape: f32[1,512], index: 14, kind: input, shape index: {}]   ;;  %s5386_s15 = inlined_call_operand.vmem [shape: bf16[512,128], index: 15, kind: input, shape index: {}]   ;;  %s5387_s16 = inlined_call_operand.vmem [shape: bf16[32,128], index: 16, kind: output, shape index: {}]  }
   0x1   :  { %5389 = sst [smem:[#allocation2_spill]] %s5371_s0 }
   0x2 LB: > { %s3506_s22 = sadd.s32 4294967295, %s4250_s21   ;;  %p3510_p0 = scmp.ge.s32.totalorder %s4250_s21, 1  ;;  %s4250_s21 = sphi %s4341_s21, %s26_s21  }
   0x3   : > { %p518_p1 = scmp.lt.s32.totalorder %s4250_s21, 3 }
   0x5   : > { %p519_p2 = pnand %p3510_p0, %p518_p1 }
   0x6   : > { %s3511_s29 = sshll.u32 (!%p519_p2), %s3506_s22, 1  ;;  %s3513_s17 = sshll.u32 (!%p519_p2), %s3506_s22, 4 }
   0x7   : > { %522 = sbr.rel (%p519_p2) target bundleno = 1877 (0x755), region = 84  ;;  %p594_p3 = scmp.lt.s32.totalorder (!%p519_p2), %s3511_s29, 3 }
   0x8   : > { %p600_p4 = scmp.lt.s32.totalorder (!%p519_p2), %s3513_s17, 31  ;;  %s5390_s30 = sld [smem:[#allocation2_spill]] (!%p519_p2) }
   0xc   : > { %v4000_v0 = vld [vmem:[%s5377_s6 + $0x38] sm:$0xff]   ;;  %v4252_v1 = vmov 0.0   ;;  %v4002_v3 = vld [vmem:[%s5377_s6 + $0x30] sm:$0xff]   ;;  %vm4253_vm0 = vmmov 0   ;;  %v4005_v5 = vld [vmem:[%s5380_s9 + $0x28] sm:$0xff]   ;;  %v1443_v6 = vlaneseq  ;;  %s5393_s29 = smov (!%p594_p3, %s3511_s29), 3 }
   0xd   : > { %3806 = vmatprep.subr.bf16.mxu0 %v4252_v1  ;;  %v4001_v2 = vld [vmem:[%s5380_s9 + $0x38] sm:$0xff]   ;;  %3822 = vmatprep.mubr.msk.bf16.mxu0 %vm4253_vm0, %v4252_v1  ;;  %v4003_v4 = vld [vmem:[%s5380_s9 + $0x30] sm:$0xff]   ;;  %v4004_v7 = vld [vmem:[%s5377_s6 + $0x28] sm:$0xff]   ;;  %s3520_s25 = sshll.u32 %s5393_s29, 3  ;;  %s5395_s17 = smov (!%p600_p4, %s3513_s17), 31  ;;  %vm2551_vm1 = vcmask 1041409  }
   0xe   : > { %3807 = vmatpush3.bf16.msra.mxu0 %v4000_v0  ;;  %3826 = vmatprep.subr.bf16.mxu1 %v4001_v2  ;;  %v4007_v8 = vld [vmem:[%s5380_s9 + $0x20] sm:$0xff]   ;;  %v4377_v9 = vshrl.u32 %v1443_v6, 7  ;;  %v4009_v11 = vld [vmem:[%s5380_s9 + $0x18] sm:$0xff]   ;;  %s4386_s0 = sshll.u32 %s5395_s17, 2  ;;  %s4393_s20 = scalar_lea.vmem %s5375_s4, %s3520_s25  ;;  %v4011_v15 = vld [vmem:[%s5380_s9 + $0x10] sm:$0xff]   ;;  %vm2553_vm2 = vcmask 1042434  }
   0xf   : > { %3808 = vmatprep.subr.bf16.mxu0 %v4252_v1  ;;  %3827 = vmatpush3.bf16.msra.mxu1 %v4001_v2  ;;  %v4006_v10 = vld [vmem:[%s5377_s6 + $0x20] sm:$0xff]   ;;  %v4008_v14 = vld [vmem:[%s5377_s6 + $0x18] sm:$0xff]   ;;  %s4408_s26 = scalar_lea.vmem %s5374_s3, %s4386_s0  ;;  %v4010_v22 = vld [vmem:[%s5377_s6 + $0x10] sm:$0xff]   ;;  %s5388_s22 = sshll.u32 %s5393_s29, 2  ;;  %vm2555_vm3 = vcmask 1043459   ;;  %vm2557_vm4 = vcmask 1044484  }
  0x10   : > { %3828 = vmatprep.subr.bf16.mxu1 %v4003_v4  ;;  %v4396_v12 = vsub.s32 0, %v4377_v9  ;;  %v4399_v13 = vsub.s32 2, %v4377_v9  ;;  %v639_v16 = vld [vmem:[%s4393_s20] sm:$0xff]  ;;  %v4416_v17 = vsub.s32 1, %v4377_v9  ;;  %v4422_v21 = vsub.s32 3, %v4377_v9  ;;  %v4013_v23 = vld [vmem:[%s5380_s9 + $0x8] sm:$0xff]   ;;  %s4449_s18 = scalar_lea.vmem %s5390_s30, %s5388_s22  ;;  %s4506_s27 = scalar_lea.vmem %s5372_s1, %s4386_s0 }
  0x11   : > { %v4017_v18 = vld [vmem:[%s4408_s26] sm:$0xff]   ;;  %v4434_v25 = vsub.s32 4, %v4377_v9  ;;  %v4438_v27 = vsub.s32 5, %v4377_v9  ;;  %v4012_v28 = vld [vmem:[%s5377_s6 + $0x8] sm:$0xff]   ;;  %v4456_v31 = vsub.s32 6, %v4377_v9  ;;  %v4464_v35 = vsub.s32 7, %v4377_v9  ;;  %s4519_s17 = scalar_lea.vmem %s5373_s2, %s4386_s0  ;;  %s627_s19 = scalar_lea.vmem %s5376_s5, %s3520_s25 }
  0x12   : > { %3809 = vmatpush3.bf16.msra.mxu0 %v4002_v3  ;;  %v1446_v19 = vrot.slane %v639_v16, %v4396_v12  ;;  %v1460_v20 = vrot.slane %v639_v16, %v4399_v13  ;;  %3842 = vmatprep.mubr.bf16.mxu1 %v4017_v18  ;;  %v1453_v24 = vrot.slane %v639_v16, %v4416_v17  ;;  %v4014_v29 = vld [vmem:[%s5377_s6] sm:$0xff]   ;;  %v4018_v36 = vld [vmem:[%s5378_s7 + $0x38] sm:$0xff]   ;;  %v4471_v37 = vld [vmem:[%s4393_s20 + $0x8] sm:$0xff]  ;;  %vm2559_vm5 = vcmask 1045509   ;;  %s5391_s25 = sshll.u32 %s5393_s29, 2 }
  0x13   : > { %3810 = vmatprep.subr.bf16.mxu0 %v4252_v1  ;;  %3829 = vmatpush3.bf16.msra.mxu1 %v4003_v4  ;;  %v1467_v26 = vrot.slane %v639_v16, %v4422_v21  ;;  %v1474_v30 = vrot.slane %v639_v16, %v4434_v25  ;;  %v4015_v32 = vld [vmem:[%s5380_s9] sm:$0xff]   ;;  %v1481_v33 = vrot.slane %v639_v16, %v4438_v27  ;;  %v4020_v39 = vld [vmem:[%s5379_s8 + $0x38] sm:$0xff]   ;;  %v4019_v40 = vld [vmem:[%s4408_s26 + $0x8] sm:$0xff]   ;;  %vm2561_vm6 = vcmask 1046534  }
  0x14   : > { %3830 = vmatprep.subr.bf16.mxu1 %v4005_v5  ;;  %1448 = vbcast.lane.b32.xlu0 %v1446_v19, 256  ;;  %v637_v34 = vld [vmem:[%s4449_s18] sm:$0xff]   ;;  %v1488_v38 = vrot.slane %v639_v16, %v4456_v31  ;;  %v1495_v41 = vrot.slane %v639_v16, %v4464_v35  ;;  %v4021_v42 = vld [vmem:[%s5378_s7 + $0x30] sm:$0xff]   ;;  %v1502_v45 = vrot.slane %v4471_v37, %v4396_v12  ;;  %v4024_v47 = vld [vmem:[%s5378_s7 + $0x28] sm:$0xff]   ;;  %vm2563_vm7 = vcmask 1047559  }
  0x15   : > { %1462 = vbcast.lane.b32.xlu1 %v1460_v20, 256  ;;  %v4023_v43 = vld [vmem:[%s4408_s26 + $0x10] sm:$0xff]   ;;  %v1509_v46 = vrot.slane %v4471_v37, %v4416_v17  ;;  %v4025_v48 = vld [vmem:[%s4408_s26 + $0x18] sm:$0xff]   ;;  %v4026_v49 = vld [vmem:[%s5379_s8 + $0x28] sm:$0xff]   ;;  %v1516_v50 = vrot.slane %v4471_v37, %v4399_v13  ;;  %v1523_v52 = vrot.slane %v4471_v37, %v4422_v21  ;;  %v1530_v56 = vrot.slane %v4471_v37, %v4434_v25 }
  0x16   : > { %3811 = vmatpush3.bf16.msra.mxu0 %v4004_v7  ;;  %v4022_v44 = vld [vmem:[%s5379_s8 + $0x30] sm:$0xff]   ;;  %v4027_v51 = vld [vmem:[%s5378_s7 + $0x20] sm:$0xff]   ;;  %v4030_v57 = vld [vmem:[%s5378_s7 + $0x18] sm:$0xff]   ;;  %v1537_v58 = vrot.slane %v4471_v37, %v4438_v27  ;;  %v1544_v61 = vrot.slane %v4471_v37, %v4456_v31 }
  0x17   : > { %3812 = vmatprep.subr.bf16.mxu0 %v4252_v1  ;;  %3831 = vmatpush3.bf16.msra.mxu1 %v4005_v5  ;;  %v4028_v53 = vld [vmem:[%s5379_s8 + $0x20] sm:$0xff]   ;;  %v4032_v59 = vld [vmem:[%s5379_s8 + $0x18] sm:$0xff]   ;;  %v4031_v60 = vld [vmem:[%s4408_s26 + $0x28] sm:$0xff]  }
  0x18   : > { %3832 = vmatprep.subr.bf16.mxu1 %v4007_v8  ;;  %1455 = vbcast.lane.b32.xlu0 %v1453_v24, 256  ;;  %v4029_v54 = vld [vmem:[%s4408_s26 + $0x20] sm:$0xff]   ;;  %v4033_v62 = vld [vmem:[%s5378_s7 + $0x10] sm:$0xff]   ;;  %v4036_v2 = vld [vmem:[%s5378_s7 + $0x8] sm:$0xff]  }
  0x19   : > { %1469 = vbcast.lane.b32.xlu1 %v1467_v26, 256  ;;  %v4041_v55 = vld [vmem:[%s4506_s27] sm:$0xff]   ;;  %v4035_v63 = vld [vmem:[%s4408_s26 + $0x30] sm:$0xff]   ;;  %v4038_v3 = vld [vmem:[%s5379_s8 + $0x8] sm:$0xff]  }
  0x1a   : > { %3813 = vmatpush3.bf16.msra.mxu0 %v4006_v10  ;;  %v4034_v0 = vld [vmem:[%s5379_s8 + $0x10] sm:$0xff]   ;;  %v4037_v4 = vld [vmem:[%s4408_s26 + $0x38] sm:$0xff]   ;;  %v4039_v5 = vld [vmem:[%s5378_s7] sm:$0xff]  }
  0x1b   : > { %3814 = vmatprep.subr.bf16.mxu0 %v4252_v1  ;;  %3833 = vmatpush3.bf16.msra.mxu1 %v4007_v8  ;;  %v4043_v6 = vld [vmem:[%s4519_s17] sm:$0xff]   ;;  %v4042_v8 = vld [vmem:[%s4506_s27 + $0x8] sm:$0xff]   ;;  %v4045_v10 = vld [vmem:[%s4506_s27 + $0x10] sm:$0xff]  }
  0x1c   : > { %3834 = vmatprep.subr.bf16.mxu1 %v4009_v11  ;;  %1476 = vbcast.lane.b32.xlu0 %v1474_v30, 256  ;;  %v4040_v7 = vld [vmem:[%s5379_s8] sm:$0xff]   ;;  %v4048_v18 = vld [vmem:[%s4519_s17 + $0x18] sm:$0xff]   ;;  %v4050_v20 = vld [vmem:[%s4506_s27 + $0x28] sm:$0xff]  }
  0x1d   : > { %1483 = vbcast.lane.b32.xlu1 %v1481_v33, 256  ;;  %v4049_v16 = vld [vmem:[%s4506_s27 + $0x20] sm:$0xff]   ;;  %v4055_v24 = vld [vmem:[%s4519_s17 + $0x30] sm:$0xff]   ;;  %v4054_v26 = vld [vmem:[%s4506_s27 + $0x38] sm:$0xff]  }
  0x1e   : > { %3815 = vmatpush3.bf16.msra.mxu0 %v4008_v14  ;;  %v4047_v14 = vld [vmem:[%s4519_s17 + $0x10] sm:$0xff]   ;;  %v4051_v19 = vld [vmem:[%s4519_s17 + $0x20] sm:$0xff]  }
  0x1f   : > { %3816 = vmatprep.subr.bf16.mxu0 %v4252_v1  ;;  %3835 = vmatpush3.bf16.msra.mxu1 %v4009_v11  ;;  %v4044_v11 = vld [vmem:[%s4519_s17 + $0x8] sm:$0xff]   ;;  %v4058_v30 = vld [vmem:[%s5381_s10 + $0x30] sm:$0xff]   ;;  %v4060_v33 = vld [vmem:[%s5381_s10 + $0x20] sm:$0xff]  }
  0x20   : > { %3836 = vmatprep.subr.bf16.mxu1 %v4011_v15  ;;  %1490 = vbcast.lane.b32.xlu0 %v1488_v38, 256  ;;  %v4064_v38 = vld [vmem:[%s5381_s10] sm:$0xff]  }
  0x21   : > { %1497 = vbcast.lane.b32.xlu1 %v1495_v41, 256 }
  0x22   : > { %3817 = vmatpush3.bf16.msra.mxu0 %v4010_v22  ;;  %v4053_v22 = vld [vmem:[%s4506_s27 + $0x30] sm:$0xff]  }
  0x23   : > { %3818 = vmatprep.subr.bf16.mxu0 %v4252_v1  ;;  %3837 = vmatpush3.bf16.msra.mxu1 %v4011_v15  ;;  %v4046_v15 = vld [vmem:[%s4506_s27 + $0x18] sm:$0xff]  }
  0x24   : > { %3838 = vmatprep.subr.bf16.mxu1 %v4013_v23  ;;  %1504 = vbcast.lane.b32.xlu0 %v1502_v45, 256 }
  0x25   : > { %1511 = vbcast.lane.b32.xlu1 %v1509_v46, 256 }
  0x26   : > { %3819 = vmatpush3.bf16.msra.mxu0 %v4012_v28  ;;  %v4056_v28 = vld [vmem:[%s4519_s17 + $0x38] sm:$0xff]  }
  0x27   : > { %3820 = vmatprep.subr.bf16.mxu0 %v4252_v1  ;;  %3839 = vmatpush3.bf16.msra.mxu1 %v4013_v23  ;;  %v1551_v1 = vrot.slane %v4471_v37, %v4464_v35  ;;  %v4052_v23 = vld [vmem:[%s4519_s17 + $0x28] sm:$0xff]  }
  0x28   : > { %3840 = vmatprep.subr.bf16.mxu1 %v4015_v32  ;;  %1518 = vbcast.lane.b32.xlu0 %v1516_v50, 256  ;;  %v4063_v37 = vld [vmem:[%s5381_s10 + $0x8] sm:$0xff]  }
  0x29   : > { %1525 = vbcast.lane.b32.xlu1 %v1523_v52, 256 }
  0x2a   : > { %3821 = vmatpush3.bf16.msra.mxu0 %v4014_v29  ;;  %v4057_v29 = vld [vmem:[%s5381_s10 + $0x38] sm:$0xff]  }
  0x2b   : > { %3858 = vmatprep.subr.bf16.mxu0 %v4018_v36  ;;  %3841 = vmatpush3.bf16.msra.mxu1 %v4015_v32  ;;  %v4059_v32 = vld [vmem:[%s5381_s10 + $0x28] sm:$0xff]  }
  0x2c   : > { %3890 = vmatprep.subr.bf16.mxu1 %v4020_v39  ;;  %1532 = vbcast.lane.b32.xlu0 %v1530_v56, 256 }
  0x2d   : > { %3823 = vmatmul.mubr.bf16.vlgmr.msra.gmra.mxu0 %v637_v34  ;;  %1539 = vbcast.lane.b32.xlu1 %v1537_v58, 256  ;;  %v4061_v34 = vld [vmem:[%s5381_s10 + $0x18] sm:$0xff]  }
  0x2e   : > { %3859 = vmatpush3.bf16.msra.mxu0 %v4018_v36  ;;  %3843 = vmatmul.mubr.bf16.vlgmr.msra.gmra.mxu1 %v4019_v40  ;;  %v4062_v36 = vld [vmem:[%s5381_s10 + $0x10] sm:$0xff]  }
  0x2f   : > { %3860 = vmatprep.subr.bf16.mxu0 %v4021_v42  ;;  %3891 = vmatpush3.bf16.msra.mxu1 %v4020_v39 }
  0x30   : > { %3846 = vmatprep.mubr.bf16.mxu1 %v4023_v43  ;;  %3892 = vmatprep.subr.bf16.mxu1 %v4022_v44 }
  0x31   : > { %3874 = vmatprep.mubr.bf16.mxu0 %v4041_v55  ;;  %1546 = vbcast.lane.b32.xlu0 %v1544_v61, 256 }
  0x32   : > { %3861 = vmatpush3.bf16.msra.mxu0 %v4021_v42  ;;  %1553 = vbcast.lane.b32.xlu1 %v1551_v1, 256 }
  0x33   : > { %3862 = vmatprep.subr.bf16.mxu0 %v4024_v47  ;;  %3893 = vmatpush3.bf16.msra.mxu1 %v4022_v44 }
  0x34   : > { %3894 = vmatprep.subr.bf16.mxu1 %v4026_v49 }
  0x36   : > { %3863 = vmatpush3.bf16.msra.mxu0 %v4024_v47  ;;  %3847 = vmatmul.mubr.bf16.gmra.mxu1 %v4025_v48  ;;  %v4254_v47 = vmov 1966171168  }
  0x37   : > { %3864 = vmatprep.subr.bf16.mxu0 %v4027_v51  ;;  %3895 = vmatpush3.bf16.msra.mxu1 %v4026_v49  ;;  %v1575_v48 = vunpack.c.l.s4 %v4254_v47 }
  0x38   : > { %3850 = vmatprep.mubr.bf16.mxu1 %v4029_v54  ;;  %3896 = vmatprep.subr.bf16.mxu1 %v4028_v53 }
  0x3a   : > { %3865 = vmatpush3.bf16.msra.mxu0 %v4027_v51  ;;  %v1576_v51 = vunpack.c.0.s8 %v1575_v48 }
  0x3b   : > { %3866 = vmatprep.subr.bf16.mxu0 %v4030_v57  ;;  %3897 = vmatpush3.bf16.msra.mxu1 %v4028_v53 }
  0x3c   : > { %3898 = vmatprep.subr.bf16.mxu1 %v4032_v59  ;;  %v4606_v55 = vsub.s32 %v1576_v51, %v4377_v9 }
  0x3e   : > { %3867 = vmatpush3.bf16.msra.mxu0 %v4030_v57  ;;  %3851 = vmatmul.mubr.bf16.gmra.mxu1 %v4031_v60 }
  0x3f   : > { %3868 = vmatprep.subr.bf16.mxu0 %v4033_v62  ;;  %3899 = vmatpush3.bf16.msra.mxu1 %v4032_v59 }
  0x40   : > { %3854 = vmatprep.mubr.bf16.mxu1 %v4035_v63  ;;  %3900 = vmatprep.subr.bf16.mxu1 %v4034_v0 }
  0x42   : > { %3869 = vmatpush3.bf16.msra.mxu0 %v4033_v62 }
  0x43   : > { %3870 = vmatprep.subr.bf16.mxu0 %v4036_v2  ;;  %3901 = vmatpush3.bf16.msra.mxu1 %v4034_v0 }
  0x44   : > { %3902 = vmatprep.subr.bf16.mxu1 %v4038_v3 }
  0x46   : > { %3871 = vmatpush3.bf16.msra.mxu0 %v4036_v2  ;;  %3855 = vmatmul.mubr.bf16.gmra.mxu1 %v4037_v4 }
  0x47   : > { %3872 = vmatprep.subr.bf16.mxu0 %v4039_v5  ;;  %3903 = vmatpush3.bf16.msra.mxu1 %v4038_v3 }
  0x48   : > { %3906 = vmatprep.mubr.bf16.mxu1 %v4043_v6  ;;  %3904 = vmatprep.subr.bf16.mxu1 %v4040_v7 }
  0x4a   : > { %3873 = vmatpush3.bf16.msra.mxu0 %v4039_v5 }
  0x4b   : > { %3905 = vmatpush3.bf16.msra.mxu1 %v4040_v7  ;;  %3922 = vmatprep.subr.bf16.mxu0 %v4057_v29 }
  0x4d   : > { %3875 = vmatmul.mubr.bf16.vlgmr.msra.gmra.mxu0 %v4042_v8  ;;  %v4635_v8 = vld [vmem:[%s5383_s12] sm:$0xff] }
  0x4e   : > { %3878 = vmatprep.mubr.bf16.mxu0 %v4045_v10  ;;  %3907 = vmatmul.mubr.bf16.vlgmr.msra.gmra.mxu1 %v4044_v11 }
  0x4f   : > { %3910 = vmatprep.mubr.bf16.mxu1 %v4047_v14  ;;  %3923 = vmatpush3.bf16.msra.mxu0 %v4057_v29 }
  0x50   : > { %3924 = vmatprep.subr.bf16.mxu0 %v4058_v30 }
  0x53   : > { %3925 = vmatpush3.bf16.msra.mxu0 %v4058_v30  ;;  %v4649_v30 = vrot.slane %v4635_v8, %v4396_v12 }
  0x54   : > { %3926 = vmatprep.subr.bf16.mxu0 %v4059_v32 }
  0x55   : > { %3879 = vmatmul.mubr.bf16.gmra.mxu0 %v4046_v15 }
  0x56   : > { %3882 = vmatprep.mubr.bf16.mxu0 %v4049_v16  ;;  %3911 = vmatmul.mubr.bf16.gmra.mxu1 %v4048_v18 }
  0x57   : > { %3914 = vmatprep.mubr.bf16.mxu1 %v4051_v19  ;;  %3927 = vmatpush3.bf16.msra.mxu0 %v4059_v32 }
  0x58   : > { %3928 = vmatprep.subr.bf16.mxu0 %v4060_v33 }
  0x5b   : > { %3929 = vmatpush3.bf16.msra.mxu0 %v4060_v33 }
  0x5c   : > { %3930 = vmatprep.subr.bf16.mxu0 %v4061_v34 }
  0x5d   : > { %3883 = vmatmul.mubr.bf16.gmra.mxu0 %v4050_v20 }
  0x5e   : > { %3886 = vmatprep.mubr.bf16.mxu0 %v4053_v22  ;;  %3915 = vmatmul.mubr.bf16.gmra.mxu1 %v4052_v23 }
  0x5f   : > { %3918 = vmatprep.mubr.bf16.mxu1 %v4055_v24  ;;  %3931 = vmatpush3.bf16.msra.mxu0 %v4061_v34 }
  0x60   : > { %3932 = vmatprep.subr.bf16.mxu0 %v4062_v36 }
  0x63   : > { %3933 = vmatpush3.bf16.msra.mxu0 %v4062_v36 }
  0x64   : > { %3934 = vmatprep.subr.bf16.mxu0 %v4063_v37 }
  0x65   : > { %3887 = vmatmul.mubr.bf16.gmra.mxu0 %v4054_v26 }
  0x66   : > { %3919 = vmatmul.mubr.bf16.gmra.mxu1 %v4056_v28 }
  0x67   : > { %3935 = vmatpush3.bf16.msra.mxu0 %v4063_v37 }
  0x68   : > { %3936 = vmatprep.subr.bf16.mxu0 %v4064_v38 }
  0x6b   : > { %3937 = vmatpush3.bf16.msra.mxu0 %v4064_v38 }
  0x86   : > { %v1449_v54 = vpop.permute.xlu0 %1448 }
  0x87   : > { %v1463_v58 = vpop.permute.xlu1 %1462 }
  0x8a   : > { %v4615_v61 = vpop.permute.xlu0 %1455 }
  0x8b   : > { %v1470_v2 = vpop.permute.xlu1 %1469 }
  0x8e   : > { %v4625_v5 = vpop.permute.xlu0 %1476 }
  0x8f   : > { %v4639_v19 = vpop.permute.xlu1 %1483 }
  0x92   : > { %v1491_v32 = vpop.permute.xlu0 %1490 }
  0xed   : > { %v745_v39 = vpop.f32.mrf.mxu0 }
  0xee   : > { %v3844_v40 = vpop.f32.mrf.mxu1  ;;  %v1580_v59 = vrot.slane %v745_v39, %v4606_v55  ;;  %v1573_v62 = vcombine.high %v745_v39, %v745_v39 }
  0xef   : > { %v3824_v41 = vpop.f32.mrf.mxu0 }
  0xf0   : > { %v946_v42 = vpop.f32.mrf.mxu1  ;;  %v1588_v0 = vcombine.high %v1580_v59, %v1580_v59  ;;  %v1587_v9 = vrot.slane %v1573_v62, %v4606_v55  ;;  %v1596_v3 = vrot.slane %v1580_v59, %v4606_v55 }
  0xf1   : > { %v748_v43 = vpop.f32.mrf.mxu0 }
  0xf2   : > { %v3845_v44 = vpop.f32.mrf.mxu1  ;;  %v4628_v6 = vrot.slane %v1588_v0, %v4606_v55  ;;  %v1589_v10 = vcombine.high %v1587_v9, %v1587_v9  ;;  %v1618_v11 = vcombine.high %v1596_v3, %v1596_v3  ;;  %v1622_v14 = vcombine.high %v748_v43, %v748_v43 }
  0xf3   : > { %v3825_v45 = vpop.f32.mrf.mxu0  ;;  %v4642_v20 = vrot.slane %v1587_v9, %v4606_v55  ;;  %v1629_v22 = vrot.slane %v748_v43, %v4606_v55  ;;  %v1674_v34 = vrot.slane %v1596_v3, %v4396_v12 }
  0xf4   : > { %v4595_v46 = vpop.f32.mrf.mxu1  ;;  %v1620_v26 = vcombine.high %v4628_v6, %v4628_v6  ;;  %v4652_v33 = vrot.slane %v1589_v10, %v4606_v55  ;;  %v1636_v36 = vrot.slane %v1622_v14, %v4606_v55  ;;  %v1682_v38 = vrot.slane %v1618_v11, %v4396_v12 }
  0xf5   : > { %v1637_v45 = vcombine.high %v1629_v22, %v1629_v22  ;;  %v4660_v47 = vrot.slane %v1629_v22, %v4606_v55  ;;  %v1690_v62 = vrot.slane %v4642_v20, %v4396_v12  ;;  %v1619_v14 = vcombine.high %v4642_v20, %v4642_v20 }
  0xf6   : > { %v4597_v49 = vpop.f32.mrf.mxu1  ;;  %v1686_v59 = vrot.slane %v1620_v26, %v4396_v12  ;;  %v1638_v10 = vcombine.high %v1636_v36, %v1636_v36  ;;  %v4673_v22 = vrot.slane %v1636_v36, %v4606_v55 }
  0xf7   : > { %v4681_v26 = vrot.slane %v1637_v45, %v4606_v55 }
  0xf8   : > { %v4599_v50 = vpop.f32.mrf.mxu1 }
  0xfa   : > { %v4601_v52 = vpop.f32.mrf.mxu1 }
  0xfc   : > { %v4603_v53 = vpop.f32.mrf.mxu1 }
  0xfe   : > { %v4608_v56 = vpop.f32.mrf.mxu1 }
 0x100   : > { %v4610_v57 = vpop.f32.mrf.mxu1 }
 0x102   : > { %v4613_v60 = vpop.f32.mrf.mxu1 }
 0x104   : > { %v4617_v63 = vpop.f32.mrf.mxu1 }
 0x106   : > { %v4619_v1 = vpop.f32.mrf.mxu1 }
 0x108   : > { %v4623_v4 = vpop.f32.mrf.mxu1 }
 0x10a   : > { %v4630_v7 = vpop.f32.mrf.mxu1 }
 0x10c   : > { %v4637_v15 = vpop.f32.mrf.mxu1 }
 0x10d   : > { %v3876_v16 = vpop.f32.mrf.mxu0 }
 0x10e   : > { %v1148_v18 = vadd.f32 %v3876_v16, %v3844_v40  ;;  %v3908_v23 = vpop.f32.mrf.mxu1  ;;  %v1694_v16 = vrot.slane %v4652_v33, %v4396_v12 }
 0x10f   : > { %v1139_v24 = vpop.f32.mrf.mxu0 }
 0x110   : > { %v1429_v28 = vadd.f32 %v3908_v23, %v1148_v18  ;;  %v1140_v29 = vadd.f32 %v1139_v24, %v946_v42  ;;  %v1364_v37 = vpop.f32.mrf.mxu1  ;;  %v1678_v42 = vrot.slane %v4628_v6, %v4396_v12  ;;  %v1621_v18 = vcombine.high %v4652_v33, %v4652_v33  ;;  %v4678_v24 = vpop.permute.xlu0 %1504 }
 0x111   : > { %v3877_v39 = vpop.f32.mrf.mxu0 }
 0x112   : > { %v1427_v40 = vadd.f32 %v1364_v37, %v1140_v29  ;;  %v1557_v41 = vmul.f32 %v1463_v58, %v1429_v28  ;;  %v1151_v43 = vadd.f32 %v3877_v39, %v3845_v44  ;;  %v3909_v48 = vpop.f32.mrf.mxu1  ;;  %v1498_v44 = vpop.permute.xlu1 %1497  ;;  %v1667_v28 = vcombine.high %v4660_v47, %v4660_v47 }
 0x113   : > { %v1142_v51 = vpop.f32.mrf.mxu0  ;;  %v1706_v29 = vrot.slane %v4660_v47, %v4396_v12 }
 0x114   : > { %v1555_v0 = vmul.f32 %v1449_v54, %v1427_v40  ;;  %v1753_v9 = vadd.f32 %v1682_v38, %v1557_v41  ;;  %v1430_v3 = vadd.f32 %v3909_v48, %v1151_v43  ;;  %v1143_v58 = vadd.f32 %v1142_v51, %v4595_v46  ;;  %v1367_v11 = vpop.f32.mrf.mxu1 }
 0x115   : > { %v3880_v6 = vpop.f32.mrf.mxu0  ;;  %v1698_v51 = vrot.slane %v1619_v14, %v4396_v12 }
 0x116   : > { %v4676_v54 = vadd.f32 %v4649_v30, %v1753_v9  ;;  %v1428_v46 = vadd.f32 %v1367_v11, %v1143_v58  ;;  %v1558_v23 = vmul.f32 %v1470_v2, %v1430_v3  ;;  %v1164_v37 = vadd.f32 %v3880_v6, %v4597_v49  ;;  %v3912_v36 = vpop.f32.mrf.mxu1 }
 0x117   : > { %v1155_v38 = vpop.f32.mrf.mxu0  ;;  %v1751_v39 = vadd.f32 %v1674_v34, %v1555_v0  ;;  %v1702_v3 = vrot.slane %v1621_v18, %v4396_v12  ;;  %v4695_v49 = vrot.slane %v1638_v10, %v4606_v55  ;;  %v1519_v10 = vpop.permute.xlu0 %1518 }
 0x118   : > { %v1789_v40 = vmul.f32 %v4676_v54, %v4676_v54  ;;  %v1556_v2 = vmul.f32 %v4615_v61, %v1428_v46  ;;  %v1754_v41 = vadd.f32 %v1686_v59, %v1558_v23  ;;  %v1433_v43 = vadd.f32 %v3912_v36, %v1164_v37  ;;  %v1380_v48 = vpop.f32.mrf.mxu1  ;;  %v4701_v61 = vpop.permute.xlu1 %1511 }
 0x119   : > { %v1156_v45 = vadd.f32 %v1155_v38, %v4599_v50  ;;  %v3881_v9 = vpop.f32.mrf.mxu0  ;;  %v1714_v46 = vrot.slane %v1667_v28, %v4396_v12  ;;  %v4706_v18 = vadd.f32 %v4649_v30, %v1751_v39  ;;  %v1669_v23 = vcombine.high %v4681_v26, %v4681_v26 }
 0x11a   : > { %v1805_v34 = vmul.f32 %v1789_v40, %v4676_v54  ;;  %v1752_v0 = vadd.f32 %v1678_v42, %v1556_v2  ;;  %v4699_v58 = vadd.f32 %v4649_v30, %v1754_v41  ;;  %v1561_v11 = vmul.f32 %v1491_v32, %v1433_v43  ;;  %v3913_v6 = vpop.f32.mrf.mxu1 }
 0x11b   : > { %v1431_v59 = vadd.f32 %v1380_v48, %v1156_v45  ;;  %v1167_v50 = vadd.f32 %v3881_v9, %v4601_v52  ;;  %v1158_v14 = vpop.f32.mrf.mxu0  ;;  %v1710_v2 = vrot.slane %v4681_v26, %v4396_v12  ;;  %v1668_v41 = vcombine.high %v4673_v22, %v4673_v22 }
 0x11c   : > { %v1821_v55 = vmul.f32 0.044715, %v1805_v34  ;;  %v1790_v42 = vmul.f32 %v4699_v58, %v4699_v58  ;;  %v1757_v32 = vadd.f32 %v1698_v51, %v1561_v11  ;;  %v1159_v52 = vadd.f32 %v1158_v14, %v4603_v53  ;;  %v1383_v38 = vpop.f32.mrf.mxu1  ;;  %v1526_v34 = vpop.permute.xlu1 %1525 }
 0x11d   : > { %v1559_v37 = vmul.f32 %v4625_v5, %v1431_v59  ;;  %v1434_v36 = vadd.f32 %v3913_v6, %v1167_v50  ;;  %v3884_v40 = vpop.f32.mrf.mxu0  ;;  %v4715_v28 = vadd.f32 %v4649_v30, %v1752_v0  ;;  %v1718_v0 = vrot.slane %v1669_v23, %v4396_v12 }
 0x11e   : > { %v1180_v39 = vadd.f32 %v3884_v40, %v4608_v56  ;;  %v1837_v43 = vadd.f32 %v1821_v55, %v4676_v54  ;;  %v1806_v5 = vmul.f32 %v1790_v42, %v4699_v58  ;;  %v1432_v45 = vadd.f32 %v1383_v38, %v1159_v52  ;;  %v3916_v53 = vpop.f32.mrf.mxu1  ;;  %v1533_v52 = vpop.permute.xlu0 %1532 }
 0x11f   : > { %v1562_v48 = vmul.f32 %v1498_v44, %v1434_v36  ;;  %v1171_v51 = vpop.f32.mrf.mxu0  ;;  %v1722_v56 = vrot.slane %v4673_v22, %v4396_v12  ;;  %v1670_v59 = vcombine.high %v4695_v49, %v4695_v49  ;;  %v1787_v11 = vmul.f32 %v4706_v18, %v4706_v18 }
 0x120   : > { %v1437_v9 = vadd.f32 %v3916_v53, %v1180_v39  ;;  %v1755_v50 = vadd.f32 %v1690_v62, %v1559_v37  ;;  %v4735_v44 = vadd.f32 %v4649_v30, %v1757_v32  ;;  %v1396_v14 = vpop.f32.mrf.mxu1  ;;  %v1560_v42 = vmul.f32 %v4639_v19, %v1432_v45 }
 0x121   : > { %v1758_v6 = vadd.f32 %v1702_v3, %v1562_v48  ;;  %v3885_v55 = vpop.f32.mrf.mxu0  ;;  %v1172_v23 = vadd.f32 %v1171_v51, %v4610_v57  ;;  %v1726_v38 = vrot.slane %v4695_v49, %v4396_v12  ;;  %v1853_v40 = vmul.f32 0.7978846, %v1837_v43 }
 0x122   : > { %v1565_v36 = vmul.f32 %v1519_v10, %v1437_v9  ;;  %v1788_v20 = vmul.f32 %v4715_v28, %v4715_v28  ;;  %v1822_v62 = vmul.f32 0.044715, %v1806_v5  ;;  %v3917_v37 = vpop.f32.mrf.mxu1  ;;  %v1730_v3 = vrot.slane %v1668_v41, %v4396_v12 }
 0x123   : > { %v1174_v32 = vpop.f32.mrf.mxu0  ;;  %v4745_v39 = vadd.f32 %v4649_v30, %v1758_v6  ;;  %v1435_v19 = vadd.f32 %v1396_v14, %v1172_v23  ;;  %v1183_v57 = vadd.f32 %v3885_v55, %v4613_v60  ;;  %v4749_v10 = vmul.f32 %v1787_v11, %v4706_v18  ;;  %v1540_v11 = vpop.permute.xlu1 %1539 }
 0x124   : > { %v1761_v45 = vadd.f32 %v1714_v46, %v1565_v36  ;;  %v4752_v43 = vadd.f32 %v4649_v30, %v1755_v50  ;;  %v1793_v5 = vmul.f32 %v4735_v44, %v4735_v44  ;;  %v1399_v48 = vpop.f32.mrf.mxu1  ;;  %v1734_v41 = vrot.slane %v1670_v59, %v4396_v12  ;;  %v1547_v23 = vpop.permute.xlu0 %1546 }
 0x125   : > { %v3888_v53 = vpop.f32.mrf.mxu0  ;;  %v1756_v51 = vadd.f32 %v1694_v16, %v1560_v42  ;;  %v1563_v46 = vmul.f32 %v4678_v24, %v1435_v19  ;;  %v1438_v9 = vadd.f32 %v3917_v37, %v1183_v57  ;;  %4154 = vtanh.f32 %v1853_v40 }
 0x126   : > { %v4762_v60 = vadd.f32 %v4649_v30, %v1761_v45  ;;  %v1804_v50 = vmul.f32 %v1788_v20, %v4715_v28  ;;  %v1838_v6 = vadd.f32 %v1822_v62, %v4699_v58  ;;  %v1175_v14 = vadd.f32 %v1174_v32, %v4617_v63  ;;  %v3920_v55 = vpop.f32.mrf.mxu1 }
 0x127   : > { %v1187_v59 = vpop.f32.mrf.mxu0  ;;  %v1794_v33 = vmul.f32 %v4745_v39, %v4745_v39  ;;  %v1759_v16 = vadd.f32 %v1706_v29, %v1563_v46  ;;  %v1566_v24 = vmul.f32 %v1526_v34, %v1438_v9  ;;  %v1196_v42 = vadd.f32 %v3888_v53, %v4619_v1  ;;  %v1554_v9 = vpop.permute.xlu1 %1553 }
 0x128   : > { %v1791_v36 = vmul.f32 %v4752_v43, %v4752_v43  ;;  %v1809_v40 = vmul.f32 %v1793_v5, %v4735_v44  ;;  %v1436_v20 = vadd.f32 %v1399_v48, %v1175_v14  ;;  %v1188_v63 = vadd.f32 %v1187_v59, %v4623_v4  ;;  %v1412_v62 = vpop.f32.mrf.mxu1 }
 0x129   : > { %v3889_v37 = vpop.f32.mrf.mxu0  ;;  %v4778_v32 = vadd.f32 %v4649_v30, %v1756_v51  ;;  %v1797_v47 = vmul.f32 %v4762_v60, %v4762_v60  ;;  %v1762_v29 = vadd.f32 %v1718_v0, %v1566_v24  ;;  %v1441_v34 = vadd.f32 %v3920_v55, %v1196_v42 }
 0x12a   : > { %v1854_v1 = vmul.f32 0.7978846, %v1838_v6  ;;  %v1564_v19 = vmul.f32 %v4701_v61, %v1436_v20  ;;  %v1439_v45 = vadd.f32 %v1412_v62, %v1188_v63  ;;  %v1199_v57 = vadd.f32 %v3889_v37, %v4630_v7  ;;  %v3921_v5 = vpop.f32.mrf.mxu1 }
 0x12b   : > { %v1190_v48 = vpop.f32.mrf.mxu0  ;;  %v1810_v4 = vmul.f32 %v1794_v33, %v4745_v39  ;;  %v4786_v53 = vadd.f32 %v4649_v30, %v1759_v16  ;;  %v4789_v51 = vadd.f32 %v4649_v30, %v1762_v29  ;;  %v1569_v46 = vmul.f32 %v1547_v23, %v1441_v34 }
 0x12c   : > { %v1760_v0 = vadd.f32 %v1710_v2, %v1564_v19  ;;  %v1567_v61 = vmul.f32 %v1533_v52, %v1439_v45  ;;  %v1442_v6 = vadd.f32 %v3921_v5, %v1199_v57  ;;  %v1191_v7 = vadd.f32 %v1190_v48, %v4637_v15  ;;  %v1415_v14 = vpop.f32.mrf.mxu1 }
 0x12d   : > { %v1825_v55 = vmul.f32 0.044715, %v1809_v40  ;;  %v1792_v59 = vmul.f32 %v4778_v32, %v4778_v32  ;;  %v1813_v33 = vmul.f32 %v1797_v47, %v4762_v60  ;;  %v1798_v16 = vmul.f32 %v4789_v51, %v4789_v51 }
 0x12e   : > { %v1763_v24 = vadd.f32 %v1722_v56, %v1567_v61  ;;  %v1765_v26 = vadd.f32 %v1730_v3, %v1569_v46  ;;  %v1440_v2 = vadd.f32 %v1415_v14, %v1191_v7  ;;  %v1570_v52 = vmul.f32 %v1554_v9, %v1442_v6 }
 0x12f   : > { %v1826_v42 = vmul.f32 0.044715, %v1810_v4  ;;  %v1795_v15 = vmul.f32 %v4786_v53, %v4786_v53  ;;  %v4806_v23 = vadd.f32 %v4649_v30, %v1760_v0  ;;  %v1814_v40 = vmul.f32 %v1798_v16, %v4789_v51 }
 0x130   : > { %v4810_v20 = vadd.f32 %v4649_v30, %v1763_v24  ;;  %v1568_v63 = vmul.f32 %v1540_v11, %v1440_v2  ;;  %v1766_v62 = vadd.f32 %v1734_v41, %v1570_v52  ;;  %v1819_v22 = vmul.f32 0.044715, %v4749_v10 }
 0x131   : > { %4156 = vtanh.f32 %v1854_v1  ;;  %v1807_v56 = vmul.f32 %v1791_v36, %v4752_v43  ;;  %v1829_v3 = vmul.f32 0.044715, %v1813_v33  ;;  %v1820_v37 = vmul.f32 0.044715, %v1804_v50 }
 0x132   : > { %v1808_v47 = vmul.f32 %v1792_v59, %v4778_v32  ;;  %v4816_v29 = vadd.f32 %v4649_v30, %v1765_v26  ;;  %v1764_v34 = vadd.f32 %v1726_v38, %v1568_v63  ;;  %v4822_v19 = vadd.f32 %v4649_v30, %v1766_v62  ;;  %v4155_v41 = vpop.eup %4154 }
 0x133   : > { %v1841_v10 = vadd.f32 %v1825_v55, %v4735_v44  ;;  %v1842_v11 = vadd.f32 %v1826_v42, %v4745_v39  ;;  %v1796_v50 = vmul.f32 %v4806_v23, %v4806_v23  ;;  %v1830_v36 = vmul.f32 0.044715, %v1814_v40 }
 0x134   : > { %v1811_v1 = vmul.f32 %v1795_v15, %v4786_v53  ;;  %v1799_v45 = vmul.f32 %v4810_v20, %v4810_v20  ;;  %v4832_v49 = vadd.f32 %v4649_v30, %v1764_v34  ;;  %v1835_v38 = vadd.f32 %v1819_v22, %v4706_v18 }
 0x135   : > { %v1845_v57 = vadd.f32 %v1829_v3, %v4762_v60  ;;  %v1802_v5 = vmul.f32 %v4822_v19, %v4822_v19  ;;  %v1836_v48 = vadd.f32 %v1820_v37, %v4715_v28  ;;  %v1823_v4 = vmul.f32 0.044715, %v1807_v56 }
 0x136   : > { %v1801_v46 = vmul.f32 %v4816_v29, %v4816_v29  ;;  %v1800_v9 = vmul.f32 %v4832_v49, %v4832_v49  ;;  %v1851_v0 = vmul.f32 0.7978846, %v1835_v38  ;;  %v1824_v61 = vmul.f32 0.044715, %v1808_v47 }
 0x137   : > { %v1812_v30 = vmul.f32 %v1796_v50, %v4806_v23  ;;  %v1846_v6 = vadd.f32 %v1830_v36, %v4789_v51  ;;  %v1852_v7 = vmul.f32 0.7978846, %v1836_v48  ;;  %v1839_v14 = vadd.f32 %v1823_v4, %v4752_v43 }
 0x138   : > { %v1815_v55 = vmul.f32 %v1799_v45, %v4810_v20  ;;  %v1816_v59 = vmul.f32 %v1800_v9, %v4832_v49  ;;  %4158 = vtanh.f32 %v1851_v0  ;;  %v1840_v33 = vadd.f32 %v1824_v61, %v4778_v32 }
 0x139   : > { %v1818_v16 = vmul.f32 %v1802_v5, %v4822_v19  ;;  %4160 = vtanh.f32 %v1852_v7  ;;  %v1855_v24 = vmul.f32 0.7978846, %v1839_v14  ;;  %v1857_v26 = vmul.f32 0.7978846, %v1841_v10 }
 0x13a   : > { %v1856_v2 = vmul.f32 0.7978846, %v1840_v33  ;;  %v1858_v52 = vmul.f32 0.7978846, %v1842_v11  ;;  %v1827_v42 = vmul.f32 0.044715, %v1811_v1  ;;  %v1817_v15 = vmul.f32 %v1801_v46, %v4816_v29 }
 0x13b   : > { %4162 = vtanh.f32 %v1855_v24  ;;  %v1828_v40 = vmul.f32 0.044715, %v1812_v30  ;;  %v1861_v63 = vmul.f32 0.7978846, %v1845_v57  ;;  %v1831_v22 = vmul.f32 0.044715, %v1815_v55 }
 0x13c   : > { %4164 = vtanh.f32 %v1856_v2  ;;  %v1843_v62 = vadd.f32 %v1827_v42, %v4786_v53  ;;  %v1832_v56 = vmul.f32 0.044715, %v1816_v59  ;;  %v1834_v3 = vmul.f32 0.044715, %v1818_v16 }
 0x13d   : > { %4166 = vtanh.f32 %v1857_v26  ;;  %v1844_v37 = vadd.f32 %v1828_v40, %v4806_v23  ;;  %v1862_v47 = vmul.f32 0.7978846, %v1846_v6  ;;  %v1847_v11 = vadd.f32 %v1831_v22, %v4810_v20 }
 0x13e   : > { %v4157_v34 = vpop.eup %4156  ;;  %4168 = vtanh.f32 %v1858_v52  ;;  %v1859_v10 = vmul.f32 0.7978846, %v1843_v62  ;;  %v1848_v50 = vadd.f32 %v1832_v56, %v4832_v49  ;;  %v1833_v1 = vmul.f32 0.044715, %v1817_v15 }
 0x13f   : > { %v1860_v36 = vmul.f32 0.7978846, %v1844_v37  ;;  %4170 = vtanh.f32 %v1861_v63  ;;  %v1863_v45 = vmul.f32 0.7978846, %v1847_v11  ;;  %v1886_v57 = vadd.f32 1.0, %v4157_v34 }
 0x140   : > { %4172 = vtanh.f32 %v1859_v10  ;;  %v1864_v38 = vmul.f32 0.7978846, %v1848_v50  ;;  %v1850_v5 = vadd.f32 %v1834_v3, %v4822_v19  ;;  %v1885_v48 = vadd.f32 1.0, %v4155_v41 }
 0x141   : > { %4174 = vtanh.f32 %v1860_v36  ;;  %v1849_v4 = vadd.f32 %v1833_v1, %v4816_v29  ;;  %v1902_v9 = vmul.f32 0.5, %v1886_v57 }
 0x142   : > { %4176 = vtanh.f32 %v1862_v47  ;;  %v1866_v30 = vmul.f32 0.7978846, %v1850_v5  ;;  %v1901_v6 = vmul.f32 0.5, %v1885_v48 }
 0x143   : > { %4178 = vtanh.f32 %v1863_v45  ;;  %v1865_v59 = vmul.f32 0.7978846, %v1849_v4  ;;  %v1918_v16 = vmul.f32 %v1902_v9, %v4699_v58 }
 0x144   : > { %4180 = vtanh.f32 %v1864_v38  ;;  %v1917_v42 = vmul.f32 %v1901_v6, %v4676_v54 }
 0x145   : > { %v4159_v46 = vpop.eup %4158  ;;  %4182 = vtanh.f32 %v1866_v30 }
 0x146   : > { %v4161_v0 = vpop.eup %4160  ;;  %v1883_v61 = vadd.f32 1.0, %v4159_v46  ;;  %4184 = vtanh.f32 %v1865_v59  ;;  %v1932_v47 = vpack.c.bf16 %v1918_v16, %v1917_v42 }
 0x147   : > { %v1884_v7 = vadd.f32 1.0, %v4161_v0 }
 0x148   : > { %v4163_v14 = vpop.eup %4162  ;;  %v1899_v55 = vmul.f32 0.5, %v1883_v61 }
 0x149   : > { %v4165_v33 = vpop.eup %4164  ;;  %v1900_v24 = vmul.f32 0.5, %v1884_v7  ;;  %v1887_v26 = vadd.f32 1.0, %v4163_v14 }
 0x14a   : > { %v4167_v41 = vpop.eup %4166  ;;  %v1888_v2 = vadd.f32 1.0, %v4165_v33  ;;  %v1915_v15 = vmul.f32 %v1899_v55, %v4706_v18 }
 0x14b   : > { %v4169_v52 = vpop.eup %4168  ;;  %v1916_v40 = vmul.f32 %v1900_v24, %v4715_v28  ;;  %v1903_v63 = vmul.f32 0.5, %v1887_v26  ;;  %v1889_v56 = vadd.f32 1.0, %v4167_v41 }
 0x14c   : > { %v4171_v62 = vpop.eup %4170  ;;  %v1904_v22 = vmul.f32 0.5, %v1888_v2  ;;  %v1890_v3 = vadd.f32 1.0, %v4169_v52 }
 0x14d   : > { %v4173_v37 = vpop.eup %4172  ;;  %v1931_v58 = vpack.c.bf16 %v1916_v40, %v1915_v15  ;;  %v1919_v10 = vmul.f32 %v1903_v63, %v4752_v43  ;;  %v1905_v45 = vmul.f32 0.5, %v1889_v56  ;;  %v1893_v61 = vadd.f32 1.0, %v4171_v62  ;;  %v4071_v62 = vld [vmem:[%s5382_s11 + $0x8] sm:$0xff]  }
 0x14e   : > { %v4175_v34 = vpop.eup %4174  ;;  %v1920_v11 = vmul.f32 %v1904_v22, %v4778_v32  ;;  %v1906_v50 = vmul.f32 0.5, %v1890_v3  ;;  %v1891_v54 = vadd.f32 1.0, %v4173_v37  ;;  %v4072_v22 = vld [vmem:[%s5382_s11] sm:$0xff]   ;;  %v4899_v56 = vrot.slane %v4635_v8, %v4416_v17 }
 0x14f   : > { %v4177_v36 = vpop.eup %4176  ;;  %3938 = vmatprep.mubr.bf16.mxu0 %v1931_v58  ;;  %v1892_v18 = vadd.f32 1.0, %v4175_v34  ;;  %v1921_v0 = vmul.f32 %v1905_v45, %v4735_v44  ;;  %v1909_v33 = vmul.f32 0.5, %v1893_v61 }
 0x150   : > { %v4179_v28 = vpop.eup %4178  ;;  %3939 = vmatmul.mubr.bf16.vlgmr.msra.gmra.mxu0 %v1932_v47  ;;  %v1933_v1 = vpack.c.bf16 %v1920_v11, %v1919_v10  ;;  %v1907_v38 = vmul.f32 0.5, %v1891_v54  ;;  %v1922_v48 = vmul.f32 %v1906_v50, %v4745_v39  ;;  %v1894_v4 = vadd.f32 1.0, %v4177_v36 }
 0x151   : > { %v4181_v57 = vpop.eup %4180  ;;  %v1908_v5 = vmul.f32 0.5, %v1892_v18  ;;  %v1895_v9 = vadd.f32 1.0, %v4179_v28  ;;  %v1925_v44 = vmul.f32 %v1909_v33, %v4762_v60  ;;  %v4066_v60 = vld [vmem:[%s5382_s11 + $0x30] sm:$0xff]  }
 0x152   : > { %3942 = vmatprep.mubr.bf16.mxu0 %v1933_v1  ;;  %v1896_v46 = vadd.f32 1.0, %v4181_v57  ;;  %v1923_v43 = vmul.f32 %v1907_v38, %v4786_v53  ;;  %v1934_v7 = vpack.c.bf16 %v1922_v48, %v1921_v0  ;;  %v1910_v14 = vmul.f32 0.5, %v1894_v4  ;;  %v4183_v55 = vpop.eup %4182 }
 0x153   : > { %v1924_v32 = vmul.f32 %v1908_v5, %v4806_v23  ;;  %v1911_v59 = vmul.f32 0.5, %v1895_v9  ;;  %v4185_v16 = vpop.eup %4184  ;;  %v1898_v24 = vadd.f32 1.0, %v4183_v55 }
 0x154   : > { %v1912_v6 = vmul.f32 0.5, %v1896_v46  ;;  %v1926_v53 = vmul.f32 %v1910_v14, %v4789_v51  ;;  %v1897_v26 = vadd.f32 1.0, %v4185_v16  ;;  %v4065_v51 = vld [vmem:[%s5382_s11 + $0x38] sm:$0xff]  }
 0x155   : > { %v1935_v30 = vpack.c.bf16 %v1924_v32, %v1923_v43  ;;  %v1927_v23 = vmul.f32 %v1911_v59, %v4810_v20  ;;  %v1914_v52 = vmul.f32 0.5, %v1898_v24  ;;  %3954 = vmatprep.subr.bf16.mxu1 %v4065_v51  ;;  %v4067_v20 = vld [vmem:[%s5382_s11 + $0x28] sm:$0xff]  }
 0x156   : > { %v1928_v39 = vmul.f32 %v1912_v6, %v4832_v49  ;;  %v1936_v2 = vpack.c.bf16 %v1926_v53, %v1925_v44  ;;  %v1913_v42 = vmul.f32 0.5, %v1897_v26  ;;  %3955 = vmatpush3.bf16.msra.mxu1 %v4065_v51  ;;  %v4070_v49 = vld [vmem:[%s5382_s11 + $0x10] sm:$0xff]  }
 0x157   : > { %v1930_v15 = vmul.f32 %v1914_v52, %v4822_v19  ;;  %3956 = vmatprep.subr.bf16.mxu1 %v4066_v60  ;;  %v4069_v19 = vld [vmem:[%s5382_s11 + $0x18] sm:$0xff]  }
 0x158   : > { %3943 = vmatmul.mubr.bf16.gmra.mxu0 %v1934_v7  ;;  %v1937_v41 = vpack.c.bf16 %v1928_v39, %v1927_v23  ;;  %v1929_v40 = vmul.f32 %v1913_v42, %v4816_v29  ;;  %v4068_v29 = vld [vmem:[%s5382_s11 + $0x20] sm:$0xff]  }
 0x159   : > { %3946 = vmatprep.mubr.bf16.mxu0 %v1935_v30 }
 0x15a   : > { %v1938_v63 = vpack.c.bf16 %v1930_v15, %v1929_v40  ;;  %3957 = vmatpush3.bf16.msra.mxu1 %v4066_v60 }
 0x15b   : > { %3958 = vmatprep.subr.bf16.mxu1 %v4067_v20 }
 0x15e   : > { %3959 = vmatpush3.bf16.msra.mxu1 %v4067_v20 }
 0x15f   : > { %3960 = vmatprep.subr.bf16.mxu1 %v4068_v29 }
 0x160   : > { %3947 = vmatmul.mubr.bf16.gmra.mxu0 %v1936_v2 }
 0x161   : > { %3950 = vmatprep.mubr.bf16.mxu0 %v1937_v41 }
 0x162   : > { %3961 = vmatpush3.bf16.msra.mxu1 %v4068_v29 }
 0x163   : > { %3962 = vmatprep.subr.bf16.mxu1 %v4069_v19 }
 0x166   : > { %3963 = vmatpush3.bf16.msra.mxu1 %v4069_v19 }
 0x167   : > { %3964 = vmatprep.subr.bf16.mxu1 %v4070_v49 }
 0x168   : > { %3951 = vmatmul.mubr.bf16.gmra.mxu0 %v1938_v63 }
 0x16a   : > { %3965 = vmatpush3.bf16.msra.mxu1 %v4070_v49 }
 0x16b   : > { %3966 = vmatprep.subr.bf16.mxu1 %v4071_v62 }
 0x16e   : > { %3967 = vmatpush3.bf16.msra.mxu1 %v4071_v62 }
 0x16f   : > { %3968 = vmatprep.subr.bf16.mxu1 %v4072_v22 }
 0x172   : > { %3969 = vmatpush3.bf16.msra.mxu1 %v4072_v22 }
 0x210   : > { %v3940_v3 = vpop.f32.mrf.mxu0 }
 0x211   : > { %v4902_v37 = vadd.f32 %v3940_v3, %v4899_v56 }
 0x212   : > { %v2041_v58 = vpop.f32.mrf.mxu0 }
 0x213   : > { %v2106_v47 = vmul.f32 %v4902_v37, %v4902_v37  ;;  %v4907_v34 = vadd.f32 %v2041_v58, %v4899_v56 }
 0x214   : > { %v3941_v10 = vpop.f32.mrf.mxu0 }
 0x215   : > { %v2122_v11 = vmul.f32 %v2106_v47, %v4902_v37  ;;  %v2104_v50 = vmul.f32 %v4907_v34, %v4907_v34  ;;  %v4913_v8 = vadd.f32 %v3941_v10, %v4899_v56 }
 0x216   : > { %v2044_v54 = vpop.f32.mrf.mxu0 }
 0x217   : > { %v2138_v36 = vmul.f32 0.044715, %v2122_v11  ;;  %v2120_v18 = vmul.f32 %v2104_v50, %v4907_v34  ;;  %v2107_v28 = vmul.f32 %v4913_v8, %v4913_v8  ;;  %v4919_v1 = vadd.f32 %v2044_v54, %v4899_v56 }
 0x218   : > { %v3944_v45 = vpop.f32.mrf.mxu0 }
 0x219   : > { %v2154_v38 = vadd.f32 %v2138_v36, %v4902_v37  ;;  %v2136_v57 = vmul.f32 0.044715, %v2120_v18  ;;  %v2123_v5 = vmul.f32 %v2107_v28, %v4913_v8  ;;  %v2105_v48 = vmul.f32 %v4919_v1, %v4919_v1 }
 0x21a   : > { %v4926_v4 = vadd.f32 %v3944_v45, %v4899_v56  ;;  %v2057_v46 = vpop.f32.mrf.mxu0 }
 0x21b   : > { %v2170_v43 = vmul.f32 0.7978846, %v2154_v38  ;;  %v2152_v32 = vadd.f32 %v2136_v57, %v4907_v34  ;;  %v2139_v9 = vmul.f32 0.044715, %v2123_v5  ;;  %v2121_v0 = vmul.f32 %v2105_v48, %v4919_v1 }
 0x21c   : > { %v2110_v61 = vmul.f32 %v4926_v4, %v4926_v4  ;;  %v4933_v30 = vadd.f32 %v2057_v46, %v4899_v56  ;;  %v3945_v6 = vpop.f32.mrf.mxu0 }
 0x21d   : > { %4186 = vtanh.f32 %v2170_v43  ;;  %v2168_v7 = vmul.f32 0.7978846, %v2152_v32  ;;  %v2155_v14 = vadd.f32 %v2139_v9, %v4913_v8  ;;  %v2137_v55 = vmul.f32 0.044715, %v2121_v0 }
 0x21e   : > { %v2126_v59 = vmul.f32 %v2110_v61, %v4926_v4  ;;  %v2108_v33 = vmul.f32 %v4933_v30, %v4933_v30  ;;  %v4940_v16 = vadd.f32 %v3945_v6, %v4899_v56  ;;  %v2060_v39 = vpop.f32.mrf.mxu0 }
 0x21f   : > { %v2171_v53 = vmul.f32 0.7978846, %v2155_v14  ;;  %v2153_v24 = vadd.f32 %v2137_v55, %v4919_v1  ;;  %v4944_v23 = vadd.f32 %v2060_v39, %v4899_v56  ;;  %4188 = vtanh.f32 %v2168_v7 }
 0x220   : > { %v2142_v44 = vmul.f32 0.044715, %v2126_v59  ;;  %v2124_v26 = vmul.f32 %v2108_v33, %v4933_v30  ;;  %v2111_v41 = vmul.f32 %v4940_v16, %v4940_v16  ;;  %v3948_v2 = vpop.f32.mrf.mxu0 }
 0x221   : > { %4190 = vtanh.f32 %v2171_v53  ;;  %v2169_v52 = vmul.f32 0.7978846, %v2153_v24  ;;  %v2109_v42 = vmul.f32 %v4944_v23, %v4944_v23  ;;  %v4952_v15 = vadd.f32 %v3948_v2, %v4899_v56 }
 0x222   : > { %v2158_v40 = vadd.f32 %v2142_v44, %v4926_v4  ;;  %v2140_v63 = vmul.f32 0.044715, %v2124_v26  ;;  %v2127_v51 = vmul.f32 %v2111_v41, %v4940_v16  ;;  %v2073_v60 = vpop.f32.mrf.mxu0 }
 0x223   : > { %4192 = vtanh.f32 %v2169_v52  ;;  %v2125_v20 = vmul.f32 %v2109_v42, %v4944_v23  ;;  %v2114_v29 = vmul.f32 %v4952_v15, %v4952_v15  ;;  %v4960_v19 = vadd.f32 %v2073_v60, %v4899_v56 }
 0x224   : > { %v2174_v49 = vmul.f32 0.7978846, %v2158_v40  ;;  %v2156_v62 = vadd.f32 %v2140_v63, %v4933_v30  ;;  %v2143_v22 = vmul.f32 0.044715, %v2127_v51  ;;  %v3949_v3 = vpop.f32.mrf.mxu0 }
 0x225   : > { %v2141_v58 = vmul.f32 0.044715, %v2125_v20  ;;  %v2130_v47 = vmul.f32 %v2114_v29, %v4952_v15  ;;  %v2112_v10 = vmul.f32 %v4960_v19, %v4960_v19  ;;  %v4967_v11 = vadd.f32 %v3949_v3, %v4899_v56 }
 0x226   : > { %4194 = vtanh.f32 %v2174_v49  ;;  %v2172_v50 = vmul.f32 0.7978846, %v2156_v62  ;;  %v2159_v54 = vadd.f32 %v2143_v22, %v4940_v16  ;;  %v2076_v36 = vpop.f32.mrf.mxu0 }
 0x227   : > { %v2157_v18 = vadd.f32 %v2141_v58, %v4944_v23  ;;  %v2146_v28 = vmul.f32 0.044715, %v2130_v47  ;;  %v2128_v45 = vmul.f32 %v2112_v10, %v4960_v19  ;;  %v2115_v38 = vmul.f32 %v4967_v11, %v4967_v11 }
 0x228   : > { %4196 = vtanh.f32 %v2172_v50  ;;  %v2175_v57 = vmul.f32 0.7978846, %v2159_v54  ;;  %v4975_v5 = vadd.f32 %v2076_v36, %v4899_v56  ;;  %v3952_v48 = vpop.f32.mrf.mxu0 }
 0x229   : > { %v2173_v46 = vmul.f32 0.7978846, %v2157_v18  ;;  %v2162_v43 = vadd.f32 %v2146_v28, %v4952_v15  ;;  %v2144_v32 = vmul.f32 0.044715, %v2128_v45  ;;  %v2131_v9 = vmul.f32 %v2115_v38, %v4967_v11 }
 0x22a   : > { %v4187_v0 = vpop.eup %4186  ;;  %4198 = vtanh.f32 %v2175_v57  ;;  %v2113_v61 = vmul.f32 %v4975_v5, %v4975_v5  ;;  %v4982_v6 = vadd.f32 %v3952_v48, %v4899_v56  ;;  %v2089_v7 = vpop.f32.mrf.mxu0 }
 0x22b   : > { %v2202_v14 = vadd.f32 1.0, %v4187_v0  ;;  %4200 = vtanh.f32 %v2173_v46  ;;  %v2178_v55 = vmul.f32 0.7978846, %v2162_v43  ;;  %v2160_v59 = vadd.f32 %v2144_v32, %v4960_v19 }
 0x22c   : > { %v2147_v33 = vmul.f32 0.044715, %v2131_v9  ;;  %v2129_v39 = vmul.f32 %v2113_v61, %v4975_v5  ;;  %v2118_v53 = vmul.f32 %v4982_v6, %v4982_v6  ;;  %v4989_v24 = vadd.f32 %v2089_v7, %v4899_v56  ;;  %v3953_v44 = vpop.f32.mrf.mxu0  ;;  %v4189_v26 = vpop.eup %4188 }
 0x22d   : > { %4202 = vtanh.f32 %v2178_v55  ;;  %v2176_v41 = vmul.f32 0.7978846, %v2160_v59  ;;  %v4992_v2 = vadd.f32 %v3953_v44, %v4899_v56  ;;  %v2218_v20 = vmul.f32 0.5, %v2202_v14 }
 0x22e   : > { %v4191_v52 = vpop.eup %4190  ;;  %v2163_v42 = vadd.f32 %v2147_v33, %v4967_v11  ;;  %v2145_v40 = vmul.f32 0.044715, %v2129_v39  ;;  %v2134_v63 = vmul.f32 %v2118_v53, %v4982_v6  ;;  %v2116_v51 = vmul.f32 %v4989_v24, %v4989_v24  ;;  %v2092_v60 = vpop.f32.mrf.mxu0 }
 0x22f   : > { %v2203_v29 = vadd.f32 1.0, %v4191_v52  ;;  %4204 = vtanh.f32 %v2176_v41  ;;  %v2119_v49 = vmul.f32 %v4992_v2, %v4992_v2  ;;  %v5004_v54 = vadd.f32 %v2092_v60, %v4899_v56 }
 0x230   : > { %v4193_v62 = vpop.eup %4192  ;;  %v2179_v22 = vmul.f32 0.7978846, %v2163_v42  ;;  %v2161_v3 = vadd.f32 %v2145_v40, %v4975_v5  ;;  %v2150_v58 = vmul.f32 0.044715, %v2134_v63  ;;  %v2132_v47 = vmul.f32 %v2116_v51, %v4989_v24 }
 0x231   : > { %v2219_v10 = vmul.f32 0.5, %v2203_v29  ;;  %v2135_v50 = vmul.f32 %v2119_v49, %v4992_v2  ;;  %v2200_v36 = vadd.f32 1.0, %v4189_v26  ;;  %v2117_v48 = vmul.f32 %v5004_v54, %v5004_v54 }
 0x232   : > { %4206 = vtanh.f32 %v2179_v22  ;;  %v2177_v18 = vmul.f32 0.7978846, %v2161_v3  ;;  %v2166_v28 = vadd.f32 %v2150_v58, %v4982_v6  ;;  %v2148_v45 = vmul.f32 0.044715, %v2132_v47 }
 0x233   : > { %v4195_v38 = vpop.eup %4194  ;;  %v2151_v57 = vmul.f32 0.044715, %v2135_v50  ;;  %v2201_v46 = vadd.f32 1.0, %v4193_v62  ;;  %v2216_v9 = vmul.f32 0.5, %v2200_v36  ;;  %v2234_v56 = vmul.f32 %v2218_v20, %v4902_v37 }
 0x234   : > { %4208 = vtanh.f32 %v2177_v18  ;;  %v2182_v43 = vmul.f32 0.7978846, %v2166_v28  ;;  %v2164_v32 = vadd.f32 %v2148_v45, %v4989_v24  ;;  %v2133_v7 = vmul.f32 %v2117_v48, %v5004_v54 }
 0x235   : > { %v4197_v0 = vpop.eup %4196  ;;  %v2167_v61 = vadd.f32 %v2151_v57, %v4992_v2  ;;  %v2217_v14 = vmul.f32 0.5, %v2201_v46  ;;  %v2235_v55 = vmul.f32 %v2219_v10, %v4913_v8  ;;  %v2232_v26 = vmul.f32 %v2216_v9, %v4907_v34 }
 0x236   : > { %4210 = vtanh.f32 %v2182_v43  ;;  %v2180_v59 = vmul.f32 0.7978846, %v2164_v32  ;;  %v2204_v33 = vadd.f32 1.0, %v4197_v0  ;;  %v2149_v44 = vmul.f32 0.044715, %v2133_v7 }
 0x237   : > { %v4199_v39 = vpop.eup %4198  ;;  %v2183_v53 = vmul.f32 0.7978846, %v2167_v61  ;;  %v2233_v41 = vmul.f32 %v2217_v14, %v4919_v1  ;;  %v2206_v42 = vadd.f32 1.0, %v4195_v38  ;;  %v2249_v20 = vpack.c.bf16 %v2235_v55, %v2234_v56 }
 0x238   : > { %v4201_v52 = vpop.eup %4200  ;;  %4212 = vtanh.f32 %v2180_v59  ;;  %v2220_v37 = vmul.f32 0.5, %v2204_v33  ;;  %v2207_v40 = vadd.f32 1.0, %v4199_v39  ;;  %v2165_v63 = vadd.f32 %v2149_v44, %v5004_v54 }
 0x239   : > { %4214 = vtanh.f32 %v2183_v53  ;;  %v2248_v51 = vpack.c.bf16 %v2233_v41, %v2232_v26  ;;  %v2205_v8 = vadd.f32 1.0, %v4201_v52  ;;  %v2222_v34 = vmul.f32 0.5, %v2206_v42  ;;  %v5032_v42 = vld [vmem:[%s5383_s12] sm:$0xff] }
 0x23a   : > { %v4203_v60 = vpop.eup %4202  ;;  %v2223_v29 = vmul.f32 0.5, %v2207_v40  ;;  %v2181_v49 = vmul.f32 0.7978846, %v2165_v63  ;;  %v2236_v1 = vmul.f32 %v2220_v37, %v4933_v30  ;;  %v5036_v40 = vrot.slane %v5032_v42, %v4399_v13 }
 0x23b   : > { %3970 = vmatprep.mubr.bf16.mxu1 %v2248_v51  ;;  %v2221_v62 = vmul.f32 0.5, %v2205_v8  ;;  %v2238_v36 = vmul.f32 %v2222_v34, %v4926_v4  ;;  %v2210_v18 = vadd.f32 1.0, %v4203_v60 }
 0x23c   : > { %v4205_v22 = vpop.eup %4204  ;;  %3971 = vmatmul.mubr.bf16.vlgmr.msra.gmra.mxu1 %v2249_v20  ;;  %4216 = vtanh.f32 %v2181_v49  ;;  %v2239_v58 = vmul.f32 %v2223_v29, %v4940_v16 }
 0x23d   : > { %v2237_v3 = vmul.f32 %v2221_v62, %v4944_v23  ;;  %v2208_v47 = vadd.f32 1.0, %v4205_v22  ;;  %v2226_v32 = vmul.f32 0.5, %v2210_v18 }
 0x23e   : > { %v2251_v38 = vpack.c.bf16 %v2239_v58, %v2238_v36 }
 0x23f   : > { %v4207_v10 = vpop.eup %4206  ;;  %v2250_v50 = vpack.c.bf16 %v2237_v3, %v2236_v1  ;;  %v2224_v48 = vmul.f32 0.5, %v2208_v47  ;;  %v2242_v14 = vmul.f32 %v2226_v32, %v4952_v15 }
 0x240   : > { %v2211_v28 = vadd.f32 1.0, %v4207_v10 }
 0x241   : > { %v4209_v45 = vpop.eup %4208  ;;  %3974 = vmatprep.mubr.bf16.mxu1 %v2250_v50  ;;  %v2240_v16 = vmul.f32 %v2224_v48, %v4960_v19 }
 0x242   : > { %v2209_v57 = vadd.f32 1.0, %v4209_v45  ;;  %v2227_v46 = vmul.f32 0.5, %v2211_v28 }
 0x243   : > { %v4211_v43 = vpop.eup %4210 }
 0x244   : > { %3975 = vmatmul.mubr.bf16.gmra.mxu1 %v2251_v38  ;;  %v2225_v30 = vmul.f32 0.5, %v2209_v57  ;;  %v2243_v4 = vmul.f32 %v2227_v46, %v4967_v11  ;;  %v2214_v55 = vadd.f32 1.0, %v4211_v43 }
 0x245   : > { %v4213_v23 = vpop.eup %4212 }
 0x246   : > { %v4215_v9 = vpop.eup %4214  ;;  %v2241_v0 = vmul.f32 %v2225_v30, %v4975_v5  ;;  %v2212_v56 = vadd.f32 1.0, %v4213_v23  ;;  %v2253_v33 = vpack.c.bf16 %v2243_v4, %v2242_v14  ;;  %v2230_v26 = vmul.f32 0.5, %v2214_v55 }
 0x247   : > { %v2215_v61 = vadd.f32 1.0, %v4215_v9 }
 0x248   : > { %v2252_v7 = vpack.c.bf16 %v2241_v0, %v2240_v16  ;;  %v2228_v44 = vmul.f32 0.5, %v2212_v56  ;;  %v2246_v52 = vmul.f32 %v2230_v26, %v4982_v6 }
 0x249   : > { %v4217_v59 = vpop.eup %4216  ;;  %v2231_v39 = vmul.f32 0.5, %v2215_v61 }
 0x24a   : > { %3978 = vmatprep.mubr.bf16.mxu1 %v2252_v7  ;;  %v2213_v53 = vadd.f32 1.0, %v4217_v59  ;;  %v2244_v5 = vmul.f32 %v2228_v44, %v4989_v24 }
 0x24b   : > { %v2247_v19 = vmul.f32 %v2231_v39, %v4992_v2 }
 0x24c   : > { %3979 = vmatmul.mubr.bf16.gmra.mxu1 %v2253_v33  ;;  %v2229_v41 = vmul.f32 0.5, %v2213_v53 }
 0x24d   : > { %v2255_v15 = vpack.c.bf16 %v2247_v19, %v2246_v52 }
 0x24e   : > { %v2245_v11 = vmul.f32 %v2229_v41, %v5004_v54 }
 0x250   : > { %v2254_v37 = vpack.c.bf16 %v2245_v11, %v2244_v5 }
 0x252   : > { %3982 = vmatprep.mubr.bf16.mxu1 %v2254_v37 }
 0x254   : > { %3983 = vmatmul.mubr.bf16.gmra.mxu1 %v2255_v15 }
 0x2fc   : > { %v3972_v2 = vpop.f32.mrf.mxu1 }
 0x2fd   : > { %v2367_v24 = vadd.f32 %v3972_v2, %v5036_v40 }
 0x2fe   : > { %v2358_v63 = vpop.f32.mrf.mxu1 }
 0x2ff   : > { %v2433_v54 = vrot.slane %v2367_v24, 4  ;;  %v2359_v6 = vadd.f32 %v2358_v63, %v5036_v40 }
 0x300   : > { %v3973_v51 = vpop.f32.mrf.mxu1 }
 0x301   : > { %v2434_v8 = vadd.f32 %v2433_v54, %v2367_v24  ;;  %v2421_v60 = vrot.slane %v2359_v6, 4  ;;  %v2370_v20 = vadd.f32 %v3973_v51, %v5036_v40 }
 0x302   : > { %v2361_v29 = vpop.f32.mrf.mxu1 }
 0x303   : > { %v2435_v49 = vrot.slane %v2434_v8, 2  ;;  %v2422_v62 = vadd.f32 %v2421_v60, %v2359_v6  ;;  %v2439_v22 = vrot.slane %v2370_v20, 4  ;;  %v2362_v34 = vadd.f32 %v2361_v29, %v5036_v40  ;;  %v5050_v29 = vld [vmem:[%s4449_s18] sm:$0xff]   ;;  %s633_s18 = scalar_lea.vmem %s5387_s16, %s5391_s25 }
 0x304   : > { %v3976_v1 = vpop.f32.mrf.mxu1 }
 0x305   : > { %v2440_v3 = vadd.f32 %v2439_v22, %v2370_v20  ;;  %v2427_v58 = vrot.slane %v2362_v34, 4  ;;  %v2423_v47 = vrot.slane %v2422_v62, 2  ;;  %v2383_v10 = vadd.f32 %v3976_v1, %v5036_v40 }
 0x306   : > { %v2374_v50 = vpop.f32.mrf.mxu1  ;;  %v2436_v36 = vadd.f32 %v2435_v49, %v2434_v8  ;;  %v2533_v49 = vunpack.c.l.bf16 %v5050_v29 }
 0x307   : > { %v2441_v18 = vrot.slane %v2440_v3, 2  ;;  %v2428_v28 = vadd.f32 %v2427_v58, %v2362_v34  ;;  %v2457_v45 = vrot.slane %v2383_v10, 4  ;;  %v2375_v38 = vadd.f32 %v2374_v50, %v5036_v40 }
 0x308   : > { %v3977_v57 = vpop.f32.mrf.mxu1  ;;  %v2424_v46 = vadd.f32 %v2423_v47, %v2422_v62  ;;  %v2437_v9 = vrot.slane %v2436_v36, 1 }
 0x309   : > { %v2429_v48 = vrot.slane %v2428_v28, 2  ;;  %v2458_v43 = vadd.f32 %v2457_v45, %v2383_v10  ;;  %v2445_v30 = vrot.slane %v2375_v38, 4  ;;  %v2386_v32 = vadd.f32 %v3977_v57, %v5036_v40 }
 0x30a   : > { %v2377_v23 = vpop.f32.mrf.mxu1  ;;  %v2442_v16 = vadd.f32 %v2441_v18, %v2440_v3  ;;  %v2425_v33 = vrot.slane %v2424_v46, 1  ;;  %v2438_v41 = vadd.f32 %v2437_v9, %v2436_v36 }
 0x30b   : > { %v2430_v0 = vadd.f32 %v2429_v48, %v2428_v28  ;;  %v2459_v4 = vrot.slane %v2458_v43, 2  ;;  %v2446_v56 = vadd.f32 %v2445_v30, %v2375_v38  ;;  %v2463_v61 = vrot.slane %v2386_v32, 4 }
 0x30c   : > { %v2378_v7 = vadd.f32 %v2377_v23, %v5036_v40  ;;  %v3980_v14 = vpop.f32.mrf.mxu1  ;;  %v2443_v19 = vrot.slane %v2442_v16, 1  ;;  %v2426_v51 = vadd.f32 %v2425_v33, %v2424_v46  ;;  %v2519_v62 = vmul.f32 0.033333335, %v2438_v41 }
 0x30d   : > { %v2431_v55 = vrot.slane %v2430_v0, 1  ;;  %v2399_v59 = vadd.f32 %v3980_v14, %v5036_v40  ;;  %v2447_v39 = vrot.slane %v2446_v56, 2  ;;  %v2464_v53 = vadd.f32 %v2463_v61, %v2386_v32 }
 0x30e   : > { %v2451_v44 = vrot.slane %v2378_v7, 4  ;;  %v2390_v26 = vpop.f32.mrf.mxu1  ;;  %v2460_v37 = vadd.f32 %v2459_v4, %v2458_v43  ;;  %v2444_v3 = vadd.f32 %v2443_v19, %v2442_v16  ;;  %v2517_v38 = vmul.f32 0.033333335, %v2426_v51 }
 0x30f   : > { %v2481_v5 = vrot.slane %v2399_v59, 4  ;;  %v2391_v11 = vadd.f32 %v2390_v26, %v5036_v40  ;;  %v2432_v52 = vadd.f32 %v2431_v55, %v2430_v0  ;;  %v2448_v15 = vadd.f32 %v2447_v39, %v2446_v56 }
 0x310   : > { %v2452_v2 = vadd.f32 %v2451_v44, %v2378_v7  ;;  %v3981_v24 = vpop.f32.mrf.mxu1  ;;  %v2465_v8 = vrot.slane %v2464_v53, 2  ;;  %v2461_v47 = vrot.slane %v2460_v37, 1  ;;  %v2520_v16 = vmul.f32 0.033333335, %v2444_v3 }
 0x311   : > { %v2482_v63 = vadd.f32 %v2481_v5, %v2399_v59  ;;  %v2469_v54 = vrot.slane %v2391_v11, 4  ;;  %v2402_v6 = vadd.f32 %v3981_v24, %v5036_v40  ;;  %v2449_v22 = vrot.slane %v2448_v15, 1 }
 0x312   : > { %v2453_v60 = vrot.slane %v2452_v2, 2  ;;  %v2393_v20 = vpop.f32.mrf.mxu1  ;;  %v2518_v58 = vmul.f32 0.033333335, %v2432_v52  ;;  %v2466_v57 = vadd.f32 %v2465_v8, %v2464_v53  ;;  %v2462_v0 = vadd.f32 %v2461_v47, %v2460_v37 }
 0x313   : > { %v2470_v34 = vadd.f32 %v2469_v54, %v2391_v11  ;;  %v2487_v1 = vrot.slane %v2402_v6, 4  ;;  %v2483_v36 = vrot.slane %v2482_v63, 2  ;;  %v2394_v45 = vadd.f32 %v2393_v20, %v5036_v40 }
 0x314   : > { %v2454_v10 = vadd.f32 %v2453_v60, %v2452_v2  ;;  %v3984_v50 = vpop.f32.mrf.mxu1  ;;  %v2450_v30 = vadd.f32 %v2449_v22, %v2448_v15  ;;  %v2552_v7 = vsel %vm2551_vm1, %v2518_v58, %v2517_v38  ;;  %v2467_v19 = vrot.slane %v2466_v57, 1 }
 0x315   : > { %v2471_v18 = vrot.slane %v2470_v34, 2  ;;  %v2488_v28 = vadd.f32 %v2487_v1, %v2402_v6  ;;  %v2415_v46 = vadd.f32 %v3984_v50, %v5036_v40  ;;  %v2475_v9 = vrot.slane %v2394_v45, 4 }
 0x316   : > { %v2455_v48 = vrot.slane %v2454_v10, 1  ;;  %v2406_v43 = vpop.f32.mrf.mxu1  ;;  %v2484_v14 = vadd.f32 %v2483_v36, %v2482_v63  ;;  %v2521_v41 = vmul.f32 0.033333335, %v2450_v30  ;;  %v2554_v6 = vsel %vm2553_vm2, %v2519_v62, %v2552_v7 }
 0x317   : > { %v2472_v32 = vadd.f32 %v2471_v18, %v2470_v34  ;;  %v2489_v23 = vrot.slane %v2488_v28, 2  ;;  %v2505_v4 = vrot.slane %v2415_v46, 4  ;;  %v2407_v56 = vadd.f32 %v2406_v43, %v5036_v40 }
 0x318   : > { %v3985_v61 = vpop.f32.mrf.mxu1  ;;  %v2476_v59 = vadd.f32 %v2475_v9, %v2394_v45  ;;  %v2456_v33 = vadd.f32 %v2455_v48, %v2454_v10  ;;  %v2485_v24 = vrot.slane %v2484_v14, 1  ;;  %v2556_v3 = vsel %vm2555_vm3, %v2520_v16, %v2554_v6 }
 0x319   : > { %v2490_v55 = vadd.f32 %v2489_v23, %v2488_v28  ;;  %v2506_v39 = vadd.f32 %v2505_v4, %v2415_v46  ;;  %v2493_v53 = vrot.slane %v2407_v56, 4  ;;  %v2418_v44 = vadd.f32 %v3985_v61, %v5036_v40 }
 0x31a   : > { %v2409_v26 = vpop.f32.mrf.mxu1  ;;  %v2473_v5 = vrot.slane %v2472_v32, 1  ;;  %v2477_v11 = vrot.slane %v2476_v59, 2  ;;  %v2522_v51 = vmul.f32 0.033333335, %v2456_v33  ;;  %v2468_v58 = vadd.f32 %v2467_v19, %v2466_v57 }
 0x31b   : > { %v2507_v52 = vrot.slane %v2506_v39, 2  ;;  %v2494_v37 = vadd.f32 %v2493_v53, %v2407_v56  ;;  %v2511_v15 = vrot.slane %v2418_v44, 4  ;;  %v2410_v2 = vadd.f32 %v2409_v26, %v5036_v40 }
 0x31c   : > { %v2491_v63 = vrot.slane %v2490_v55, 1  ;;  %v2478_v54 = vadd.f32 %v2477_v11, %v2476_v59  ;;  %v2474_v22 = vadd.f32 %v2473_v5, %v2472_v32  ;;  %v2523_v36 = vmul.f32 0.033333335, %v2462_v0 }
 0x31d   : > { %v2495_v8 = vrot.slane %v2494_v37, 2  ;;  %v2512_v60 = vadd.f32 %v2511_v15, %v2418_v44  ;;  %v2499_v20 = vrot.slane %v2410_v2, 4  ;;  %v2508_v1 = vadd.f32 %v2507_v52, %v2506_v39 }
 0x31e   : > { %v2479_v34 = vrot.slane %v2478_v54, 1  ;;  %v2486_v40 = vadd.f32 %v2485_v24, %v2484_v14  ;;  %v2492_v18 = vadd.f32 %v2491_v63, %v2490_v55  ;;  %v2558_v48 = vsel %vm2557_vm4, %v2521_v41, %v2556_v3  ;;  %v4081_v3 = vld [vmem:[%s5384_s13 + $0xc4] ss:$16 sps:$4 sm:$0xff]  }
 0x31f   : > { %v2496_v47 = vadd.f32 %v2495_v8, %v2494_v37  ;;  %v2513_v10 = vrot.slane %v2512_v60, 2  ;;  %v2500_v50 = vadd.f32 %v2499_v20, %v2410_v2  ;;  %v2525_v46 = vmul.f32 0.033333335, %v2474_v22  ;;  %v4075_v20 = vld [vmem:[%s5384_s13 + $0xe4] ss:$16 sps:$4 sm:$0xff]  }
 0x320   : > { %v2480_v28 = vadd.f32 %v2479_v34, %v2478_v54  ;;  %v2509_v30 = vrot.slane %v2508_v1, 1  ;;  %v2560_v32 = vsel %vm2559_vm5, %v2522_v51, %v2558_v48  ;;  %v2524_v16 = vmul.f32 0.033333335, %v2468_v58  ;;  %v4078_v22 = vld [vmem:[%s5384_s13 + $0xec] ss:$16 sps:$4 sm:$0xff]   ;;  %2826 = vmatprep.subr.bf16.mxu0 %v4075_v20  ;;  %v4127_v20 = vld [vmem:[%s5386_s15 + $0x30] sm:$0xff]  }
 0x321   : > { %v2497_v45 = vrot.slane %v2496_v47, 1  ;;  %v2514_v38 = vadd.f32 %v2513_v10, %v2512_v60  ;;  %v2501_v62 = vrot.slane %v2500_v50, 2  ;;  %v2527_v4 = vmul.f32 0.033333335, %v2486_v40  ;;  %v4073_v34 = vld [vmem:[%s5384_s13 + $0xe0] ss:$16 sps:$4 sm:$0xff]   ;;  %2869 = vmatprep.subr.bf16.mxu1 %v4078_v22 }
 0x322   : > { %v2526_v43 = vmul.f32 0.033333335, %v2480_v28  ;;  %v2562_v56 = vsel %vm2561_vm6, %v2523_v36, %v2560_v32  ;;  %v2528_v61 = vmul.f32 0.033333335, %v2492_v18  ;;  %v2510_v55 = vadd.f32 %v2509_v30, %v2508_v1  ;;  %v4076_v1 = vld [vmem:[%s5384_s13 + $0xe8] ss:$16 sps:$4 sm:$0xff]   ;;  %2827 = vmatpush1.bf16.msra.mxu0 %v4073_v34 }
 0x323   : > { %v2498_v23 = vadd.f32 %v2497_v45, %v2496_v47  ;;  %v2515_v9 = vrot.slane %v2514_v38, 1  ;;  %v2502_v57 = vadd.f32 %v2501_v62, %v2500_v50  ;;  %v2564_v14 = vsel %vm2563_vm7, %v2524_v16, %v2562_v56  ;;  %2870 = vmatpush1.bf16.msra.mxu1 %v4076_v1  ;;  %v4084_v58 = vld [vmem:[%s5384_s13 + $0xcc] ss:$16 sps:$4 sm:$0xff]   ;;  %v4079_v47 = vld [vmem:[%s5384_s13 + $0xc0] ss:$16 sps:$4 sm:$0xff]   ;;  %2828 = vmatprep.subr.bf16.mxu0 %v4081_v3 }
 0x324   : > { %v2565_v0 = vsel %vm2551_vm1, %v2526_v43, %v2525_v46  ;;  %v2574_v33 = vadd.f32 %v2564_v14, %v2533_v49  ;;  %v2531_v19 = vmul.f32 0.033333335, %v2510_v55  ;;  %v2534_v5 = vunpack.c.h.bf16 %v5050_v29  ;;  %v4082_v10 = vld [vmem:[%s5384_s13 + $0xc8] ss:$16 sps:$4 sm:$0xff]   ;;  %2871 = vmatprep.subr.bf16.mxu1 %v4084_v58  ;;  %v4087_v50 = vld [vmem:[%s5384_s13 + $0xa4] ss:$16 sps:$4 sm:$0xff]  }
 0x325   : > { %v2503_v7 = vrot.slane %v2502_v57, 1  ;;  %v2529_v59 = vmul.f32 0.033333335, %v2498_v23  ;;  %v2566_v39 = vsel %vm2553_vm2, %v2527_v4, %v2565_v0  ;;  %v2516_v53 = vadd.f32 %v2515_v9, %v2514_v38  ;;  %v4090_v36 = vld [vmem:[%s5384_s13 + $0xac] ss:$16 sps:$4 sm:$0xff]   ;;  %v4128_v22 = vld [vmem:[%s5386_s15 + $0xb0] sm:$0xff]  }
 0x326   : > { %v2567_v26 = vsel %vm2555_vm3, %v2528_v61, %v2566_v39  ;;  %2576 = vadd.xlane.f32.xlu0 %v2574_v33  ;;  %2829 = vmatpush1.bf16.msra.mxu0 %v4079_v47  ;;  %v4085_v40 = vld [vmem:[%s5384_s13 + $0xa0] ss:$16 sps:$4 sm:$0xff]   ;;  %v4088_v18 = vld [vmem:[%s5384_s13 + $0xa8] ss:$16 sps:$4 sm:$0xff]   ;;  %v4093_v28 = vld [vmem:[%s5384_s13 + $0x84] ss:$16 sps:$4 sm:$0xff]  }
 0x327   : > { %v2504_v44 = vadd.f32 %v2503_v7, %v2502_v57  ;;  %v2568_v11 = vsel %vm2557_vm4, %v2529_v59, %v2567_v26  ;;  %v2532_v52 = vmul.f32 0.033333335, %v2516_v53  ;;  %2872 = vmatpush1.bf16.msra.mxu1 %v4082_v10  ;;  %2830 = vmatprep.subr.bf16.mxu0 %v4087_v50  ;;  %v4096_v45 = vld [vmem:[%s5384_s13 + $0x8c] ss:$16 sps:$4 sm:$0xff]   ;;  %v4091_v38 = vld [vmem:[%s5384_s13 + $0x80] ss:$16 sps:$4 sm:$0xff]  }
 0x328   : > { %2873 = vmatprep.subr.bf16.mxu1 %v4090_v36  ;;  %v4094_v62 = vld [vmem:[%s5384_s13 + $0x88] ss:$16 sps:$4 sm:$0xff]   ;;  %v4099_v48 = vld [vmem:[%s5384_s13 + $0x64] ss:$16 sps:$4 sm:$0xff]   ;;  %v4102_v46 = vld [vmem:[%s5384_s13 + $0x6c] ss:$16 sps:$4 sm:$0xff]  }
 0x329   : > { %v2530_v41 = vmul.f32 0.033333335, %v2504_v44  ;;  %v4097_v43 = vld [vmem:[%s5384_s13 + $0x60] ss:$16 sps:$4 sm:$0xff]   ;;  %v4100_v30 = vld [vmem:[%s5384_s13 + $0x68] ss:$16 sps:$4 sm:$0xff]  }
 0x32a   : > { %2831 = vmatpush1.bf16.msra.mxu0 %v4085_v40  ;;  %v4105_v32 = vld [vmem:[%s5384_s13 + $0x44] ss:$16 sps:$4 sm:$0xff]   ;;  %v4108_v23 = vld [vmem:[%s5384_s13 + $0x4c] ss:$16 sps:$4 sm:$0xff]   ;;  %v4103_v9 = vld [vmem:[%s5384_s13 + $0x40] ss:$16 sps:$4 sm:$0xff]  }
 0x32b   : > { %v2569_v37 = vsel %vm2559_vm5, %v2530_v41, %v2568_v11  ;;  %2874 = vmatpush1.bf16.msra.mxu1 %v4088_v18  ;;  %2832 = vmatprep.subr.bf16.mxu0 %v4093_v28  ;;  %v4106_v57 = vld [vmem:[%s5384_s13 + $0x48] ss:$16 sps:$4 sm:$0xff]   ;;  %v4111_v16 = vld [vmem:[%s5384_s13 + $0x24] ss:$16 sps:$4 sm:$0xff]   ;;  %v4114_v4 = vld [vmem:[%s5384_s13 + $0x2c] ss:$16 sps:$4 sm:$0xff]  }
 0x32c   : > { %v2570_v15 = vsel %vm2561_vm6, %v2531_v19, %v2569_v37  ;;  %2875 = vmatprep.subr.bf16.mxu1 %v4096_v45  ;;  %v4255_v0 = vmov 0   ;;  %v4109_v56 = vld [vmem:[%s5384_s13 + $0x20] ss:$16 sps:$4 sm:$0xff]   ;;  %v4112_v61 = vld [vmem:[%s5384_s13 + $0x28] ss:$16 sps:$4 sm:$0xff]   ;;  %v2608_v37 = vrot.slane %v5032_v42, %v4434_v25 }
 0x32d   : > { %v2571_v49 = vsel %vm2563_vm7, %v2532_v52, %v2570_v15  ;;  %2858 = vmatprep.mubr.bf16.mxu0 %v4255_v0  ;;  %2901 = vmatprep.mubr.bf16.mxu1 %v4255_v0  ;;  %v4117_v7 = vld [vmem:[%s5384_s13 + $0x4] ss:$16 sps:$4 sm:$0xff]   ;;  %v4120_v14 = vld [vmem:[%s5384_s13 + $0xc] ss:$16 sps:$4 sm:$0xff]   ;;  %v4115_v55 = vld [vmem:[%s5384_s13] ss:$16 sps:$4 sm:$0xff]  }
 0x32e   : > { %v2575_v2 = vadd.f32 %v2571_v49, %v2534_v5  ;;  %2833 = vmatpush1.bf16.msra.mxu0 %v4091_v38  ;;  %3998 = vset.pattern.permute.xlu1 %v4255_v0  ;;  %v4118_v59 = vld [vmem:[%s5384_s13 + $0x8] ss:$16 sps:$4 sm:$0xff]   ;;  %v2602_v5 = vrot.slane %v5032_v42, %v4422_v21  ;;  %v4133_v47 = vld [vmem:[%s5386_s15 + $0x60] sm:$0xff]   ;;  %v4141_v38 = vld [vmem:[%s5386_s15 + $0x50] sm:$0xff]  }
 0x32f   : > { %2876 = vmatpush1.bf16.msra.mxu1 %v4094_v62  ;;  %2834 = vmatprep.subr.bf16.mxu0 %v4099_v48  ;;  %v4122_v25 = vld [vmem:[%s5386_s15 + $0xf8] sm:$0xff]   ;;  %v4129_v34 = vld [vmem:[%s5386_s15 + $0x68] sm:$0xff]   ;;  %v4134_v10 = vld [vmem:[%s5386_s15 + $0xe0] sm:$0xff]  }
 0x330   : > { %2578 = vadd.xlane.f32.xlu1 %v2575_v2  ;;  %2877 = vmatprep.subr.bf16.mxu1 %v4102_v46  ;;  %v4130_v1 = vld [vmem:[%s5386_s15 + $0xe8] sm:$0xff]   ;;  %v4135_v50 = vld [vmem:[%s5386_s15 + $0x20] sm:$0xff]   ;;  %v4137_v40 = vld [vmem:[%s5386_s15 + $0x58] sm:$0xff]  }
 0x331   : > { %3999 = vset.pattern.permute.xlu0 %v4255_v0  ;;  %v4131_v3 = vld [vmem:[%s5386_s15 + $0x28] sm:$0xff]   ;;  %v4136_v36 = vld [vmem:[%s5386_s15 + $0xa0] sm:$0xff]   ;;  %v4138_v18 = vld [vmem:[%s5386_s15 + $0xd8] sm:$0xff]  }
 0x332   : > { %2835 = vmatpush1.bf16.msra.mxu0 %v4097_v43  ;;  %v4132_v58 = vld [vmem:[%s5386_s15 + $0xa8] sm:$0xff]   ;;  %v4139_v28 = vld [vmem:[%s5386_s15 + $0x18] sm:$0xff]   ;;  %v4142_v62 = vld [vmem:[%s5386_s15 + $0xd0] sm:$0xff]  }
 0x333   : > { %2878 = vmatpush1.bf16.msra.mxu1 %v4100_v30  ;;  %2836 = vmatprep.subr.bf16.mxu0 %v4105_v32  ;;  %v4140_v45 = vld [vmem:[%s5386_s15 + $0x98] sm:$0xff]   ;;  %v4143_v48 = vld [vmem:[%s5386_s15 + $0x10] sm:$0xff]   ;;  %v4145_v43 = vld [vmem:[%s5386_s15 + $0x48] sm:$0xff]  }
 0x334   : > { %2879 = vmatprep.subr.bf16.mxu1 %v4108_v23  ;;  %v4144_v46 = vld [vmem:[%s5386_s15 + $0x90] sm:$0xff]   ;;  %v4146_v30 = vld [vmem:[%s5386_s15 + $0xc8] sm:$0xff]   ;;  %v2644_v0 = vld [vmem:[%s5385_s14] sm:$0xf] }
 0x335   : > { %v4147_v32 = vld [vmem:[%s5386_s15 + $0x8] sm:$0xff]  }
 0x336   : > { %2837 = vmatpush1.bf16.msra.mxu0 %v4103_v9  ;;  %v4148_v23 = vld [vmem:[%s5386_s15 + $0x88] sm:$0xff]   ;;  %v4149_v9 = vld [vmem:[%s5386_s15 + $0x40] sm:$0xff]  }
 0x337   : > { %2880 = vmatpush1.bf16.msra.mxu1 %v4106_v57  ;;  %2838 = vmatprep.subr.bf16.mxu0 %v4111_v16  ;;  %v4150_v57 = vld [vmem:[%s5386_s15 + $0xc0] sm:$0xff]  }
 0x338   : > { %2881 = vmatprep.subr.bf16.mxu1 %v4114_v4  ;;  %v4151_v16 = vld [vmem:[%s5386_s15] sm:$0xff]  }
 0x339   : > { %v4152_v4 = vld [vmem:[%s5386_s15 + $0x80] sm:$0xff]  }
 0x33a   : > { %2839 = vmatpush1.bf16.msra.mxu0 %v4109_v56  ;;  %v2649_v56 = vrot.slane %v2644_v0, %v4396_v12 }
 0x33b   : > { %2882 = vmatpush1.bf16.msra.mxu1 %v4112_v61  ;;  %2840 = vmatprep.subr.bf16.mxu0 %v4117_v7  ;;  %v2657_v61 = vrot.slane %v2644_v0, %v4399_v13  ;;  %v2653_v7 = vrot.slane %v2644_v0, %v4416_v17 }
 0x33c   : > { %2883 = vmatprep.subr.bf16.mxu1 %v4120_v14  ;;  %v2661_v14 = vrot.slane %v2644_v0, %v4422_v21 }
 0x33e   : > { %2841 = vmatpush1.bf16.msra.mxu0 %v4115_v55 }
 0x33f   : > { %2884 = vmatpush1.bf16.msra.mxu1 %v4118_v59 }
 0x340   : > { %3784 = vmatprep.subr.bf16.mxu1 %v4122_v25 }
 0x3af   : > { %v2577_v24 = vpop.xlane.xlu0 %2576 }
 0x3b0   : > { %v2581_v63 = vmul.f32 0.0078125, %v2577_v24 }
 0x3b2   : > { %v5075_v54 = vsub.f32 %v2574_v33, %v2581_v63 }
 0x3b4   : > { %v2585_v6 = vmul.f32 %v5075_v54, %v5075_v54 }
 0x3b6   : > { %2587 = vadd.xlane.f32.xlu0 %v2585_v6 }
 0x3b9   : > { %v2579_v29 = vpop.xlane.xlu1 %2578 }
 0x3ba   : > { %v2582_v51 = vmul.f32 0.0078125, %v2579_v29  ;;  %v4123_v29 = vld [vmem:[%s5386_s15 + $0x38] sm:$0xff]  }
 0x3bc   : > { %v5079_v8 = vsub.f32 %v2575_v2, %v2582_v51  ;;  %v4124_v51 = vld [vmem:[%s5386_s15 + $0xb8] sm:$0xff]  }
 0x3be   : > { %v2586_v60 = vmul.f32 %v5079_v8, %v5079_v8 }
 0x3c0   : > { %2589 = vadd.xlane.f32.xlu0 %v2586_v60  ;;  %v4126_v60 = vld [vmem:[%s5386_s15 + $0xf0] sm:$0xff]  }
 0x43f   : > { %v2588_v33 = vpop.xlane.xlu0 %2587 }
 0x440   : > { %v2591_v39 = vmul.f32 0.0078125, %v2588_v33 }
 0x442   : > { %v2593_v53 = vadd.f32 1e-05, %v2591_v39 }
 0x444   : > { %4218 = vrsqrt.f32 %v2593_v53 }
 0x449   : > { %v2590_v44 = vpop.xlane.xlu0 %2589 }
 0x44a   : > { %v2592_v26 = vmul.f32 0.0078125, %v2590_v44 }
 0x44c   : > { %v2594_v41 = vadd.f32 1e-05, %v2592_v26 }
 0x44e   : > { %4220 = vrsqrt.f32 %v2594_v41 }
 0x451   : > { %v4219_v19 = vpop.eup %4218 }
 0x452   : > { %v2597_v11 = vmul.f32 %v4219_v19, %v5075_v54  ;;  %v4121_v54 = vld [vmem:[%s5386_s15 + $0x78] sm:$0xff]  }
 0x453   : > { %3762 = vmatprep.subr.bf16.mxu0 %v4121_v54 }
 0x454   : > { %v2603_v49 = vmul.f32 %v2602_v5, %v2597_v11 }
 0x456   : > { %v5185_v24 = vadd.f32 %v2608_v37, %v2603_v49 }
 0x45b   : > { %v4221_v52 = vpop.eup %4220 }
 0x45c   : > { %v2598_v15 = vmul.f32 %v4221_v52, %v5079_v8  ;;  %v4125_v8 = vld [vmem:[%s5386_s15 + $0x70] sm:$0xff]  }
 0x45e   : > { %v2604_v2 = vmul.f32 %v2602_v5, %v2598_v15 }
 0x460   : > { %v5187_v63 = vadd.f32 %v2608_v37, %v2604_v2 }
 0x462   : > { %v2611_v6 = vpack.c.bf16 %v5187_v63, %v5185_v24 }
 0x464   : > { %2859 = vmatmul.mubr.bf16.vlgmr.msra.gmra.mxu0 %v2611_v6  ;;  %2902 = vmatmul.mubr.bf16.vlgmr.msra.gmra.mxu1 %v2611_v6 }
 0x465   : > { %3763 = vmatpush3.bf16.msra.mxu0 %v4123_v29  ;;  %3785 = vmatpush3.bf16.msra.mxu1 %v4124_v51 }
 0x466   : > { %3764 = vmatprep.subr.bf16.mxu0 %v4125_v8  ;;  %3786 = vmatprep.subr.bf16.mxu1 %v4126_v60 }
 0x469   : > { %3765 = vmatpush3.bf16.msra.mxu0 %v4127_v20  ;;  %3787 = vmatpush3.bf16.msra.mxu1 %v4128_v22 }
 0x46a   : > { %3766 = vmatprep.subr.bf16.mxu0 %v4129_v34  ;;  %3788 = vmatprep.subr.bf16.mxu1 %v4130_v1 }
 0x46d   : > { %3767 = vmatpush3.bf16.msra.mxu0 %v4131_v3  ;;  %3789 = vmatpush3.bf16.msra.mxu1 %v4132_v58 }
 0x46e   : > { %3768 = vmatprep.subr.bf16.mxu0 %v4133_v47  ;;  %3790 = vmatprep.subr.bf16.mxu1 %v4134_v10 }
 0x471   : > { %3769 = vmatpush3.bf16.msra.mxu0 %v4135_v50  ;;  %3791 = vmatpush3.bf16.msra.mxu1 %v4136_v36 }
 0x472   : > { %3770 = vmatprep.subr.bf16.mxu0 %v4137_v40  ;;  %3792 = vmatprep.subr.bf16.mxu1 %v4138_v18 }
 0x475   : > { %3771 = vmatpush3.bf16.msra.mxu0 %v4139_v28  ;;  %3793 = vmatpush3.bf16.msra.mxu1 %v4140_v45 }
 0x476   : > { %3772 = vmatprep.subr.bf16.mxu0 %v4141_v38  ;;  %3794 = vmatprep.subr.bf16.mxu1 %v4142_v62 }
 0x479   : > { %3773 = vmatpush3.bf16.msra.mxu0 %v4143_v48  ;;  %3795 = vmatpush3.bf16.msra.mxu1 %v4144_v46 }
 0x47a   : > { %3774 = vmatprep.subr.bf16.mxu0 %v4145_v43  ;;  %3796 = vmatprep.subr.bf16.mxu1 %v4146_v30 }
 0x47d   : > { %3775 = vmatpush3.bf16.msra.mxu0 %v4147_v32  ;;  %3797 = vmatpush3.bf16.msra.mxu1 %v4148_v23 }
 0x47e   : > { %3776 = vmatprep.subr.bf16.mxu0 %v4149_v9  ;;  %3798 = vmatprep.subr.bf16.mxu1 %v4150_v57 }
 0x481   : > { %3777 = vmatpush3.bf16.msra.mxu0 %v4151_v16  ;;  %3799 = vmatpush3.bf16.msra.mxu1 %v4152_v4 }
 0x524   : > { %v2860_v55 = vpop.f32.mrf.mxu0  ;;  %v2903_v59 = vpop.f32.mrf.mxu1 }
 0x525   : > { %v5294_v33 = vadd.f32 %v2860_v55, %v2649_v56  ;;  %v5296_v39 = vadd.f32 %v2903_v59, %v2657_v61 }
 0x526   : > { %v2862_v53 = vpop.f32.mrf.mxu0  ;;  %v2905_v44 = vpop.f32.mrf.mxu1 }
 0x527   : > { %v2912_v26 = vmul.f32 %v5294_v33, %v5294_v33  ;;  %v2914_v12 = vmul.f32 %v5296_v39, %v5296_v39  ;;  %v5302_v41 = vadd.f32 %v2862_v53, %v2653_v7  ;;  %v5304_v13 = vadd.f32 %v2905_v44, %v2661_v14 }
 0x528   : > { %v2864_v17 = vpop.f32.mrf.mxu0  ;;  %v2907_v21 = vpop.f32.mrf.mxu1 }
 0x529   : > { %v2920_v19 = vmul.f32 %v2912_v26, %v5294_v33  ;;  %v2922_v5 = vmul.f32 %v2914_v12, %v5296_v39  ;;  %v2913_v11 = vmul.f32 %v5302_v41, %v5302_v41  ;;  %v2915_v52 = vmul.f32 %v5304_v13, %v5304_v13 }
 0x52a   : > { %v5312_v37 = vadd.f32 %v2864_v17, %v2649_v56  ;;  %v5314_v15 = vadd.f32 %v2907_v21, %v2657_v61  ;;  %v2866_v49 = vpop.f32.mrf.mxu0  ;;  %v2909_v2 = vpop.f32.mrf.mxu1 }
 0x52b   : > { %v2928_v6 = vmul.f32 0.044715, %v2920_v19  ;;  %v2930_v54 = vmul.f32 0.044715, %v2922_v5  ;;  %v2921_v25 = vmul.f32 %v2913_v11, %v5302_v41  ;;  %v2923_v29 = vmul.f32 %v2915_v52, %v5304_v13 }
 0x52c   : > { %v2916_v51 = vmul.f32 %v5312_v37, %v5312_v37  ;;  %v2918_v8 = vmul.f32 %v5314_v15, %v5314_v15  ;;  %v5322_v60 = vadd.f32 %v2866_v49, %v2653_v7  ;;  %v5324_v20 = vadd.f32 %v2909_v2, %v2661_v14 }
 0x52d   : > { %v2936_v22 = vadd.f32 %v2928_v6, %v5294_v33  ;;  %v2938_v34 = vadd.f32 %v2930_v54, %v5296_v39  ;;  %v2929_v1 = vmul.f32 0.044715, %v2921_v25  ;;  %v2931_v3 = vmul.f32 0.044715, %v2923_v29 }
 0x52e   : > { %v2924_v58 = vmul.f32 %v2916_v51, %v5312_v37  ;;  %v2926_v47 = vmul.f32 %v2918_v8, %v5314_v15  ;;  %v2917_v10 = vmul.f32 %v5322_v60, %v5322_v60  ;;  %v2919_v50 = vmul.f32 %v5324_v20, %v5324_v20 }
 0x52f   : > { %v2944_v36 = vmul.f32 0.7978846, %v2936_v22  ;;  %v2946_v40 = vmul.f32 0.7978846, %v2938_v34  ;;  %v2937_v18 = vadd.f32 %v2929_v1, %v5302_v41  ;;  %v2939_v28 = vadd.f32 %v2931_v3, %v5304_v13 }
 0x530   : > { %v2932_v45 = vmul.f32 0.044715, %v2924_v58  ;;  %v2934_v38 = vmul.f32 0.044715, %v2926_v47  ;;  %v2925_v62 = vmul.f32 %v2917_v10, %v5322_v60  ;;  %v2927_v48 = vmul.f32 %v2919_v50, %v5324_v20 }
 0x531   : > { %4222 = vtanh.f32 %v2944_v36  ;;  %v2945_v46 = vmul.f32 0.7978846, %v2937_v18  ;;  %v2947_v43 = vmul.f32 0.7978846, %v2939_v28 }
 0x532   : > { %4224 = vtanh.f32 %v2946_v40  ;;  %v2940_v30 = vadd.f32 %v2932_v45, %v5312_v37  ;;  %v2942_v32 = vadd.f32 %v2934_v38, %v5314_v15  ;;  %v2933_v23 = vmul.f32 0.044715, %v2925_v62 }
 0x533   : > { %4226 = vtanh.f32 %v2945_v46  ;;  %v2935_v9 = vmul.f32 0.044715, %v2927_v48 }
 0x534   : > { %4228 = vtanh.f32 %v2947_v43  ;;  %v2948_v57 = vmul.f32 0.7978846, %v2940_v30  ;;  %v2950_v16 = vmul.f32 0.7978846, %v2942_v32  ;;  %v2941_v4 = vadd.f32 %v2933_v23, %v5322_v60 }
 0x535   : > { %v2943_v0 = vadd.f32 %v2935_v9, %v5324_v20 }
 0x536   : > { %4230 = vtanh.f32 %v2948_v57  ;;  %v2949_v56 = vmul.f32 0.7978846, %v2941_v4 }
 0x537   : > { %4232 = vtanh.f32 %v2950_v16  ;;  %v2951_v61 = vmul.f32 0.7978846, %v2943_v0 }
 0x538   : > { %4234 = vtanh.f32 %v2949_v56 }
 0x539   : > { %4236 = vtanh.f32 %v2951_v61 }
 0x53e   : > { %v4223_v7 = vpop.eup %4222 }
 0x53f   : > { %v4225_v14 = vpop.eup %4224  ;;  %v2960_v26 = vadd.f32 1.0, %v4223_v7 }
 0x540   : > { %v4227_v55 = vpop.eup %4226  ;;  %v2962_v21 = vadd.f32 1.0, %v4225_v14 }
 0x541   : > { %v4229_v59 = vpop.eup %4228  ;;  %v2961_v53 = vadd.f32 1.0, %v4227_v55  ;;  %v2968_v54 = vmul.f32 0.5, %v2960_v26 }
 0x542   : > { %v2963_v12 = vadd.f32 1.0, %v4229_v59  ;;  %v2970_v8 = vmul.f32 0.5, %v2962_v21 }
 0x543   : > { %v4231_v44 = vpop.eup %4230  ;;  %v2969_v6 = vmul.f32 0.5, %v2961_v53  ;;  %v2976_v10 = vmul.f32 %v2968_v54, %v5294_v33  ;;  %v3367_v53 = vld [vmem:[%s627_s19 + $0x8] sm:$0xff] }
 0x544   : > { %v4233_v17 = vpop.eup %4232  ;;  %v2964_v19 = vadd.f32 1.0, %v4231_v44  ;;  %v2971_v51 = vmul.f32 0.5, %v2963_v12  ;;  %v2978_v40 = vmul.f32 %v2970_v8, %v5296_v39 }
 0x545   : > { %v4235_v5 = vpop.eup %4234  ;;  %v2966_v11 = vadd.f32 1.0, %v4233_v17  ;;  %v2977_v58 = vmul.f32 %v2969_v6, %v5302_v41 }
 0x546   : > { %v4237_v52 = vpop.eup %4236  ;;  %v2972_v49 = vmul.f32 0.5, %v2964_v19  ;;  %v2965_v2 = vadd.f32 1.0, %v4235_v5  ;;  %v2979_v50 = vmul.f32 %v2971_v51, %v5304_v13  ;;  %v3357_v19 = vrot.slane %v5032_v42, %v4456_v31 }
 0x547   : > { %v2974_v25 = vmul.f32 0.5, %v2966_v11  ;;  %v2967_v29 = vadd.f32 1.0, %v4237_v52 }
 0x548   : > { %v2973_v22 = vmul.f32 0.5, %v2965_v2  ;;  %v2980_v34 = vmul.f32 %v2972_v49, %v5312_v37  ;;  %v3363_v49 = vrot.slane %v5032_v42, %v4464_v35 }
 0x549   : > { %v2975_v1 = vmul.f32 0.5, %v2967_v29  ;;  %v2982_v3 = vmul.f32 %v2974_v25, %v5314_v15 }
 0x54a   : > { %v2981_v47 = vmul.f32 %v2973_v22, %v5322_v60  ;;  %v2984_v45 = vpack.c.bf16 %v2980_v34, %v2976_v10  ;;  %v3055_v60 = vrot.slane %v5032_v42, %v4438_v27 }
 0x54b   : > { %v2983_v36 = vmul.f32 %v2975_v1, %v5324_v20  ;;  %v2986_v37 = vpack.c.bf16 %v2982_v3, %v2978_v40 }
 0x54c   : > { %v2985_v18 = vpack.c.bf16 %v2981_v47, %v2977_v58 }
 0x54d   : > { %v2987_v28 = vpack.c.bf16 %v2983_v36, %v2979_v50 }
 0x54e   : > { %3280 = vmatprep.mubr.bf16.mxu0 %v2985_v18 }
 0x54f   : > { %3321 = vmatprep.mubr.bf16.mxu1 %v2987_v28  ;;  %3281 = vmatmul.mubr.bf16.vlgmr.msra.gmra.mxu0 %v2984_v45 }
 0x550   : > { %3322 = vmatmul.mubr.bf16.vlgmr.msra.gmra.mxu1 %v2986_v37 }
 0x60f   : > { %v3778_v15 = vpop.f32.mrf.mxu0 }
 0x610   : > { %v3800_v41 = vpop.f32.mrf.mxu1 }
 0x611   : > { %v3779_v33 = vpop.f32.mrf.mxu0 }
 0x612   : > { %v3780_v38 = vadd.f32 %v3779_v33, %v3778_v15  ;;  %v3801_v13 = vpop.f32.mrf.mxu1 }
 0x613   : > { %v3781_v62 = vpop.f32.mrf.mxu0  ;;  %v3802_v48 = vadd.f32 %v3801_v13, %v3800_v41 }
 0x614   : > { %v3283_v20 = vadd.f32 %v3780_v38, %v3055_v60  ;;  %v3803_v39 = vpop.f32.mrf.mxu1 }
 0x615   : > { %v3782_v46 = vpop.f32.mrf.mxu0 }
 0x616   : > { %v3324_v43 = vadd.f32 %v3802_v48, %v3283_v20  ;;  %v3783_v30 = vadd.f32 %v3782_v46, %v3781_v62  ;;  %v3804_v32 = vpop.f32.mrf.mxu1 }
 0x617   : > { %v3805_v9 = vadd.f32 %v3804_v32, %v3803_v39 }
 0x618   : > { %v3286_v23 = vadd.f32 %v3783_v30, %v3055_v60  ;;  %v3330_v57 = vadd.f32 %v3324_v43, %v5185_v24  ;;  %v3366_v24 = vld [vmem:[%s627_s19] sm:$0xff] }
 0x61a   : > { %v3327_v16 = vadd.f32 %v3805_v9, %v3286_v23  ;;  %3332 = vadd.xlane.f32.xlu1 %v3330_v57 }
 0x61c   : > { %v3331_v27 = vadd.f32 %v3327_v16, %v5187_v63 }
 0x61e   : > { %3334 = vadd.xlane.f32.xlu0 %v3331_v27 }
 0x6a3   : > { %v3333_v4 = vpop.xlane.xlu1 %3332 }
 0x6a4   : > { %v3336_v0 = vmul.f32 0.0078125, %v3333_v4 }
 0x6a6   : > { %v3338_v56 = vsub.f32 %v3330_v57, %v3336_v0 }
 0x6a7   : > { %v3335_v61 = vpop.xlane.xlu0 %3334 }
 0x6a8   : > { %v3337_v7 = vmul.f32 0.0078125, %v3335_v61  ;;  %v3340_v14 = vmul.f32 %v3338_v56, %v3338_v56 }
 0x6aa   : > { %v3339_v55 = vsub.f32 %v3331_v27, %v3337_v7  ;;  %3342 = vadd.xlane.f32.xlu1 %v3340_v14 }
 0x6ac   : > { %v3341_v59 = vmul.f32 %v3339_v55, %v3339_v55 }
 0x6ae   : > { %3344 = vadd.xlane.f32.xlu0 %v3341_v59 }
 0x6bb   : > { %3370 = vperm.xlu1 %3998, %v3366_v24  }
 0x6c4   : > { %3375 = vperm.xlu0 %3999, %v3367_v53  }
 0x733   : > { %v3343_v63 = vpop.xlane.xlu1 %3342 }
 0x734   : > { %v3346_v44 = vmul.f32 0.0078125, %v3343_v63 }
 0x736   : > { %v3348_v26 = vadd.f32 1e-05, %v3346_v44 }
 0x737   : > { %v3345_v12 = vpop.xlane.xlu0 %3344  ;;  %v3371_v29 = vpop.permute.xlu1 %3370 }
 0x738   : > { %4238 = vrsqrt.f32 %v3348_v26  ;;  %v3347_v17 = vmul.f32 0.0078125, %v3345_v12 }
 0x73a   : > { %v3349_v21 = vadd.f32 1e-05, %v3347_v17 }
 0x73c   : > { %4240 = vrsqrt.f32 %v3349_v21 }
 0x73f   : > { %v3376_v51 = vpop.permute.xlu0 %3375 }
 0x745   : > { %v4239_v5 = vpop.eup %4238 }
 0x746   : > { %v3352_v11 = vmul.f32 %v4239_v5, %v3338_v56 }
 0x748   : > { %v3358_v52 = vmul.f32 %v3357_v19, %v3352_v11 }
 0x749   : > { %v4241_v2 = vpop.eup %4240 }
 0x74a   : > { %v3353_v6 = vmul.f32 %v4241_v2, %v3339_v55  ;;  %v3364_v54 = vadd.f32 %v3363_v49, %v3358_v52 }
 0x74c   : > { %v3359_v25 = vmul.f32 %v3357_v19, %v3353_v6  ;;  %v3378_v22 = vmul.f32 %v3371_v29, %v3364_v54 }
 0x74e   : > { %v3365_v8 = vadd.f32 %v3363_v49, %v3359_v25 }
 0x750   : > { %v3379_v34 = vmul.f32 %v3376_v51, %v3365_v8 }
 0x752   : > { %v3671_v31 = vpack.c.bf16 %v3379_v34, %v3378_v22 }
 0x754   : > { %3672 = vst [vmem:[%s633_s18] sm:$0xff] %v3671_v31  }
 0x755 PF: > { %s26_s21 = sadd.s32 1, %s4250_s21  }
 0x756   : > { %p23_p5 = scmp.ge.s32.totalorder %s26_s21, 4  }
 0x758   :  { %25 = sbr.rel (!%p23_p5) target bundleno = 2 (0x2), region = 129 }

</bundles_post_ra>
